<compile_context>
chip_gen: v7x
topology: tpu7x:2x2x1
jax: 0.10.0
libtpu: 0.0.40
codegen_flags: <defaults>
</compile_context>

<pallas_src>
import functools
import math

import jax
import jax.numpy as jnp
from jax.experimental import pallas as pl
from jax.experimental.pallas import tpu as pltpu

# Make the pure-JAX reference use the same high-precision f32 matmul path as
# the in-kernel MXU dots so the correctness check is tight.
jax.config.update("jax_default_matmul_precision", "highest")


# ----------------------------------------------------------------------------
# In-kernel math helpers.
# ----------------------------------------------------------------------------
def _layer_norm(x, g, b, eps):
    m = jnp.mean(x, axis=-1, keepdims=True)
    c = x - m
    var = jnp.mean(c * c, axis=-1, keepdims=True)
    return c * jax.lax.rsqrt(var + eps) * g + b


def _mha(q_in, kv_in, mask, w_ref, b_ref, base, n_head):
    """Multi-head attention on flattened tokens.

    q_in : (bb*Sq, D) f32, kv_in : (bb*Sk, D) f32, mask : (bb, Sq, Sk) {0,1}.
    w_ref: (8, D, D) = [Wq,Wk,Wv,Wo]_self ++ [Wq,Wk,Wv,Wo]_cross ; b_ref: (8, D).
    """
    D = q_in.shape[-1]
    dk = D // n_head
    scale = 1.0 / math.sqrt(dk)
    wq, wk, wv, wo = w_ref[base + 0], w_ref[base + 1], w_ref[base + 2], w_ref[base + 3]
    bq = b_ref[base + 0:base + 1, :]
    bk = b_ref[base + 1:base + 2, :]
    bv = b_ref[base + 2:base + 3, :]
    bo = b_ref[base + 3:base + 4, :]

    # Full-M, full-K projections on the MXU; fold 1/sqrt(dk) into Q.
    q = (jnp.dot(q_in, wq, preferred_element_type=jnp.float32) + bq) * scale
    k = jnp.dot(kv_in, wk, preferred_element_type=jnp.float32) + bk
    v = jnp.dot(kv_in, wv, preferred_element_type=jnp.float32) + bv

    bb, Sq, Sk = mask.shape
    ctx = []
    for i in range(bb):  # tiny static unroll over the batch rows of this block
        qi = q[i * Sq:(i + 1) * Sq, :]
        ki = k[i * Sk:(i + 1) * Sk, :]
        vi = v[i * Sk:(i + 1) * Sk, :]
        # head-major (H, S, dk) so score / PV are single batched dot_generals
        qh = jnp.stack([qi[:, h * dk:(h + 1) * dk] for h in range(n_head)], axis=0)
        kh = jnp.stack([ki[:, h * dk:(h + 1) * dk] for h in range(n_head)], axis=0)
        vh = jnp.stack([vi[:, h * dk:(h + 1) * dk] for h in range(n_head)], axis=0)

        s = jnp.einsum('hqd,hkd->hqk', qh, kh, preferred_element_type=jnp.float32)
        s = jnp.where(mask[i][None, :, :] > 0.5, s, -1e9)
        s = s - jnp.max(s, axis=-1, keepdims=True)
        p = jnp.exp(s)
        p = p * pl.reciprocal(jnp.sum(p, axis=-1, keepdims=True), approx=True)
        o = jnp.einsum('hqk,hkd->hqd', p, vh, preferred_element_type=jnp.float32)
        ctx.append(jnp.concatenate([o[h] for h in range(n_head)], axis=-1))   # (Sq, D)
    ctx = ctx[0] if len(ctx) == 1 else jnp.concatenate(ctx, axis=0)           # (bb*Sq, D)

    # Single concat-heads output projection: one full K = D contraction.
    return jnp.dot(ctx, wo, preferred_element_type=jnp.float32) + bo


# ----------------------------------------------------------------------------
# Fused Pallas kernel: grid = (batch_blocks, n_layer); x carried in VMEM.
# ----------------------------------------------------------------------------
def _decoder_kernel(tgt_ref, enc_ref, tmask_ref, smask_ref,
                    w_ref, b_ref, ln_ref, f1_ref, fb1_ref, f2_ref, fb2_ref,
                    out_ref, x_scr, *, n_head, eps):
    l = pl.program_id(1)
    n_layer = pl.num_programs(1)
    bb, St, D = out_ref.shape
    Ss = enc_ref.shape[1]

    # Activation carry lives in VMEM for the whole layer loop.
    @pl.when(l == 0)
    def _():
        x_scr[...] = tgt_ref[...].astype(jnp.float32).reshape(bb * St, D)

    x = x_scr[...]
    enc = enc_ref[...].astype(jnp.float32).reshape(bb * Ss, D)
    tmask = tmask_ref[...]
    smask = smask_ref[...]

    # 1) pre-norm residual: masked self-attention
    xn = _layer_norm(x, ln_ref[0:1, :], ln_ref[3:4, :], eps)
    x = x + _mha(xn, xn, tmask, w_ref, b_ref, 0, n_head)
    # 2) pre-norm residual: cross-attention (K/V = raw encoder output)
    xn = _layer_norm(x, ln_ref[1:2, :], ln_ref[4:5, :], eps)
    x = x + _mha(xn, enc, smask, w_ref, b_ref, 4, n_head)
    # 3) pre-norm residual: position-wise FFN (ReLU)
    xn = _layer_norm(x, ln_ref[2:3, :], ln_ref[5:6, :], eps)
    h = jnp.maximum(
        jnp.dot(xn, f1_ref[...], preferred_element_type=jnp.float32) + fb1_ref[...], 0.0)
    x = x + jnp.dot(h, f2_ref[...], preferred_element_type=jnp.float32) + fb2_ref[...]

    x_scr[...] = x

    @pl.when(l == n_layer - 1)
    def _():
        out_ref[...] = x.reshape(bb, St, D).astype(out_ref.dtype)


def decoder_forward(tgt, encoder_out, tgt_mask, src_tgt_mask, params, *,
                    n_head, eps=1e-5, batch_block=1):
    """Pallas equivalent of Decoder.forward (all n_layer blocks in one call)."""
    B, St, D = tgt.shape
    _, Ss, _ = encoder_out.shape
    attn_w, attn_b, ln_p, ffw1, ffb1, ffw2, ffb2 = params
    n_layer = attn_w.shape[0]
    Dff = ffw1.shape[-1]
    bb = batch_block
    assert B % bb == 0, "batch must be divisible by batch_block"

    kernel = functools.partial(_decoder_kernel, n_head=n_head, eps=eps)

    grid_spec = pltpu.PrefetchScalarGridSpec(
        num_scalar_prefetch=0,
        grid=(B // bb, n_layer),
        in_specs=[
            pl.BlockSpec((bb, St, D), lambda bi, l: (bi, 0, 0)),        # tgt
            pl.BlockSpec((bb, Ss, D), lambda bi, l: (bi, 0, 0)),        # encoder_out
            pl.BlockSpec((bb, St, St), lambda bi, l: (bi, 0, 0)),       # tgt_mask
            pl.BlockSpec((bb, St, Ss), lambda bi, l: (bi, 0, 0)),       # src_tgt_mask
            pl.BlockSpec((None, 8, D, D), lambda bi, l: (l, 0, 0, 0)),  # attn W (per layer)
            pl.BlockSpec((None, 8, D), lambda bi, l: (l, 0, 0)),        # attn b
            pl.BlockSpec((None, 6, D), lambda bi, l: (l, 0, 0)),        # LN gamma/beta
            pl.BlockSpec((None, D, Dff), lambda bi, l: (l, 0, 0)),      # FF W1
            pl.BlockSpec((None, 1, Dff), lambda bi, l: (l, 0, 0)),      # FF b1
            pl.BlockSpec((None, Dff, D), lambda bi, l: (l, 0, 0)),      # FF W2
            pl.BlockSpec((None, 1, D), lambda bi, l: (l, 0, 0)),        # FF b2
        ],
        out_specs=pl.BlockSpec((bb, St, D), lambda bi, l: (bi, 0, 0)),
        scratch_shapes=[pltpu.VMEM((bb * St, D), jnp.float32)],         # x carry
    )

    # Re-derived VMEM budget: double-buffered per-layer weights + activations
    # + headroom (safe under v7x's 64 MiB physical VMEM).
    per_layer_w = (8 * D * D + D * Dff + Dff * D + 8 * D + 6 * D + Dff + D) * 4
    act_bytes = 2 * 4 * bb * (2 * St * D + Ss * D + St * St + St * Ss)
    vmem_limit = min(max(4 * per_layer_w + act_bytes + (8 << 20), 16 << 20), 64 << 20)

    return pl.pallas_call(
        kernel,
        out_shape=jax.ShapeDtypeStruct((B, St, D), tgt.dtype),
        grid_spec=grid_spec,
        compiler_params=pltpu.CompilerParams(
            dimension_semantics=("parallel", "arbitrary"),
            vmem_limit_bytes=int(vmem_limit),
        ),
    )(tgt, encoder_out, tgt_mask, src_tgt_mask,
      attn_w, attn_b, ln_p, ffw1, ffb1, ffw2, ffb2)


# ----------------------------------------------------------------------------
# Pure-JAX reference (independent batched implementation of the same block).
# ----------------------------------------------------------------------------
def decoder_reference(tgt, encoder_out, tgt_mask, src_tgt_mask, params, *,
                      n_head, eps=1e-5):
    attn_w, attn_b, ln_p, ffw1, ffb1, ffw2, ffb2 = params
    n_layer = attn_w.shape[0]

    def layer_norm(x, g, b):
        m = jnp.mean(x, axis=-1, keepdims=True)
        c = x - m
        var = jnp.mean(c * c, axis=-1, keepdims=True)
        return c * jax.lax.rsqrt(var + eps) * g + b

    def mha(q_in, kv_in, mask, w, b, base):
        Bq, Sq, D = q_in.shape
        Sk = kv_in.shape[1]
        dk = D // n_head
        q = q_in @ w[base + 0] + b[base + 0]
        k = kv_in @ w[base + 1] + b[base + 1]
        v = kv_in @ w[base + 2] + b[base + 2]
        qh = q.reshape(Bq, Sq, n_head, dk).transpose(0, 2, 1, 3)
        kh = k.reshape(Bq, Sk, n_head, dk).transpose(0, 2, 1, 3)
        vh = v.reshape(Bq, Sk, n_head, dk).transpose(0, 2, 1, 3)
        s = jnp.einsum('bhqd,bhkd->bhqk', qh, kh) / math.sqrt(dk)
        s = jnp.where(mask[:, None, :, :] == 0, -1e9, s)   # masked_fill semantics
        p = jax.nn.softmax(s, axis=-1)
        o = jnp.einsum('bhqk,bhkd->bhqd', p, vh)
        o = o.transpose(0, 2, 1, 3).reshape(Bq, Sq, D)
        return o @ w[base + 3] + b[base + 3]

    out = tgt
    for l in range(n_layer):
        x = out
        xn = layer_norm(x, ln_p[l, 0], ln_p[l, 3])
        x = x + mha(xn, xn, tgt_mask, attn_w[l], attn_b[l], 0)
        xn = layer_norm(x, ln_p[l, 1], ln_p[l, 4])
        x = x + mha(xn, encoder_out, src_tgt_mask, attn_w[l], attn_b[l], 4)
        xn = layer_norm(x, ln_p[l, 2], ln_p[l, 5])
        h = jnp.maximum(xn @ ffw1[l] + ffb1[l, 0], 0.0)
        x = x + h @ ffw2[l] + ffb2[l, 0]
        out = x
    return out


if __name__ == "__main__":
    key = jax.random.PRNGKey(0)
    B, St, Ss = 2, 8, 8
    D, Dff, n_head, n_layer = 128, 256, 4, 2

    keys = jax.random.split(key, 2 + n_layer)
    tgt = jax.random.normal(keys[0], (B, St, D), jnp.float32)
    encoder_out = jax.random.normal(keys[1], (B, Ss, D), jnp.float32)

    # causal target mask + padded source mask (1.0 = keep, 0.0 = mask out)
    causal = jnp.tril(jnp.ones((St, St), jnp.float32))
    tgt_mask = jnp.broadcast_to(causal, (B, St, St))
    src_len = jnp.array([Ss, Ss - 2], dtype=jnp.int32)
    src_valid = (jnp.arange(Ss)[None, :] < src_len[:, None]).astype(jnp.float32)
    src_tgt_mask = jnp.broadcast_to(src_valid[:, None, :], (B, St, Ss))

    def init_layer(k):
        ks = jax.random.split(k, 8)
        s = 1.0 / math.sqrt(D)
        attn_w = jax.random.normal(ks[0], (8, D, D), jnp.float32) * s
        attn_b = jax.random.normal(ks[1], (8, D), jnp.float32) * 0.02
        ln_g = 1.0 + 0.1 * jax.random.normal(ks[2], (3, D), jnp.float32)
        ln_b = 0.1 * jax.random.normal(ks[3], (3, D), jnp.float32)
        ln = jnp.concatenate([ln_g, ln_b], axis=0)
        ffw1 = jax.random.normal(ks[4], (D, Dff), jnp.float32) * s
        ffb1 = jax.random.normal(ks[5], (1, Dff), jnp.float32) * 0.02
        ffw2 = jax.random.normal(ks[6], (Dff, D), jnp.float32) * (1.0 / math.sqrt(Dff))
        ffb2 = jax.random.normal(ks[7], (1, D), jnp.float32) * 0.02
        return attn_w, attn_b, ln, ffw1, ffb1, ffw2, ffb2

    per_layer = [init_layer(k) for k in keys[2:]]
    # Stack each parameter with a leading n_layer axis (streamed per grid step).
    params = tuple(jnp.stack([lay[i] for lay in per_layer], axis=0) for i in range(7))

    out = decoder_forward(tgt, encoder_out, tgt_mask, src_tgt_mask, params,
                          n_head=n_head, batch_block=1)
    out = jax.block_until_ready(out)

    ref = decoder_reference(tgt, encoder_out, tgt_mask, src_tgt_mask, params,
                            n_head=n_head)
    ref = jax.block_until_ready(ref)

    assert out.shape == (B, St, D)
    max_err = float(jnp.max(jnp.abs(out - ref)))
    assert jnp.allclose(out, ref, atol=2e-2, rtol=2e-2), max_err

    print("KERNEL_OK")
</pallas_src>

<mosaic_0001>
module attributes {stable_mosaic.version = 11 : i64} {
  func.func @_decoder_kernel(%arg0: i32, %arg1: i32, %arg2: memref<1x8x128xf32, #tpu.memory_space<vmem>>, %arg3: memref<1x8x128xf32, #tpu.memory_space<vmem>>, %arg4: memref<1x8x8xf32, #tpu.memory_space<vmem>>, %arg5: memref<1x8x8xf32, #tpu.memory_space<vmem>>, %arg6: memref<1x8x128x128xf32, #tpu.memory_space<vmem>>, %arg7: memref<1x8x128xf32, #tpu.memory_space<vmem>>, %arg8: memref<1x6x128xf32, #tpu.memory_space<vmem>>, %arg9: memref<1x128x256xf32, #tpu.memory_space<vmem>>, %arg10: memref<1x1x256xf32, #tpu.memory_space<vmem>>, %arg11: memref<1x256x128xf32, #tpu.memory_space<vmem>>, %arg12: memref<1x1x128xf32, #tpu.memory_space<vmem>>, %arg13: memref<1x8x128xf32, #tpu.memory_space<vmem>>, %arg14: memref<8x128xf32, #tpu.memory_space<vmem>>) attributes {dimension_semantics = [#tpu.dimension_semantics<parallel>, #tpu.dimension_semantics<arbitrary>], iteration_bounds = array<i64: 2, 2>, scalar_prefetch = 0 : i64, scratch_operands = 1 : i64, tpu.core_type = #tpu.core_type<tc>, window_params = [{transform_indices = @transform_0, window_bounds = array<i64: 1, 8, 128>}, {transform_indices = @transform_1, window_bounds = array<i64: 1, 8, 128>}, {transform_indices = @transform_2, window_bounds = array<i64: 1, 8, 8>}, {transform_indices = @transform_3, window_bounds = array<i64: 1, 8, 8>}, {transform_indices = @transform_4, window_bounds = array<i64: 1, 8, 128, 128>}, {transform_indices = @transform_5, window_bounds = array<i64: 1, 8, 128>}, {transform_indices = @transform_6, window_bounds = array<i64: 1, 6, 128>}, {transform_indices = @transform_7, window_bounds = array<i64: 1, 128, 256>}, {transform_indices = @transform_8, window_bounds = array<i64: 1, 1, 256>}, {transform_indices = @transform_9, window_bounds = array<i64: 1, 256, 128>}, {transform_indices = @transform_10, window_bounds = array<i64: 1, 1, 128>}, {transform_indices = @transform_11, window_bounds = array<i64: 1, 8, 128>}]} {
    %c0_i32 = arith.constant 0 : i32
    %0 = arith.cmpi eq, %arg1, %c0_i32 : i32
    %1 = arith.extui %0 : i1 to i32
    %c0_i32_0 = arith.constant 0 : i32
    %2 = arith.cmpi ne, %1, %c0_i32_0 : i32
    scf.if %2 {
      %c0_132 = arith.constant 0 : index
      %c0_133 = arith.constant 0 : index
      %c0_134 = arith.constant 0 : index
      %275 = vector.load %arg2[%c0_132, %c0_133, %c0_134] : memref<1x8x128xf32, #tpu.memory_space<vmem>>, vector<1x8x128xf32>
      %276 = vector.shape_cast %275 : vector<1x8x128xf32> to vector<8x128xf32>
      %c0_135 = arith.constant 0 : index
      %c0_136 = arith.constant 0 : index
      %277 = vector.load %arg14[%c0_135, %c0_136] : memref<8x128xf32, #tpu.memory_space<vmem>>, vector<8x128xf32>
      tpu.vector_store %arg14[%c0_135, %c0_136], %276 {strides = array<i32>} : memref<8x128xf32, #tpu.memory_space<vmem>>, vector<8x128xf32>,
    } else {
    }
    %c0 = arith.constant 0 : index
    %c0_1 = arith.constant 0 : index
    %3 = vector.load %arg14[%c0, %c0_1] : memref<8x128xf32, #tpu.memory_space<vmem>>, vector<8x128xf32>
    %c0_2 = arith.constant 0 : index
    %c0_3 = arith.constant 0 : index
    %c0_4 = arith.constant 0 : index
    %4 = vector.load %arg3[%c0_2, %c0_3, %c0_4] : memref<1x8x128xf32, #tpu.memory_space<vmem>>, vector<1x8x128xf32>
    %5 = vector.shape_cast %4 : vector<1x8x128xf32> to vector<8x128xf32>
    %c0_5 = arith.constant 0 : index
    %c0_6 = arith.constant 0 : index
    %c0_7 = arith.constant 0 : index
    %6 = vector.load %arg4[%c0_5, %c0_6, %c0_7] : memref<1x8x8xf32, #tpu.memory_space<vmem>>, vector<1x8x8xf32>
    %c0_8 = arith.constant 0 : index
    %c0_9 = arith.constant 0 : index
    %c0_10 = arith.constant 0 : index
    %7 = vector.load %arg5[%c0_8, %c0_9, %c0_10] : memref<1x8x8xf32, #tpu.memory_space<vmem>>, vector<1x8x8xf32>
    %c0_11 = arith.constant 0 : index
    %c0_12 = arith.constant 0 : index
    %c0_13 = arith.constant 0 : index
    %8 = vector.load %arg8[%c0_11, %c0_12, %c0_13] : memref<1x6x128xf32, #tpu.memory_space<vmem>>, vector<1x1x128xf32>
    %9 = vector.shape_cast %8 : vector<1x1x128xf32> to vector<1x128xf32>
    %c0_14 = arith.constant 0 : index
    %c3 = arith.constant 3 : index
    %c0_15 = arith.constant 0 : index
    %10 = vector.load %arg8[%c0_14, %c3, %c0_15] : memref<1x6x128xf32, #tpu.memory_space<vmem>>, vector<1x1x128xf32>
    %11 = vector.shape_cast %10 : vector<1x1x128xf32> to vector<1x128xf32>
    %cst = arith.constant dense<0.000000e+00> : vector<8xf32>
    %12 = vector.multi_reduction <add>, %3, %cst [1] : vector<8x128xf32> to vector<8xf32>
    %13 = vector.shape_cast %12 : vector<8xf32> to vector<8x1xf32>
    %cst_16 = arith.constant 1.280000e+02 : f32
    %14 = vector.broadcast %cst_16 : f32 to vector<8x1xf32>
    %15 = arith.divf %13, %14 : vector<8x1xf32>
    %16 = vector.broadcast %15 : vector<8x1xf32> to vector<8x128xf32>
    %17 = arith.subf %3, %16 : vector<8x128xf32>
    %18 = arith.mulf %17, %17 : vector<8x128xf32>
    %cst_17 = arith.constant dense<0.000000e+00> : vector<8xf32>
    %19 = vector.multi_reduction <add>, %18, %cst_17 [1] : vector<8x128xf32> to vector<8xf32>
    %20 = vector.shape_cast %19 : vector<8xf32> to vector<8x1xf32>
    %cst_18 = arith.constant 1.280000e+02 : f32
    %21 = vector.broadcast %cst_18 : f32 to vector<8x1xf32>
    %22 = arith.divf %20, %21 : vector<8x1xf32>
    %cst_19 = arith.constant 9.99999974E-6 : f32
    %23 = vector.broadcast %cst_19 : f32 to vector<8x1xf32>
    %24 = arith.addf %22, %23 : vector<8x1xf32>
    %25 = math.rsqrt %24 : vector<8x1xf32>
    %26 = vector.broadcast %25 : vector<8x1xf32> to vector<8x128xf32>
    %27 = arith.mulf %17, %26 : vector<8x128xf32>
    %28 = vector.broadcast %9 : vector<1x128xf32> to vector<8x128xf32>
    %29 = arith.mulf %27, %28 : vector<8x128xf32>
    %30 = vector.broadcast %11 : vector<1x128xf32> to vector<8x128xf32>
    %31 = arith.addf %29, %30 : vector<8x128xf32>
    %c0_20 = arith.constant 0 : index
    %c0_21 = arith.constant 0 : index
    %c0_22 = arith.constant 0 : index
    %c0_23 = arith.constant 0 : index
    %32 = vector.load %arg6[%c0_20, %c0_21, %c0_22, %c0_23] : memref<1x8x128x128xf32, #tpu.memory_space<vmem>>, vector<1x1x128x128xf32>
    %33 = vector.shape_cast %32 : vector<1x1x128x128xf32> to vector<128x128xf32>
    %c0_24 = arith.constant 0 : index
    %c1 = arith.constant 1 : index
    %c0_25 = arith.constant 0 : index
    %c0_26 = arith.constant 0 : index
    %34 = vector.load %arg6[%c0_24, %c1, %c0_25, %c0_26] : memref<1x8x128x128xf32, #tpu.memory_space<vmem>>, vector<1x1x128x128xf32>
    %35 = vector.shape_cast %34 : vector<1x1x128x128xf32> to vector<128x128xf32>
    %c0_27 = arith.constant 0 : index
    %c2 = arith.constant 2 : index
    %c0_28 = arith.constant 0 : index
    %c0_29 = arith.constant 0 : index
    %36 = vector.load %arg6[%c0_27, %c2, %c0_28, %c0_29] : memref<1x8x128x128xf32, #tpu.memory_space<vmem>>, vector<1x1x128x128xf32>
    %37 = vector.shape_cast %36 : vector<1x1x128x128xf32> to vector<128x128xf32>
    %c0_30 = arith.constant 0 : index
    %c3_31 = arith.constant 3 : index
    %c0_32 = arith.constant 0 : index
    %c0_33 = arith.constant 0 : index
    %38 = vector.load %arg6[%c0_30, %c3_31, %c0_32, %c0_33] : memref<1x8x128x128xf32, #tpu.memory_space<vmem>>, vector<1x1x128x128xf32>
    %39 = vector.shape_cast %38 : vector<1x1x128x128xf32> to vector<128x128xf32>
    %c0_34 = arith.constant 0 : index
    %c0_35 = arith.constant 0 : index
    %c0_36 = arith.constant 0 : index
    %40 = vector.load %arg7[%c0_34, %c0_35, %c0_36] : memref<1x8x128xf32, #tpu.memory_space<vmem>>, vector<1x1x128xf32>
    %41 = vector.shape_cast %40 : vector<1x1x128xf32> to vector<1x128xf32>
    %c0_37 = arith.constant 0 : index
    %c1_38 = arith.constant 1 : index
    %c0_39 = arith.constant 0 : index
    %42 = vector.load %arg7[%c0_37, %c1_38, %c0_39] : memref<1x8x128xf32, #tpu.memory_space<vmem>>, vector<1x1x128xf32>
    %43 = vector.shape_cast %42 : vector<1x1x128xf32> to vector<1x128xf32>
    %c0_40 = arith.constant 0 : index
    %c2_41 = arith.constant 2 : index
    %c0_42 = arith.constant 0 : index
    %44 = vector.load %arg7[%c0_40, %c2_41, %c0_42] : memref<1x8x128xf32, #tpu.memory_space<vmem>>, vector<1x1x128xf32>
    %45 = vector.shape_cast %44 : vector<1x1x128xf32> to vector<1x128xf32>
    %c0_43 = arith.constant 0 : index
    %c3_44 = arith.constant 3 : index
    %c0_45 = arith.constant 0 : index
    %46 = vector.load %arg7[%c0_43, %c3_44, %c0_45] : memref<1x8x128xf32, #tpu.memory_space<vmem>>, vector<1x1x128xf32>
    %47 = vector.shape_cast %46 : vector<1x1x128xf32> to vector<1x128xf32>
    %cst_46 = arith.constant dense<0.000000e+00> : vector<8x128xf32>
    %48 = tpu.matmul %31, %33, %cst_46 {dimension_numbers = #tpu.dot_dimension_numbers<[1], [0], [0], [1], [0, 0, 1, 1], [], []>, precision = #tpu.contract_precision<fp32>} : vector<8x128xf32>, vector<128x128xf32>, vector<8x128xf32> -> vector<8x128xf32>
    %49 = vector.broadcast %41 : vector<1x128xf32> to vector<8x128xf32>
    %50 = arith.addf %48, %49 : vector<8x128xf32>
    %cst_47 = arith.constant 0.176776692 : f32
    %51 = vector.broadcast %cst_47 : f32 to vector<8x128xf32>
    %52 = arith.mulf %50, %51 : vector<8x128xf32>
    %cst_48 = arith.constant dense<0.000000e+00> : vector<8x128xf32>
    %53 = tpu.matmul %31, %35, %cst_48 {dimension_numbers = #tpu.dot_dimension_numbers<[1], [0], [0], [1], [0, 0, 1, 1], [], []>, precision = #tpu.contract_precision<fp32>} : vector<8x128xf32>, vector<128x128xf32>, vector<8x128xf32> -> vector<8x128xf32>
    %54 = vector.broadcast %43 : vector<1x128xf32> to vector<8x128xf32>
    %55 = arith.addf %53, %54 : vector<8x128xf32>
    %cst_49 = arith.constant dense<0.000000e+00> : vector<8x128xf32>
    %56 = tpu.matmul %31, %37, %cst_49 {dimension_numbers = #tpu.dot_dimension_numbers<[1], [0], [0], [1], [0, 0, 1, 1], [], []>, precision = #tpu.contract_precision<fp32>} : vector<8x128xf32>, vector<128x128xf32>, vector<8x128xf32> -> vector<8x128xf32>
    %57 = vector.broadcast %45 : vector<1x128xf32> to vector<8x128xf32>
    %58 = arith.addf %56, %57 : vector<8x128xf32>
    %59 = vector.extract_strided_slice %52 {offsets = [0, 0], sizes = [8, 32], strides = [1, 1]} : vector<8x128xf32> to vector<8x32xf32>
    %60 = vector.extract_strided_slice %52 {offsets = [0, 32], sizes = [8, 32], strides = [1, 1]} : vector<8x128xf32> to vector<8x32xf32>
    %61 = vector.extract_strided_slice %52 {offsets = [0, 64], sizes = [8, 32], strides = [1, 1]} : vector<8x128xf32> to vector<8x32xf32>
    %62 = vector.extract_strided_slice %52 {offsets = [0, 96], sizes = [8, 32], strides = [1, 1]} : vector<8x128xf32> to vector<8x32xf32>
    %63 = vector.shape_cast %59 : vector<8x32xf32> to vector<1x8x32xf32>
    %64 = vector.shape_cast %60 : vector<8x32xf32> to vector<1x8x32xf32>
    %65 = vector.shape_cast %61 : vector<8x32xf32> to vector<1x8x32xf32>
    %66 = vector.shape_cast %62 : vector<8x32xf32> to vector<1x8x32xf32>
    %67 = tpu.concatenate %63, %64, %65, %66 in 0 : vector<1x8x32xf32>, vector<1x8x32xf32>, vector<1x8x32xf32>, vector<1x8x32xf32> -> vector<4x8x32xf32>
    %68 = vector.extract_strided_slice %55 {offsets = [0, 0], sizes = [8, 32], strides = [1, 1]} : vector<8x128xf32> to vector<8x32xf32>
    %69 = vector.extract_strided_slice %55 {offsets = [0, 32], sizes = [8, 32], strides = [1, 1]} : vector<8x128xf32> to vector<8x32xf32>
    %70 = vector.extract_strided_slice %55 {offsets = [0, 64], sizes = [8, 32], strides = [1, 1]} : vector<8x128xf32> to vector<8x32xf32>
    %71 = vector.extract_strided_slice %55 {offsets = [0, 96], sizes = [8, 32], strides = [1, 1]} : vector<8x128xf32> to vector<8x32xf32>
    %72 = vector.shape_cast %68 : vector<8x32xf32> to vector<1x8x32xf32>
    %73 = vector.shape_cast %69 : vector<8x32xf32> to vector<1x8x32xf32>
    %74 = vector.shape_cast %70 : vector<8x32xf32> to vector<1x8x32xf32>
    %75 = vector.shape_cast %71 : vector<8x32xf32> to vector<1x8x32xf32>
    %76 = tpu.concatenate %72, %73, %74, %75 in 0 : vector<1x8x32xf32>, vector<1x8x32xf32>, vector<1x8x32xf32>, vector<1x8x32xf32> -> vector<4x8x32xf32>
    %77 = vector.extract_strided_slice %58 {offsets = [0, 0], sizes = [8, 32], strides = [1, 1]} : vector<8x128xf32> to vector<8x32xf32>
    %78 = vector.extract_strided_slice %58 {offsets = [0, 32], sizes = [8, 32], strides = [1, 1]} : vector<8x128xf32> to vector<8x32xf32>
    %79 = vector.extract_strided_slice %58 {offsets = [0, 64], sizes = [8, 32], strides = [1, 1]} : vector<8x128xf32> to vector<8x32xf32>
    %80 = vector.extract_strided_slice %58 {offsets = [0, 96], sizes = [8, 32], strides = [1, 1]} : vector<8x128xf32> to vector<8x32xf32>
    %81 = vector.shape_cast %77 : vector<8x32xf32> to vector<1x8x32xf32>
    %82 = vector.shape_cast %78 : vector<8x32xf32> to vector<1x8x32xf32>
    %83 = vector.shape_cast %79 : vector<8x32xf32> to vector<1x8x32xf32>
    %84 = vector.shape_cast %80 : vector<8x32xf32> to vector<1x8x32xf32>
    %85 = tpu.concatenate %81, %82, %83, %84 in 0 : vector<1x8x32xf32>, vector<1x8x32xf32>, vector<1x8x32xf32>, vector<1x8x32xf32> -> vector<4x8x32xf32>
    "tpu.trace_start"() <{level = 10 : i32, message = "hqd,hkd->hqk"}> : () -> ()
    %cst_50 = arith.constant dense<0.000000e+00> : vector<4x8x8xf32>
    %86 = tpu.matmul %67, %76, %cst_50 {dimension_numbers = #tpu.dot_dimension_numbers<[2], [2], [1], [1], [0, 0, 0, 1, 1, 1], [0], [0]>, precision = #tpu.contract_precision<fp32>} : vector<4x8x32xf32>, vector<4x8x32xf32>, vector<4x8x8xf32> -> vector<4x8x8xf32>
    "tpu.trace_stop"() : () -> ()
    %87 = vector.shape_cast %6 : vector<1x8x8xf32> to vector<8x8xf32>
    %88 = vector.shape_cast %87 : vector<8x8xf32> to vector<1x8x8xf32>
    %cst_51 = arith.constant 5.000000e-01 : f32
    %89 = vector.broadcast %cst_51 : f32 to vector<1x8x8xf32>
    %90 = arith.cmpf ogt, %88, %89 : vector<1x8x8xf32>
    %cst_52 = arith.constant -1.000000e+09 : f32
    %91 = vector.shape_cast %90 : vector<1x8x8xi1> to vector<1x8x8xi1>
    %92 = vector.broadcast %91 : vector<1x8x8xi1> to vector<4x8x8xi1>
    %93 = vector.broadcast %cst_52 : f32 to vector<4x8x8xf32>
    %94 = arith.select %92, %86, %93 : vector<4x8x8xi1>, vector<4x8x8xf32>
    %cst_53 = arith.constant dense<0xFF800000> : vector<4x8xf32>
    %95 = vector.multi_reduction <maximumf>, %94, %cst_53 [2] : vector<4x8x8xf32> to vector<4x8xf32>
    %96 = vector.shape_cast %95 : vector<4x8xf32> to vector<4x8x1xf32>
    %97 = vector.broadcast %96 : vector<4x8x1xf32> to vector<4x8x8xf32>
    %98 = arith.subf %94, %97 : vector<4x8x8xf32>
    %99 = math.exp %98 : vector<4x8x8xf32>
    %cst_54 = arith.constant dense<0.000000e+00> : vector<4x8xf32>
    %100 = vector.multi_reduction <add>, %99, %cst_54 [2] : vector<4x8x8xf32> to vector<4x8xf32>
    %101 = vector.shape_cast %100 : vector<4x8xf32> to vector<4x8x1xf32>
    %102 = tpu.reciprocal %101 {approx = true} : vector<4x8x1xf32> -> vector<4x8x1xf32>
    %103 = vector.broadcast %102 : vector<4x8x1xf32> to vector<4x8x8xf32>
    %104 = arith.mulf %99, %103 : vector<4x8x8xf32>
    "tpu.trace_start"() <{level = 10 : i32, message = "hqk,hkd->hqd"}> : () -> ()
    %cst_55 = arith.constant dense<0.000000e+00> : vector<4x8x32xf32>
    %105 = tpu.matmul %104, %85, %cst_55 {dimension_numbers = #tpu.dot_dimension_numbers<[2], [1], [1], [2], [0, 0, 0, 1, 1, 2], [0], [0]>, precision = #tpu.contract_precision<fp32>} : vector<4x8x8xf32>, vector<4x8x32xf32>, vector<4x8x32xf32> -> vector<4x8x32xf32>
    "tpu.trace_stop"() : () -> ()
    %106 = vector.extract_strided_slice %105 {offsets = [0, 0, 0], sizes = [1, 8, 32], strides = [1, 1, 1]} : vector<4x8x32xf32> to vector<1x8x32xf32>
    %107 = vector.shape_cast %106 : vector<1x8x32xf32> to vector<8x32xf32>
    %108 = vector.extract_strided_slice %105 {offsets = [1, 0, 0], sizes = [1, 8, 32], strides = [1, 1, 1]} : vector<4x8x32xf32> to vector<1x8x32xf32>
    %109 = vector.shape_cast %108 : vector<1x8x32xf32> to vector<8x32xf32>
    %110 = vector.extract_strided_slice %105 {offsets = [2, 0, 0], sizes = [1, 8, 32], strides = [1, 1, 1]} : vector<4x8x32xf32> to vector<1x8x32xf32>
    %111 = vector.shape_cast %110 : vector<1x8x32xf32> to vector<8x32xf32>
    %112 = vector.extract_strided_slice %105 {offsets = [3, 0, 0], sizes = [1, 8, 32], strides = [1, 1, 1]} : vector<4x8x32xf32> to vector<1x8x32xf32>
    %113 = vector.shape_cast %112 : vector<1x8x32xf32> to vector<8x32xf32>
    %114 = tpu.concatenate %107, %109, %111, %113 in 1 : vector<8x32xf32>, vector<8x32xf32>, vector<8x32xf32>, vector<8x32xf32> -> vector<8x128xf32>
    %cst_56 = arith.constant dense<0.000000e+00> : vector<8x128xf32>
    %115 = tpu.matmul %114, %39, %cst_56 {dimension_numbers = #tpu.dot_dimension_numbers<[1], [0], [0], [1], [0, 0, 1, 1], [], []>, precision = #tpu.contract_precision<fp32>} : vector<8x128xf32>, vector<128x128xf32>, vector<8x128xf32> -> vector<8x128xf32>
    %116 = vector.broadcast %47 : vector<1x128xf32> to vector<8x128xf32>
    %117 = arith.addf %115, %116 : vector<8x128xf32>
    %118 = arith.addf %3, %117 : vector<8x128xf32>
    %c0_57 = arith.constant 0 : index
    %c1_58 = arith.constant 1 : index
    %c0_59 = arith.constant 0 : index
    %119 = vector.load %arg8[%c0_57, %c1_58, %c0_59] : memref<1x6x128xf32, #tpu.memory_space<vmem>>, vector<1x1x128xf32>
    %120 = vector.shape_cast %119 : vector<1x1x128xf32> to vector<1x128xf32>
    %c0_60 = arith.constant 0 : index
    %c4 = arith.constant 4 : index
    %c0_61 = arith.constant 0 : index
    %121 = vector.load %arg8[%c0_60, %c4, %c0_61] : memref<1x6x128xf32, #tpu.memory_space<vmem>>, vector<1x1x128xf32>
    %122 = vector.shape_cast %121 : vector<1x1x128xf32> to vector<1x128xf32>
    %cst_62 = arith.constant dense<0.000000e+00> : vector<8xf32>
    %123 = vector.multi_reduction <add>, %118, %cst_62 [1] : vector<8x128xf32> to vector<8xf32>
    %124 = vector.shape_cast %123 : vector<8xf32> to vector<8x1xf32>
    %cst_63 = arith.constant 1.280000e+02 : f32
    %125 = vector.broadcast %cst_63 : f32 to vector<8x1xf32>
    %126 = arith.divf %124, %125 : vector<8x1xf32>
    %127 = vector.broadcast %126 : vector<8x1xf32> to vector<8x128xf32>
    %128 = arith.subf %118, %127 : vector<8x128xf32>
    %129 = arith.mulf %128, %128 : vector<8x128xf32>
    %cst_64 = arith.constant dense<0.000000e+00> : vector<8xf32>
    %130 = vector.multi_reduction <add>, %129, %cst_64 [1] : vector<8x128xf32> to vector<8xf32>
    %131 = vector.shape_cast %130 : vector<8xf32> to vector<8x1xf32>
    %cst_65 = arith.constant 1.280000e+02 : f32
    %132 = vector.broadcast %cst_65 : f32 to vector<8x1xf32>
    %133 = arith.divf %131, %132 : vector<8x1xf32>
    %cst_66 = arith.constant 9.99999974E-6 : f32
    %134 = vector.broadcast %cst_66 : f32 to vector<8x1xf32>
    %135 = arith.addf %133, %134 : vector<8x1xf32>
    %136 = math.rsqrt %135 : vector<8x1xf32>
    %137 = vector.broadcast %136 : vector<8x1xf32> to vector<8x128xf32>
    %138 = arith.mulf %128, %137 : vector<8x128xf32>
    %139 = vector.broadcast %120 : vector<1x128xf32> to vector<8x128xf32>
    %140 = arith.mulf %138, %139 : vector<8x128xf32>
    %141 = vector.broadcast %122 : vector<1x128xf32> to vector<8x128xf32>
    %142 = arith.addf %140, %141 : vector<8x128xf32>
    %c0_67 = arith.constant 0 : index
    %c4_68 = arith.constant 4 : index
    %c0_69 = arith.constant 0 : index
    %c0_70 = arith.constant 0 : index
    %143 = vector.load %arg6[%c0_67, %c4_68, %c0_69, %c0_70] : memref<1x8x128x128xf32, #tpu.memory_space<vmem>>, vector<1x1x128x128xf32>
    %144 = vector.shape_cast %143 : vector<1x1x128x128xf32> to vector<128x128xf32>
    %c0_71 = arith.constant 0 : index
    %c5 = arith.constant 5 : index
    %c0_72 = arith.constant 0 : index
    %c0_73 = arith.constant 0 : index
    %145 = vector.load %arg6[%c0_71, %c5, %c0_72, %c0_73] : memref<1x8x128x128xf32, #tpu.memory_space<vmem>>, vector<1x1x128x128xf32>
    %146 = vector.shape_cast %145 : vector<1x1x128x128xf32> to vector<128x128xf32>
    %c0_74 = arith.constant 0 : index
    %c6 = arith.constant 6 : index
    %c0_75 = arith.constant 0 : index
    %c0_76 = arith.constant 0 : index
    %147 = vector.load %arg6[%c0_74, %c6, %c0_75, %c0_76] : memref<1x8x128x128xf32, #tpu.memory_space<vmem>>, vector<1x1x128x128xf32>
    %148 = vector.shape_cast %147 : vector<1x1x128x128xf32> to vector<128x128xf32>
    %c0_77 = arith.constant 0 : index
    %c7 = arith.constant 7 : index
    %c0_78 = arith.constant 0 : index
    %c0_79 = arith.constant 0 : index
    %149 = vector.load %arg6[%c0_77, %c7, %c0_78, %c0_79] : memref<1x8x128x128xf32, #tpu.memory_space<vmem>>, vector<1x1x128x128xf32>
    %150 = vector.shape_cast %149 : vector<1x1x128x128xf32> to vector<128x128xf32>
    %c0_80 = arith.constant 0 : index
    %c4_81 = arith.constant 4 : index
    %c0_82 = arith.constant 0 : index
    %151 = vector.load %arg7[%c0_80, %c4_81, %c0_82] : memref<1x8x128xf32, #tpu.memory_space<vmem>>, vector<1x1x128xf32>
    %152 = vector.shape_cast %151 : vector<1x1x128xf32> to vector<1x128xf32>
    %c0_83 = arith.constant 0 : index
    %c5_84 = arith.constant 5 : index
    %c0_85 = arith.constant 0 : index
    %153 = vector.load %arg7[%c0_83, %c5_84, %c0_85] : memref<1x8x128xf32, #tpu.memory_space<vmem>>, vector<1x1x128xf32>
    %154 = vector.shape_cast %153 : vector<1x1x128xf32> to vector<1x128xf32>
    %c0_86 = arith.constant 0 : index
    %c6_87 = arith.constant 6 : index
    %c0_88 = arith.constant 0 : index
    %155 = vector.load %arg7[%c0_86, %c6_87, %c0_88] : memref<1x8x128xf32, #tpu.memory_space<vmem>>, vector<1x1x128xf32>
    %156 = vector.shape_cast %155 : vector<1x1x128xf32> to vector<1x128xf32>
    %c0_89 = arith.constant 0 : index
    %c7_90 = arith.constant 7 : index
    %c0_91 = arith.constant 0 : index
    %157 = vector.load %arg7[%c0_89, %c7_90, %c0_91] : memref<1x8x128xf32, #tpu.memory_space<vmem>>, vector<1x1x128xf32>
    %158 = vector.shape_cast %157 : vector<1x1x128xf32> to vector<1x128xf32>
    %cst_92 = arith.constant dense<0.000000e+00> : vector<8x128xf32>
    %159 = tpu.matmul %142, %144, %cst_92 {dimension_numbers = #tpu.dot_dimension_numbers<[1], [0], [0], [1], [0, 0, 1, 1], [], []>, precision = #tpu.contract_precision<fp32>} : vector<8x128xf32>, vector<128x128xf32>, vector<8x128xf32> -> vector<8x128xf32>
    %160 = vector.broadcast %152 : vector<1x128xf32> to vector<8x128xf32>
    %161 = arith.addf %159, %160 : vector<8x128xf32>
    %cst_93 = arith.constant 0.176776692 : f32
    %162 = vector.broadcast %cst_93 : f32 to vector<8x128xf32>
    %163 = arith.mulf %161, %162 : vector<8x128xf32>
    %cst_94 = arith.constant dense<0.000000e+00> : vector<8x128xf32>
    %164 = tpu.matmul %5, %146, %cst_94 {dimension_numbers = #tpu.dot_dimension_numbers<[1], [0], [0], [1], [0, 0, 1, 1], [], []>, precision = #tpu.contract_precision<fp32>} : vector<8x128xf32>, vector<128x128xf32>, vector<8x128xf32> -> vector<8x128xf32>
    %165 = vector.broadcast %154 : vector<1x128xf32> to vector<8x128xf32>
    %166 = arith.addf %164, %165 : vector<8x128xf32>
    %cst_95 = arith.constant dense<0.000000e+00> : vector<8x128xf32>
    %167 = tpu.matmul %5, %148, %cst_95 {dimension_numbers = #tpu.dot_dimension_numbers<[1], [0], [0], [1], [0, 0, 1, 1], [], []>, precision = #tpu.contract_precision<fp32>} : vector<8x128xf32>, vector<128x128xf32>, vector<8x128xf32> -> vector<8x128xf32>
    %168 = vector.broadcast %156 : vector<1x128xf32> to vector<8x128xf32>
    %169 = arith.addf %167, %168 : vector<8x128xf32>
    %170 = vector.extract_strided_slice %163 {offsets = [0, 0], sizes = [8, 32], strides = [1, 1]} : vector<8x128xf32> to vector<8x32xf32>
    %171 = vector.extract_strided_slice %163 {offsets = [0, 32], sizes = [8, 32], strides = [1, 1]} : vector<8x128xf32> to vector<8x32xf32>
    %172 = vector.extract_strided_slice %163 {offsets = [0, 64], sizes = [8, 32], strides = [1, 1]} : vector<8x128xf32> to vector<8x32xf32>
    %173 = vector.extract_strided_slice %163 {offsets = [0, 96], sizes = [8, 32], strides = [1, 1]} : vector<8x128xf32> to vector<8x32xf32>
    %174 = vector.shape_cast %170 : vector<8x32xf32> to vector<1x8x32xf32>
    %175 = vector.shape_cast %171 : vector<8x32xf32> to vector<1x8x32xf32>
    %176 = vector.shape_cast %172 : vector<8x32xf32> to vector<1x8x32xf32>
    %177 = vector.shape_cast %173 : vector<8x32xf32> to vector<1x8x32xf32>
    %178 = tpu.concatenate %174, %175, %176, %177 in 0 : vector<1x8x32xf32>, vector<1x8x32xf32>, vector<1x8x32xf32>, vector<1x8x32xf32> -> vector<4x8x32xf32>
    %179 = vector.extract_strided_slice %166 {offsets = [0, 0], sizes = [8, 32], strides = [1, 1]} : vector<8x128xf32> to vector<8x32xf32>
    %180 = vector.extract_strided_slice %166 {offsets = [0, 32], sizes = [8, 32], strides = [1, 1]} : vector<8x128xf32> to vector<8x32xf32>
    %181 = vector.extract_strided_slice %166 {offsets = [0, 64], sizes = [8, 32], strides = [1, 1]} : vector<8x128xf32> to vector<8x32xf32>
    %182 = vector.extract_strided_slice %166 {offsets = [0, 96], sizes = [8, 32], strides = [1, 1]} : vector<8x128xf32> to vector<8x32xf32>
    %183 = vector.shape_cast %179 : vector<8x32xf32> to vector<1x8x32xf32>
    %184 = vector.shape_cast %180 : vector<8x32xf32> to vector<1x8x32xf32>
    %185 = vector.shape_cast %181 : vector<8x32xf32> to vector<1x8x32xf32>
    %186 = vector.shape_cast %182 : vector<8x32xf32> to vector<1x8x32xf32>
    %187 = tpu.concatenate %183, %184, %185, %186 in 0 : vector<1x8x32xf32>, vector<1x8x32xf32>, vector<1x8x32xf32>, vector<1x8x32xf32> -> vector<4x8x32xf32>
    %188 = vector.extract_strided_slice %169 {offsets = [0, 0], sizes = [8, 32], strides = [1, 1]} : vector<8x128xf32> to vector<8x32xf32>
    %189 = vector.extract_strided_slice %169 {offsets = [0, 32], sizes = [8, 32], strides = [1, 1]} : vector<8x128xf32> to vector<8x32xf32>
    %190 = vector.extract_strided_slice %169 {offsets = [0, 64], sizes = [8, 32], strides = [1, 1]} : vector<8x128xf32> to vector<8x32xf32>
    %191 = vector.extract_strided_slice %169 {offsets = [0, 96], sizes = [8, 32], strides = [1, 1]} : vector<8x128xf32> to vector<8x32xf32>
    %192 = vector.shape_cast %188 : vector<8x32xf32> to vector<1x8x32xf32>
    %193 = vector.shape_cast %189 : vector<8x32xf32> to vector<1x8x32xf32>
    %194 = vector.shape_cast %190 : vector<8x32xf32> to vector<1x8x32xf32>
    %195 = vector.shape_cast %191 : vector<8x32xf32> to vector<1x8x32xf32>
    %196 = tpu.concatenate %192, %193, %194, %195 in 0 : vector<1x8x32xf32>, vector<1x8x32xf32>, vector<1x8x32xf32>, vector<1x8x32xf32> -> vector<4x8x32xf32>
    "tpu.trace_start"() <{level = 10 : i32, message = "hqd,hkd->hqk"}> : () -> ()
    %cst_96 = arith.constant dense<0.000000e+00> : vector<4x8x8xf32>
    %197 = tpu.matmul %178, %187, %cst_96 {dimension_numbers = #tpu.dot_dimension_numbers<[2], [2], [1], [1], [0, 0, 0, 1, 1, 1], [0], [0]>, precision = #tpu.contract_precision<fp32>} : vector<4x8x32xf32>, vector<4x8x32xf32>, vector<4x8x8xf32> -> vector<4x8x8xf32>
    "tpu.trace_stop"() : () -> ()
    %198 = vector.shape_cast %7 : vector<1x8x8xf32> to vector<8x8xf32>
    %199 = vector.shape_cast %198 : vector<8x8xf32> to vector<1x8x8xf32>
    %cst_97 = arith.constant 5.000000e-01 : f32
    %200 = vector.broadcast %cst_97 : f32 to vector<1x8x8xf32>
    %201 = arith.cmpf ogt, %199, %200 : vector<1x8x8xf32>
    %cst_98 = arith.constant -1.000000e+09 : f32
    %202 = vector.shape_cast %201 : vector<1x8x8xi1> to vector<1x8x8xi1>
    %203 = vector.broadcast %202 : vector<1x8x8xi1> to vector<4x8x8xi1>
    %204 = vector.broadcast %cst_98 : f32 to vector<4x8x8xf32>
    %205 = arith.select %203, %197, %204 : vector<4x8x8xi1>, vector<4x8x8xf32>
    %cst_99 = arith.constant dense<0xFF800000> : vector<4x8xf32>
    %206 = vector.multi_reduction <maximumf>, %205, %cst_99 [2] : vector<4x8x8xf32> to vector<4x8xf32>
    %207 = vector.shape_cast %206 : vector<4x8xf32> to vector<4x8x1xf32>
    %208 = vector.broadcast %207 : vector<4x8x1xf32> to vector<4x8x8xf32>
    %209 = arith.subf %205, %208 : vector<4x8x8xf32>
    %210 = math.exp %209 : vector<4x8x8xf32>
    %cst_100 = arith.constant dense<0.000000e+00> : vector<4x8xf32>
    %211 = vector.multi_reduction <add>, %210, %cst_100 [2] : vector<4x8x8xf32> to vector<4x8xf32>
    %212 = vector.shape_cast %211 : vector<4x8xf32> to vector<4x8x1xf32>
    %213 = tpu.reciprocal %212 {approx = true} : vector<4x8x1xf32> -> vector<4x8x1xf32>
    %214 = vector.broadcast %213 : vector<4x8x1xf32> to vector<4x8x8xf32>
    %215 = arith.mulf %210, %214 : vector<4x8x8xf32>
    "tpu.trace_start"() <{level = 10 : i32, message = "hqk,hkd->hqd"}> : () -> ()
    %cst_101 = arith.constant dense<0.000000e+00> : vector<4x8x32xf32>
    %216 = tpu.matmul %215, %196, %cst_101 {dimension_numbers = #tpu.dot_dimension_numbers<[2], [1], [1], [2], [0, 0, 0, 1, 1, 2], [0], [0]>, precision = #tpu.contract_precision<fp32>} : vector<4x8x8xf32>, vector<4x8x32xf32>, vector<4x8x32xf32> -> vector<4x8x32xf32>
    "tpu.trace_stop"() : () -> ()
    %217 = vector.extract_strided_slice %216 {offsets = [0, 0, 0], sizes = [1, 8, 32], strides = [1, 1, 1]} : vector<4x8x32xf32> to vector<1x8x32xf32>
    %218 = vector.shape_cast %217 : vector<1x8x32xf32> to vector<8x32xf32>
    %219 = vector.extract_strided_slice %216 {offsets = [1, 0, 0], sizes = [1, 8, 32], strides = [1, 1, 1]} : vector<4x8x32xf32> to vector<1x8x32xf32>
    %220 = vector.shape_cast %219 : vector<1x8x32xf32> to vector<8x32xf32>
    %221 = vector.extract_strided_slice %216 {offsets = [2, 0, 0], sizes = [1, 8, 32], strides = [1, 1, 1]} : vector<4x8x32xf32> to vector<1x8x32xf32>
    %222 = vector.shape_cast %221 : vector<1x8x32xf32> to vector<8x32xf32>
    %223 = vector.extract_strided_slice %216 {offsets = [3, 0, 0], sizes = [1, 8, 32], strides = [1, 1, 1]} : vector<4x8x32xf32> to vector<1x8x32xf32>
    %224 = vector.shape_cast %223 : vector<1x8x32xf32> to vector<8x32xf32>
    %225 = tpu.concatenate %218, %220, %222, %224 in 1 : vector<8x32xf32>, vector<8x32xf32>, vector<8x32xf32>, vector<8x32xf32> -> vector<8x128xf32>
    %cst_102 = arith.constant dense<0.000000e+00> : vector<8x128xf32>
    %226 = tpu.matmul %225, %150, %cst_102 {dimension_numbers = #tpu.dot_dimension_numbers<[1], [0], [0], [1], [0, 0, 1, 1], [], []>, precision = #tpu.contract_precision<fp32>} : vector<8x128xf32>, vector<128x128xf32>, vector<8x128xf32> -> vector<8x128xf32>
    %227 = vector.broadcast %158 : vector<1x128xf32> to vector<8x128xf32>
    %228 = arith.addf %226, %227 : vector<8x128xf32>
    %229 = arith.addf %118, %228 : vector<8x128xf32>
    %c0_103 = arith.constant 0 : index
    %c2_104 = arith.constant 2 : index
    %c0_105 = arith.constant 0 : index
    %230 = vector.load %arg8[%c0_103, %c2_104, %c0_105] : memref<1x6x128xf32, #tpu.memory_space<vmem>>, vector<1x1x128xf32>
    %231 = vector.shape_cast %230 : vector<1x1x128xf32> to vector<1x128xf32>
    %c0_106 = arith.constant 0 : index
    %c5_107 = arith.constant 5 : index
    %c0_108 = arith.constant 0 : index
    %232 = vector.load %arg8[%c0_106, %c5_107, %c0_108] : memref<1x6x128xf32, #tpu.memory_space<vmem>>, vector<1x1x128xf32>
    %233 = vector.shape_cast %232 : vector<1x1x128xf32> to vector<1x128xf32>
    %cst_109 = arith.constant dense<0.000000e+00> : vector<8xf32>
    %234 = vector.multi_reduction <add>, %229, %cst_109 [1] : vector<8x128xf32> to vector<8xf32>
    %235 = vector.shape_cast %234 : vector<8xf32> to vector<8x1xf32>
    %cst_110 = arith.constant 1.280000e+02 : f32
    %236 = vector.broadcast %cst_110 : f32 to vector<8x1xf32>
    %237 = arith.divf %235, %236 : vector<8x1xf32>
    %238 = vector.broadcast %237 : vector<8x1xf32> to vector<8x128xf32>
    %239 = arith.subf %229, %238 : vector<8x128xf32>
    %240 = arith.mulf %239, %239 : vector<8x128xf32>
    %cst_111 = arith.constant dense<0.000000e+00> : vector<8xf32>
    %241 = vector.multi_reduction <add>, %240, %cst_111 [1] : vector<8x128xf32> to vector<8xf32>
    %242 = vector.shape_cast %241 : vector<8xf32> to vector<8x1xf32>
    %cst_112 = arith.constant 1.280000e+02 : f32
    %243 = vector.broadcast %cst_112 : f32 to vector<8x1xf32>
    %244 = arith.divf %242, %243 : vector<8x1xf32>
    %cst_113 = arith.constant 9.99999974E-6 : f32
    %245 = vector.broadcast %cst_113 : f32 to vector<8x1xf32>
    %246 = arith.addf %244, %245 : vector<8x1xf32>
    %247 = math.rsqrt %246 : vector<8x1xf32>
    %248 = vector.broadcast %247 : vector<8x1xf32> to vector<8x128xf32>
    %249 = arith.mulf %239, %248 : vector<8x128xf32>
    %250 = vector.broadcast %231 : vector<1x128xf32> to vector<8x128xf32>
    %251 = arith.mulf %249, %250 : vector<8x128xf32>
    %252 = vector.broadcast %233 : vector<1x128xf32> to vector<8x128xf32>
    %253 = arith.addf %251, %252 : vector<8x128xf32>
    %c0_114 = arith.constant 0 : index
    %c0_115 = arith.constant 0 : index
    %c0_116 = arith.constant 0 : index
    %254 = vector.load %arg9[%c0_114, %c0_115, %c0_116] : memref<1x128x256xf32, #tpu.memory_space<vmem>>, vector<1x128x256xf32>
    %255 = vector.shape_cast %254 : vector<1x128x256xf32> to vector<128x256xf32>
    %cst_117 = arith.constant dense<0.000000e+00> : vector<8x256xf32>
    %256 = tpu.matmul %253, %255, %cst_117 {dimension_numbers = #tpu.dot_dimension_numbers<[1], [0], [0], [1], [0, 0, 1, 1], [], []>, precision = #tpu.contract_precision<fp32>} : vector<8x128xf32>, vector<128x256xf32>, vector<8x256xf32> -> vector<8x256xf32>
    %c0_118 = arith.constant 0 : index
    %c0_119 = arith.constant 0 : index
    %c0_120 = arith.constant 0 : index
    %257 = vector.load %arg10[%c0_118, %c0_119, %c0_120] : memref<1x1x256xf32, #tpu.memory_space<vmem>>, vector<1x1x256xf32>
    %258 = vector.shape_cast %257 : vector<1x1x256xf32> to vector<1x256xf32>
    %259 = vector.broadcast %258 : vector<1x256xf32> to vector<8x256xf32>
    %260 = arith.addf %256, %259 : vector<8x256xf32>
    %cst_121 = arith.constant 0.000000e+00 : f32
    %261 = vector.broadcast %cst_121 : f32 to vector<8x256xf32>
    %262 = arith.maximumf %260, %261 : vector<8x256xf32>
    %c0_122 = arith.constant 0 : index
    %c0_123 = arith.constant 0 : index
    %c0_124 = arith.constant 0 : index
    %263 = vector.load %arg11[%c0_122, %c0_123, %c0_124] : memref<1x256x128xf32, #tpu.memory_space<vmem>>, vector<1x256x128xf32>
    %264 = vector.shape_cast %263 : vector<1x256x128xf32> to vector<256x128xf32>
    %cst_125 = arith.constant dense<0.000000e+00> : vector<8x128xf32>
    %265 = tpu.matmul %262, %264, %cst_125 {dimension_numbers = #tpu.dot_dimension_numbers<[1], [0], [0], [1], [0, 0, 1, 1], [], []>, precision = #tpu.contract_precision<fp32>} : vector<8x256xf32>, vector<256x128xf32>, vector<8x128xf32> -> vector<8x128xf32>
    %266 = arith.addf %229, %265 : vector<8x128xf32>
    %c0_126 = arith.constant 0 : index
    %c0_127 = arith.constant 0 : index
    %c0_128 = arith.constant 0 : index
    %267 = vector.load %arg12[%c0_126, %c0_127, %c0_128] : memref<1x1x128xf32, #tpu.memory_space<vmem>>, vector<1x1x128xf32>
    %268 = vector.shape_cast %267 : vector<1x1x128xf32> to vector<1x128xf32>
    %269 = vector.broadcast %268 : vector<1x128xf32> to vector<8x128xf32>
    %270 = arith.addf %266, %269 : vector<8x128xf32>
    %c0_129 = arith.constant 0 : index
    %c0_130 = arith.constant 0 : index
    %271 = vector.load %arg14[%c0_129, %c0_130] : memref<8x128xf32, #tpu.memory_space<vmem>>, vector<8x128xf32>
    tpu.vector_store %arg14[%c0_129, %c0_130], %270 {strides = array<i32>} : memref<8x128xf32, #tpu.memory_space<vmem>>, vector<8x128xf32>,
    %c1_i32 = arith.constant 1 : i32
    %272 = arith.cmpi eq, %arg1, %c1_i32 : i32
    %273 = arith.extui %272 : i1 to i32
    %c0_i32_131 = arith.constant 0 : i32
    %274 = arith.cmpi ne, %273, %c0_i32_131 : i32
    scf.if %274 {
      %275 = vector.shape_cast %270 : vector<8x128xf32> to vector<1x8x128xf32>
      %c0_132 = arith.constant 0 : index
      %c0_133 = arith.constant 0 : index
      %c0_134 = arith.constant 0 : index
      %276 = vector.load %arg13[%c0_132, %c0_133, %c0_134] : memref<1x8x128xf32, #tpu.memory_space<vmem>>, vector<1x8x128xf32>
      tpu.vector_store %arg13[%c0_132, %c0_133, %c0_134], %275 {strides = array<i32>} : memref<1x8x128xf32, #tpu.memory_space<vmem>>, vector<1x8x128xf32>,
    } else {
    }
    return
  }
  func.func @transform_0(%arg0: i32, %arg1: i32) -> (i32, i32, i32) {
    %c0_i32 = arith.constant 0 : i32
    %c0_i32_0 = arith.constant 0 : i32
    %c0_i32_1 = arith.constant 0 : i32
    return %arg0, %c0_i32, %c0_i32_0 : i32, i32, i32
  }
  func.func @transform_1(%arg0: i32, %arg1: i32) -> (i32, i32, i32) {
    %c0_i32 = arith.constant 0 : i32
    %c0_i32_0 = arith.constant 0 : i32
    %c0_i32_1 = arith.constant 0 : i32
    return %arg0, %c0_i32, %c0_i32_0 : i32, i32, i32
  }
  func.func @transform_2(%arg0: i32, %arg1: i32) -> (i32, i32, i32) {
    %c0_i32 = arith.constant 0 : i32
    %c0_i32_0 = arith.constant 0 : i32
    %c0_i32_1 = arith.constant 0 : i32
    return %arg0, %c0_i32, %c0_i32_0 : i32, i32, i32
  }
  func.func @transform_3(%arg0: i32, %arg1: i32) -> (i32, i32, i32) {
    %c0_i32 = arith.constant 0 : i32
    %c0_i32_0 = arith.constant 0 : i32
    %c0_i32_1 = arith.constant 0 : i32
    return %arg0, %c0_i32, %c0_i32_0 : i32, i32, i32
  }
  func.func @transform_4(%arg0: i32, %arg1: i32) -> (i32, i32, i32, i32) {
    %c0_i32 = arith.constant 0 : i32
    %c0_i32_0 = arith.constant 0 : i32
    %c0_i32_1 = arith.constant 0 : i32
    %c0_i32_2 = arith.constant 0 : i32
    return %arg1, %c0_i32, %c0_i32_0, %c0_i32_1 : i32, i32, i32, i32
  }
  func.func @transform_5(%arg0: i32, %arg1: i32) -> (i32, i32, i32) {
    %c0_i32 = arith.constant 0 : i32
    %c0_i32_0 = arith.constant 0 : i32
    %c0_i32_1 = arith.constant 0 : i32
    return %arg1, %c0_i32, %c0_i32_0 : i32, i32, i32
  }
  func.func @transform_6(%arg0: i32, %arg1: i32) -> (i32, i32, i32) {
    %c0_i32 = arith.constant 0 : i32
    %c0_i32_0 = arith.constant 0 : i32
    %c0_i32_1 = arith.constant 0 : i32
    return %arg1, %c0_i32, %c0_i32_0 : i32, i32, i32
  }
  func.func @transform_7(%arg0: i32, %arg1: i32) -> (i32, i32, i32) {
    %c0_i32 = arith.constant 0 : i32
    %c0_i32_0 = arith.constant 0 : i32
    %c0_i32_1 = arith.constant 0 : i32
    return %arg1, %c0_i32, %c0_i32_0 : i32, i32, i32
  }
  func.func @transform_8(%arg0: i32, %arg1: i32) -> (i32, i32, i32) {
    %c0_i32 = arith.constant 0 : i32
    %c0_i32_0 = arith.constant 0 : i32
    %c0_i32_1 = arith.constant 0 : i32
    return %arg1, %c0_i32, %c0_i32_0 : i32, i32, i32
  }
  func.func @transform_9(%arg0: i32, %arg1: i32) -> (i32, i32, i32) {
    %c0_i32 = arith.constant 0 : i32
    %c0_i32_0 = arith.constant 0 : i32
    %c0_i32_1 = arith.constant 0 : i32
    return %arg1, %c0_i32, %c0_i32_0 : i32, i32, i32
  }
  func.func @transform_10(%arg0: i32, %arg1: i32) -> (i32, i32, i32) {
    %c0_i32 = arith.constant 0 : i32
    %c0_i32_0 = arith.constant 0 : i32
    %c0_i32_1 = arith.constant 0 : i32
    return %arg1, %c0_i32, %c0_i32_0 : i32, i32, i32
  }
  func.func @transform_11(%arg0: i32, %arg1: i32) -> (i32, i32, i32) {
    %c0_i32 = arith.constant 0 : i32
    %c0_i32_0 = arith.constant 0 : i32
    %c0_i32_1 = arith.constant 0 : i32
    return %arg0, %c0_i32, %c0_i32_0 : i32, i32, i32
  }
}

</mosaic_0001>

<bundles_post_ra>
// kernel: tpu_custom_call.1
= control target key start
LH: loop header
LB: loop body
LE: loop exit
PB: predicated region body
PF: predicated region fallthrough
CT: control target
= control target key end

     0   :  { %s25723_s0 = inlined_call_operand.vmem [shape: f32[2,8,128], index: 0, kind: input, shape index: {}]   ;;  %s25724_s1 = inlined_call_operand.hbm [shape: f32[2,8,128], index: 1, kind: input, shape index: {}]   ;;  %s25725_s2 = inlined_call_operand.vmem [shape: f32[2,8,8], index: 2, kind: input, shape index: {}]   ;;  %s25726_s3 = inlined_call_operand.hbm [shape: f32[2,8,8], index: 3, kind: input, shape index: {}]   ;;  %s25727_s4 = inlined_call_operand.hbm [shape: f32[2,8,128,128], index: 4, kind: input, shape index: {}]   ;;  %s25728_s5 = inlined_call_operand.hbm [shape: f32[2,8,128], index: 5, kind: input, shape index: {}]   ;;  %s25729_s6 = inlined_call_operand.vmem [shape: f32[2,6,128], index: 6, kind: input, shape index: {}]   ;;  %s25730_s7 = inlined_call_operand.hbm [shape: f32[2,128,256], index: 7, kind: input, shape index: {}]   ;;  %s25731_s8 = inlined_call_operand.vmem [shape: f32[2,1,256], index: 8, kind: input, shape index: {}]   ;;  %s25732_s9 = inlined_call_operand.hbm [shape: f32[2,256,128], index: 9, kind: input, shape index: {}]   ;;  %s25733_s10 = inlined_call_operand.vmem [shape: f32[2,1,128], index: 10, kind: input, shape index: {}]   ;;  %s25734_s11 = inlined_call_operand.hbm [shape: f32[2,8,128], index: 11, kind: output, shape index: {}]  }
   0x1   :  { %26011 = sst [smem:[#allocation78_spill]] %s25723_s0 }
   0x2   :  { %26012 = sst [smem:[#allocation79_spill]] %s25724_s1 }
   0x3   :  { %26013 = sst [smem:[#allocation80_spill]] %s25725_s2 }
   0x4   :  { %26014 = sst [smem:[#allocation81_spill]] %s25726_s3 }
   0x5   :  { %26015 = sst [smem:[#allocation82_spill]] %s25727_s4 }
   0x6   :  { %26016 = sst [smem:[#allocation83_spill]] %s25728_s5 }
   0x7   :  { %26017 = sst [smem:[#allocation84_spill]] %s25729_s6 }
   0x8   :  { %26018 = sst [smem:[#allocation85_spill]] %s25730_s7 }
   0x9   :  { %26019 = sst [smem:[#allocation86_spill]] %s25731_s8 }
   0xa   :  { %26020 = sst [smem:[#allocation87_spill]] %s25732_s9 }
   0xb   :  { %26021 = sst [smem:[#allocation88_spill]] %s25733_s10 }
   0xc   :  { %26022 = sst [smem:[#allocation89_spill]] %s25734_s11 }
   0xd   :  { %16 = vsyncpa [#allocation4], 0 }
   0xe   :  { %18 = vsyncpa [#allocation4 + $0x1], 0 }
   0xf   :  { %19 = vsyncpa [#allocation7], 0 }
  0x10   :  { %21 = vsyncpa [#allocation7 + $0x1], 0 }
  0x11   :  { %22 = vsyncpa [#allocation10], 0 }
  0x12   :  { %24 = vsyncpa [#allocation10 + $0x1], 0 }
  0x13   :  { %25 = vsyncpa [#allocation13], 0 }
  0x14   :  { %27 = vsyncpa [#allocation13 + $0x1], 0 }
  0x15   :  { %28 = vsyncpa [#allocation5], 0 }
  0x16   :  { %30 = vsyncpa [#allocation5 + $0x1], 0  ;;  %s21410_s17 = smov 0   ;;  %s21412_s18 = smov 0  }
  0x17   :  { %s21414_s19 = smov 0   ;;  %s21416_s20 = smov 0  }
  0x18   :  { %s21418_s21 = smov 0   ;;  %s21420_s22 = smov 0  }
  0x19   :  { %s21422_s23 = smov 0   ;;  %s21424_s24 = smov 0  }
  0x1a   :  { %s21426_s25 = smov 0   ;;  %s21428_s26 = smov 0  }
  0x1b   :  { %s21430_s27 = smov 0  }
  0x1c LB: > { %26023 = sst [smem:[#allocation21_spill]] %s21295_s18  ;;  %s21464_s28 = sadd.s32 4294967295, %s21331_s27   ;;  %s21331_s27 = sphi %s21430_s27, %s36_s27   ;;  %s21327_s26 = sphi %s21428_s26, %s26404_s26   ;;  %s21323_s25 = sphi %s21426_s25, %s26408_s25   ;;  %s21319_s24 = sphi %s21424_s24, %s26402_s24   ;;  %s21315_s23 = sphi %s21422_s23, %s26401_s23   ;;  %s21311_s22 = sphi %s21420_s22, %s26407_s22   ;;  %s21307_s21 = sphi %s21418_s21, %s26399_s21   ;;  %s21303_s20 = sphi %s21416_s20, %s26398_s20   ;;  %s21299_s19 = sphi %s21414_s19, %s26406_s19   ;;  %s21295_s18 = sphi %s21412_s18, %s26405_s18   ;;  %s21291_s17 = sphi %s21410_s17, %s26396_s17  }
  0x1d   : > { %26024 = sst [smem:[#allocation22_spill]] %s21303_s20  ;;  %s15519_s29 = sadd.s32 4294967294, %s21331_s27  }
  0x1e   : > { %26025 = sst [smem:[#allocation23_spill]] %s21307_s21  ;;  %p88_p0 = scmp.ne.s32.totalorder %s21311_s22, %s21307_s21 }
  0x1f   : > { %26026 = sst [smem:[#allocation24_spill]] %s21311_s22  ;;  %p89_p1 = scmp.eq.s32.totalorder %s21331_s27, 0 }
  0x20   : > { %26027 = sst [smem:[#allocation25_spill]] %s21315_s23  ;;  %p94_p2 = scmp.ne.s32.totalorder %s21307_s21, %s21303_s20 }
  0x21   : > { %26028 = sst [smem:[#allocation26_spill]] %s21319_s24  ;;  %p95_p3 = scmp.eq.s32.totalorder %s21464_s28, 0 }
  0x22   : > { %26029 = sst [smem:[#allocation27_spill]] %s21323_s25  ;;  %p21475_p4 = por %p89_p1, %p88_p0 }
  0x23   : > { %26030 = sst [smem:[#allocation28_spill]] %s21327_s26  ;;  %p166_p5 = scmp.ne.s32.totalorder %s21299_s19, %s21295_s18 }
  0x24   : > { %26031 = sst [smem:[#allocation29_spill]] %s21464_s28  ;;  %p21481_p6 = por %p95_p3, %p94_p2 }
  0x25   : > { %p172_p7 = scmp.ne.s32.totalorder %s21295_s18, %s21291_s17  ;;  %p21486_p8 = por %p166_p5, %p89_p1 }
  0x26   : > { %s26033_s14 = scalar_select %p21481_p6, 1, 0 }
  0x27   : > { %p352_p9 = scmp.eq.s32.totalorder %s21464_s28, 3  ;;  %p21491_p10 = por %p172_p7, %p95_p3 }
  0x28   : > { %26034 = sst [smem:[#allocation30_spill]] %s26033_s14  ;;  %p358_p11 = scmp.eq.s32.totalorder %s15519_s29, 3 }
  0x29   : > { %s26036_s16 = scalar_select %p21491_p10, 1, 0 }
  0x2a   : > { %p21495_p12 = por %p352_p9, %p88_p0  ;;  %p21499_p13 = por %p358_p11, %p94_p2 }
  0x2b   : > { %26037 = sst [smem:[#allocation31_spill]] %s26036_s16  ;;  %p20874_p1 = scmp.lt.s32.totalorder %s21331_s27, 4 }
  0x2c   : > { %s26038_s12 = scalar_select %p21495_p12, 1, 0 }
  0x2d   : > { %s26040_s30 = scalar_select %p21499_p13, 1, 0 }
  0x2e   : > { %26039 = sst [smem:[#allocation32_spill]] %s26038_s12  ;;  %s25740_s17 = sand.u32 1, %s21311_s22  }
  0x2f   : > { %26041 = sst [smem:[#allocation33_spill]] %s26040_s30  ;;  %s25741_s20 = sshll.u32 %s21327_s26, 7 }
  0x30   : > { %s21508_s11 = sshll.u32 %s25740_s17, 3  ;;  %p21512_p3 = pnand %p20874_p1, %p21475_p4 }
  0x31   : > { %s25743_s29 = sand.u32 1, %s21331_s27   ;;  %s26043_s3 = sld [smem:[#allocation81_spill]] }
  0x32   : > { %s26042_s10 = scalar_select %p21512_p3, 1, 0 }
  0x33   : > { %s414_s17 = scalar_lea.vmem [#allocation6], %s21508_s11  ;;  %p21529_p0 = pnand %p20874_p1, %p21486_p8 }
  0x34   : > { %s421_s13 = sshll.u32 %s414_s17, 4  ;;  %s21535_s2 = scalar_lea.sflag [#allocation7], %s25743_s29  ;;  %s21525_s13 = int_to_ptr.vmem [resolvable:$true] %s421_s13 }
  0x35   : > { %s26044_s6 = scalar_select %p21529_p0, 1, 0 }
  0x36   : > { %p25756_p4 = pneg %p21512_p3 }
  0x37   : > { %s21522_s30 = scalar_lea.hbm %s26043_s3, %s25741_s20  ;;  %s21018_s17 = scalar_lea.hbm %s26043_s3, 256 }
  0x38   : > { %s21013_s0 = scalar_lea.hbm %s21522_s30, 128  ;;  %p21019_p8 = scmp.lt.u32.totalorder %s21522_s30, %s26043_s3 }
  0x39   : > { %p21014_p2 = scmp.ne.s32.totalorder %s21522_s30, %s21013_s0  ;;  %p21020_p9 = scmp.lt.u32.totalorder %s21018_s17, %s21013_s0 }
  0x3a   : > { %p21022_p1 = scmp.lt.u32.totalorder %s21013_s0, %s21522_s30 }
  0x3b   : > { %p21016_p5 = pnand %p25756_p4, %p21014_p2  ;;  %p21021_p11 = por %p21020_p9, %p21019_p8 }
  0x3d   : > { %p21017_p7 = pneg %p21016_p5  ;;  %p21023_p13 = por %p21022_p1, %p21021_p11 }
  0x3f   : > { %p21024_p12 = pnand %p21023_p13, %p21017_p7 }
  0x41   : > { %21027 = shalt.err (!%p21024_p12)
}
  0x42   : > { %s21028_s29 = scalar_lea.vmem %s21525_s13, 128  ;;  %s21333_s8 = smov [#allocation6]  }
  0x43   : > { %p21029_p2 = scmp.ne.s32.totalorder %s21525_s13, %s21028_s29  ;;  %s21033_s12 = sshll.u32 %s21333_s8, 4  ;;  %s21034_s12 = int_to_ptr.vmem [resolvable:$false] %s21033_s12 }
  0x44   : > { %s21035_s20 = scalar_lea.vmem %s21034_s12, 256  ;;  %p21036_p6 = scmp.lt.s32.totalorder %s21525_s13, %s21034_s12 }
  0x45   : > { %p21031_p5 = pnand %p21029_p2, %p25756_p4  ;;  %p21037_p8 = scmp.lt.s32.totalorder %s21035_s20, %s21028_s29 }
  0x47   : > { %p21032_p10 = pneg %p21031_p5  ;;  %p21038_p9 = por %p21037_p8, %p21036_p6 }
  0x49   : > { %p21039_p11 = pnand %p21038_p9, %p21032_p10 }
  0x4b   : > { %21042 = shalt.err (!%p21039_p11)
}
  0x4c   : > { %20857 = dma.hbm_to_vmem [thread:$0]  (!%p21512_p3), %s21522_s30, 128, %s21525_s13, %s21535_s2  }
  0x4d   : > { %p15537_p12 = scmp.ge.s32.totalorder %s21331_s27, 1  ;;  %p527_p6 = scmp.lt.s32.totalorder %s21331_s27, 5 }
  0x4e   : > { %s159_s0 = sadd.s32 1, %s21299_s19  ;;  %s45_s17 = sadd.s32 1, %s21323_s25 }
  0x4f   : > { %p21566_p10 = pnand %p15537_p12, %p527_p6  ;;  %p46_p13 = scmp.ge.s32.totalorder %s45_s17, 2 }
  0x50   : > { %s21572_s15 = sand.u32 1, %s21299_s19   ;;  %s26047_s30 = sadd.s32 1, %s21327_s26 }
  0x51   : > { %s26045_s29 = scalar_select %p21566_p10, 1, 0 }
  0x52   : > { %s26410_s17 = smov (%p46_p13, %s45_s17), 0  ;;  %s26412_s30 = smov (!%p46_p13, %s26047_s30), %s21327_s26 }
  0x53   : > { %26046 = sst [smem:[#allocation34_spill]] %s26410_s17  ;;  %s156_s13 = ssub.s32 %s21323_s25, %s26410_s17 }
  0x54   : > { %s15529_s12 = sshll.u32 %s21572_s15, 3  ;;  %p50_p7 = scmp.ge.s32.totalorder %s26412_s30, 2 }
  0x55   : > { %p157_p1 = scmp.eq.s32.totalorder %s156_s13, 0  ;;  %s15530_s20 = sshll.u32 %s21323_s25, 7 }
  0x56   : > { %s26414_s30 = smov (%p50_p7, %s26412_s30), 0  ;;  %s26050_s5 = sld [smem:[#allocation83_spill]] }
  0x57   : > { %26048 = sst [smem:[#allocation35_spill]] %s26414_s30  ;;  %s78_s8 = ssub.s32 %s21327_s26, %s26414_s30 }
  0x58   : > { %s21587_s3 = scalar_select %p157_p1, %s21299_s19, %s159_s0  }
  0x59   : > { %p79_p2 = scmp.eq.s32.totalorder %s78_s8, 0  ;;  %s453_s17 = scalar_lea.vmem [#allocation9], %s15529_s12 }
  0x5a   : > { %26049 = sst [smem:[#allocation36_spill]] %s21587_s3  ;;  %s460_s18 = sshll.u32 %s453_s17, 4  ;;  %s21596_s18 = int_to_ptr.vmem [resolvable:$true] %s460_s18 }
  0x5b   : > { %s26051_s28 = sadd.s32 1, %s21311_s22  ;;  %s26053_s0 = sand.u32 1, %s21331_s27  }
  0x5c   : > { %s21594_s16 = scalar_lea.hbm %s26050_s5, %s15530_s20  ;;  %s21606_s30 = scalar_lea.sflag [#allocation10], %s26053_s0 }
  0x5d   : > { %s21602_s14 = scalar_select %p79_p2, %s21311_s22, %s26051_s28  }
  0x5e   : > { %s21043_s3 = scalar_lea.hbm %s21594_s16, 128  ;;  %p21612_p8 = pneg %p21529_p0 }
  0x5f   : > { %26052 = sst [smem:[#allocation37_spill]] %s21602_s14  ;;  %p21044_p5 = scmp.ne.s32.totalorder %s21594_s16, %s21043_s3 }
  0x60   : > { %s26054_s23 = scalar_select %p21612_p8, 1, 0 }
  0x61   : > { %p21046_p9 = pnand %p21612_p8, %p21044_p5  ;;  %s21048_s8 = scalar_lea.hbm %s26050_s5, 256 }
  0x62   : > { %p21049_p12 = scmp.lt.u32.totalorder %s21594_s16, %s26050_s5  ;;  %p21050_p6 = scmp.lt.u32.totalorder %s21048_s8, %s21043_s3 }
  0x63   : > { %p21047_p11 = pneg %p21046_p9  ;;  %p21052_p7 = scmp.lt.u32.totalorder %s21043_s3, %s21594_s16 }
  0x64   : > { %p21051_p13 = por %p21050_p6, %p21049_p12 }
  0x66   : > { %p21053_p1 = por %p21052_p7, %p21051_p13 }
  0x68   : > { %p21054_p2 = pnand %p21053_p1, %p21047_p11 }
  0x6a   : > { %21057 = shalt.err (!%p21054_p2)
}
  0x6b   : > { %s21058_s20 = scalar_lea.vmem %s21596_s18, 128  ;;  %s21334_s0 = smov [#allocation9]  }
  0x6c   : > { %p21059_p5 = scmp.ne.s32.totalorder %s21596_s18, %s21058_s20  ;;  %s21063_s24 = sshll.u32 %s21334_s0, 4  ;;  %s21064_s24 = int_to_ptr.vmem [resolvable:$false] %s21063_s24 }
  0x6d   : > { %s21065_s17 = scalar_lea.vmem %s21064_s24, 256  ;;  %p21066_p10 = scmp.lt.s32.totalorder %s21596_s18, %s21064_s24 }
  0x6e   : > { %p21061_p9 = pnand %p21059_p5, %p21612_p8  ;;  %p21067_p3 = scmp.lt.s32.totalorder %s21065_s17, %s21058_s20 }
  0x70   : > { %p21062_p4 = pneg %p21061_p9  ;;  %p21068_p12 = por %p21067_p3, %p21066_p10 }
  0x72   : > { %p21069_p6 = pnand %p21068_p12, %p21062_p4 }
  0x74   : > { %21072 = shalt.err (!%p21069_p6)
}
  0x75   : > { %20863 = dma.hbm_to_vmem [thread:$0]  (!%p21529_p0), %s21594_s16, 128, %s21596_s18, %s21606_s30  }
  0x76   : > { %s26055_s3 = sshll.u32 %s21327_s26, 7  ;;  %s26056_s1 = sld [smem:[#allocation79_spill]] }
  0x77   : > { %s389_s20 = scalar_lea.vmem [#allocation3], %s21508_s11  ;;  %s26057_s24 = sand.u32 1, %s21311_s22  }
  0x78   : > { %s396_s0 = sshll.u32 %s389_s20, 4  ;;  %s386_s17 = scalar_lea.sflag [#allocation4], %s26057_s24  ;;  %s397_s0 = int_to_ptr.vmem [resolvable:$true] %s396_s0 }
  0x79   : > { %p26058_p4 = scmp.ne.s32.totalorder %s26042_s10, 0 }
  0x7b   : > { %p26059_p10 = pneg %p26058_p4 }
  0x7c   : > { %s21641_s12 = scalar_lea.hbm %s26056_s1, %s26055_s3  ;;  %s21078_s3 = scalar_lea.hbm %s26056_s1, 256 }
  0x7d   : > { %s21073_s13 = scalar_lea.hbm %s21641_s12, 128  ;;  %p21079_p7 = scmp.lt.u32.totalorder %s21641_s12, %s26056_s1 }
  0x7e   : > { %p21074_p3 = scmp.ne.s32.totalorder %s21641_s12, %s21073_s13  ;;  %p21080_p1 = scmp.lt.u32.totalorder %s21078_s3, %s21073_s13 }
  0x7f   : > { %p21082_p5 = scmp.lt.u32.totalorder %s21073_s13, %s21641_s12 }
  0x80   : > { %p21076_p11 = pnand %p21074_p3, %p26059_p10  ;;  %p21081_p2 = por %p21080_p1, %p21079_p7 }
  0x82   : > { %p21077_p13 = pneg %p21076_p11  ;;  %p21083_p9 = por %p21082_p5, %p21081_p2 }
  0x84   : > { %p21084_p12 = pnand %p21083_p9, %p21077_p13 }
  0x86   : > { %21087 = shalt.err (!%p21084_p12)
}
  0x87   : > { %s21088_s11 = scalar_lea.vmem %s397_s0, 128  ;;  %p26060_p3 = pmov %p26059_p10 }
  0x88   : > { %p21089_p6 = scmp.ne.s32.totalorder %s397_s0, %s21088_s11  ;;  %s21335_s20 = smov [#allocation3]  }
  0x89   : > { %s21093_s24 = sshll.u32 %s21335_s20, 4  ;;  %s21094_s24 = int_to_ptr.vmem [resolvable:$false] %s21093_s24 }
  0x8a   : > { %p21091_p10 = pnand %p21089_p6, %p26060_p3  ;;  %s21095_s18 = scalar_lea.vmem %s21094_s24, 256 }
  0x8b   : > { %p21096_p0 = scmp.lt.s32.totalorder %s397_s0, %s21094_s24  ;;  %p21097_p8 = scmp.lt.s32.totalorder %s21095_s18, %s21088_s11 }
  0x8c   : > { %p21092_p11 = pneg %p21091_p10 }
  0x8d   : > { %p21098_p1 = por %p21097_p8, %p21096_p0 }
  0x8f   : > { %p21099_p7 = pnand %p21098_p1, %p21092_p11 }
  0x91   : > { %21102 = shalt.err (!%p21099_p7)
}
  0x92   : > { %20854 = dma.hbm_to_vmem [thread:$0]  (!%p26058_p4), %s21641_s12, 128, %s397_s0, %s386_s17  }
  0x93   : > { %s15682_s13 = sshll.u32 %s21323_s25, 14  ;;  %s26061_s16 = sshll.u32 %s21572_s15, 10 }
  0x94   : > { %s432_s3 = scalar_lea.vmem [#allocation8], %s26061_s16  ;;  %s26062_s4 = sld [smem:[#allocation82_spill]] }
  0x95   : > { %s439_s8 = sshll.u32 %s432_s3, 4  ;;  %p26063_p8 = scmp.ne.s32.totalorder %s26054_s23, 0  ;;  %s21673_s8 = int_to_ptr.vmem [resolvable:$true] %s439_s8 }
  0x9a   : > { %s21671_s1 = scalar_lea.hbm %s26062_s4, %s15682_s13  ;;  %s21108_s17 = scalar_lea.hbm %s26062_s4, 32768 }
  0x9b   : > { %s21103_s10 = scalar_lea.hbm %s21671_s1, 16384  ;;  %p21109_p2 = scmp.lt.u32.totalorder %s21671_s1, %s26062_s4 }
  0x9c   : > { %p21104_p0 = scmp.ne.s32.totalorder %s21671_s1, %s21103_s10  ;;  %p21110_p5 = scmp.lt.u32.totalorder %s21108_s17, %s21103_s10 }
  0x9d   : > { %p21112_p12 = scmp.lt.u32.totalorder %s21103_s10, %s21671_s1 }
  0x9e   : > { %p21106_p13 = pnand %p21104_p0, %p26063_p8  ;;  %p21111_p9 = por %p21110_p5, %p21109_p2 }
  0xa0   : > { %p21107_p4 = pneg %p21106_p13  ;;  %p21113_p6 = por %p21112_p12, %p21111_p9 }
  0xa2   : > { %p21114_p3 = pnand %p21113_p6, %p21107_p4 }
  0xa4   : > { %21117 = shalt.err (!%p21114_p3)
}
  0xa5   : > { %s21118_s18 = scalar_lea.vmem %s21673_s8, 16384  ;;  %s21336_s13 = smov [#allocation8]  }
  0xa6   : > { %p21119_p10 = scmp.ne.s32.totalorder %s21673_s8, %s21118_s18  ;;  %s21123_s16 = sshll.u32 %s21336_s13, 4  ;;  %s21124_s16 = int_to_ptr.vmem [resolvable:$false] %s21123_s16 }
  0xa7   : > { %s21125_s3 = scalar_lea.vmem %s21124_s16, 32768  ;;  %p21126_p7 = scmp.lt.s32.totalorder %s21673_s8, %s21124_s16 }
  0xa8   : > { %p21121_p11 = pnand %p21119_p10, %p26063_p8  ;;  %p21127_p0 = scmp.lt.s32.totalorder %s21125_s3, %s21118_s18 }
  0xaa   : > { %p21122_p1 = pneg %p21121_p11  ;;  %p21128_p13 = por %p21127_p0, %p21126_p7 }
  0xac   : > { %p21129_p2 = pnand %p21128_p13, %p21122_p1 }
  0xae   : > { %21132 = shalt.err (!%p21129_p2)
}
  0xaf   : > { %s21337_s28 = smov 128   ;;  %s21338_s20 = smov 8  }
  0xb0   : > { %p26064_p4 = scmp.ne.s32.totalorder %s26044_s6, 0  ;;  %s15683_s10 = sshll.u32 %s21323_s25, 12 }
  0xb1   : > { %s26065_s7 = sld [smem:[#allocation85_spill]]  ;;  %s26066_s11 = sshll.u32 %s21572_s15, 8 }
  0xb2   : > { %20860 = dma.hbm_to_vmem [thread:$0]  (!%p26064_p4), %s21671_s1, 16384, %s21673_s8, %s21535_s2, %s21337_s28, %s21337_s28, %s21338_s20  }
  0xb3   : > { %s478_s24 = scalar_lea.vmem [#allocation11], %s26066_s11 }
  0xb4   : > { %s485_s18 = sshll.u32 %s478_s24, 4  ;;  %s21710_s18 = int_to_ptr.vmem [resolvable:$true] %s485_s18 }
  0xb7   : > { %s21706_s17 = scalar_lea.hbm %s26065_s7, %s15683_s10  ;;  %s21138_s8 = scalar_lea.hbm %s26065_s7, 8192 }
  0xb8   : > { %s21133_s13 = scalar_lea.hbm %s21706_s17, 4096  ;;  %p21139_p6 = scmp.lt.u32.totalorder %s21706_s17, %s26065_s7 }
  0xb9   : > { %p21134_p5 = scmp.ne.s32.totalorder %s21706_s17, %s21133_s13  ;;  %p21140_p3 = scmp.lt.u32.totalorder %s21138_s8, %s21133_s13 }
  0xba   : > { %p21142_p11 = scmp.lt.u32.totalorder %s21133_s13, %s21706_s17 }
  0xbb   : > { %p21136_p9 = pnand %p21134_p5, %p26063_p8  ;;  %p21141_p10 = por %p21140_p3, %p21139_p6 }
  0xbd   : > { %p21137_p12 = pneg %p21136_p9  ;;  %p21143_p1 = por %p21142_p11, %p21141_p10 }
  0xbf   : > { %p21144_p7 = pnand %p21143_p1, %p21137_p12 }
  0xc1   : > { %21147 = shalt.err (!%p21144_p7)
}
  0xc2   : > { %s21148_s12 = scalar_lea.vmem %s21710_s18, 4096  ;;  %s21339_s0 = smov [#allocation11]  }
  0xc3   : > { %p21149_p0 = scmp.ne.s32.totalorder %s21710_s18, %s21148_s12  ;;  %s21153_s11 = sshll.u32 %s21339_s0, 4  ;;  %s21154_s11 = int_to_ptr.vmem [resolvable:$false] %s21153_s11 }
  0xc4   : > { %s21155_s24 = scalar_lea.vmem %s21154_s11, 8192  ;;  %p21156_p5 = scmp.lt.s32.totalorder %s21710_s18, %s21154_s11 }
  0xc5   : > { %p21151_p13 = pnand %p21149_p0, %p26063_p8  ;;  %p21157_p9 = scmp.lt.s32.totalorder %s21155_s24, %s21148_s12 }
  0xc7   : > { %p21152_p2 = pneg %p21151_p13  ;;  %p21158_p6 = por %p21157_p9, %p21156_p5 }
  0xc9   : > { %p21159_p3 = pnand %p21158_p6, %p21152_p2 }
  0xcb   : > { %21162 = shalt.err (!%p21159_p3)
}
  0xcc   : > { %s21340_s13 = smov 256   ;;  %s21341_s1 = smov 16  }
  0xcd   : > { %20866 = dma.hbm_to_vmem [thread:$0]  (!%p26064_p4), %s21706_s17, 4096, %s21710_s18, %s21606_s30, %s21340_s13, %s21340_s13, %s21341_s1  }
  0xce   : > { %s26067_s9 = sld [smem:[#allocation87_spill]]  ;;  %s26068_s3 = sshll.u32 %s21572_s15, 8 }
  0xcf   : > { %s506_s12 = scalar_lea.vmem [#allocation12], %s26068_s3  ;;  %s503_s11 = scalar_lea.sflag [#allocation13], %s21572_s15 }
  0xd0   : > { %s513_s0 = sshll.u32 %s506_s12, 4  ;;  %s21743_s0 = int_to_ptr.vmem [resolvable:$true] %s513_s0 }
  0xd4   : > { %s21739_s16 = scalar_lea.hbm %s26067_s9, %s15683_s10  ;;  %s21168_s10 = scalar_lea.hbm %s26067_s9, 8192 }
  0xd5   : > { %s21163_s24 = scalar_lea.hbm %s21739_s16, 4096  ;;  %p21169_p1 = scmp.lt.u32.totalorder %s21739_s16, %s26067_s9 }
  0xd6   : > { %p21164_p12 = scmp.ne.s32.totalorder %s21739_s16, %s21163_s24  ;;  %p21170_p7 = scmp.lt.u32.totalorder %s21168_s10, %s21163_s24 }
  0xd7   : > { %p21172_p13 = scmp.lt.u32.totalorder %s21163_s24, %s21739_s16 }
  0xd8   : > { %p21166_p10 = pnand %p21164_p12, %p26063_p8  ;;  %p21171_p0 = por %p21170_p7, %p21169_p1 }
  0xda   : > { %p21167_p11 = pneg %p21166_p10  ;;  %p21173_p2 = por %p21172_p13, %p21171_p0 }
  0xdc   : > { %p21174_p5 = pnand %p21173_p2, %p21167_p11 }
  0xde   : > { %21177 = shalt.err (!%p21174_p5)
}
  0xdf   : > { %s21178_s1 = scalar_lea.vmem %s21743_s0, 4096  ;;  %s21342_s2 = smov [#allocation12]  }
  0xe0   : > { %p21179_p9 = scmp.ne.s32.totalorder %s21743_s0, %s21178_s1  ;;  %s21183_s8 = sshll.u32 %s21342_s2, 4  ;;  %s21184_s8 = int_to_ptr.vmem [resolvable:$false] %s21183_s8 }
  0xe1   : > { %s21185_s3 = scalar_lea.vmem %s21184_s8, 8192  ;;  %p21186_p12 = scmp.lt.s32.totalorder %s21743_s0, %s21184_s8 }
  0xe2   : > { %p21181_p6 = pnand %p21179_p9, %p26063_p8  ;;  %p21187_p10 = scmp.lt.s32.totalorder %s21185_s3, %s21178_s1 }
  0xe4   : > { %p21182_p3 = pneg %p21181_p6  ;;  %p21188_p1 = por %p21187_p10, %p21186_p12 }
  0xe6   : > { %p21189_p7 = pnand %p21188_p1, %p21182_p3 }
  0xe8   : > { %21192 = shalt.err (!%p21189_p7)
}
  0xe9   : > { %20869 = dma.hbm_to_vmem [thread:$0]  (!%p26064_p4), %s21739_s16, 4096, %s21743_s0, %s503_s11, %s21337_s28, %s21337_s28, %s21338_s20  }
  0xea   : > { %p26069_p8 = scmp.ne.s32.totalorder %s26045_s29, 0 }
  0xec   : > { %531 = sbr.rel (%p26069_p8) target bundleno = 5714 (0x1652), region = 64 }
  0xf3   : > { %s26070_s23 = sld [smem:[#allocation30_spill]]  ;;  %s21775_s12 = sand.u32 1, %s21307_s21  }
  0xf4   : > { %s21778_s24 = sshll.u32 %s21775_s12, 3  ;;  %s534_s6 = scalar_lea.sflag [#allocation4], %s21775_s12 }
  0xf9   : > { %p26071_p11 = scmp.ne.s32.totalorder %s26070_s23, 0 }
  0xfb   : > { %21266 = dma.done.wait (%p26071_p11), %s534_s6, 128  }
  0xfc   : > { %21268 = vsyncadd (%p26071_p11), %s534_s6, 4294967168  ;;  %s26072_s15 = sld [smem:[#allocation29_spill]] }
 0x102   : > { %s542_s29 = sand.u32 1, %s26072_s15  }
 0x103   : > { %s543_s28 = scalar_lea.sflag [#allocation7], %s542_s29 }
 0x104   : > { %21270 = dma.done.wait (%p26071_p11), %s543_s28, 128  }
 0x105   : > { %21272 = vsyncadd (%p26071_p11), %s543_s28, 4294967168  ;;  %s26073_s16 = sld [smem:[#allocation21_spill]]  ;;  %s26074_s0 = sld [smem:[#allocation31_spill]] }
 0x10b   : > { %s553_s11 = sand.u32 1, %s26073_s16   ;;  %p26075_p4 = scmp.ne.s32.totalorder %s26074_s0, 0 }
 0x10c   : > { %s15540_s17 = sshll.u32 %s553_s11, 10 }
 0x10d   : > { %s21793_s10 = scalar_lea.vmem [#allocation8], %s15540_s17 }
 0x10e   : > { %21274 = dma.done.wait (%p26075_p4), %s543_s28, 16384  }
 0x10f   : > { %21276 = vsyncadd (%p26075_p4), %s543_s28, 4294950912  ;;  %s15541_s18 = sshll.u32 %s553_s11, 3  ;;  %s561_s13 = scalar_lea.sflag [#allocation10], %s542_s29 }
 0x110   : > { %s21799_s1 = scalar_lea.vmem [#allocation9], %s15541_s18 }
 0x111   : > { %21278 = dma.done.wait (%p26075_p4), %s561_s13, 4224  }
 0x112   : > { %21280 = vsyncadd (%p26075_p4), %s561_s13, 4294963072  ;;  %s15542_s2 = sshll.u32 %s553_s11, 8  ;;  %s579_s3 = scalar_lea.sflag [#allocation13], %s553_s11 }
 0x113   : > { %s21805_s8 = scalar_lea.vmem [#allocation11], %s15542_s2  ;;  %s21807_s23 = scalar_lea.vmem [#allocation12], %s15542_s2 }
 0x114   : > { %21282 = dma.done.wait (%p26075_p4), %s579_s3, 4096  }
 0x115   : > { %21284 = vsyncadd (%p26075_p4), %s579_s3, 4294963200  ;;  %s26076_s6 = sld [smem:[#allocation26_spill]]  ;;  %s26077_s15 = sld [smem:[#allocation25_spill]] }
 0x116   : > { %s26078_s17 = sld [smem:[#allocation78_spill]]  ;;  %s26079_s2 = sld [smem:[#allocation80_spill]] }
 0x117   : > { %s26080_s7 = sld [smem:[#allocation84_spill]]  ;;  %s26081_s14 = sld [smem:[#allocation86_spill]] }
 0x118   : > { %s26082_s11 = sld [smem:[#allocation88_spill]]  ;;  %s664_s21 = scalar_lea.vmem [#allocation14], %s21778_s24 }
 0x11b   : > { %p665_p0 = scmp.lt.s32.totalorder %s26076_s6, 1  ;;  %p673_p13 = scmp.lt.s32.totalorder %s26077_s15, 1 }
 0x11c   : > { %p15549_p2 = scmp.ne.s32.totalorder %s26077_s15, 0 }
 0x11d   : > { %s26416_s6 = smov (!%p665_p0, %s26076_s6), 1 }
 0x11e   : > { %s21817_s29 = scalar_select %p673_p13, %s26077_s15, 1 }
 0x11f   : > { %s15545_s28 = sshll.u32 %s26416_s6, 3  ;;  %687 = sbr.rel (%p15549_p2) target bundleno = 294 (0x126), region = 92 }
 0x120   : > { %s668_s18 = scalar_lea.vmem %s26078_s17, %s15545_s28  ;;  %s21825_s3 = scalar_lea.vmem %s26079_s2, %s15545_s28 }
 0x121   : > { %s15547_s20 = sshll.u32 %s21817_s29, 3  ;;  %s15548_s30 = sshll.u32 %s21817_s29, 1  ;;  %v688_v0 = vld [vmem:[%s668_s18] sm:$0xff] (!%p15549_p2) }
 0x122   : > { %s21832_s9 = scalar_lea.vmem %s26080_s7, %s15547_s20  ;;  %s21837_s6 = scalar_lea.vmem %s26081_s14, %s15548_s30  ;;  %689 = vst [vmem:[#allocation2] sm:$0xff] (!%p15549_p2), %v688_v0 }
 0x123   : > { %s683_s17 = scalar_lea.vmem %s26082_s11, %s21817_s29 }
 0x126 PF: > { %v718_v2 = vld [vmem:[%s21793_s10] sm:$0xff]  ;;  %v719_v3 = vld [vmem:[%s21793_s10 + $0x8] sm:$0xff]  ;;  %v25772_v5 = vmov 0.0|0.0   ;;  %v21872_v21 = vld [vmem:[%s21793_s10 + $0x10] sm:$0xff]  ;;  %vm21344_vm0 = vmmov 0   ;;  %vm2749_vm1 = vcmask 261120  }
 0x127   : > { %v15552_v4 = vld [vmem:[%s21793_s10 + $0x80] sm:$0xff]  ;;  %19063 = vmatprep.subr.bf16.mxu0 %v25772_v5  ;;  %19207 = vmatprep.subr.bf16.mxu1 %v25772_v5  ;;  %v794_v6 = vand.u32 4294901760, %v718_v2  ;;  %v797_v7 = vand.u32 4294901760, %v719_v3  ;;  %v15553_v8 = vld [vmem:[%s21793_s10 + $0x88] sm:$0xff]  ;;  %v21875_v22 = vld [vmem:[%s21793_s10 + $0x18] sm:$0xff]  ;;  %v800_v24 = vand.u32 4294901760, %v21872_v21 }
 0x128   : > { %v1440_v9 = vand.u32 4294901760, %v15552_v4  ;;  %v1443_v10 = vand.u32 4294901760, %v15553_v8  ;;  %v21878_v23 = vld [vmem:[%s21793_s10 + $0x90] sm:$0xff]  ;;  %v803_v25 = vand.u32 4294901760, %v21875_v22  ;;  %v21883_v26 = vld [vmem:[%s21793_s10 + $0x98] sm:$0xff]  ;;  %v21900_v31 = vld [vmem:[%s21793_s10 + $0x20] sm:$0xff] }
 0x129   : > { %v690_v1 = vld [vmem:[#allocation2] sm:$0xff]  ;;  %v21851_v11 = vpack.c.bf16 %v797_v7, %v794_v6  ;;  %v21853_v12 = vsub.f32 %v718_v2, %v794_v6  ;;  %v21855_v13 = vsub.f32 %v719_v3, %v797_v7  ;;  %v1446_v27 = vand.u32 4294901760, %v21878_v23  ;;  %v21903_v32 = vld [vmem:[%s21793_s10 + $0x28] sm:$0xff]  ;;  %v21906_v33 = vld [vmem:[%s21793_s10 + $0xa0] sm:$0xff]  ;;  %s21346_s4 = smov 64   ;;  %s21347_s5 = smov 96  }
 0x12a   : > { %696 = vadd.xlane.f32.xlu0 %v690_v1  ;;  %v21857_v14 = vsub.f32 %v15552_v4, %v1440_v9  ;;  %v21859_v15 = vpack.c.bf16 %v1443_v10, %v1440_v9  ;;  %v21861_v16 = vsub.f32 %v15553_v8, %v1443_v10  ;;  %v25771_v28 = vand.u32 4294901760, %v21883_v26  ;;  %v21912_v36 = vld [vmem:[%s21793_s10 + $0xa8] sm:$0xff]  ;;  %v724_v41 = vld [vmem:[%s21793_s10 + $0x30] sm:$0xff]  ;;  %v725_v42 = vld [vmem:[%s21793_s10 + $0x38] sm:$0xff]  ;;  %s21348_s7 = smov 32   ;;  %s26169_s22 = scalar_lea.vmem [#allocation3], %s21778_s24 }
 0x12b   : > { %26083 = vst [vmem:[#allocation38_spill] sm:$0xff] %v21851_v11  ;;  %19065 = vmatpush3.bf16.msra.mxu0 %v21851_v11  ;;  %v21891_v29 = vpack.c.bf16 %v803_v25, %v800_v24  ;;  %v25770_v34 = vand.u32 4294901760, %v21900_v31  ;;  %v25769_v35 = vand.u32 4294901760, %v21903_v32  ;;  %v25768_v37 = vand.u32 4294901760, %v21906_v33  ;;  %v15558_v43 = vld [vmem:[%s21793_s10 + $0xb0] sm:$0xff]  ;;  %v15559_v46 = vld [vmem:[%s21793_s10 + $0xb8] sm:$0xff] }
 0x12c   : > { %26084 = vst [vmem:[#allocation39_spill] sm:$0xff] %v21859_v15  ;;  %19209 = vmatpush3.bf16.msra.mxu1 %v21859_v15  ;;  %19066 = vmatprep.subr.bf16.mxu0 %v25772_v5  ;;  %v21897_v30 = vpack.c.bf16 %v25771_v28, %v1446_v27  ;;  %v25767_v38 = vand.u32 4294901760, %v21912_v36  ;;  %v812_v44 = vand.u32 4294901760, %v724_v41  ;;  %v815_v45 = vand.u32 4294901760, %v725_v42  ;;  %v726_v51 = vld [vmem:[%s21793_s10 + $0x40] sm:$0xff]  ;;  %v727_v52 = vld [vmem:[%s21793_s10 + $0x48] sm:$0xff] }
 0x12d   : > { %19210 = vmatprep.subr.bf16.mxu1 %v25772_v5  ;;  %26085 = vst [vmem:[#allocation40_spill] sm:$0xff] %v21891_v29  ;;  %v21923_v39 = vpack.c.bf16 %v25769_v35, %v25770_v34  ;;  %v1458_v47 = vand.u32 4294901760, %v15558_v43  ;;  %v1461_v48 = vand.u32 4294901760, %v15559_v46  ;;  %v15560_v53 = vld [vmem:[%s21793_s10 + $0xc0] sm:$0xff]  ;;  %v818_v54 = vand.u32 4294901760, %v726_v51  ;;  %v15561_v56 = vld [vmem:[%s21793_s10 + $0xc8] sm:$0xff] }
 0x12e   : > { %26086 = vst [vmem:[#allocation41_spill] sm:$0xff] %v21897_v30  ;;  %v21929_v40 = vpack.c.bf16 %v25767_v38, %v25768_v37  ;;  %v21939_v49 = vpack.c.bf16 %v815_v45, %v812_v44  ;;  %v821_v55 = vand.u32 4294901760, %v727_v52  ;;  %v1464_v57 = vand.u32 4294901760, %v15560_v53  ;;  %v728_v61 = vld [vmem:[%s21793_s10 + $0x50] sm:$0xff]  ;;  %v729_v62 = vld [vmem:[%s21793_s10 + $0x58] sm:$0xff]  ;;  %v730_v8 = vld [vmem:[%s21793_s10 + $0x60] sm:$0xff] }
 0x12f   : > { %19068 = vmatpush3.bf16.msra.mxu0 %v21891_v29  ;;  %26087 = vst [vmem:[#allocation42_spill] sm:$0xff] %v21923_v39  ;;  %v21941_v50 = vpack.c.bf16 %v1461_v48, %v1458_v47  ;;  %v1467_v58 = vand.u32 4294901760, %v15561_v56  ;;  %v15562_v63 = vld [vmem:[%s21793_s10 + $0xd0] sm:$0xff]  ;;  %v824_v0 = vand.u32 4294901760, %v728_v61  ;;  %v15563_v2 = vld [vmem:[%s21793_s10 + $0xd8] sm:$0xff]  ;;  %v731_v9 = vld [vmem:[%s21793_s10 + $0x68] sm:$0xff]  ;;  %v21977_v35 = vsub.f32 %v21872_v21, %v800_v24 }
 0x130   : > { %19212 = vmatpush3.bf16.msra.mxu1 %v21897_v30  ;;  %19069 = vmatprep.subr.bf16.mxu0 %v25772_v5  ;;  %26088 = vst [vmem:[#allocation43_spill] sm:$0xff] %v21929_v40  ;;  %26089 = vst [vmem:[#allocation44_spill] sm:$0xff] %v21939_v49  ;;  %v21951_v59 = vpack.c.bf16 %v821_v55, %v818_v54  ;;  %v1470_v3 = vand.u32 4294901760, %v15562_v63  ;;  %v1473_v4 = vand.u32 4294901760, %v15563_v2  ;;  %v15564_v10 = vld [vmem:[%s21793_s10 + $0xe0] sm:$0xff]  ;;  %v26097_v21 = vand.u32 4294901760, %v21900_v31 }
 0x131   : > { %19213 = vmatprep.subr.bf16.mxu1 %v25772_v5  ;;  %26090 = vst [vmem:[#allocation45_spill] sm:$0xff] %v21941_v50  ;;  %v21953_v60 = vpack.c.bf16 %v1467_v58, %v1464_v57  ;;  %v1476_v38 = vand.u32 4294901760, %v15564_v10  ;;  %v21982_v34 = vsub.f32 %v21875_v22, %v803_v25  ;;  %v21987_v28 = vsub.f32 %v21878_v23, %v1446_v27  ;;  %s26187_s25 = scalar_lea.vmem [#allocation6], %s21778_s24  ;;  %s26388_s30 = sld [smem:[#allocation25_spill]] }
 0x132   : > { %26091 = vst [vmem:[#allocation46_spill] sm:$0xff] %v21951_v59  ;;  %v21965_v7 = vpack.c.bf16 %v1473_v4, %v1470_v3  ;;  %v21998_v24 = vsub.f32 %v21900_v31, %v26097_v21  ;;  %v26098_v22 = vand.u32 4294901760, %v21903_v32  ;;  %v26099_v23 = vand.u32 4294901760, %v21906_v33 }
 0x133   : > { %19071 = vmatpush3.bf16.msra.mxu0 %v21923_v39  ;;  %26092 = vst [vmem:[#allocation47_spill] sm:$0xff] %v21953_v60  ;;  %v22017_v31 = vsub.f32 %v725_v42, %v815_v45  ;;  %v22019_v21 = vsub.f32 %v15558_v43, %v1458_v47  ;;  %v22037_v42 = vsub.f32 %v15562_v63, %v1470_v3  ;;  %v15567_v45 = vld [vmem:[%s21793_s10 + $0xf8] sm:$0xff]  ;;  %v25784_v3 = vand.u32 4294901760, %v21857_v14 }
 0x134   : > { %19215 = vmatpush3.bf16.msra.mxu1 %v21929_v40  ;;  %19072 = vmatprep.subr.bf16.mxu0 %v25772_v5  ;;  %26094 = vst [vmem:[#allocation49_spill] sm:$0xff] %v21965_v7  ;;  %v22003_v25 = vsub.f32 %v21903_v32, %v26098_v22  ;;  %v22008_v27 = vsub.f32 %v21906_v33, %v26099_v23  ;;  %vm4557_vm3 = vcmask 64512   ;;  %vm6411_vm4 = vcmask 523264  }
 0x135   : > { %19216 = vmatprep.subr.bf16.mxu1 %v25772_v5  ;;  %v22021_v32 = vsub.f32 %v15559_v46, %v1461_v48  ;;  %v22023_v22 = vsub.f32 %v726_v51, %v818_v54  ;;  %v22027_v33 = vsub.f32 %v15560_v53, %v1464_v57  ;;  %v22029_v23 = vsub.f32 %v15561_v56, %v1467_v58 }
 0x136   : > { %v22039_v43 = vsub.f32 %v15563_v2, %v1473_v4  ;;  %v1485_v57 = vand.u32 4294901760, %v15567_v45  ;;  %v25785_v4 = vand.u32 4294901760, %v21861_v16  ;;  %vm6413_vm5 = vcmask 785408  }
 0x137   : > { %19074 = vmatpush3.bf16.msra.mxu0 %v21939_v49  ;;  %p15677_p5 = scmp.ne.s32.totalorder %s26388_s30, 1 }
 0x138   : > { %19218 = vmatpush3.bf16.msra.mxu1 %v21941_v50  ;;  %19075 = vmatprep.subr.bf16.mxu0 %v25772_v5  ;;  %v732_v50 = vld [vmem:[%s21793_s10 + $0x70] sm:$0xff] }
 0x139   : > { %19219 = vmatprep.subr.bf16.mxu1 %v25772_v5  ;;  %v836_v54 = vand.u32 4294901760, %v732_v50 }
 0x13b   : > { %19077 = vmatpush3.bf16.msra.mxu0 %v21951_v59  ;;  %v22025_v59 = vsub.f32 %v727_v52, %v821_v55  ;;  %v22051_v52 = vsub.f32 %v15564_v10, %v1476_v38  ;;  %v25794_v10 = vand.u32 4294901760, %v21982_v34 }
 0x13c   : > { %19221 = vmatpush3.bf16.msra.mxu1 %v21953_v60  ;;  %19078 = vmatprep.subr.bf16.mxu0 %v25772_v5  ;;  %v22015_v60 = vsub.f32 %v724_v41, %v812_v44  ;;  %v15566_v44 = vld [vmem:[%s21793_s10 + $0xf0] sm:$0xff] }
 0x13d   : > { %19222 = vmatprep.subr.bf16.mxu1 %v25772_v5  ;;  %v1482_v56 = vand.u32 4294901760, %v15566_v44 }
 0x13f   : > { %v22068_v63 = vsub.f32 %v15566_v44, %v1482_v56  ;;  %v1541_v44 = vsub.f32 %v21861_v16, %v25785_v4 }
 0x140   : > { %19224 = vmatpush3.bf16.msra.mxu1 %v21965_v7 }
 0x1b7   : > { %v697_v17 = vpop.xlane.xlu0 %696 }
 0x1b8   : > { %v699_v18 = vmul.f32 0.0078125, %v697_v17  ;;  %v15565_v17 = vld [vmem:[%s21793_s10 + $0xe8] sm:$0xff] }
 0x1b9   : > { %v1479_v37 = vand.u32 4294901760, %v15565_v17 }
 0x1ba   : > { %v21867_v19 = vsub.f32 %v690_v1, %v699_v18  ;;  %v827_v1 = vand.u32 4294901760, %v729_v62  ;;  %v830_v18 = vand.u32 4294901760, %v730_v8 }
 0x1bb   : > { %v22049_v51 = vpack.c.bf16 %v1479_v37, %v1476_v38  ;;  %v22053_v53 = vsub.f32 %v15565_v17, %v1479_v37  ;;  %v25787_v37 = vand.u32 4294901760, %v21853_v12  ;;  %v25793_v17 = vand.u32 4294901760, %v21987_v28 }
 0x1bc   : > { %v701_v20 = vmul.f32 %v21867_v19, %v21867_v19  ;;  %v21963_v6 = vpack.c.bf16 %v827_v1, %v824_v0  ;;  %v22035_v41 = vsub.f32 %v729_v62, %v827_v1  ;;  %v22045_v47 = vsub.f32 %v730_v8, %v830_v18 }
 0x1bd   : > { %26102 = vst [vmem:[#allocation51_spill] sm:$0xff] %v22049_v51  ;;  %v22066_v62 = vpack.c.bf16 %v1485_v57, %v1482_v56  ;;  %v25789_v1 = vmov 0.0   ;;  %v888_v2 = vsub.f32 %v21853_v12, %v25787_v37  ;;  %v25788_v8 = vand.u32 4294901760, %v21977_v35 }
 0x1be   : > { %702 = vadd.xlane.f32.xlu0 %v701_v20  ;;  %26093 = vst [vmem:[#allocation48_spill] sm:$0xff] %v21963_v6  ;;  %19080 = vmatpush3.bf16.msra.mxu0 %v21963_v6  ;;  %v833_v20 = vand.u32 4294901760, %v731_v9  ;;  %v26096_v6 = vmov 0.0|0.0   ;;  %v1548_v56 = vsub.f32 %v21987_v28, %v25793_v17 }
 0x1bf   : > { %19081 = vmatprep.subr.bf16.mxu0 %v25772_v5  ;;  %v26095_v5 = vand.u32 4294901760, %v21883_v26  ;;  %19225 = vmatprep.subr.bf16.mxu1 %v26096_v6  ;;  %26104 = vst [vmem:[#allocation53_spill] sm:$0xff] %v22066_v62 }
 0x1c0   : > { %v22043_v46 = vpack.c.bf16 %v833_v20, %v830_v18  ;;  %v22047_v48 = vsub.f32 %v731_v9, %v833_v20  ;;  %19227 = vmatpush3.bf16.msra.mxu1 %v22049_v51  ;;  %16935 = vmatprep.mubr.msk.f32.mxu0 %vm21344_vm0, %v25789_v1  ;;  %v889_v20 = vand.u32 4294901760, %v888_v2 }
 0x1c1   : > { %v21992_v7 = vsub.f32 %v21883_v26, %v26095_v5  ;;  %v26100_v5 = vand.u32 4294901760, %v21912_v36  ;;  %19228 = vmatprep.subr.bf16.mxu1 %v26096_v6  ;;  %17145 = vmatprep.mubr.msk.f32.mxu1 %vm21344_vm0, %v25789_v1 }
 0x1c2   : > { %26101 = vst [vmem:[#allocation50_spill] sm:$0xff] %v22043_v46  ;;  %19083 = vmatpush3.bf16.msra.mxu0 %v22043_v46  ;;  %v25812_v46 = vand.u32 4294901760, %v22027_v33 }
 0x1c3   : > { %v22013_v26 = vsub.f32 %v21912_v36, %v26100_v5  ;;  %v733_v36 = vld [vmem:[%s21793_s10 + $0x78] sm:$0xff]  ;;  %v22033_v5 = vsub.f32 %v728_v61, %v824_v0  ;;  %19084 = vmatprep.subr.bf16.mxu0 %v26096_v6  ;;  %v22061_v61 = vsub.f32 %v732_v50, %v836_v54  ;;  %v22070_v0 = vsub.f32 %v15567_v45, %v1485_v57 }
 0x1c4   : > { %v839_v55 = vand.u32 4294901760, %v733_v36  ;;  %v25786_v50 = vand.u32 4294901760, %v21855_v13  ;;  %19230 = vmatpush3.bf16.msra.mxu1 %v22066_v62  ;;  %v25795_v18 = vand.u32 4294901760, %v21992_v7  ;;  %v902_v45 = vsub.f32 %v21977_v35, %v25788_v8 }
 0x1c5   : > { %19231 = vmatprep.subr.bf16.mxu1 %v26096_v6  ;;  %v1549_v8 = vand.u32 4294901760, %v1548_v56  ;;  %v25803_v56 = vand.u32 4294901760, %v22017_v31 }
 0x1c6   : > { %v22059_v58 = vpack.c.bf16 %v839_v55, %v836_v54  ;;  %v22063_v38 = vsub.f32 %v733_v36, %v839_v55  ;;  %v895_v9 = vsub.f32 %v21855_v13, %v25786_v50  ;;  %v1534_v36 = vsub.f32 %v21857_v14, %v25784_v3 }
 0x1c7   : > { %v909_v55 = vsub.f32 %v21982_v34, %v25794_v10  ;;  %v1555_v57 = vsub.f32 %v21992_v7, %v25795_v18  ;;  %v1542_v3 = vand.u32 4294901760, %v1541_v44  ;;  %v903_v4 = vand.u32 4294901760, %v902_v45 }
 0x1c8   : > { %26103 = vst [vmem:[#allocation52_spill] sm:$0xff] %v22059_v58  ;;  %19086 = vmatpush3.bf16.msra.mxu0 %v22059_v58  ;;  %v896_v54 = vand.u32 4294901760, %v895_v9  ;;  %v1535_v2 = vand.u32 4294901760, %v1534_v36  ;;  %v25798_v50 = vand.u32 4294901760, %v21998_v24  ;;  %v25797_v10 = vand.u32 4294901760, %v22003_v25 }
 0x1c9   : > { %19087 = vmatprep.subr.bf16.mxu0 %v26096_v6  ;;  %v910_v9 = vand.u32 4294901760, %v909_v55  ;;  %v1556_v1 = vand.u32 4294901760, %v1555_v57  ;;  %v25796_v18 = vand.u32 4294901760, %v22008_v27  ;;  %v25800_v45 = vand.u32 4294901760, %v22015_v60 }
 0x1ca   : > { %v22112_v37 = vpack.c.bf16 %v896_v54, %v889_v20  ;;  %v22114_v62 = vpack.c.bf16 %v1542_v3, %v1535_v2  ;;  %v916_v17 = vsub.f32 %v21998_v24, %v25798_v50  ;;  %v25799_v20 = vand.u32 4294901760, %v22013_v26 }
 0x1cb   : > { %v22121_v36 = vpack.c.bf16 %v910_v9, %v903_v4  ;;  %v22123_v44 = vpack.c.bf16 %v1556_v1, %v1549_v8  ;;  %v923_v3 = vsub.f32 %v22003_v25, %v25797_v10  ;;  %v1562_v55 = vsub.f32 %v22008_v27, %v25796_v18 }
 0x1cc   : > { %v917_v54 = vand.u32 4294901760, %v916_v17  ;;  %v1569_v1 = vsub.f32 %v22013_v26, %v25799_v20  ;;  %v930_v4 = vsub.f32 %v22015_v60, %v25800_v45  ;;  %v25808_v8 = vand.u32 4294901760, %v22019_v21 }
 0x1cd   : > { %v25815_v17 = vand.u32 4294901760, %v22021_v32  ;;  %v924_v57 = vand.u32 4294901760, %v923_v3  ;;  %v1563_v2 = vand.u32 4294901760, %v1562_v55  ;;  %v937_v9 = vsub.f32 %v22017_v31, %v25803_v56 }
 0x1ce   : > { %v25813_v18 = vand.u32 4294901760, %v22023_v22  ;;  %v1570_v10 = vand.u32 4294901760, %v1569_v1  ;;  %v931_v50 = vand.u32 4294901760, %v930_v4  ;;  %v1576_v20 = vsub.f32 %v22019_v21, %v25808_v8 }
 0x1cf   : > { %v1583_v45 = vsub.f32 %v22021_v32, %v25815_v17  ;;  %v22152_v58 = vpack.c.bf16 %v924_v57, %v917_v54  ;;  %v938_v3 = vand.u32 4294901760, %v937_v9  ;;  %v25811_v56 = vand.u32 4294901760, %v22025_v59 }
 0x1d0   : > { %v944_v55 = vsub.f32 %v22023_v22, %v25813_v18  ;;  %v22158_v51 = vpack.c.bf16 %v1570_v10, %v1563_v2  ;;  %v1577_v1 = vand.u32 4294901760, %v1576_v20  ;;  %v25814_v57 = vand.u32 4294901760, %v22029_v23 }
 0x1d1   : > { %v1584_v4 = vand.u32 4294901760, %v1583_v45  ;;  %v22161_v8 = vpack.c.bf16 %v938_v3, %v931_v50  ;;  %v951_v54 = vsub.f32 %v22025_v59, %v25811_v56  ;;  %v1590_v10 = vsub.f32 %v22027_v33, %v25812_v46 }
 0x1d2   : > { %v945_v49 = vand.u32 4294901760, %v944_v55  ;;  %v25818_v20 = vand.u32 4294901760, %v22033_v5  ;;  %v25819_v45 = vand.u32 4294901760, %v22035_v41  ;;  %v1597_v50 = vsub.f32 %v22029_v23, %v25814_v57 }
 0x1d3   : > { %v22167_v9 = vpack.c.bf16 %v1584_v4, %v1577_v1  ;;  %v952_v2 = vand.u32 4294901760, %v951_v54  ;;  %v25824_v3 = vand.u32 4294901760, %v22037_v42  ;;  %v25825_v55 = vand.u32 4294901760, %v22039_v43 }
 0x1d4   : > { %v1591_v56 = vand.u32 4294901760, %v1590_v10  ;;  %v958_v1 = vsub.f32 %v22033_v5, %v25818_v20  ;;  %v965_v4 = vsub.f32 %v22035_v41, %v25819_v45  ;;  %v25829_v46 = vand.u32 4294901760, %v22045_v47 }
 0x1d5   : > { %v22186_v54 = vpack.c.bf16 %v952_v2, %v945_v49  ;;  %v1598_v18 = vand.u32 4294901760, %v1597_v50  ;;  %v1604_v57 = vsub.f32 %v22037_v42, %v25824_v3  ;;  %v1611_v10 = vsub.f32 %v22039_v43, %v25825_v55 }
 0x1d6   : > { %v959_v17 = vand.u32 4294901760, %v958_v1  ;;  %v966_v40 = vand.u32 4294901760, %v965_v4  ;;  %v972_v20 = vsub.f32 %v22045_v47, %v25829_v46  ;;  %v25826_v45 = vand.u32 4294901760, %v22047_v48 }
 0x1d7   : > { %v22198_v39 = vpack.c.bf16 %v1598_v18, %v1591_v56  ;;  %v1605_v49 = vand.u32 4294901760, %v1604_v57  ;;  %v1612_v2 = vand.u32 4294901760, %v1611_v10  ;;  %v25827_v50 = vand.u32 4294901760, %v22051_v52 }
 0x1d8   : > { %v22201_v30 = vpack.c.bf16 %v966_v40, %v959_v17  ;;  %v973_v3 = vand.u32 4294901760, %v972_v20  ;;  %v979_v1 = vsub.f32 %v22047_v48, %v25826_v45  ;;  %v25828_v4 = vand.u32 4294901760, %v22053_v53 }
 0x1d9   : > { %v22207_v55 = vpack.c.bf16 %v1612_v2, %v1605_v49  ;;  %v1618_v18 = vsub.f32 %v22051_v52, %v25827_v50  ;;  %v25834_v56 = vand.u32 4294901760, %v22061_v61  ;;  %v25837_v57 = vand.u32 4294901760, %v22063_v38 }
 0x1da   : > { %v980_v10 = vand.u32 4294901760, %v979_v1  ;;  %v1625_v40 = vsub.f32 %v22053_v53, %v25828_v4  ;;  %v25839_v17 = vand.u32 4294901760, %v22068_v63  ;;  %v25838_v20 = vand.u32 4294901760, %v22070_v0 }
 0x1db   : > { %26105 = vst [vmem:[#allocation54_spill] sm:$0xff] %v22207_v55  ;;  %v1619_v45 = vand.u32 4294901760, %v1618_v18  ;;  %v986_v49 = vsub.f32 %v22061_v61, %v25834_v56  ;;  %v993_v2 = vsub.f32 %v22063_v38, %v25837_v57 }
 0x1dc   : > { %v22225_v50 = vpack.c.bf16 %v980_v10, %v973_v3  ;;  %v1626_v1 = vand.u32 4294901760, %v1625_v40  ;;  %v1632_v4 = vsub.f32 %v22068_v63, %v25839_v17  ;;  %v1639_v46 = vsub.f32 %v22070_v0, %v25838_v20 }
 0x1dd   : > { %v987_v18 = vand.u32 4294901760, %v986_v49  ;;  %v994_v29 = vand.u32 4294901760, %v993_v2  ;;  %v19112_v3 = vpack.c.bf16 %v21855_v13, %v21853_v12  ;;  %v19256_v10 = vpack.c.bf16 %v21861_v16, %v21857_v14 }
 0x1de   : > { %v22233_v15 = vpack.c.bf16 %v1626_v1, %v1619_v45  ;;  %v1633_v56 = vand.u32 4294901760, %v1632_v4  ;;  %v1640_v11 = vand.u32 4294901760, %v1639_v46  ;;  %v19277_v4 = vpack.c.bf16 %v22070_v0, %v22068_v63  ;;  %v15551_v45 = vld [vmem:[%s21832_s9 + $0x3] ss:$0 sm:$0xff] }
 0x1df   : > { %v22235_v55 = vpack.c.bf16 %v994_v29, %v987_v18  ;;  %v15550_v29 = vld [vmem:[%s21832_s9] ss:$0 sm:$0xff] }
 0x1e0   : > { %v22237_v57 = vpack.c.bf16 %v1640_v11, %v1633_v56 }
 0x24b   : > { %v703_v46 = vpop.xlane.xlu0 %702 }
 0x24c   : > { %v704_v56 = vmul.f32 0.0078125, %v703_v46 }
 0x24e   : > { %v705_v11 = vadd.f32 1e-05, %v704_v56 }
 0x250   : > { %20974 = vrsqrt.f32 %v705_v11  ;;  %v26127_v11 = vld [vmem:[#allocation44_spill] sm:$0xff] }
 0x25a   : > { %v20975_v2 = vpop.eup %20974 }
 0x25b   : > { %v707_v1 = vmul.f32 %v20975_v2, %v21867_v19  ;;  %v26106_v19 = vmov 0.0   ;;  %v26129_v2 = vld [vmem:[#allocation46_spill] sm:$0xff] }
 0x25d   : > { %v712_v49 = vmul.f32 %v15550_v29, %v707_v1  ;;  %v26126_v29 = vld [vmem:[#allocation43_spill] sm:$0xff] }
 0x25e   : > { %v26130_v1 = vld [vmem:[#allocation47_spill] sm:$0xff] }
 0x25f   : > { %v717_v18 = vadd.f32 %v15551_v45, %v712_v49  ;;  %v26124_v49 = vld [vmem:[#allocation41_spill] sm:$0xff]  ;;  %v26125_v45 = vld [vmem:[#allocation42_spill] sm:$0xff] }
 0x261   : > { %v22274_v40 = vand.u32 4294901760, %v717_v18 }
 0x263   : > { %v22277_v20 = vsub.f32 %v717_v18, %v22274_v40  ;;  %v26131_v18 = vld [vmem:[#allocation48_spill] sm:$0xff] }
 0x265   : > { %v22280_v17 = vand.u32 4294901760, %v22277_v20 }
 0x267   : > { %v877_v46 = vsub.f32 %v22277_v20, %v22280_v17 }
 0x269   : > { %v22284_v56 = vand.u32 4294901760, %v877_v46  ;;  %v26132_v46 = vld [vmem:[#allocation49_spill] sm:$0xff] }
 0x26b   : > { %16936 = vmatmul.mubr.f32.vlgmr.msra.gmra.mrb[0].mxu0 %v22284_v56  ;;  %17146 = vmatmul.mubr.f32.vlgmr.msra.gmra.mrb[0].mxu1 %v22284_v56 }
 0x26c   : > { %19089 = vmatpush3.bf16.msra.mxu0 %v22112_v37  ;;  %19233 = vmatpush3.bf16.msra.mxu1 %v22114_v62  ;;  %v26112_v37 = vpack.c.bf16 %v22017_v31, %v22015_v60  ;;  %v26113_v62 = vpack.c.bf16 %v22021_v32, %v22019_v21 }
 0x26d   : > { %19090 = vmatprep.subr.bf16.mxu0 %v26096_v6  ;;  %19234 = vmatprep.subr.bf16.mxu1 %v26096_v6 }
 0x26e   : > { %16970 = vmatprep.mubr.msk.f32.mxu0 %vm21344_vm0, %v26106_v19  ;;  %17180 = vmatprep.mubr.msk.f32.mxu1 %vm21344_vm0, %v26106_v19 }
 0x270   : > { %19092 = vmatpush3.bf16.msra.mxu0 %v22121_v36  ;;  %19236 = vmatpush3.bf16.msra.mxu1 %v22123_v44  ;;  %v26114_v36 = vpack.c.bf16 %v22025_v59, %v22023_v22  ;;  %v26115_v44 = vpack.c.bf16 %v22029_v23, %v22027_v33 }
 0x271   : > { %19093 = vmatprep.subr.bf16.mxu0 %v26096_v6  ;;  %19237 = vmatprep.subr.bf16.mxu1 %v26096_v6 }
 0x274   : > { %19095 = vmatpush3.bf16.msra.mxu0 %v22152_v58  ;;  %19239 = vmatpush3.bf16.msra.mxu1 %v22158_v51  ;;  %v26107_v51 = vld [vmem:[#allocation54_spill] sm:$0xff]  ;;  %v26111_v58 = vpack.c.bf16 %v22013_v26, %v22008_v27 }
 0x275   : > { %19096 = vmatprep.subr.bf16.mxu0 %v26096_v6  ;;  %19240 = vmatprep.subr.bf16.mxu1 %v26096_v6 }
 0x278   : > { %19098 = vmatpush3.bf16.msra.mxu0 %v22161_v8  ;;  %19242 = vmatpush3.bf16.msra.mxu1 %v22167_v9  ;;  %v26116_v8 = vpack.c.bf16 %v22035_v41, %v22033_v5  ;;  %v26117_v9 = vpack.c.bf16 %v22039_v43, %v22037_v42 }
 0x279   : > { %19099 = vmatprep.subr.bf16.mxu0 %v26096_v6  ;;  %19243 = vmatprep.subr.bf16.mxu1 %v26096_v6 }
 0x27c   : > { %19101 = vmatpush3.bf16.msra.mxu0 %v22186_v54  ;;  %19245 = vmatpush3.bf16.msra.mxu1 %v22198_v39  ;;  %v26110_v39 = vpack.c.bf16 %v22003_v25, %v21998_v24  ;;  %v26119_v54 = vpack.c.bf16 %v22053_v53, %v22051_v52 }
 0x27d   : > { %19102 = vmatprep.subr.bf16.mxu0 %v26096_v6  ;;  %19246 = vmatprep.subr.bf16.mxu1 %v26096_v6 }
 0x280   : > { %19104 = vmatpush3.bf16.msra.mxu0 %v22201_v30  ;;  %19248 = vmatpush3.bf16.msra.mxu1 %v26107_v51  ;;  %v26109_v30 = vpack.c.bf16 %v21992_v7, %v21987_v28  ;;  %v26133_v51 = vld [vmem:[#allocation50_spill] sm:$0xff] }
 0x281   : > { %19105 = vmatprep.subr.bf16.mxu0 %v26096_v6  ;;  %19249 = vmatprep.subr.bf16.mxu1 %v26096_v6 }
 0x284   : > { %19107 = vmatpush3.bf16.msra.mxu0 %v22225_v50  ;;  %19251 = vmatpush3.bf16.msra.mxu1 %v22233_v15  ;;  %v26108_v15 = vpack.c.bf16 %v21982_v34, %v21977_v35  ;;  %v26120_v50 = vpack.c.bf16 %v22063_v38, %v22061_v61 }
 0x285   : > { %19108 = vmatprep.subr.bf16.mxu0 %v26096_v6  ;;  %19252 = vmatprep.subr.bf16.mxu1 %v26096_v6 }
 0x288   : > { %19110 = vmatpush3.bf16.msra.mxu0 %v22235_v55  ;;  %19254 = vmatpush3.bf16.msra.mxu1 %v22237_v57  ;;  %v26118_v55 = vpack.c.bf16 %v22047_v48, %v22045_v47  ;;  %v26121_v57 = vld [vmem:[#allocation38_spill] sm:$0xff] }
 0x289   : > { %19111 = vmatprep.subr.bf16.mxu0 %v26096_v6  ;;  %19255 = vmatprep.subr.bf16.mxu1 %v26096_v6 }
 0x28b   : > { %16971 = vmatmul.mubr.f32.vlgmr.msra.gmra.mrb[0].mxu0 %v22274_v40  ;;  %17181 = vmatmul.mubr.f32.vlgmr.msra.gmra.mrb[0].mxu1 %v22274_v40 }
 0x28c   : > { %19113 = vmatpush3.bf16.msra.mxu0 %v19112_v3  ;;  %19257 = vmatpush3.bf16.msra.mxu1 %v19256_v10  ;;  %v26122_v3 = vld [vmem:[#allocation39_spill] sm:$0xff]  ;;  %v26123_v10 = vld [vmem:[#allocation40_spill] sm:$0xff] }
 0x28d   : > { %19114 = vmatprep.subr.bf16.mxu0 %v26096_v6  ;;  %19258 = vmatprep.subr.bf16.mxu1 %v26096_v6 }
 0x28e   : > { %17005 = vmatprep.mubr.msk.f32.mxu0 %vm21344_vm0, %v26106_v19  ;;  %17215 = vmatprep.mubr.msk.f32.mxu1 %vm21344_vm0, %v26106_v19 }
 0x290   : > { %19116 = vmatpush3.bf16.msra.mxu0 %v26108_v15  ;;  %19260 = vmatpush3.bf16.msra.mxu1 %v26109_v30  ;;  %v26134_v15 = vld [vmem:[#allocation51_spill] sm:$0xff]  ;;  %v26135_v30 = vld [vmem:[#allocation52_spill] sm:$0xff] }
 0x291   : > { %19117 = vmatprep.subr.bf16.mxu0 %v26096_v6  ;;  %19261 = vmatprep.subr.bf16.mxu1 %v26096_v6 }
 0x294   : > { %19119 = vmatpush3.bf16.msra.mxu0 %v26110_v39  ;;  %19263 = vmatpush3.bf16.msra.mxu1 %v26111_v58  ;;  %v26136_v39 = vld [vmem:[#allocation53_spill] sm:$0xff]  ;;  %v26137_v58 = vand.u32 4294901760, %v21853_v12  ;;  %v26141_v12 = vand.u32 4294901760, %v21977_v35  ;;  %v26146_v35 = vand.u32 4294901760, %v22003_v25  ;;  %v26152_v25 = vand.u32 4294901760, %v22021_v32 }
 0x295   : > { %19120 = vmatprep.subr.bf16.mxu0 %v26096_v6  ;;  %19264 = vmatprep.subr.bf16.mxu1 %v26096_v6  ;;  %v26158_v32 = vand.u32 4294901760, %v22035_v41  ;;  %v26164_v41 = vand.u32 4294901760, %v22053_v53  ;;  %v15569_v53 = vld [vmem:[%s21793_s10 + $0x108] sm:$0xff] }
 0x298   : > { %19122 = vmatpush3.bf16.msra.mxu0 %v26112_v37  ;;  %19266 = vmatpush3.bf16.msra.mxu1 %v26113_v62  ;;  %v26138_v37 = vand.u32 4294901760, %v21855_v13  ;;  %v26142_v13 = vand.u32 4294901760, %v21982_v34  ;;  %v26145_v34 = vand.u32 4294901760, %v21998_v24  ;;  %v26151_v24 = vand.u32 4294901760, %v22019_v21 }
 0x299   : > { %19123 = vmatprep.subr.bf16.mxu0 %v26096_v6  ;;  %19267 = vmatprep.subr.bf16.mxu1 %v26096_v6  ;;  %v26157_v21 = vand.u32 4294901760, %v22033_v5  ;;  %v26163_v5 = vand.u32 4294901760, %v22051_v52  ;;  %v15568_v52 = vld [vmem:[%s21793_s10 + $0x100] sm:$0xff] }
 0x29a   : > { %v19160_v62 = vpack.c.bf16 %v26138_v37, %v26137_v58  ;;  %v26149_v58 = vand.u32 4294901760, %v22015_v60  ;;  %v26150_v37 = vand.u32 4294901760, %v22017_v31  ;;  %v26155_v60 = vand.u32 4294901760, %v22027_v33 }
 0x29b   : > { %v26156_v31 = vand.u32 4294901760, %v22029_v23  ;;  %v26161_v33 = vand.u32 4294901760, %v22045_v47  ;;  %v26162_v23 = vand.u32 4294901760, %v22047_v48  ;;  %v26167_v47 = vand.u32 4294901760, %v22068_v63  ;;  %v15570_v63 = vld [vmem:[%s21793_s10 + $0x110] sm:$0xff] }
 0x29c   : > { %19125 = vmatpush3.bf16.msra.mxu0 %v26114_v36  ;;  %19269 = vmatpush3.bf16.msra.mxu1 %v26115_v44  ;;  %v26139_v36 = vand.u32 4294901760, %v21857_v14  ;;  %v26140_v44 = vand.u32 4294901760, %v21861_v16  ;;  %v26143_v14 = vand.u32 4294901760, %v21987_v28  ;;  %v26144_v16 = vand.u32 4294901760, %v21992_v7 }
 0x29d   : > { %19126 = vmatprep.subr.bf16.mxu0 %v26096_v6  ;;  %19270 = vmatprep.subr.bf16.mxu1 %v26096_v6  ;;  %v19166_v28 = vpack.c.bf16 %v26146_v35, %v26145_v34  ;;  %v26147_v7 = vand.u32 4294901760, %v22008_v27  ;;  %v26153_v27 = vand.u32 4294901760, %v22023_v22  ;;  %v26159_v22 = vand.u32 4294901760, %v22037_v42 }
 0x29e   : > { %v26165_v42 = vand.u32 4294901760, %v22061_v61  ;;  %v26168_v48 = vand.u32 4294901760, %v22070_v0  ;;  %v2085_v61 = vand.u32 4294901760, %v15568_v52  ;;  %v15571_v0 = vld [vmem:[%s21793_s10 + $0x118] sm:$0xff] }
 0x2a0   : > { %19128 = vmatpush3.bf16.msra.mxu0 %v26116_v8  ;;  %19272 = vmatpush3.bf16.msra.mxu1 %v26117_v9  ;;  %v19304_v8 = vpack.c.bf16 %v26140_v44, %v26139_v36  ;;  %v19163_v9 = vpack.c.bf16 %v26142_v13, %v26141_v12  ;;  %v19313_v36 = vpack.c.bf16 %v26152_v25, %v26151_v24  ;;  %v15580_v24 = vld [vmem:[%s21793_s10 + $0x160] sm:$0xff]  ;;  %v22598_v25 = vld [vmem:[%s21793_s10 + $0x168] sm:$0xff] }
 0x2a1   : > { %19129 = vmatprep.subr.bf16.mxu0 %v26096_v6  ;;  %19273 = vmatprep.subr.bf16.mxu1 %v26096_v6  ;;  %v19175_v12 = vpack.c.bf16 %v26158_v32, %v26157_v21  ;;  %v15582_v21 = vld [vmem:[%s21793_s10 + $0x170] sm:$0xff]  ;;  %v22613_v32 = vld [vmem:[%s21793_s10 + $0x178] sm:$0xff] }
 0x2a4   : > { %19131 = vmatpush3.bf16.msra.mxu0 %v26118_v55  ;;  %19275 = vmatpush3.bf16.msra.mxu1 %v26119_v54  ;;  %v19307_v55 = vpack.c.bf16 %v26144_v16, %v26143_v14  ;;  %v26148_v54 = vand.u32 4294901760, %v22013_v26  ;;  %v26154_v26 = vand.u32 4294901760, %v22025_v59  ;;  %v26160_v59 = vand.u32 4294901760, %v22039_v43 }
 0x2a5   : > { %19132 = vmatprep.subr.bf16.mxu0 %v26096_v6  ;;  %19276 = vmatprep.subr.bf16.mxu1 %v26096_v6  ;;  %v19322_v14 = vpack.c.bf16 %v26164_v41, %v26163_v5  ;;  %v26166_v43 = vand.u32 4294901760, %v22063_v38  ;;  %v2088_v38 = vand.u32 4294901760, %v15569_v53  ;;  %v2127_v5 = vand.u32 4294901760, %v15582_v21 }
 0x2a6   : > { %v19172_v44 = vpack.c.bf16 %v26154_v26, %v26153_v27  ;;  %v19319_v13 = vpack.c.bf16 %v26160_v59, %v26159_v22  ;;  %v2130_v41 = vand.u32 4294901760, %v22613_v32 }
 0x2a7   : > { %v19181_v16 = vpack.c.bf16 %v26166_v43, %v26165_v42 }
 0x2a8   : > { %19134 = vmatpush3.bf16.msra.mxu0 %v26120_v50  ;;  %19278 = vmatpush3.bf16.msra.mxu1 %v19277_v4  ;;  %v26128_v4 = vld [vmem:[#allocation45_spill] sm:$0xff]  ;;  %v19310_v50 = vpack.c.bf16 %v26148_v54, %v26147_v7  ;;  %v22588_v54 = vsub.f32 %v15568_v52, %v2085_v61 }
 0x2a9   : > { %19135 = vmatprep.subr.bf16.mxu0 %v26096_v6  ;;  %19279 = vmatprep.subr.bf16.mxu1 %v26096_v6  ;;  %v15579_v7 = vld [vmem:[%s21793_s10 + $0x158] sm:$0xff] }
 0x2aa   : > { %v2178_v26 = vand.u32 4294901760, %v22588_v54 }
 0x2ab   : > { %17006 = vmatmul.mubr.f32.vlgmr.msra.gmra.mrb[0].mxu0 %v22277_v20  ;;  %17216 = vmatmul.mubr.f32.vlgmr.msra.gmra.mrb[0].mxu1 %v22277_v20 }
 0x2ac   : > { %19137 = vmatpush3.bf16.msra.mxu0 %v26121_v57  ;;  %19281 = vmatpush3.bf16.msra.mxu1 %v26122_v3  ;;  %v2179_v22 = vsub.f32 %v22588_v54, %v2178_v26 }
 0x2ad   : > { %19138 = vmatprep.subr.bf16.mxu0 %v26096_v6  ;;  %19282 = vmatprep.subr.bf16.mxu1 %v26096_v6 }
 0x2ae   : > { %17040 = vmatprep.mubr.msk.f32.mxu0 %vm21344_vm0, %v26106_v19  ;;  %17250 = vmatprep.mubr.msk.f32.mxu1 %vm21344_vm0, %v26106_v19  ;;  %v2180_v42 = vand.u32 4294901760, %v2179_v22 }
 0x2b0   : > { %19140 = vmatpush3.bf16.msra.mxu0 %v26123_v10  ;;  %19284 = vmatpush3.bf16.msra.mxu1 %v26124_v49 }
 0x2b1   : > { %19141 = vmatprep.subr.bf16.mxu0 %v26096_v6  ;;  %19285 = vmatprep.subr.bf16.mxu1 %v26096_v6 }
 0x2b4   : > { %19143 = vmatpush3.bf16.msra.mxu0 %v26125_v45  ;;  %19287 = vmatpush3.bf16.msra.mxu1 %v26126_v29 }
 0x2b5   : > { %19144 = vmatprep.subr.bf16.mxu0 %v26096_v6  ;;  %19288 = vmatprep.subr.bf16.mxu1 %v26096_v6 }
 0x2b8   : > { %19146 = vmatpush3.bf16.msra.mxu0 %v26127_v11  ;;  %19290 = vmatpush3.bf16.msra.mxu1 %v26128_v4 }
 0x2b9   : > { %19147 = vmatprep.subr.bf16.mxu0 %v26096_v6  ;;  %19291 = vmatprep.subr.bf16.mxu1 %v26096_v6 }
 0x2bc   : > { %19149 = vmatpush3.bf16.msra.mxu0 %v26129_v2  ;;  %19293 = vmatpush3.bf16.msra.mxu1 %v26130_v1 }
 0x2bd   : > { %19150 = vmatprep.subr.bf16.mxu0 %v26096_v6  ;;  %19294 = vmatprep.subr.bf16.mxu1 %v26096_v6 }
 0x2c0   : > { %19152 = vmatpush3.bf16.msra.mxu0 %v26131_v18  ;;  %19296 = vmatpush3.bf16.msra.mxu1 %v26132_v46 }
 0x2c1   : > { %19153 = vmatprep.subr.bf16.mxu0 %v26096_v6  ;;  %19297 = vmatprep.subr.bf16.mxu1 %v26096_v6 }
 0x2c4   : > { %19155 = vmatpush3.bf16.msra.mxu0 %v26133_v51  ;;  %19299 = vmatpush3.bf16.msra.mxu1 %v26134_v15 }
 0x2c5   : > { %19156 = vmatprep.subr.bf16.mxu0 %v26096_v6  ;;  %19300 = vmatprep.subr.bf16.mxu1 %v26096_v6 }
 0x2c8   : > { %19158 = vmatpush3.bf16.msra.mxu0 %v26135_v30  ;;  %19302 = vmatpush3.bf16.msra.mxu1 %v26136_v39 }
 0x2c9   : > { %19159 = vmatprep.subr.bf16.mxu0 %v26096_v6  ;;  %19303 = vmatprep.subr.bf16.mxu1 %v26096_v6 }
 0x2cb   : > { %17041 = vmatmul.mubr.f32.vlgmr.msra.gmra.mrb[0].mxu0 %v22280_v17  ;;  %17251 = vmatmul.mubr.f32.vlgmr.msra.gmra.mrb[0].mxu1 %v22280_v17 }
 0x2cc   : > { %19161 = vmatpush3.bf16.msra.mxu0 %v19160_v62  ;;  %19305 = vmatpush3.bf16.msra.mxu1 %v19304_v8  ;;  %v19169_v62 = vpack.c.bf16 %v26150_v37, %v26149_v58  ;;  %v19316_v8 = vpack.c.bf16 %v26156_v31, %v26155_v60  ;;  %v2121_v31 = vand.u32 4294901760, %v15580_v24 }
 0x2cd   : > { %19162 = vmatprep.subr.bf16.mxu0 %v26096_v6  ;;  %19306 = vmatprep.subr.bf16.mxu1 %v26096_v6 }
 0x2ce   : > { %17075 = vmatprep.mubr.msk.f32.mxu0 %vm21344_vm0, %v26106_v19  ;;  %17285 = vmatprep.mubr.msk.f32.mxu1 %vm21344_vm0, %v26106_v19 }
 0x2d0   : > { %19164 = vmatpush3.bf16.msra.mxu0 %v19163_v9  ;;  %19308 = vmatpush3.bf16.msra.mxu1 %v19307_v55  ;;  %v19178_v9 = vpack.c.bf16 %v26162_v23, %v26161_v33  ;;  %v19325_v55 = vpack.c.bf16 %v26168_v48, %v26167_v47 }
 0x2d1   : > { %19165 = vmatprep.subr.bf16.mxu0 %v26096_v6  ;;  %19309 = vmatprep.subr.bf16.mxu1 %v26096_v6 }
 0x2d4   : > { %19167 = vmatpush3.bf16.msra.mxu0 %v19166_v28  ;;  %19311 = vmatpush3.bf16.msra.mxu1 %v19310_v50  ;;  %v15578_v28 = vld [vmem:[%s21793_s10 + $0x150] sm:$0xff]  ;;  %v22590_v50 = vsub.f32 %v15569_v53, %v2088_v38 }
 0x2d5   : > { %19168 = vmatprep.subr.bf16.mxu0 %v26096_v6  ;;  %19312 = vmatprep.subr.bf16.mxu1 %v26096_v6  ;;  %v2115_v37 = vand.u32 4294901760, %v15578_v28 }
 0x2d8   : > { %19170 = vmatpush3.bf16.msra.mxu0 %v19169_v62  ;;  %19314 = vmatpush3.bf16.msra.mxu1 %v19313_v36  ;;  %v2118_v62 = vand.u32 4294901760, %v15579_v7 }
 0x2d9   : > { %19171 = vmatprep.subr.bf16.mxu0 %v26096_v6  ;;  %19315 = vmatprep.subr.bf16.mxu1 %v26096_v6 }
 0x2da   : > { %v22607_v60 = vpack.c.bf16 %v2118_v62, %v2115_v37 }
 0x2dc   : > { %19173 = vmatpush3.bf16.msra.mxu0 %v19172_v44  ;;  %19317 = vmatpush3.bf16.msra.mxu1 %v19316_v8  ;;  %v2185_v44 = vand.u32 4294901760, %v22590_v50  ;;  %v2124_v8 = vand.u32 4294901760, %v22598_v25 }
 0x2dd   : > { %19174 = vmatprep.subr.bf16.mxu0 %v26096_v6  ;;  %19318 = vmatprep.subr.bf16.mxu1 %v26096_v6 }
 0x2de   : > { %v2186_v59 = vsub.f32 %v22590_v50, %v2185_v44  ;;  %v22689_v22 = vsub.f32 %v22598_v25, %v2124_v8  ;;  %v22701_v25 = vsub.f32 %v22613_v32, %v2130_v41 }
 0x2e0   : > { %19176 = vmatpush3.bf16.msra.mxu0 %v19175_v12  ;;  %19320 = vmatpush3.bf16.msra.mxu1 %v19319_v13  ;;  %v2187_v43 = vand.u32 4294901760, %v2186_v59 }
 0x2e1   : > { %19177 = vmatprep.subr.bf16.mxu0 %v26096_v6  ;;  %19321 = vmatprep.subr.bf16.mxu1 %v26096_v6 }
 0x2e4   : > { %19179 = vmatpush3.bf16.msra.mxu0 %v19178_v9  ;;  %19323 = vmatpush3.bf16.msra.mxu1 %v19322_v14  ;;  %v22628_v9 = vpack.c.bf16 %v2124_v8, %v2121_v31 }
 0x2e5   : > { %19180 = vmatprep.subr.bf16.mxu0 %v26096_v6  ;;  %19324 = vmatprep.subr.bf16.mxu1 %v26096_v6 }
 0x2e8   : > { %19182 = vmatpush3.bf16.msra.mxu0 %v19181_v16  ;;  %19326 = vmatpush3.bf16.msra.mxu1 %v19325_v55  ;;  %v22643_v55 = vpack.c.bf16 %v2130_v41, %v2127_v5 }
 0x2e9   : > { %19183 = vmatprep.subr.bf16.mxu0 %v26096_v6  ;;  %19327 = vmatprep.subr.bf16.mxu1 %v26096_v6 }
 0x2eb   : > { %17076 = vmatmul.mubr.f32.vlgmr.msra.gmra.mrb[0].mxu0 %v22274_v40  ;;  %17286 = vmatmul.mubr.f32.vlgmr.msra.gmra.mrb[0].mxu1 %v22274_v40 }
 0x2ec   : > { %19185 = vmatpush3.bf16.msra.mxu0 %v26121_v57  ;;  %19329 = vmatpush3.bf16.msra.mxu1 %v26122_v3  ;;  %v22558_v57 = vpack.c.bf16 %v2088_v38, %v2085_v61  ;;  %v2091_v3 = vand.u32 4294901760, %v15570_v63 }
 0x2ed   : > { %19186 = vmatprep.subr.bf16.mxu0 %v26096_v6  ;;  %19330 = vmatprep.subr.bf16.mxu1 %v26096_v6 }
 0x2ee   : > { %17110 = vmatprep.mubr.msk.f32.mxu0 %vm21344_vm0, %v26106_v19  ;;  %17320 = vmatprep.mubr.msk.f32.mxu1 %vm21344_vm0, %v26106_v19  ;;  %v22600_v36 = vsub.f32 %v15570_v63, %v2091_v3  ;;  %v19376_v63 = vpack.c.bf16 %v2187_v43, %v2180_v42 }
 0x2f0   : > { %19188 = vmatpush3.bf16.msra.mxu0 %v26123_v10  ;;  %19332 = vmatpush3.bf16.msra.mxu1 %v26124_v49  ;;  %v2094_v10 = vand.u32 4294901760, %v15571_v0  ;;  %v15572_v49 = vld [vmem:[%s21793_s10 + $0x120] sm:$0xff]  ;;  %v2192_v13 = vand.u32 4294901760, %v22600_v36 }
 0x2f1   : > { %19189 = vmatprep.subr.bf16.mxu0 %v26096_v6  ;;  %19333 = vmatprep.subr.bf16.mxu1 %v26096_v6 }
 0x2f2   : > { %v22602_v27 = vsub.f32 %v15571_v0, %v2094_v10  ;;  %v2193_v16 = vsub.f32 %v22600_v36, %v2192_v13 }
 0x2f4   : > { %19191 = vmatpush3.bf16.msra.mxu0 %v26125_v45  ;;  %19335 = vmatpush3.bf16.msra.mxu1 %v26126_v29  ;;  %v15573_v45 = vld [vmem:[%s21793_s10 + $0x128] sm:$0xff]  ;;  %v22567_v29 = vpack.c.bf16 %v2094_v10, %v2091_v3  ;;  %v2199_v33 = vand.u32 4294901760, %v22602_v27  ;;  %v2194_v0 = vand.u32 4294901760, %v2193_v16 }
 0x2f5   : > { %19192 = vmatprep.subr.bf16.mxu0 %v26096_v6  ;;  %19336 = vmatprep.subr.bf16.mxu1 %v26096_v6 }
 0x2f6   : > { %v2200_v47 = vsub.f32 %v22602_v27, %v2199_v33 }
 0x2f8   : > { %19194 = vmatpush3.bf16.msra.mxu0 %v26127_v11  ;;  %19338 = vmatpush3.bf16.msra.mxu1 %v26128_v4  ;;  %v2097_v11 = vand.u32 4294901760, %v15572_v49  ;;  %v2100_v4 = vand.u32 4294901760, %v15573_v45  ;;  %v2201_v3 = vand.u32 4294901760, %v2200_v47 }
 0x2f9   : > { %19195 = vmatprep.subr.bf16.mxu0 %v26096_v6  ;;  %19339 = vmatprep.subr.bf16.mxu1 %v26096_v6 }
 0x2fa   : > { %v22615_v12 = vsub.f32 %v15572_v49, %v2097_v11  ;;  %v22625_v23 = vsub.f32 %v15573_v45, %v2100_v4 }
 0x2fc   : > { %19197 = vmatpush3.bf16.msra.mxu0 %v26129_v2  ;;  %19341 = vmatpush3.bf16.msra.mxu1 %v26130_v1  ;;  %v15574_v2 = vld [vmem:[%s21793_s10 + $0x130] sm:$0xff]  ;;  %v15575_v1 = vld [vmem:[%s21793_s10 + $0x138] sm:$0xff]  ;;  %v2206_v52 = vand.u32 4294901760, %v22615_v12  ;;  %v2213_v53 = vand.u32 4294901760, %v22625_v23 }
 0x2fd   : > { %19198 = vmatprep.subr.bf16.mxu0 %v26096_v6  ;;  %19342 = vmatprep.subr.bf16.mxu1 %v26096_v6 }
 0x2fe   : > { %v2207_v10 = vsub.f32 %v22615_v12, %v2206_v52  ;;  %v2214_v49 = vsub.f32 %v22625_v23, %v2213_v53 }
 0x300   : > { %19200 = vmatpush3.bf16.msra.mxu0 %v26131_v18  ;;  %19344 = vmatpush3.bf16.msra.mxu1 %v26132_v46  ;;  %v22577_v18 = vpack.c.bf16 %v2100_v4, %v2097_v11  ;;  %v2103_v46 = vand.u32 4294901760, %v15574_v2  ;;  %v22662_v4 = vsub.f32 %v15578_v28, %v2115_v37 }
 0x301   : > { %19201 = vmatprep.subr.bf16.mxu0 %v26096_v6  ;;  %19345 = vmatprep.subr.bf16.mxu1 %v26096_v6 }
 0x302   : > { %v22632_v14 = vsub.f32 %v15574_v2, %v2103_v46  ;;  %v22664_v2 = vsub.f32 %v15579_v7, %v2118_v62  ;;  %v2248_v37 = vand.u32 4294901760, %v22662_v4 }
 0x304   : > { %19203 = vmatpush3.bf16.msra.mxu0 %v26133_v51  ;;  %19347 = vmatpush3.bf16.msra.mxu1 %v26134_v15  ;;  %v2106_v51 = vand.u32 4294901760, %v15575_v1  ;;  %v15576_v15 = vld [vmem:[%s21793_s10 + $0x140] sm:$0xff]  ;;  %v2220_v45 = vand.u32 4294901760, %v22632_v14  ;;  %v2255_v62 = vand.u32 4294901760, %v22664_v2  ;;  %v2249_v47 = vsub.f32 %v22662_v4, %v2248_v37 }
 0x305   : > { %19204 = vmatprep.subr.bf16.mxu0 %v26096_v6  ;;  %19348 = vmatprep.subr.bf16.mxu1 %v26096_v6  ;;  %v2109_v34 = vand.u32 4294901760, %v15576_v15 }
 0x306   : > { %v22640_v48 = vsub.f32 %v15575_v1, %v2106_v51  ;;  %v19379_v1 = vpack.c.bf16 %v2201_v3, %v2194_v0  ;;  %v2250_v3 = vand.u32 4294901760, %v2249_v47  ;;  %v19406_v47 = vpack.c.bf16 %v22625_v23, %v22615_v12 }
 0x307   : > { %v22648_v61 = vsub.f32 %v15576_v15, %v2109_v34  ;;  %v2208_v15 = vand.u32 4294901760, %v2207_v10 }
 0x308   : > { %19206 = vmatpush3.bf16.msra.mxu0 %v26135_v30  ;;  %19350 = vmatpush3.bf16.msra.mxu1 %v26136_v39  ;;  %v15577_v30 = vld [vmem:[%s21793_s10 + $0x148] sm:$0xff]  ;;  %v22583_v39 = vpack.c.bf16 %v2106_v51, %v2103_v46  ;;  %v2227_v11 = vand.u32 4294901760, %v22640_v48 }
 0x309   : > { %19351 = vmatprep.subr.bf16.mxu0 %v26096_v6  ;;  %17533 = vmatprep.subr.mxu1 %v26106_v19  ;;  %v2112_v35 = vand.u32 4294901760, %v15577_v30  ;;  %v2234_v46 = vand.u32 4294901760, %v22648_v61 }
 0x30b   : > { %17111 = vmatmul.mubr.f32.vlgmr.msra.gmra.mrb[0].mxu0 %v22274_v40  ;;  %17321 = vmatmul.mubr.f32.vlgmr.msra.gmra.mrb[0].mxu1 %v22274_v40  ;;  %v22593_v58 = vpack.c.bf16 %v2112_v35, %v2109_v34  ;;  %v22650_v38 = vsub.f32 %v15577_v30, %v2112_v35  ;;  %v2215_v30 = vand.u32 4294901760, %v2214_v49  ;;  %v2221_v34 = vsub.f32 %v22632_v14, %v2220_v45 }
 0x30c   : > { %19353 = vmatpush3.bf16.msra.mxu0 %v22558_v57  ;;  %17355 = vmatprep.mubr.msk.f32.mxu0 %vm21344_vm0, %v26106_v19  ;;  %v2228_v35 = vsub.f32 %v22640_v48, %v2227_v11  ;;  %v2235_v28 = vsub.f32 %v22648_v61, %v2234_v46 }
 0x30d   : > { %19354 = vmatprep.subr.bf16.mxu0 %v26096_v6  ;;  %17535 = vmatprep.mubr.msk.f32.mxu1 %vm21344_vm0, %v26106_v19  ;;  %v2241_v51 = vand.u32 4294901760, %v22650_v38  ;;  %v19382_v59 = vpack.c.bf16 %v2215_v30, %v2208_v15  ;;  %v2222_v42 = vand.u32 4294901760, %v2221_v34 }
 0x30e   : > { %v2236_v43 = vand.u32 4294901760, %v2235_v28 }
 0x30f   : > { %v2242_v7 = vsub.f32 %v22650_v38, %v2241_v51 }
 0x310   : > { %19356 = vmatpush3.bf16.msra.mxu0 %v22567_v29 }
 0x311   : > { %19357 = vmatprep.subr.bf16.mxu0 %v26096_v6  ;;  %v2243_v16 = vand.u32 4294901760, %v2242_v7 }
 0x314   : > { %19359 = vmatpush3.bf16.msra.mxu0 %v22577_v18 }
 0x315   : > { %19360 = vmatprep.subr.bf16.mxu0 %v26096_v6 }
 0x318   : > { %19362 = vmatpush3.bf16.msra.mxu0 %v22583_v39 }
 0x319   : > { %19363 = vmatprep.subr.bf16.mxu0 %v26096_v6 }
 0x31c   : > { %19365 = vmatpush3.bf16.msra.mxu0 %v22593_v58 }
 0x31d   : > { %19366 = vmatprep.subr.bf16.mxu0 %v26096_v6 }
 0x320   : > { %19368 = vmatpush3.bf16.msra.mxu0 %v22607_v60 }
 0x321   : > { %19369 = vmatprep.subr.bf16.mxu0 %v26096_v6 }
 0x324   : > { %19371 = vmatpush3.bf16.msra.mxu0 %v22628_v9 }
 0x325   : > { %19372 = vmatprep.subr.bf16.mxu0 %v26096_v6 }
 0x328   : > { %19374 = vmatpush3.bf16.msra.mxu0 %v22643_v55 }
 0x329   : > { %19375 = vmatprep.subr.bf16.mxu0 %v26096_v6 }
 0x32b   : > { %17356 = vmatmul.mubr.f32.vlgmr.msra.gmra.mrb[2].mxu0 %v22284_v56  ;;  %v22678_v56 = vsub.f32 %v15580_v24, %v2121_v31  ;;  %v2229_v24 = vand.u32 4294901760, %v2228_v35  ;;  %v22692_v31 = vsub.f32 %v15582_v21, %v2127_v5  ;;  %v2269_v21 = vand.u32 4294901760, %v22689_v22 }
 0x32c   : > { %19377 = vmatpush3.bf16.msra.mxu0 %v19376_v63  ;;  %17390 = vmatprep.mubr.msk.f32.mxu0 %vm21344_vm0, %v26106_v19  ;;  %v2256_v63 = vsub.f32 %v22664_v2, %v2255_v62  ;;  %v19388_v5 = vpack.c.bf16 %v2243_v16, %v2236_v43  ;;  %v19400_v43 = vpack.c.bf16 %v22590_v50, %v22588_v54 }
 0x32d   : > { %19378 = vmatprep.subr.bf16.mxu0 %v26096_v6  ;;  %v19385_v8 = vpack.c.bf16 %v2229_v24, %v2222_v42  ;;  %v2262_v0 = vand.u32 4294901760, %v22678_v56  ;;  %v2270_v32 = vsub.f32 %v22689_v22, %v2269_v21  ;;  %v2276_v41 = vand.u32 4294901760, %v22692_v31 }
 0x32e   : > { %v2257_v10 = vand.u32 4294901760, %v2256_v63  ;;  %v19403_v16 = vpack.c.bf16 %v22602_v27, %v22600_v36  ;;  %v19409_v63 = vpack.c.bf16 %v22640_v48, %v22632_v14  ;;  %v19454_v54 = vpack.c.bf16 %v2213_v53, %v2206_v52 }
 0x32f   : > { %v2263_v49 = vsub.f32 %v22678_v56, %v2262_v0  ;;  %v2271_v34 = vand.u32 4294901760, %v2270_v32  ;;  %v2277_v35 = vsub.f32 %v22692_v31, %v2276_v41  ;;  %v19460_v50 = vpack.c.bf16 %v2241_v51, %v2234_v46 }
 0x330   : > { %19380 = vmatpush3.bf16.msra.mxu0 %v19379_v1  ;;  %v2283_v1 = vand.u32 4294901760, %v22701_v25  ;;  %v19391_v15 = vpack.c.bf16 %v2257_v10, %v2250_v3  ;;  %v19418_v3 = vpack.c.bf16 %v22689_v22, %v22678_v56  ;;  %v19421_v10 = vpack.c.bf16 %v22701_v25, %v22692_v31 }
 0x331   : > { %19381 = vmatprep.subr.bf16.mxu0 %v26096_v6  ;;  %v2264_v30 = vand.u32 4294901760, %v2263_v49  ;;  %v19451_v49 = vpack.c.bf16 %v2199_v33, %v2192_v13  ;;  %v19463_v36 = vpack.c.bf16 %v2255_v62, %v2248_v37  ;;  %v19466_v27 = vpack.c.bf16 %v2269_v21, %v2262_v0 }
 0x332   : > { %v2284_v28 = vsub.f32 %v22701_v25, %v2283_v1 }
 0x333   : > { %v19394_v7 = vpack.c.bf16 %v2271_v34, %v2264_v30 }
 0x334   : > { %19383 = vmatpush3.bf16.msra.mxu0 %v19382_v59  ;;  %v2278_v59 = vand.u32 4294901760, %v2277_v35  ;;  %v2285_v42 = vand.u32 4294901760, %v2284_v28 }
 0x335   : > { %19384 = vmatprep.subr.bf16.mxu0 %v26096_v6 }
 0x336   : > { %v19397_v24 = vpack.c.bf16 %v2285_v42, %v2278_v59 }
 0x338   : > { %19386 = vmatpush3.bf16.msra.mxu0 %v19385_v8  ;;  %v19412_v8 = vpack.c.bf16 %v22650_v38, %v22648_v61 }
 0x339   : > { %19387 = vmatprep.subr.bf16.mxu0 %v26096_v6 }
 0x33c   : > { %19389 = vmatpush3.bf16.msra.mxu0 %v19388_v5  ;;  %v19415_v5 = vpack.c.bf16 %v22664_v2, %v22662_v4 }
 0x33d   : > { %19390 = vmatprep.subr.bf16.mxu0 %v26096_v6 }
 0x340   : > { %19392 = vmatpush3.bf16.msra.mxu0 %v19391_v15 }
 0x341   : > { %19393 = vmatprep.subr.bf16.mxu0 %v26096_v6 }
 0x344   : > { %19395 = vmatpush3.bf16.msra.mxu0 %v19394_v7 }
 0x345   : > { %19396 = vmatprep.subr.bf16.mxu0 %v26096_v6 }
 0x348   : > { %19398 = vmatpush3.bf16.msra.mxu0 %v19397_v24 }
 0x349   : > { %19399 = vmatprep.subr.bf16.mxu0 %v26096_v6 }
 0x34b   : > { %17391 = vmatmul.mubr.f32.vlgmr.msra.gmra.mrb[2].mxu0 %v22274_v40 }
 0x34c   : > { %19401 = vmatpush3.bf16.msra.mxu0 %v19400_v43  ;;  %17425 = vmatprep.mubr.msk.f32.mxu0 %vm21344_vm0, %v26106_v19 }
 0x34d   : > { %19402 = vmatprep.subr.bf16.mxu0 %v26096_v6 }
 0x350   : > { %19404 = vmatpush3.bf16.msra.mxu0 %v19403_v16 }
 0x351   : > { %19405 = vmatprep.subr.bf16.mxu0 %v26096_v6 }
 0x354   : > { %19407 = vmatpush3.bf16.msra.mxu0 %v19406_v47 }
 0x355   : > { %19408 = vmatprep.subr.bf16.mxu0 %v26096_v6 }
 0x358   : > { %19410 = vmatpush3.bf16.msra.mxu0 %v19409_v63 }
 0x359   : > { %19411 = vmatprep.subr.bf16.mxu0 %v26096_v6 }
 0x35c   : > { %19413 = vmatpush3.bf16.msra.mxu0 %v19412_v8 }
 0x35d   : > { %19414 = vmatprep.subr.bf16.mxu0 %v26096_v6 }
 0x360   : > { %19416 = vmatpush3.bf16.msra.mxu0 %v19415_v5 }
 0x361   : > { %19417 = vmatprep.subr.bf16.mxu0 %v26096_v6 }
 0x364   : > { %19419 = vmatpush3.bf16.msra.mxu0 %v19418_v3 }
 0x365   : > { %19420 = vmatprep.subr.bf16.mxu0 %v26096_v6 }
 0x368   : > { %19422 = vmatpush3.bf16.msra.mxu0 %v19421_v10 }
 0x369   : > { %19423 = vmatprep.subr.bf16.mxu0 %v26096_v6 }
 0x36b   : > { %17426 = vmatmul.mubr.f32.vlgmr.msra.gmra.mrb[2].mxu0 %v22277_v20  ;;  %v19448_v20 = vpack.c.bf16 %v2185_v44, %v2178_v26  ;;  %v19469_v26 = vpack.c.bf16 %v2283_v1, %v2276_v41 }
 0x36c   : > { %19425 = vmatpush3.bf16.msra.mxu0 %v22558_v57  ;;  %17460 = vmatprep.mubr.msk.f32.mxu0 %vm21344_vm0, %v26106_v19 }
 0x36d   : > { %19426 = vmatprep.subr.bf16.mxu0 %v26096_v6 }
 0x370   : > { %19428 = vmatpush3.bf16.msra.mxu0 %v22567_v29 }
 0x371   : > { %19429 = vmatprep.subr.bf16.mxu0 %v26096_v6 }
 0x374   : > { %19431 = vmatpush3.bf16.msra.mxu0 %v22577_v18 }
 0x375   : > { %19432 = vmatprep.subr.bf16.mxu0 %v26096_v6 }
 0x378   : > { %19434 = vmatpush3.bf16.msra.mxu0 %v22583_v39 }
 0x379   : > { %19435 = vmatprep.subr.bf16.mxu0 %v26096_v6 }
 0x37c   : > { %19437 = vmatpush3.bf16.msra.mxu0 %v22593_v58 }
 0x37d   : > { %19438 = vmatprep.subr.bf16.mxu0 %v26096_v6 }
 0x380   : > { %19440 = vmatpush3.bf16.msra.mxu0 %v22607_v60 }
 0x381   : > { %19441 = vmatprep.subr.bf16.mxu0 %v26096_v6 }
 0x384   : > { %19443 = vmatpush3.bf16.msra.mxu0 %v22628_v9 }
 0x385   : > { %19444 = vmatprep.subr.bf16.mxu0 %v26096_v6 }
 0x388   : > { %19446 = vmatpush3.bf16.msra.mxu0 %v22643_v55 }
 0x389   : > { %19447 = vmatprep.subr.bf16.mxu0 %v26096_v6 }
 0x38b   : > { %17461 = vmatmul.mubr.f32.vlgmr.msra.gmra.mrb[2].mxu0 %v22280_v17  ;;  %v19457_v17 = vpack.c.bf16 %v2227_v11, %v2220_v45 }
 0x38c   : > { %19449 = vmatpush3.bf16.msra.mxu0 %v19448_v20  ;;  %17495 = vmatprep.mubr.msk.f32.mxu0 %vm21344_vm0, %v26106_v19 }
 0x38d   : > { %19450 = vmatprep.subr.bf16.mxu0 %v26096_v6 }
 0x390   : > { %19452 = vmatpush3.bf16.msra.mxu0 %v19451_v49 }
 0x391   : > { %19453 = vmatprep.subr.bf16.mxu0 %v26096_v6 }
 0x394   : > { %19455 = vmatpush3.bf16.msra.mxu0 %v19454_v54 }
 0x395   : > { %19456 = vmatprep.subr.bf16.mxu0 %v26096_v6 }
 0x398   : > { %19458 = vmatpush3.bf16.msra.mxu0 %v19457_v17 }
 0x399   : > { %19459 = vmatprep.subr.bf16.mxu0 %v26096_v6 }
 0x39c   : > { %19461 = vmatpush3.bf16.msra.mxu0 %v19460_v50 }
 0x39d   : > { %19462 = vmatprep.subr.bf16.mxu0 %v26096_v6 }
 0x3a0   : > { %19464 = vmatpush3.bf16.msra.mxu0 %v19463_v36 }
 0x3a1   : > { %19465 = vmatprep.subr.bf16.mxu0 %v26096_v6 }
 0x3a4   : > { %19467 = vmatpush3.bf16.msra.mxu0 %v19466_v27 }
 0x3a5   : > { %19468 = vmatprep.subr.bf16.mxu0 %v26096_v6 }
 0x3a8   : > { %19470 = vmatpush3.bf16.msra.mxu0 %v19469_v26 }
 0x3a9   : > { %19471 = vmatprep.subr.bf16.mxu0 %v26096_v6 }
 0x3ab   : > { %17496 = vmatmul.mubr.f32.vlgmr.msra.gmra.mrb[2].mxu0 %v22274_v40 }
 0x3ac   : > { %19473 = vmatpush3.bf16.msra.mxu0 %v22558_v57  ;;  %17530 = vmatprep.mubr.msk.f32.mxu0 %vm21344_vm0, %v26106_v19  ;;  %v15600_v57 = vld [vmem:[%s21799_s1] ss:$0 sm:$0xff] }
 0x3ad   : > { %19474 = vmatprep.subr.bf16.mxu0 %v26096_v6 }
 0x3b0   : > { %19476 = vmatpush3.bf16.msra.mxu0 %v22567_v29  ;;  %v15601_v29 = vld [vmem:[%s21799_s1 + $0x1] ss:$0 sm:$0xff] }
 0x3b1   : > { %19477 = vmatprep.subr.bf16.mxu0 %v26096_v6 }
 0x3b4   : > { %19479 = vmatpush3.bf16.msra.mxu0 %v22577_v18 }
 0x3b5   : > { %19480 = vmatprep.subr.bf16.mxu0 %v26096_v6 }
 0x3b8   : > { %19482 = vmatpush3.bf16.msra.mxu0 %v22583_v39 }
 0x3b9   : > { %19483 = vmatprep.subr.bf16.mxu0 %v26096_v6 }
 0x3bc   : > { %19485 = vmatpush3.bf16.msra.mxu0 %v22593_v58 }
 0x3bd   : > { %19486 = vmatprep.subr.bf16.mxu0 %v26096_v6 }
 0x3c0   : > { %19488 = vmatpush3.bf16.msra.mxu0 %v22607_v60 }
 0x3c1   : > { %19489 = vmatprep.subr.bf16.mxu0 %v26096_v6 }
 0x3c4   : > { %19491 = vmatpush3.bf16.msra.mxu0 %v22628_v9 }
 0x3c5   : > { %19492 = vmatprep.subr.bf16.mxu0 %v26096_v6 }
 0x3c8   : > { %19494 = vmatpush3.bf16.msra.mxu0 %v22643_v55 }
 0x3c9   : > { %19495 = vmatprep.subr.bf16.mxu0 %v26096_v6 }
 0x3cb   : > { %17531 = vmatmul.mubr.f32.vlgmr.msra.gmra.mrb[2].mxu0 %v22274_v40 }
 0x3cc   : > { %17805 = vmatprep.mubr.msk.f32.mxu0 %vm21344_vm0, %v26106_v19 }
 0x3de   : > { %v1430_v18 = vpop.f32.mrb[0].mxu0  ;;  %v2076_v39 = vpop.f32.mrb[0].mxu1 }
 0x3df   : > { %v20599_v58 = vadd.f32 %v15600_v57, %v1430_v18  ;;  %v20600_v44 = vadd.f32 %v15601_v29, %v2076_v39  ;;  %v17112_v60 = vpop.f32.mrb[1].mxu0  ;;  %v17322_v12 = vpop.f32.mrb[1].mxu1  ;;  %v15602_v39 = vld [vmem:[%s21799_s1 + $0x2] ss:$0 sm:$0xff] }
 0x3e0   : > { %v692_v60 = vld [vmem:[%s21825_s3] sm:$0xff] }
 0x3e1   : > { %v1434_v13 = vmul.f32 0.17677669, %v20599_v58  ;;  %v2752_v33 = vsel %vm2749_vm1, %v20600_v44, 0  ;;  %vm4550_vm2 = vcmp.gt.f32.partialorder %v692_v60, 0.5 }
 0x3e2   : > { %v2755_v23 = vand.u32 4294901760, %v2752_v33 }
 0x3e3   : > { %v2750_v9 = vsel %vm2749_vm1, %v1434_v13, 0  ;;  %2728 = vrot.lane.b32.xlu0 %v1434_v13, %s21346_s4  ;;  %2726 = vrot.lane.b32.xlu1 %v1434_v13, %s21347_s5 }
 0x3e4   : > { %v2820_v40 = vand.u32 4294901760, %v2750_v9  ;;  %17534 = vmatpush3.xpose.msra.mxu1 %v2755_v23  ;;  %v2832_v14 = vsub.f32 %v2752_v33, %v2755_v23 }
 0x3e5   : > { %17538 = vmatprep.subr.mxu1 %v26106_v19 }
 0x3e6   : > { %v2821_v48 = vsub.f32 %v2750_v9, %v2820_v40  ;;  %v2833_v55 = vand.u32 4294901760, %v2832_v14 }
 0x3e7   : > { %2733 = vrot.lane.b32.xlu1 %v20600_v44, %s21347_s5 }
 0x3e8   : > { %v2822_v52 = vand.u32 4294901760, %v2821_v48  ;;  %v2834_v53 = vsub.f32 %v2832_v14, %v2833_v55 }
 0x3ea   : > { %v2823_v61 = vsub.f32 %v2821_v48, %v2822_v52  ;;  %v2835_v45 = vand.u32 4294901760, %v2834_v53 }
 0x3eb   : > { %2735 = vrot.lane.b32.xlu1 %v20600_v44, %s21346_s4 }
 0x3ec   : > { %v2824_v38 = vand.u32 4294901760, %v2823_v61 }
 0x3ee   : > { %17536 = vmatmul.mubr.f32.vlgmr.msra.gmra.mrb[2].mxu1 %v2824_v38 }
 0x3ef   : > { %17539 = vmatpush3.xpose.msra.mxu1 %v2835_v45  ;;  %2730 = vrot.lane.b32.xlu1 %v1434_v13, %s21348_s7 }
 0x3f0   : > { %17540 = vmatprep.mubr.msk.f32.mxu1 %vm21344_vm0, %v26106_v19  ;;  %17543 = vmatprep.subr.mxu1 %v26106_v19 }
 0x3f3   : > { %2737 = vrot.lane.b32.xlu1 %v20600_v44, %s21348_s7 }
 0x3f6   : > { %17541 = vmatmul.mubr.f32.vlgmr.msra.gmra.mrb[2].mxu1 %v2820_v40 }
 0x3f7   : > { %17544 = vmatpush3.xpose.msra.mxu1 %v2832_v14  ;;  %17545 = vmatprep.mubr.msk.f32.mxu1 %vm21344_vm0, %v26106_v19 }
 0x3f8   : > { %17548 = vmatprep.subr.mxu1 %v26106_v19 }
 0x3fe   : > { %17546 = vmatmul.mubr.f32.vlgmr.msra.gmra.mrb[2].mxu1 %v2821_v48 }
 0x3ff   : > { %17549 = vmatpush3.xpose.msra.mxu1 %v2755_v23  ;;  %17550 = vmatprep.mubr.msk.f32.mxu1 %vm21344_vm0, %v26106_v19 }
 0x400   : > { %17553 = vmatprep.subr.mxu1 %v26106_v19 }
 0x406   : > { %17551 = vmatmul.mubr.f32.vlgmr.msra.gmra.mrb[2].mxu1 %v2822_v52 }
 0x407   : > { %17554 = vmatpush3.xpose.msra.mxu1 %v2833_v55  ;;  %17555 = vmatprep.mubr.msk.f32.mxu1 %vm21344_vm0, %v26106_v19 }
 0x408   : > { %17558 = vmatprep.subr.mxu1 %v26106_v19 }
 0x40e   : > { %17556 = vmatmul.mubr.f32.vlgmr.msra.gmra.mrb[2].mxu1 %v2820_v40 }
 0x40f   : > { %17559 = vmatpush3.xpose.msra.mxu1 %v2755_v23  ;;  %17560 = vmatprep.mubr.msk.f32.mxu1 %vm21344_vm0, %v26106_v19 }
 0x410   : > { %17563 = vmatprep.subr.mxu1 %v26106_v19 }
 0x416   : > { %17561 = vmatmul.mubr.f32.vlgmr.msra.gmra.mrb[2].mxu1 %v2820_v40 }
 0x417   : > { %17565 = vmatprep.mubr.msk.f32.mxu1 %vm21344_vm0, %v26106_v19 }
 0x455   : > { %v2727_v11 = vpop.permute.xlu1 %2726  ;;  %v2729_v41 = vpop.permute.xlu0 %2728 }
 0x456   : > { %v3200_v4 = vsel %vm2749_vm1, %v2727_v11, 0  ;;  %v3650_v15 = vsel %vm2749_vm1, %v2729_v41, 0 }
 0x457   : > { %v3270_v2 = vand.u32 4294901760, %v3200_v4  ;;  %v3720_v34 = vand.u32 4294901760, %v3650_v15 }
 0x459   : > { %v3271_v46 = vsub.f32 %v3200_v4, %v3270_v2  ;;  %v2734_v51 = vpop.permute.xlu1 %2733  ;;  %v3721_v28 = vsub.f32 %v3650_v15, %v3720_v34 }
 0x45a   : > { %v3202_v56 = vsel %vm2749_vm1, %v2734_v51, 0 }
 0x45b   : > { %v3272_v37 = vand.u32 4294901760, %v3271_v46  ;;  %v3205_v62 = vand.u32 4294901760, %v3202_v56  ;;  %v3722_v59 = vand.u32 4294901760, %v3721_v28 }
 0x45d   : > { %v3273_v22 = vsub.f32 %v3271_v46, %v3272_v37  ;;  %v3282_v31 = vsub.f32 %v3202_v56, %v3205_v62  ;;  %17564 = vmatpush3.xpose.msra.mxu1 %v3205_v62  ;;  %v2736_v1 = vpop.permute.xlu1 %2735  ;;  %v3723_v24 = vsub.f32 %v3721_v28, %v3722_v59 }
 0x45e   : > { %17568 = vmatprep.subr.mxu1 %v26106_v19  ;;  %v3652_v30 = vsel %vm2749_vm1, %v2736_v1, 0 }
 0x45f   : > { %v3274_v25 = vand.u32 4294901760, %v3273_v22  ;;  %v3283_v0 = vand.u32 4294901760, %v3282_v31  ;;  %v3655_v35 = vand.u32 4294901760, %v3652_v30  ;;  %v3724_v16 = vand.u32 4294901760, %v3723_v24 }
 0x461   : > { %v3284_v21 = vsub.f32 %v3282_v31, %v3283_v0  ;;  %17566 = vmatmul.mubr.f32.vlgmr.msra.gmra.mrb[4].mxu1 %v3274_v25  ;;  %v3732_v7 = vsub.f32 %v3652_v30, %v3655_v35  ;;  %v2731_v63 = vpop.permute.xlu1 %2730 }
 0x462   : > { %17570 = vmatprep.mubr.msk.f32.mxu1 %vm21344_vm0, %v26106_v19  ;;  %v4100_v10 = vsel %vm2749_vm1, %v2731_v63, 0 }
 0x463   : > { %v3285_v32 = vand.u32 4294901760, %v3284_v21  ;;  %v3733_v42 = vand.u32 4294901760, %v3732_v7  ;;  %v4170_v49 = vand.u32 4294901760, %v4100_v10 }
 0x465   : > { %17569 = vmatpush3.xpose.msra.mxu1 %v3285_v32  ;;  %v3734_v43 = vsub.f32 %v3732_v7, %v3733_v42  ;;  %v2738_v3 = vpop.permute.xlu1 %2737  ;;  %v4171_v17 = vsub.f32 %v4100_v10, %v4170_v49 }
 0x466   : > { %17573 = vmatprep.subr.mxu1 %v26106_v19  ;;  %v4102_v20 = vsel %vm2749_vm1, %v2738_v3, 0 }
 0x467   : > { %v3735_v47 = vand.u32 4294901760, %v3734_v43  ;;  %v4105_v54 = vand.u32 4294901760, %v4102_v20  ;;  %v4172_v36 = vand.u32 4294901760, %v4171_v17 }
 0x469   : > { %17571 = vmatmul.mubr.f32.vlgmr.msra.gmra.mrb[4].mxu1 %v3270_v2  ;;  %v4182_v50 = vsub.f32 %v4102_v20, %v4105_v54  ;;  %v4173_v26 = vsub.f32 %v4171_v17, %v4172_v36 }
 0x46a   : > { %17574 = vmatpush3.xpose.msra.mxu1 %v3282_v31  ;;  %17575 = vmatprep.mubr.msk.f32.mxu1 %vm21344_vm0, %v26106_v19 }
 0x46b   : > { %17578 = vmatprep.subr.mxu1 %v26106_v19  ;;  %v4183_v27 = vand.u32 4294901760, %v4182_v50  ;;  %v4174_v29 = vand.u32 4294901760, %v4173_v26 }
 0x46d   : > { %v4184_v57 = vsub.f32 %v4182_v50, %v4183_v27 }
 0x46f   : > { %v4185_v18 = vand.u32 4294901760, %v4184_v57 }
 0x471   : > { %17576 = vmatmul.mubr.f32.vlgmr.msra.gmra.mrb[4].mxu1 %v3271_v46 }
 0x472   : > { %17579 = vmatpush3.xpose.msra.mxu1 %v3205_v62  ;;  %17580 = vmatprep.mubr.msk.f32.mxu1 %vm21344_vm0, %v26106_v19 }
 0x473   : > { %17583 = vmatprep.subr.mxu1 %v26106_v19 }
 0x479   : > { %17581 = vmatmul.mubr.f32.vlgmr.msra.gmra.mrb[4].mxu1 %v3272_v37 }
 0x47a   : > { %17584 = vmatpush3.xpose.msra.mxu1 %v3283_v0  ;;  %17585 = vmatprep.mubr.msk.f32.mxu1 %vm21344_vm0, %v26106_v19 }
 0x47b   : > { %17588 = vmatprep.subr.mxu1 %v26106_v19 }
 0x481   : > { %17586 = vmatmul.mubr.f32.vlgmr.msra.gmra.mrb[4].mxu1 %v3270_v2 }
 0x482   : > { %17589 = vmatpush3.xpose.msra.mxu1 %v3205_v62  ;;  %17590 = vmatprep.mubr.msk.f32.mxu1 %vm21344_vm0, %v26106_v19 }
 0x483   : > { %17593 = vmatprep.subr.mxu1 %v26106_v19 }
 0x489   : > { %17591 = vmatmul.mubr.f32.vlgmr.msra.gmra.mrb[4].mxu1 %v3270_v2 }
 0x48a   : > { %17594 = vmatpush3.xpose.msra.mxu1 %v3655_v35  ;;  %17595 = vmatprep.mubr.msk.f32.mxu1 %vm21344_vm0, %v26106_v19 }
 0x48b   : > { %17598 = vmatprep.subr.mxu1 %v26106_v19 }
 0x48d   : > { %17596 = vmatmul.mubr.f32.vlgmr.msra.gmra.mrb[6].mxu1 %v3724_v16 }
 0x48e   : > { %17599 = vmatpush3.xpose.msra.mxu1 %v3735_v47  ;;  %17600 = vmatprep.mubr.msk.f32.mxu1 %vm21344_vm0, %v26106_v19 }
 0x48f   : > { %17603 = vmatprep.subr.mxu1 %v26106_v19 }
 0x495   : > { %17601 = vmatmul.mubr.f32.vlgmr.msra.gmra.mrb[6].mxu1 %v3720_v34 }
 0x496   : > { %17604 = vmatpush3.xpose.msra.mxu1 %v3732_v7  ;;  %17605 = vmatprep.mubr.msk.f32.mxu1 %vm21344_vm0, %v26106_v19 }
 0x497   : > { %17608 = vmatprep.subr.mxu1 %v26106_v19 }
 0x49d   : > { %17606 = vmatmul.mubr.f32.vlgmr.msra.gmra.mrb[6].mxu1 %v3721_v28 }
 0x49e   : > { %17609 = vmatpush3.xpose.msra.mxu1 %v3655_v35  ;;  %v2721_v8 = vpop.f32.mrb[2].mxu0  ;;  %17610 = vmatprep.mubr.msk.f32.mxu1 %vm21344_vm0, %v26106_v19 }
 0x49f   : > { %v17532_v5 = vpop.f32.mrb[3].mxu0  ;;  %17613 = vmatprep.subr.mxu1 %v26106_v19  ;;  %v22923_v58 = vadd.f32 %v15602_v39, %v2721_v8 }
 0x4a1   : > { %v22926_v44 = vand.u32 4294901760, %v22923_v58 }
 0x4a3   : > { %v4683_v28 = vsub.f32 %v22923_v58, %v22926_v44 }
 0x4a5   : > { %17611 = vmatmul.mubr.f32.vlgmr.msra.gmra.mrb[6].mxu1 %v3722_v59 }
 0x4a6   : > { %17614 = vmatpush3.xpose.msra.mxu1 %v3733_v42  ;;  %17615 = vmatprep.mubr.msk.f32.mxu1 %vm21344_vm0, %v26106_v19  ;;  %v4684_v42 = vand.u32 4294901760, %v4683_v28 }
 0x4a7   : > { %17618 = vmatprep.subr.mxu1 %v26106_v19 }
 0x4a8   : > { %v4685_v16 = vsub.f32 %v4683_v28, %v4684_v42 }
 0x4aa   : > { %v4686_v8 = vand.u32 4294901760, %v4685_v16 }
 0x4ad   : > { %17616 = vmatmul.mubr.f32.vlgmr.msra.gmra.mrb[6].mxu1 %v3720_v34 }
 0x4ae   : > { %17619 = vmatpush3.xpose.msra.mxu1 %v3655_v35  ;;  %17620 = vmatprep.mubr.msk.f32.mxu1 %vm21344_vm0, %v26106_v19 }
 0x4af   : > { %17623 = vmatprep.subr.mxu1 %v26106_v19 }
 0x4b5   : > { %17621 = vmatmul.mubr.f32.vlgmr.msra.gmra.mrb[6].mxu1 %v3720_v34 }
 0x4b6   : > { %17624 = vmatpush3.xpose.msra.mxu1 %v4105_v54  ;;  %17625 = vmatprep.mubr.msk.f32.mxu1 %vm21344_vm0, %v26106_v19 }
 0x4b7   : > { %17628 = vmatprep.subr.mxu1 %v26106_v19 }
 0x4b9   : > { %17626 = vmatmul.mubr.f32.vlgmr.msra.gmra.mrb[8].mxu1 %v4174_v29 }
 0x4ba   : > { %17629 = vmatpush3.xpose.msra.mxu1 %v4185_v18  ;;  %17630 = vmatprep.mubr.msk.f32.mxu1 %vm21344_vm0, %v26106_v19 }
 0x4bb   : > { %17633 = vmatprep.subr.mxu1 %v26106_v19 }
 0x4c1   : > { %17631 = vmatmul.mubr.f32.vlgmr.msra.gmra.mrb[8].mxu1 %v4170_v49 }
 0x4c2   : > { %17634 = vmatpush3.xpose.msra.mxu1 %v4182_v50  ;;  %17635 = vmatprep.mubr.msk.f32.mxu1 %vm21344_vm0, %v26106_v19 }
 0x4c3   : > { %17638 = vmatprep.subr.mxu1 %v26106_v19 }
 0x4c9   : > { %17636 = vmatmul.mubr.f32.vlgmr.msra.gmra.mrb[8].mxu1 %v4171_v17 }
 0x4ca   : > { %17639 = vmatpush3.xpose.msra.mxu1 %v4105_v54  ;;  %17640 = vmatprep.mubr.msk.f32.mxu1 %vm21344_vm0, %v26106_v19 }
 0x4cb   : > { %17643 = vmatprep.subr.mxu1 %v26106_v19 }
 0x4d1   : > { %17641 = vmatmul.mubr.f32.vlgmr.msra.gmra.mrb[8].mxu1 %v4172_v36 }
 0x4d2   : > { %17644 = vmatpush3.xpose.msra.mxu1 %v4183_v27  ;;  %17645 = vmatprep.mubr.msk.f32.mxu1 %vm21344_vm0, %v26106_v19 }
 0x4d3   : > { %17648 = vmatprep.subr.mxu1 %v26106_v19 }
 0x4d9   : > { %17646 = vmatmul.mubr.f32.vlgmr.msra.gmra.mrb[8].mxu1 %v4170_v49 }
 0x4da   : > { %17649 = vmatpush3.xpose.msra.mxu1 %v4105_v54  ;;  %17650 = vmatprep.mubr.msk.f32.mxu1 %vm21344_vm0, %v26106_v19 }
 0x4db   : > { %17653 = vmatprep.subr.mxu1 %v26106_v19 }
 0x4e1   : > { %17651 = vmatmul.mubr.f32.vlgmr.msra.gmra.mrb[8].mxu1 %v4170_v49 }
 0x4e2   : > { %17654 = vmatpush3.msra.mxu1 %v22926_v44  ;;  %17655 = vmatprep.mubr.msk.f32.mxu1 %vm21344_vm0, %v26106_v19 }
 0x4e3   : > { %17658 = vmatprep.subr.mxu1 %v26106_v19 }
 0x4e9   : > { %v3196_v12 = vpop.f32.mrb[2].mxu1 }
 0x4ea   : > { %v4553_v13 = vsel %vm4550_vm2, %v3196_v12, -1e+09  ;;  %v17562_v33 = vpop.f32.mrb[3].mxu1 }
 0x4eb   : > { %v4558_v23 = vsel %vm4557_vm3, %v4553_v13, -inf }
 0x4ec   : > { %4559 = vmax.xlane.f32.xlu1 %v4558_v23 }
 0x55c   : > { %v3646_v9 = vpop.f32.mrb[4].mxu1 }
 0x55d   : > { %v4554_v40 = vsel %vm4550_vm2, %v3646_v9, -1e+09  ;;  %v17592_v14 = vpop.f32.mrb[5].mxu1 }
 0x55e   : > { %v4561_v48 = vsel %vm4557_vm3, %v4554_v40, -inf }
 0x55f   : > { %4562 = vmax.xlane.f32.xlu0 %v4561_v48 }
 0x579   : > { %v4560_v55 = vpop.xlane.xlu1 %4559 }
 0x57a   : > { %v4570_v52 = vsub.f32 %v4553_v13, %v4560_v55 }
 0x57c   : > { %v4574_v53 = vmul.f32 1.442695, %v4570_v52 }
 0x57e   : > { %20976 = vpow2.f32 %v4574_v53 }
 0x588   : > { %v4096_v61 = vpop.f32.mrb[6].mxu1  ;;  %v20977_v4 = vpop.eup %20976 }
 0x589   : > { %v4555_v38 = vsel %vm4550_vm2, %v4096_v61, -1e+09  ;;  %v17622_v45 = vpop.f32.mrb[7].mxu1  ;;  %v4582_v2 = vsel %vm4557_vm3, %v20977_v4, 0.0 }
 0x58a   : > { %v4564_v11 = vsel %vm4557_vm3, %v4555_v38, -inf }
 0x58b   : > { %4565 = vmax.xlane.f32.xlu1 %v4564_v11 }
 0x58f   : > { %4583 = vadd.xlane.f32.xlu1 %v4582_v2 }
 0x5b4   : > { %v4546_v46 = vpop.f32.mrb[8].mxu1 }
 0x5b5   : > { %v4556_v51 = vsel %vm4550_vm2, %v4546_v46, -1e+09  ;;  %v17652_v56 = vpop.f32.mrb[9].mxu1 }
 0x5b6   : > { %v4567_v37 = vsel %vm4557_vm3, %v4556_v51, -inf }
 0x5b7   : > { %4568 = vmax.xlane.f32.xlu0 %v4567_v37 }
 0x5cd   : > { %2740 = vrot.lane.b32.xlu0 %v22923_v58, %s21347_s5 }
 0x5ec   : > { %v4563_v62 = vpop.xlane.xlu0 %4562 }
 0x5ed   : > { %v4571_v22 = vsub.f32 %v4554_v40, %v4563_v62 }
 0x5ef   : > { %v4576_v31 = vmul.f32 1.442695, %v4571_v22 }
 0x5f1   : > { %20978 = vpow2.f32 %v4576_v31 }
 0x5fb   : > { %v22944_v25 = vpop.eup %20978 }
 0x5fc   : > { %v4585_v0 = vsel %vm4557_vm3, %v22944_v25, 0.0 }
 0x5fd   : > { %4586 = vadd.xlane.f32.xlu1 %v4585_v0 }
 0x618   : > { %v4566_v21 = vpop.xlane.xlu1 %4565 }
 0x619   : > { %v4572_v32 = vsub.f32 %v4555_v38, %v4566_v21 }
 0x61b   : > { %v4578_v41 = vmul.f32 1.442695, %v4572_v32 }
 0x61c   : > { %v4584_v1 = vpop.xlane.xlu1 %4583 }
 0x61d   : > { %20980 = vpow2.f32 %v4578_v41 }
 0x61e   : > { %20982 = vrcp.f32 %v4584_v1 }
 0x627   : > { %v22948_v15 = vpop.eup %20980 }
 0x628   : > { %v20983_v30 = vpop.eup %20982  ;;  %v4588_v34 = vsel %vm4557_vm3, %v22948_v15, 0.0 }
 0x629   : > { %v4598_v35 = vmul.f32 %v20983_v30, %v20977_v4  ;;  %4589 = vadd.xlane.f32.xlu1 %v4588_v34 }
 0x62b   : > { %v4603_v7 = vsel %vm4557_vm3, %v4598_v35, 0 }
 0x62c   : > { %v4671_v59 = vand.u32 4294901760, %v4603_v7 }
 0x62e   : > { %v4672_v24 = vsub.f32 %v4603_v7, %v4671_v59 }
 0x630   : > { %v4673_v43 = vand.u32 4294901760, %v4672_v24 }
 0x632   : > { %v4674_v47 = vsub.f32 %v4672_v24, %v4673_v43 }
 0x634   : > { %v4675_v63 = vand.u32 4294901760, %v4674_v47  ;;  %v15587_v47 = vld [vmem:[%s21793_s10 + $0x198] sm:$0xff] }
 0x636   : > { %17656 = vmatmul.mubr.f32.vlgmr.msra.gmra.mrb[10].mxu1 %v4675_v63 }
 0x637   : > { %17659 = vmatpush3.msra.mxu1 %v4686_v8  ;;  %17660 = vmatprep.mubr.msk.f32.mxu1 %vm21344_vm0, %v26106_v19  ;;  %v15588_v8 = vld [vmem:[%s21793_s10 + $0x1a0] sm:$0xff] }
 0x638   : > { %17663 = vmatprep.subr.mxu1 %v26106_v19 }
 0x63a   : > { %2743 = vrot.lane.b32.xlu1 %v22923_v58, %s21346_s4 }
 0x63e   : > { %17661 = vmatmul.mubr.f32.vlgmr.msra.gmra.mrb[10].mxu1 %v4671_v59  ;;  %2746 = vrot.lane.b32.xlu1 %v22923_v58, %s21348_s7 }
 0x63f   : > { %17664 = vmatpush3.msra.mxu1 %v4683_v28  ;;  %17665 = vmatprep.mubr.msk.f32.mxu1 %vm21344_vm0, %v26106_v19 }
 0x640   : > { %17668 = vmatprep.subr.mxu1 %v26106_v19 }
 0x644   : > { %v4569_v5 = vpop.xlane.xlu0 %4568 }
 0x645   : > { %v4573_v3 = vsub.f32 %v4556_v51, %v4569_v5  ;;  %v15589_v5 = vld [vmem:[%s21793_s10 + $0x1a8] sm:$0xff] }
 0x646   : > { %17666 = vmatmul.mubr.f32.vlgmr.msra.gmra.mrb[10].mxu1 %v4672_v24  ;;  %v15586_v24 = vld [vmem:[%s21793_s10 + $0x190] sm:$0xff] }
 0x647   : > { %v4580_v10 = vmul.f32 1.442695, %v4573_v3  ;;  %17669 = vmatpush3.msra.mxu1 %v22926_v44  ;;  %17670 = vmatprep.mubr.msk.f32.mxu1 %vm21344_vm0, %v26106_v19  ;;  %v6426_v63 = vand.u32 4294901760, %v15586_v24  ;;  %v6429_v3 = vand.u32 4294901760, %v15587_v47 }
 0x648   : > { %17673 = vmatprep.subr.mxu1 %v26106_v19  ;;  %v2741_v54 = vpop.permute.xlu0 %2740 }
 0x649   : > { %20984 = vpow2.f32 %v4580_v10  ;;  %v5055_v17 = vand.u32 4294901760, %v2741_v54  ;;  %v6432_v10 = vand.u32 4294901760, %v15588_v8 }
 0x64b   : > { %v5132_v27 = vsub.f32 %v2741_v54, %v5055_v17 }
 0x64d   : > { %v5133_v18 = vand.u32 4294901760, %v5132_v27 }
 0x64e   : > { %17671 = vmatmul.mubr.f32.vlgmr.msra.gmra.mrb[10].mxu1 %v4673_v43 }
 0x64f   : > { %17674 = vmatpush3.msra.mxu1 %v4684_v42  ;;  %17675 = vmatprep.mubr.msk.f32.mxu1 %vm21344_vm0, %v26106_v19  ;;  %v15585_v42 = vld [vmem:[%s21793_s10 + $0x188] sm:$0xff] }
 0x650   : > { %17678 = vmatprep.subr.mxu1 %v26106_v19  ;;  %v6423_v16 = vand.u32 4294901760, %v15585_v42 }
 0x653   : > { %v22972_v20 = vpop.eup %20984 }
 0x654   : > { %v4591_v49 = vsel %vm4557_vm3, %v22972_v20, 0.0 }
 0x655   : > { %4592 = vadd.xlane.f32.xlu0 %v4591_v49  ;;  %v23052_v49 = vld [vmem:[%s21793_s10 + $0x1b0] sm:$0xff] }
 0x656   : > { %17676 = vmatmul.mubr.f32.vlgmr.msra.gmra.mrb[10].mxu1 %v4671_v59 }
 0x657   : > { %17679 = vmatpush3.msra.mxu1 %v22926_v44  ;;  %17680 = vmatprep.mubr.msk.f32.mxu1 %vm21344_vm0, %v26106_v19  ;;  %v5134_v44 = vsub.f32 %v5132_v27, %v5133_v18 }
 0x658   : > { %17683 = vmatprep.subr.mxu1 %v26106_v19 }
 0x659   : > { %v5135_v13 = vand.u32 4294901760, %v5134_v44 }
 0x65e   : > { %17681 = vmatmul.mubr.f32.vlgmr.msra.gmra.mrb[10].mxu1 %v4671_v59  ;;  %v15584_v59 = vld [vmem:[%s21793_s10 + $0x180] sm:$0xff] }
 0x65f   : > { %17684 = vmatpush3.msra.mxu1 %v5055_v17  ;;  %17685 = vmatprep.mubr.msk.f32.mxu1 %vm21344_vm0, %v26106_v19  ;;  %v6420_v43 = vand.u32 4294901760, %v15584_v59 }
 0x660   : > { %17688 = vmatprep.subr.mxu1 %v26106_v19 }
 0x661   : > { %v23054_v54 = vsub.f32 %v15584_v59, %v6420_v43 }
 0x68a   : > { %v4587_v50 = vpop.xlane.xlu1 %4586 }
 0x68b   : > { %20986 = vrcp.f32 %v4587_v50  ;;  %v23058_v50 = vsub.f32 %v15586_v24, %v6426_v63 }
 0x68d   : > { %v6527_v44 = vand.u32 4294901760, %v23058_v50 }
 0x695   : > { %v20987_v36 = vpop.eup %20986 }
 0x696   : > { %v4599_v26 = vmul.f32 %v20987_v36, %v22944_v25  ;;  %v23060_v36 = vpack.c.bf16 %v6423_v16, %v6420_v43 }
 0x698   : > { %v5052_v57 = vsel %vm4557_vm3, %v4599_v26, 0  ;;  %v23063_v26 = vsub.f32 %v15587_v47, %v6429_v3  ;;  %19497 = vmatpush3.bf16.msra.mxu0 %v23060_v36 }
 0x699   : > { %v5120_v29 = vand.u32 4294901760, %v5052_v57  ;;  %19498 = vmatprep.subr.bf16.mxu0 %v26096_v6 }
 0x69b   : > { %v5121_v39 = vsub.f32 %v5052_v57, %v5120_v29  ;;  %v23065_v57 = vsub.f32 %v15588_v8, %v6432_v10 }
 0x69d   : > { %v5122_v58 = vand.u32 4294901760, %v5121_v39 }
 0x69f   : > { %v5123_v60 = vsub.f32 %v5121_v39, %v5122_v58 }
 0x6a1   : > { %v5124_v12 = vand.u32 4294901760, %v5123_v60  ;;  %v6438_v60 = vand.u32 4294901760, %v23052_v49 }
 0x6a3   : > { %17686 = vmatmul.mubr.f32.vlgmr.msra.gmra.mrb[12].mxu1 %v5124_v12  ;;  %v6534_v12 = vand.u32 4294901760, %v23063_v26 }
 0x6a4   : > { %17689 = vmatpush3.msra.mxu1 %v5135_v13  ;;  %17690 = vmatprep.mubr.msk.f32.mxu1 %vm21344_vm0, %v26106_v19  ;;  %v6541_v13 = vand.u32 4294901760, %v23065_v57 }
 0x6a5   : > { %17693 = vmatprep.subr.mxu1 %v26106_v19 }
 0x6ab   : > { %17691 = vmatmul.mubr.f32.vlgmr.msra.gmra.mrb[12].mxu1 %v5120_v29 }
 0x6ac   : > { %17694 = vmatpush3.msra.mxu1 %v5132_v27  ;;  %17695 = vmatprep.mubr.msk.f32.mxu1 %vm21344_vm0, %v26106_v19  ;;  %v15591_v27 = vld [vmem:[%s21793_s10 + $0x1b8] sm:$0xff] }
 0x6ad   : > { %17698 = vmatprep.subr.mxu1 %v26106_v19 }
 0x6b3   : > { %17696 = vmatmul.mubr.f32.vlgmr.msra.gmra.mrb[12].mxu1 %v5121_v39  ;;  %v6513_v39 = vand.u32 4294901760, %v23054_v54 }
 0x6b4   : > { %17699 = vmatpush3.msra.mxu1 %v5055_v17  ;;  %17700 = vmatprep.mubr.msk.f32.mxu1 %vm21344_vm0, %v26106_v19 }
 0x6b5   : > { %17703 = vmatprep.subr.mxu1 %v26106_v19 }
 0x6b6   : > { %v4590_v33 = vpop.xlane.xlu1 %4589 }
 0x6b7   : > { %20988 = vrcp.f32 %v4590_v33 }
 0x6ba   : > { %v2744_v23 = vpop.permute.xlu1 %2743 }
 0x6bb   : > { %17701 = vmatmul.mubr.f32.vlgmr.msra.gmra.mrb[12].mxu1 %v5122_v58  ;;  %v5504_v9 = vand.u32 4294901760, %v2744_v23 }
 0x6bc   : > { %17704 = vmatpush3.msra.mxu1 %v5133_v18  ;;  %17705 = vmatprep.mubr.msk.f32.mxu1 %vm21344_vm0, %v26106_v19  ;;  %v23069_v18 = vpack.c.bf16 %v6429_v3, %v6426_v63 }
 0x6bd   : > { %17708 = vmatprep.subr.mxu1 %v26106_v19  ;;  %v5581_v48 = vsub.f32 %v2744_v23, %v5504_v9  ;;  %v6441_v23 = vand.u32 4294901760, %v15591_v27 }
 0x6be   : > { %v2747_v51 = vpop.permute.xlu1 %2746  ;;  %19500 = vmatpush3.bf16.msra.mxu0 %v23069_v18 }
 0x6bf   : > { %v5582_v53 = vand.u32 4294901760, %v5581_v48  ;;  %v5953_v56 = vand.u32 4294901760, %v2747_v51  ;;  %19501 = vmatprep.subr.bf16.mxu0 %v26096_v6  ;;  %v23132_v47 = vpack.c.bf16 %v6441_v23, %v6438_v60 }
 0x6c1   : > { %v20989_v40 = vpop.eup %20988  ;;  %v5583_v45 = vsub.f32 %v5581_v48, %v5582_v53  ;;  %v6030_v62 = vsub.f32 %v2747_v51, %v5953_v56 }
 0x6c2   : > { %v4600_v14 = vmul.f32 %v20989_v40, %v22948_v15 }
 0x6c3   : > { %17706 = vmatmul.mubr.f32.vlgmr.msra.gmra.mrb[12].mxu1 %v5120_v29  ;;  %v5584_v2 = vand.u32 4294901760, %v5583_v45  ;;  %v6031_v0 = vand.u32 4294901760, %v6030_v62 }
 0x6c4   : > { %17709 = vmatpush3.msra.mxu1 %v5055_v17  ;;  %17710 = vmatprep.mubr.msk.f32.mxu1 %vm21344_vm0, %v26106_v19  ;;  %v5501_v55 = vsel %vm4557_vm3, %v4600_v14, 0  ;;  %v23056_v17 = vsub.f32 %v15585_v42, %v6423_v16  ;;  %v6528_v14 = vsub.f32 %v23058_v50, %v6527_v44 }
 0x6c5   : > { %17713 = vmatprep.subr.mxu1 %v26106_v19  ;;  %v5569_v52 = vand.u32 4294901760, %v5501_v55  ;;  %v6032_v41 = vsub.f32 %v6030_v62, %v6031_v0 }
 0x6c6   : > { %v6520_v58 = vand.u32 4294901760, %v23056_v17 }
 0x6c7   : > { %v5570_v61 = vsub.f32 %v5501_v55, %v5569_v52  ;;  %v6033_v30 = vand.u32 4294901760, %v6032_v41  ;;  %v6535_v55 = vsub.f32 %v23063_v26, %v6534_v12 }
 0x6c8   : > { %v6521_v40 = vsub.f32 %v23056_v17, %v6520_v58 }
 0x6c9   : > { %v5571_v38 = vand.u32 4294901760, %v5570_v61  ;;  %v6536_v51 = vand.u32 4294901760, %v6535_v55 }
 0x6cb   : > { %17711 = vmatmul.mubr.f32.vlgmr.msra.gmra.mrb[12].mxu1 %v5120_v29  ;;  %v5572_v11 = vsub.f32 %v5570_v61, %v5571_v38 }
 0x6cc   : > { %17714 = vmatpush3.msra.mxu1 %v5504_v9  ;;  %17715 = vmatprep.mubr.msk.f32.mxu1 %vm21344_vm0, %v26106_v19 }
 0x6cd   : > { %17718 = vmatprep.subr.mxu1 %v26106_v19  ;;  %v5573_v4 = vand.u32 4294901760, %v5572_v11  ;;  %v6522_v11 = vand.u32 4294901760, %v6521_v40 }
 0x6cf   : > { %17716 = vmatmul.mubr.f32.vlgmr.msra.gmra.mrb[14].mxu1 %v5573_v4  ;;  %v6529_v4 = vand.u32 4294901760, %v6528_v14 }
 0x6d0   : > { %17719 = vmatpush3.msra.mxu1 %v5584_v2  ;;  %17720 = vmatprep.mubr.msk.f32.mxu1 %vm21344_vm0, %v26106_v19 }
 0x6d1   : > { %17723 = vmatprep.subr.mxu1 %v26106_v19 }
 0x6d7   : > { %17721 = vmatmul.mubr.f32.vlgmr.msra.gmra.mrb[14].mxu1 %v5569_v52 }
 0x6d8   : > { %17724 = vmatpush3.msra.mxu1 %v5581_v48  ;;  %17725 = vmatprep.mubr.msk.f32.mxu1 %vm21344_vm0, %v26106_v19  ;;  %v23090_v48 = vsub.f32 %v23052_v49, %v6438_v60  ;;  %v23144_v49 = vld [vmem:[%s21793_s10 + $0x1f8] sm:$0xff] }
 0x6d9   : > { %17728 = vmatprep.subr.mxu1 %v26106_v19 }
 0x6da   : > { %v6555_v2 = vand.u32 4294901760, %v23090_v48 }
 0x6df   : > { %17726 = vmatmul.mubr.f32.vlgmr.msra.gmra.mrb[14].mxu1 %v5570_v61  ;;  %v23101_v61 = vsub.f32 %v15591_v27, %v6441_v23 }
 0x6e0   : > { %17729 = vmatpush3.msra.mxu1 %v5504_v9  ;;  %17730 = vmatprep.mubr.msk.f32.mxu1 %vm21344_vm0, %v26106_v19 }
 0x6e1   : > { %17733 = vmatprep.subr.mxu1 %v26106_v19 }
 0x6e2   : > { %v4593_v46 = vpop.xlane.xlu0 %4592 }
 0x6e3   : > { %20990 = vrcp.f32 %v4593_v46  ;;  %v15593_v46 = vld [vmem:[%s21793_s10 + $0x1c8] sm:$0xff] }
 0x6e7   : > { %17731 = vmatmul.mubr.f32.vlgmr.msra.gmra.mrb[14].mxu1 %v5571_v38  ;;  %v15592_v38 = vld [vmem:[%s21793_s10 + $0x1c0] sm:$0xff] }
 0x6e8   : > { %17734 = vmatpush3.msra.mxu1 %v5582_v53  ;;  %17735 = vmatprep.mubr.msk.f32.mxu1 %vm21344_vm0, %v26106_v19 }
 0x6e9   : > { %17738 = vmatprep.subr.mxu1 %v26106_v19 }
 0x6ed   : > { %v20991_v37 = vpop.eup %20990 }
 0x6ee   : > { %v4601_v22 = vmul.f32 %v20991_v37, %v22972_v20  ;;  %v6435_v20 = vand.u32 4294901760, %v15589_v5  ;;  %v15594_v37 = vld [vmem:[%s21793_s10 + $0x1d0] sm:$0xff] }
 0x6ef   : > { %17736 = vmatmul.mubr.f32.vlgmr.msra.gmra.mrb[14].mxu1 %v5569_v52  ;;  %v6450_v24 = vand.u32 4294901760, %v15594_v37 }
 0x6f0   : > { %17739 = vmatpush3.msra.mxu1 %v5504_v9  ;;  %17740 = vmatprep.mubr.msk.f32.mxu1 %vm21344_vm0, %v26106_v19  ;;  %v5950_v31 = vsel %vm4557_vm3, %v4601_v22, 0  ;;  %v23067_v29 = vsub.f32 %v15589_v5, %v6435_v20  ;;  %v6514_v9 = vsub.f32 %v23054_v54, %v6513_v39  ;;  %v6556_v22 = vsub.f32 %v23090_v48, %v6555_v2 }
 0x6f1   : > { %17743 = vmatprep.subr.mxu1 %v26106_v19  ;;  %v6018_v25 = vand.u32 4294901760, %v5950_v31  ;;  %v23136_v5 = vsub.f32 %v15594_v37, %v6450_v24 }
 0x6f2   : > { %v6548_v33 = vand.u32 4294901760, %v23067_v29  ;;  %v6515_v45 = vand.u32 4294901760, %v6514_v9  ;;  %v6557_v59 = vand.u32 4294901760, %v6556_v22 }
 0x6f3   : > { %v6019_v21 = vsub.f32 %v5950_v31, %v6018_v25  ;;  %v23113_v31 = vpack.c.bf16 %v6435_v20, %v6432_v10  ;;  %v23141_v20 = vld [vmem:[%s21793_s10 + $0x1f0] sm:$0xff]  ;;  %v6583_v14 = vand.u32 4294901760, %v23136_v5 }
 0x6f4   : > { %v6549_v53 = vsub.f32 %v23067_v29, %v6548_v33 }
 0x6f5   : > { %v6020_v32 = vand.u32 4294901760, %v6019_v21  ;;  %19503 = vmatpush3.bf16.msra.mxu0 %v23113_v31 }
 0x6f6   : > { %v6550_v41 = vand.u32 4294901760, %v6549_v53  ;;  %19504 = vmatprep.subr.bf16.mxu0 %v26096_v6 }
 0x6f7   : > { %17741 = vmatmul.mubr.f32.vlgmr.msra.gmra.mrb[14].mxu1 %v5569_v52  ;;  %v6021_v1 = vsub.f32 %v6019_v21, %v6020_v32  ;;  %v6542_v52 = vsub.f32 %v23065_v57, %v6541_v13 }
 0x6f8   : > { %17744 = vmatpush3.msra.mxu1 %v5953_v56  ;;  %17745 = vmatprep.mubr.msk.f32.mxu1 %vm21344_vm0, %v26106_v19 }
 0x6f9   : > { %17748 = vmatprep.subr.mxu1 %v26106_v19  ;;  %v6022_v15 = vand.u32 4294901760, %v6021_v1  ;;  %19506 = vmatpush3.bf16.msra.mxu0 %v23132_v47 }
 0x6fa   : > { %19507 = vmatprep.subr.bf16.mxu0 %v26096_v6 }
 0x6fb   : > { %17746 = vmatmul.mubr.f32.vlgmr.msra.gmra.mrb[16].mxu1 %v6022_v15  ;;  %v6447_v15 = vand.u32 4294901760, %v15593_v46 }
 0x6fc   : > { %17749 = vmatpush3.msra.mxu1 %v6033_v30  ;;  %17750 = vmatprep.mubr.msk.f32.mxu1 %vm21344_vm0, %v26106_v19  ;;  %v23120_v30 = vld [vmem:[%s21793_s10 + $0x1e0] sm:$0xff] }
 0x6fd   : > { %17753 = vmatprep.subr.mxu1 %v26106_v19  ;;  %v23130_v16 = vsub.f32 %v15593_v46, %v6447_v15  ;;  %v6456_v3 = vand.u32 4294901760, %v23120_v30 }
 0x6ff   : > { %v6576_v9 = vand.u32 4294901760, %v23130_v16  ;;  %v23156_v55 = vsub.f32 %v23120_v30, %v6456_v3 }
 0x701   : > { %v6577_v53 = vsub.f32 %v23130_v16, %v6576_v9  ;;  %v6597_v37 = vand.u32 4294901760, %v23156_v55 }
 0x703   : > { %17751 = vmatmul.mubr.f32.vlgmr.msra.gmra.mrb[16].mxu1 %v6018_v25  ;;  %v6578_v22 = vand.u32 4294901760, %v6577_v53 }
 0x704   : > { %17754 = vmatpush3.msra.mxu1 %v6030_v62  ;;  %17755 = vmatprep.mubr.msk.f32.mxu1 %vm21344_vm0, %v26106_v19  ;;  %v19520_v62 = vpack.c.bf16 %v6522_v11, %v6515_v45  ;;  %v6462_v45 = vand.u32 4294901760, %v23141_v20  ;;  %v6465_v11 = vand.u32 4294901760, %v23144_v49 }
 0x705   : > { %17758 = vmatprep.subr.mxu1 %v26106_v19 }
 0x70b   : > { %17756 = vmatmul.mubr.f32.vlgmr.msra.gmra.mrb[16].mxu1 %v6019_v21 }
 0x70c   : > { %17759 = vmatpush3.msra.mxu1 %v5953_v56  ;;  %17760 = vmatprep.mubr.msk.f32.mxu1 %vm21344_vm0, %v26106_v19 }
 0x70d   : > { %17763 = vmatprep.subr.mxu1 %v26106_v19 }
 0x713   : > { %17761 = vmatmul.mubr.f32.vlgmr.msra.gmra.mrb[16].mxu1 %v6020_v32  ;;  %v6543_v32 = vand.u32 4294901760, %v6542_v52 }
 0x714   : > { %17764 = vmatpush3.msra.mxu1 %v6031_v0  ;;  %17765 = vmatprep.mubr.msk.f32.mxu1 %vm21344_vm0, %v26106_v19  ;;  %v15595_v0 = vld [vmem:[%s21793_s10 + $0x1d8] sm:$0xff] }
 0x715   : > { %17768 = vmatprep.subr.mxu1 %v26106_v19  ;;  %v6453_v63 = vand.u32 4294901760, %v15595_v0  ;;  %v19526_v27 = vpack.c.bf16 %v6550_v41, %v6543_v32 }
 0x717   : > { %v23147_v60 = vsub.f32 %v15595_v0, %v6453_v63  ;;  %v23179_v0 = vsub.f32 %v23141_v20, %v6462_v45  ;;  %v23186_v32 = vpack.c.bf16 %v6453_v63, %v6450_v24 }
 0x71b   : > { %17766 = vmatmul.mubr.f32.vlgmr.msra.gmra.mrb[16].mxu1 %v6018_v25 }
 0x71c   : > { %17769 = vmatpush3.msra.mxu1 %v5953_v56  ;;  %17770 = vmatprep.mubr.msk.f32.mxu1 %vm21344_vm0, %v26106_v19  ;;  %v6562_v56 = vand.u32 4294901760, %v23101_v61 }
 0x71d   : > { %19519 = vmatprep.subr.bf16.mxu1 %v26096_v6 }
 0x71e   : > { %v6563_v1 = vsub.f32 %v23101_v61, %v6562_v56 }
 0x720   : > { %v6564_v43 = vand.u32 4294901760, %v6563_v1  ;;  %v6598_v1 = vsub.f32 %v23156_v55, %v6597_v37 }
 0x723   : > { %17771 = vmatmul.mubr.f32.vlgmr.msra.gmra.mrb[16].mxu1 %v6018_v25  ;;  %v6444_v25 = vand.u32 4294901760, %v15592_v38 }
 0x724   : > { %17840 = vmatprep.mubr.msk.f32.mxu1 %vm21344_vm0, %v26106_v19  ;;  %19521 = vmatpush3.bf16.msra.mxu1 %v19520_v62 }
 0x725   : > { %v23126_v42 = vsub.f32 %v15592_v38, %v6444_v25  ;;  %19522 = vmatprep.subr.bf16.mxu1 %v26096_v6  ;;  %v23149_v23 = vpack.c.bf16 %v6447_v15, %v6444_v25  ;;  %v6590_v38 = vand.u32 4294901760, %v23147_v60 }
 0x727   : > { %v6569_v8 = vand.u32 4294901760, %v23126_v42  ;;  %v6591_v25 = vsub.f32 %v23147_v60, %v6590_v38  ;;  %19509 = vmatpush3.bf16.msra.mxu0 %v23149_v23 }
 0x728   : > { %19510 = vmatprep.subr.bf16.mxu0 %v26096_v6 }
 0x729   : > { %v6570_v40 = vsub.f32 %v23126_v42, %v6569_v8 }
 0x72b   : > { %v6571_v46 = vand.u32 4294901760, %v6570_v40  ;;  %19512 = vmatpush3.bf16.msra.mxu0 %v23186_v32 }
 0x72c   : > { %19513 = vmatprep.subr.bf16.mxu0 %v26096_v6 }
 0x72d   : > { %v19532_v30 = vpack.c.bf16 %v6578_v22, %v6571_v46  ;;  %v23214_v46 = vpack.c.bf16 %v6465_v11, %v6462_v45  ;;  %v19553_v45 = vpack.c.bf16 %v23101_v61, %v23090_v48  ;;  %v15626_v48 = vld [vmem:[%s21793_s10 + $0x2a0] sm:$0xff]  ;;  %v15627_v61 = vld [vmem:[%s21793_s10 + $0x2a8] sm:$0xff] }
 0x731   : > { %v23042_v34 = vpop.f32.mrb[10].mxu1 }
 0x732   : > { %v17682_v35 = vpop.f32.mrb[11].mxu1 }
 0x733   : > { %v23123_v35 = vld [vmem:[%s21793_s10 + $0x1e8] sm:$0xff] }
 0x734   : > { %v6459_v10 = vand.u32 4294901760, %v23123_v35 }
 0x736   : > { %v23159_v52 = vsub.f32 %v23123_v35, %v6459_v10  ;;  %v6592_v35 = vand.u32 4294901760, %v6591_v25 }
 0x738   : > { %v6604_v62 = vand.u32 4294901760, %v23159_v52 }
 0x73a   : > { %v6605_v15 = vsub.f32 %v23159_v52, %v6604_v62 }
 0x79e   : > { %v5496_v28 = vpop.f32.mrb[12].mxu1 }
 0x79f   : > { %6399 = vrot.lane.b32.xlu1 %v5496_v28, %s21348_s7  ;;  %v17712_v7 = vpop.f32.mrb[13].mxu1 }
 0x7a0   : > { %v19523_v7 = vpack.c.bf16 %v6536_v51, %v6529_v4  ;;  %v19529_v4 = vpack.c.bf16 %v6564_v43, %v6557_v59  ;;  %v6584_v51 = vsub.f32 %v23136_v5, %v6583_v14  ;;  %v6599_v59 = vand.u32 4294901760, %v6598_v1 }
 0x7a1   : > { %v6606_v43 = vand.u32 4294901760, %v6605_v15  ;;  %v19562_v1 = vpack.c.bf16 %v23159_v52, %v23156_v55 }
 0x7a2   : > { %19524 = vmatpush3.bf16.msra.mxu1 %v19523_v7  ;;  %v6585_v41 = vand.u32 4294901760, %v6584_v51  ;;  %v19544_v51 = vpack.c.bf16 %v23056_v17, %v23054_v54  ;;  %v19598_v54 = vpack.c.bf16 %v6548_v33, %v6541_v13  ;;  %v19601_v17 = vpack.c.bf16 %v6562_v56, %v6555_v2  ;;  %v15625_v13 = vld [vmem:[%s21793_s10 + $0x298] sm:$0xff] }
 0x7a3   : > { %19525 = vmatprep.subr.bf16.mxu1 %v26096_v6  ;;  %v7816_v2 = vand.u32 4294901760, %v15625_v13  ;;  %v7819_v56 = vand.u32 4294901760, %v15626_v48 }
 0x7a4   : > { %v19535_v24 = vpack.c.bf16 %v6592_v35, %v6585_v41  ;;  %v19559_v41 = vpack.c.bf16 %v23147_v60, %v23136_v5 }
 0x7a5   : > { %v23351_v5 = vsub.f32 %v15625_v13, %v7816_v2 }
 0x7a6   : > { %19527 = vmatpush3.bf16.msra.mxu1 %v19526_v27 }
 0x7a7   : > { %19528 = vmatprep.subr.bf16.mxu1 %v26096_v6 }
 0x7aa   : > { %19530 = vmatpush3.bf16.msra.mxu1 %v19529_v4  ;;  %v23210_v4 = vpack.c.bf16 %v6459_v10, %v6456_v3  ;;  %v19547_v3 = vpack.c.bf16 %v23063_v26, %v23058_v50  ;;  %v19550_v10 = vpack.c.bf16 %v23067_v29, %v23065_v57  ;;  %v19604_v50 = vpack.c.bf16 %v6576_v9, %v6569_v8 }
 0x7ab   : > { %19531 = vmatprep.subr.bf16.mxu1 %v26096_v6  ;;  %v19607_v26 = vpack.c.bf16 %v6590_v38, %v6583_v14  ;;  %v19610_v57 = vpack.c.bf16 %v6604_v62, %v6597_v37  ;;  %v23353_v9 = vsub.f32 %v15626_v48, %v7819_v56  ;;  %v15603_v38 = vld [vmem:[%s21799_s1 + $0x3] ss:$0 sm:$0xff] }
 0x7ac   : > { %19515 = vmatpush3.bf16.msra.mxu0 %v23210_v4 }
 0x7ad   : > { %19516 = vmatprep.subr.bf16.mxu0 %v26096_v6 }
 0x7ae   : > { %19533 = vmatpush3.bf16.msra.mxu1 %v19532_v30 }
 0x7af   : > { %19534 = vmatprep.subr.bf16.mxu1 %v26096_v6 }
 0x7b0   : > { %19518 = vmatpush3.bf16.msra.mxu0 %v23214_v46 }
 0x7b1   : > { %19543 = vmatprep.subr.bf16.mxu0 %v26096_v6 }
 0x7b2   : > { %19536 = vmatpush3.bf16.msra.mxu1 %v19535_v24 }
 0x7b3   : > { %19537 = vmatprep.subr.bf16.mxu1 %v26096_v6 }
 0x7ca   : > { %v5945_v21 = vpop.f32.mrb[14].mxu1 }
 0x7cb   : > { %6403 = vrot.lane.b32.xlu1 %v5945_v21, %s21346_s4  ;;  %v17742_v28 = vpop.f32.mrb[15].mxu1  ;;  %v23182_v21 = vsub.f32 %v23144_v49, %v6465_v11  ;;  %v19538_v49 = vpack.c.bf16 %v6606_v43, %v6599_v59  ;;  %v19556_v11 = vpack.c.bf16 %v23130_v16, %v23126_v42 }
 0x7cc   : > { %v6611_v28 = vand.u32 4294901760, %v23179_v0 }
 0x7cd   : > { %v6618_v7 = vand.u32 4294901760, %v23182_v21  ;;  %19539 = vmatpush3.bf16.msra.mxu1 %v19538_v49  ;;  %v19565_v15 = vpack.c.bf16 %v23182_v21, %v23179_v0 }
 0x7ce   : > { %v6612_v63 = vsub.f32 %v23179_v0, %v6611_v28  ;;  %19540 = vmatprep.subr.bf16.mxu1 %v26096_v6 }
 0x7cf   : > { %v6619_v20 = vsub.f32 %v23182_v21, %v6618_v7  ;;  %v19613_v29 = vpack.c.bf16 %v6618_v7, %v6611_v28 }
 0x7d0   : > { %v6613_v27 = vand.u32 4294901760, %v6612_v63 }
 0x7d1   : > { %v6620_v40 = vand.u32 4294901760, %v6619_v20 }
 0x7d3   : > { %v19541_v53 = vpack.c.bf16 %v6620_v40, %v6613_v27 }
 0x7d5   : > { %19542 = vmatpush3.bf16.msra.mxu1 %v19541_v53  ;;  %v19592_v53 = vpack.c.bf16 %v6520_v58, %v6513_v39  ;;  %v15623_v39 = vld [vmem:[%s21793_s10 + $0x288] sm:$0xff]  ;;  %v15624_v58 = vld [vmem:[%s21793_s10 + $0x290] sm:$0xff] }
 0x7d6   : > { %19567 = vmatprep.subr.bf16.mxu1 %v26096_v6  ;;  %v7813_v33 = vand.u32 4294901760, %v15624_v58 }
 0x7d8   : > { %v23349_v8 = vsub.f32 %v15624_v58, %v7813_v33  ;;  %v23356_v60 = vpack.c.bf16 %v7816_v2, %v7813_v33 }
 0x7da   : > { %v7914_v33 = vand.u32 4294901760, %v23349_v8 }
 0x7f6   : > { %v6394_v22 = vpop.f32.mrb[16].mxu1 }
 0x7f7   : > { %6407 = vrot.lane.b32.xlu1 %v6394_v22, %s21347_s5  ;;  %v17772_v25 = vpop.f32.mrb[17].mxu1 }
 0x811   : > { %v6400_v30 = vpop.permute.xlu1 %6399 }
 0x812   : > { %v6410_v59 = vsel %vm2749_vm1, %v23042_v34, %v6400_v30  ;;  %v15629_v30 = vld [vmem:[%s21793_s10 + $0x2b8] sm:$0xff] }
 0x83d   : > { %v6404_v35 = vpop.permute.xlu1 %6403 }
 0x83e   : > { %v6412_v24 = vsel %vm6411_vm4, %v6410_v59, %v6404_v35  ;;  %v7828_v59 = vand.u32 4294901760, %v15629_v30 }
 0x840   : > { %v23405_v2 = vsub.f32 %v15629_v30, %v7828_v59 }
 0x842   : > { %v7949_v30 = vand.u32 4294901760, %v23405_v2 }
 0x869   : > { %v6408_v43 = vpop.permute.xlu1 %6407 }
 0x86a   : > { %v6414_v63 = vsel %vm6413_vm5, %v6412_v24, %v6408_v43  ;;  %v15630_v43 = vld [vmem:[%s21793_s10 + $0x2c0] sm:$0xff] }
 0x86b   : > { %v23239_v20 = vand.u32 4294901760, %v6414_v63 }
 0x86d   : > { %v6501_v49 = vsub.f32 %v6414_v63, %v23239_v20  ;;  %17841 = vmatmul.mubr.f32.vlgmr.msra.gmra.mrb[18].mxu1 %v23239_v20  ;;  %v15631_v63 = vld [vmem:[%s21793_s10 + $0x2c8] sm:$0xff] }
 0x86e   : > { %19569 = vmatpush3.bf16.msra.mxu1 %v23060_v36  ;;  %17910 = vmatprep.mubr.msk.f32.mxu1 %vm21344_vm0, %v26106_v19 }
 0x86f   : > { %v6502_v27 = vand.u32 4294901760, %v6501_v49  ;;  %19570 = vmatprep.subr.bf16.mxu1 %v26096_v6 }
 0x871   : > { %v6503_v34 = vsub.f32 %v6501_v49, %v6502_v27 }
 0x872   : > { %19572 = vmatpush3.bf16.msra.mxu1 %v23069_v18 }
 0x873   : > { %19573 = vmatprep.subr.bf16.mxu1 %v26096_v6  ;;  %v6504_v40 = vand.u32 4294901760, %v6503_v34  ;;  %v15632_v34 = vld [vmem:[%s21793_s10 + $0x2d0] sm:$0xff] }
 0x875   : > { %17806 = vmatmul.mubr.f32.vlgmr.msra.gmra.mrb[4].mxu0 %v6504_v40  ;;  %v15633_v40 = vld [vmem:[%s21793_s10 + $0x2d8] sm:$0xff] }
 0x876   : > { %19545 = vmatpush3.bf16.msra.mxu0 %v19544_v51  ;;  %19575 = vmatpush3.bf16.msra.mxu1 %v23113_v31 }
 0x877   : > { %19546 = vmatprep.subr.bf16.mxu0 %v26096_v6  ;;  %19576 = vmatprep.subr.bf16.mxu1 %v26096_v6 }
 0x878   : > { %17875 = vmatprep.mubr.msk.f32.mxu0 %vm21344_vm0, %v26106_v19 }
 0x87a   : > { %19548 = vmatpush3.bf16.msra.mxu0 %v19547_v3  ;;  %19578 = vmatpush3.bf16.msra.mxu1 %v23132_v47 }
 0x87b   : > { %19549 = vmatprep.subr.bf16.mxu0 %v26096_v6  ;;  %19579 = vmatprep.subr.bf16.mxu1 %v26096_v6 }
 0x87e   : > { %19551 = vmatpush3.bf16.msra.mxu0 %v19550_v10  ;;  %19581 = vmatpush3.bf16.msra.mxu1 %v23149_v23 }
 0x87f   : > { %19552 = vmatprep.subr.bf16.mxu0 %v26096_v6  ;;  %19582 = vmatprep.subr.bf16.mxu1 %v26096_v6 }
 0x882   : > { %19554 = vmatpush3.bf16.msra.mxu0 %v19553_v45  ;;  %19584 = vmatpush3.bf16.msra.mxu1 %v23186_v32 }
 0x883   : > { %19555 = vmatprep.subr.bf16.mxu0 %v26096_v6  ;;  %19585 = vmatprep.subr.bf16.mxu1 %v26096_v6 }
 0x886   : > { %19557 = vmatpush3.bf16.msra.mxu0 %v19556_v11  ;;  %19587 = vmatpush3.bf16.msra.mxu1 %v23210_v4 }
 0x887   : > { %19558 = vmatprep.subr.bf16.mxu0 %v26096_v6  ;;  %19588 = vmatprep.subr.bf16.mxu1 %v26096_v6 }
 0x88a   : > { %19560 = vmatpush3.bf16.msra.mxu0 %v19559_v41  ;;  %19590 = vmatpush3.bf16.msra.mxu1 %v23214_v46  ;;  %v21012_v41 = vld [vmem:[#allocation2] sm:$0xff] }
 0x88b   : > { %19561 = vmatprep.subr.bf16.mxu0 %v26096_v6  ;;  %19615 = vmatprep.subr.bf16.mxu1 %v26096_v6 }
 0x88d   : > { %17911 = vmatmul.mubr.f32.vlgmr.msra.gmra.mrb[20].mxu1 %v6502_v27 }
 0x88e   : > { %19563 = vmatpush3.bf16.msra.mxu0 %v19562_v1  ;;  %19617 = vmatpush3.bf16.msra.mxu1 %v23060_v36  ;;  %v19595_v36 = vpack.c.bf16 %v6534_v12, %v6527_v44  ;;  %v7810_v12 = vand.u32 4294901760, %v15623_v39 }
 0x88f   : > { %19564 = vmatprep.subr.bf16.mxu0 %v26096_v6  ;;  %19618 = vmatprep.subr.bf16.mxu1 %v26096_v6 }
 0x890   : > { %17980 = vmatprep.mubr.msk.f32.mxu1 %vm21344_vm0, %v26106_v19 }
 0x892   : > { %19566 = vmatpush3.bf16.msra.mxu0 %v19565_v15  ;;  %19620 = vmatpush3.bf16.msra.mxu1 %v23069_v18  ;;  %v15622_v18 = vld [vmem:[%s21793_s10 + $0x280] sm:$0xff]  ;;  %v15628_v15 = vld [vmem:[%s21793_s10 + $0x2b0] sm:$0xff] }
 0x893   : > { %19591 = vmatprep.subr.bf16.mxu0 %v26096_v6  ;;  %19621 = vmatprep.subr.bf16.mxu1 %v26096_v6  ;;  %v7807_v44 = vand.u32 4294901760, %v15622_v18  ;;  %v7825_v35 = vand.u32 4294901760, %v15628_v15 }
 0x895   : > { %17876 = vmatmul.mubr.f32.vlgmr.msra.gmra.mrb[6].mxu0 %v6501_v49  ;;  %v23343_v42 = vpack.c.bf16 %v7810_v12, %v7807_v44  ;;  %v23345_v16 = vsub.f32 %v15622_v18, %v7807_v44  ;;  %v23373_v24 = vpack.c.bf16 %v7828_v59, %v7825_v35  ;;  %v7834_v49 = vand.u32 4294901760, %v15631_v63  ;;  %v15636_v18 = vld [vmem:[%s21793_s10 + $0x2f0] sm:$0xff] }
 0x896   : > { %19593 = vmatpush3.bf16.msra.mxu0 %v19592_v53  ;;  %19623 = vmatpush3.bf16.msra.mxu1 %v23113_v31  ;;  %v7822_v31 = vand.u32 4294901760, %v15627_v61  ;;  %v15634_v53 = vld [vmem:[%s21793_s10 + $0x2e0] sm:$0xff] }
 0x897   : > { %19594 = vmatprep.subr.bf16.mxu0 %v26096_v6  ;;  %19624 = vmatprep.subr.bf16.mxu1 %v26096_v6 }
 0x898   : > { %17945 = vmatprep.mubr.msk.f32.mxu0 %vm21344_vm0, %v26106_v19  ;;  %v23362_v14 = vpack.c.bf16 %v7822_v31, %v7819_v56  ;;  %v7849_v56 = vand.u32 4294901760, %v15636_v18 }
 0x89a   : > { %19596 = vmatpush3.bf16.msra.mxu0 %v19595_v36  ;;  %19626 = vmatpush3.bf16.msra.mxu1 %v23132_v47  ;;  %v23347_v47 = vsub.f32 %v15623_v39, %v7810_v12  ;;  %v7900_v36 = vand.u32 4294901760, %v23345_v16  ;;  %v15637_v39 = vld [vmem:[%s21793_s10 + $0x2f8] sm:$0xff]  ;;  %v691_v12 = vld [vmem:[%s26169_s22] sm:$0xff] }
 0x89b   : > { %19597 = vmatprep.subr.bf16.mxu0 %v26096_v6  ;;  %19627 = vmatprep.subr.bf16.mxu1 %v26096_v6 }
 0x89c   : > { %v7901_v13 = vsub.f32 %v23345_v16, %v7900_v36 }
 0x89e   : > { %19599 = vmatpush3.bf16.msra.mxu0 %v19598_v54  ;;  %19629 = vmatpush3.bf16.msra.mxu1 %v23149_v23  ;;  %v23358_v23 = vsub.f32 %v15627_v61, %v7822_v31  ;;  %v7907_v54 = vand.u32 4294901760, %v23347_v47  ;;  %v23403_v61 = vsub.f32 %v15628_v15, %v7825_v35  ;;  %v7852_v31 = vand.u32 4294901760, %v15637_v39 }
 0x89f   : > { %19600 = vmatprep.subr.bf16.mxu0 %v26096_v6  ;;  %19630 = vmatprep.subr.bf16.mxu1 %v26096_v6 }
 0x8a2   : > { %19602 = vmatpush3.bf16.msra.mxu0 %v19601_v17  ;;  %19632 = vmatpush3.bf16.msra.mxu1 %v23186_v32 }
 0x8a3   : > { %19603 = vmatprep.subr.bf16.mxu0 %v26096_v6  ;;  %19633 = vmatprep.subr.bf16.mxu1 %v26096_v6 }
 0x8a6   : > { %19605 = vmatpush3.bf16.msra.mxu0 %v19604_v50  ;;  %19635 = vmatpush3.bf16.msra.mxu1 %v23210_v4  ;;  %v7837_v50 = vand.u32 4294901760, %v15632_v34 }
 0x8a7   : > { %19606 = vmatprep.subr.bf16.mxu0 %v26096_v6  ;;  %19636 = vmatprep.subr.bf16.mxu1 %v26096_v6 }
 0x8aa   : > { %19608 = vmatpush3.bf16.msra.mxu0 %v19607_v26  ;;  %19638 = vmatpush3.bf16.msra.mxu1 %v23214_v46  ;;  %v7840_v26 = vand.u32 4294901760, %v15633_v40 }
 0x8ab   : > { %19609 = vmatprep.subr.bf16.mxu0 %v26096_v6  ;;  %19783 = vmatprep.subr.bf16.mxu1 %v26096_v6 }
 0x8ac   : > { %v23401_v48 = vpack.c.bf16 %v7840_v26, %v7837_v50 }
 0x8ad   : > { %17981 = vmatmul.mubr.f32.vlgmr.msra.gmra.mrb[22].mxu1 %v23239_v20 }
 0x8ae   : > { %19611 = vmatpush3.bf16.msra.mxu0 %v19610_v57  ;;  %18225 = vmatprep.mubr.msk.f32.mxu1 %vm21344_vm0, %v26106_v19  ;;  %v15635_v57 = vld [vmem:[%s21793_s10 + $0x2e8] sm:$0xff] }
 0x8af   : > { %19612 = vmatprep.subr.bf16.mxu0 %v26096_v6  ;;  %19785 = vmatpush3.bf16.msra.mxu1 %v23343_v42  ;;  %v7846_v44 = vand.u32 4294901760, %v15635_v57 }
 0x8b0   : > { %19786 = vmatprep.subr.bf16.mxu1 %v26096_v6 }
 0x8b2   : > { %19614 = vmatpush3.bf16.msra.mxu0 %v19613_v29  ;;  %v7843_v29 = vand.u32 4294901760, %v15634_v53 }
 0x8b3   : > { %19639 = vmatprep.subr.bf16.mxu0 %v26096_v6  ;;  %19788 = vmatpush3.bf16.msra.mxu1 %v23356_v60 }
 0x8b4   : > { %19789 = vmatprep.subr.bf16.mxu1 %v26096_v6 }
 0x8b5   : > { %17946 = vmatmul.mubr.f32.vlgmr.msra.gmra.mrb[8].mxu0 %v23239_v20  ;;  %v7831_v20 = vand.u32 4294901760, %v15630_v43 }
 0x8b6   : > { %18015 = vmatprep.mubr.msk.f32.mxu0 %vm21344_vm0, %v26106_v19 }
 0x8b7   : > { %19791 = vmatpush3.bf16.msra.mxu1 %v23362_v14  ;;  %v23379_v27 = vpack.c.bf16 %v7834_v49, %v7831_v20  ;;  %v23436_v35 = vsub.f32 %v15630_v43, %v7831_v20  ;;  %v23450_v43 = vsub.f32 %v15633_v40, %v7840_v26  ;;  %v23452_v20 = vsub.f32 %v15634_v53, %v7843_v29 }
 0x8b8   : > { %19792 = vmatprep.subr.bf16.mxu1 %v26096_v6 }
 0x8bb   : > { %19794 = vmatpush3.bf16.msra.mxu1 %v23373_v24 }
 0x8bc   : > { %19795 = vmatprep.subr.bf16.mxu1 %v26096_v6 }
 0x8bf   : > { %19797 = vmatpush3.bf16.msra.mxu1 %v23379_v27 }
 0x8c0   : > { %19798 = vmatprep.subr.bf16.mxu1 %v26096_v6 }
 0x8c3   : > { %19800 = vmatpush3.bf16.msra.mxu1 %v23401_v48 }
 0x8c4   : > { %19801 = vmatprep.subr.bf16.mxu1 %v26096_v6 }
 0x940   : > { %v6657_v55 = vpop.f32.mrb[18].mxu1 }
 0x941   : > { %v17842_v52 = vpop.f32.mrb[19].mxu1 }
 0x942   : > { %v23409_v52 = vand.u32 4294901760, %v691_v12 }
 0x948   : > { %v6506_v37 = vpop.f32.mrb[4].mxu0 }
 0x949   : > { %v6507_v62 = vadd.f32 %v15603_v38, %v6506_v37  ;;  %v17807_v0 = vpop.f32.mrb[5].mxu0  ;;  %v7902_v38 = vand.u32 4294901760, %v7901_v13  ;;  %v7908_v37 = vsub.f32 %v23347_v47, %v7907_v54 }
 0x94a   : > { %v7921_v0 = vand.u32 4294901760, %v23351_v5 }
 0x94b   : > { %v6658_v21 = vadd.f32 %v6657_v55, %v6507_v62  ;;  %v23407_v55 = vpack.c.bf16 %v7846_v44, %v7843_v29  ;;  %v7915_v62 = vsub.f32 %v23349_v8, %v7914_v33  ;;  %v7984_v29 = vand.u32 4294901760, %v23452_v20 }
 0x94d   : > { %19803 = vmatpush3.bf16.msra.mxu1 %v23407_v55 }
 0x94e   : > { %19804 = vmatprep.subr.bf16.mxu1 %v26096_v6 }
 0x960   : > { %v6850_v32 = vpop.f32.mrb[20].mxu1 }
 0x961   : > { %v17912_v28 = vpop.f32.mrb[21].mxu1 }
 0x962   : > { %v23423_v28 = vsub.f32 %v691_v12, %v23409_v52 }
 0x968   : > { %v6761_v7 = vpop.f32.mrb[6].mxu0 }
 0x969   : > { %v6762_v4 = vadd.f32 %v6761_v7, %v6658_v21  ;;  %v17877_v46 = vpop.f32.mrb[7].mxu0  ;;  %v7928_v21 = vand.u32 4294901760, %v23353_v9  ;;  %v7909_v7 = vand.u32 4294901760, %v7908_v37  ;;  %v23441_v37 = vsub.f32 %v15631_v63, %v7834_v49 }
 0x96a   : > { %v7922_v46 = vsub.f32 %v23351_v5, %v7921_v0  ;;  %v23456_v63 = vsub.f32 %v15635_v57, %v7846_v44  ;;  %v23458_v49 = vsub.f32 %v15636_v18, %v7849_v56  ;;  %v7977_v57 = vand.u32 4294901760, %v23450_v43 }
 0x96b   : > { %v6851_v51 = vadd.f32 %v6850_v32, %v6762_v4  ;;  %v7935_v32 = vand.u32 4294901760, %v23358_v23  ;;  %v7916_v4 = vand.u32 4294901760, %v7915_v62 }
 0x96c   : > { %v7991_v18 = vand.u32 4294901760, %v23456_v63 }
 0x980   : > { %v7056_v22 = vpop.f32.mrb[22].mxu1 }
 0x981   : > { %v17982_v25 = vpop.f32.mrb[23].mxu1 }
 0x982   : > { %v23428_v25 = vpack.c.bf16 %v7852_v31, %v7849_v56  ;;  %v23480_v56 = vpack.c.bf16 %v7907_v54, %v7900_v36 }
 0x984   : > { %19806 = vmatpush3.bf16.msra.mxu1 %v23428_v25 }
 0x985   : > { %19807 = vmatprep.subr.bf16.mxu1 %v26096_v6 }
 0x988   : > { %v6969_v3 = vpop.f32.mrb[8].mxu0 }
 0x989   : > { %v6970_v10 = vadd.f32 %v6969_v3, %v6851_v51  ;;  %v17947_v45 = vpop.f32.mrb[9].mxu0  ;;  %v7929_v51 = vsub.f32 %v23353_v9, %v7928_v21  ;;  %v23431_v3 = vand.u32 4294901760, %v23423_v28 }
 0x98a   : > { %v7942_v45 = vand.u32 4294901760, %v23403_v61 }
 0x98b   : > { %v7057_v11 = vadd.f32 %v7056_v22, %v6970_v10  ;;  %v7936_v22 = vsub.f32 %v23358_v23, %v7935_v32  ;;  %v19808_v10 = vpack.c.bf16 %v7909_v7, %v7902_v38  ;;  %v7890_v59 = vsub.f32 %v23423_v28, %v23431_v3 }
 0x98c   : > { %v7943_v62 = vsub.f32 %v23403_v61, %v7942_v45  ;;  %v7950_v7 = vsub.f32 %v23405_v2, %v7949_v30 }
 0x98d   : > { %v23368_v1 = vadd.f32 %v21012_v41, %v7057_v11  ;;  %v7923_v11 = vand.u32 4294901760, %v7922_v46  ;;  %v7930_v41 = vand.u32 4294901760, %v7929_v51  ;;  %v7937_v15 = vand.u32 4294901760, %v7936_v22 }
 0x98e   : > { %v23443_v38 = vand.u32 4294901760, %v7890_v59  ;;  %v23448_v46 = vsub.f32 %v15632_v34, %v7837_v50  ;;  %v23460_v51 = vsub.f32 %v15637_v39, %v7852_v31  ;;  %v7963_v34 = vand.u32 4294901760, %v23441_v37  ;;  %v15606_v31 = vld [vmem:[%s21793_s10 + $0x200] sm:$0xff] }
 0x98f   : > { %7063 = vadd.xlane.f32.xlu1 %v23368_v1  ;;  %v19811_v12 = vpack.c.bf16 %v7923_v11, %v7916_v4  ;;  %v19814_v13 = vpack.c.bf16 %v7937_v15, %v7930_v41  ;;  %v7956_v4 = vand.u32 4294901760, %v23436_v35  ;;  %v7944_v40 = vand.u32 4294901760, %v7943_v62 }
 0x990   : > { %18226 = vmatmul.mubr.f32.vlgmr.msra.gmra.mrb[24].mxu1 %v23443_v38  ;;  %v7951_v53 = vand.u32 4294901760, %v7950_v7  ;;  %v7970_v26 = vand.u32 4294901760, %v23448_v46  ;;  %v7998_v39 = vand.u32 4294901760, %v23458_v49  ;;  %v8005_v44 = vand.u32 4294901760, %v23460_v51 }
 0x991   : > { %19809 = vmatpush3.bf16.msra.mxu1 %v19808_v10  ;;  %18260 = vmatprep.mubr.msk.f32.mxu1 %vm21344_vm0, %v26106_v19  ;;  %v7957_v50 = vsub.f32 %v23436_v35, %v7956_v4  ;;  %v15607_v10 = vld [vmem:[%s21793_s10 + $0x208] sm:$0xff]  ;;  %v7964_v11 = vsub.f32 %v23441_v37, %v7963_v34  ;;  %v23487_v41 = vpack.c.bf16 %v7921_v0, %v7914_v33  ;;  %v7161_v54 = vand.u32 4294901760, %v15606_v31 }
 0x992   : > { %19810 = vmatprep.subr.bf16.mxu1 %v26096_v6  ;;  %v23489_v15 = vpack.c.bf16 %v7935_v32, %v7928_v21  ;;  %v23491_v59 = vpack.c.bf16 %v7949_v30, %v7942_v45  ;;  %v23493_v62 = vpack.c.bf16 %v7963_v34, %v7956_v4  ;;  %v23495_v7 = vpack.c.bf16 %v7977_v57, %v7970_v26 }
 0x993   : > { %v23497_v22 = vpack.c.bf16 %v7991_v18, %v7984_v29  ;;  %v23499_v36 = vpack.c.bf16 %v8005_v44, %v7998_v39  ;;  %v7164_v58 = vand.u32 4294901760, %v15607_v10  ;;  %v7971_v33 = vsub.f32 %v23448_v46, %v7970_v26 }
 0x994   : > { %v23505_v21 = vsub.f32 %v15606_v31, %v7161_v54  ;;  %v19817_v45 = vpack.c.bf16 %v7951_v53, %v7944_v40  ;;  %v7958_v30 = vand.u32 4294901760, %v7957_v50  ;;  %v7978_v4 = vsub.f32 %v23450_v43, %v7977_v57 }
 0x995   : > { %19812 = vmatpush3.bf16.msra.mxu1 %v19811_v12  ;;  %v23503_v0 = vpack.c.bf16 %v7164_v58, %v7161_v54  ;;  %v23507_v32 = vsub.f32 %v15607_v10, %v7164_v58  ;;  %v7965_v12 = vand.u32 4294901760, %v7964_v11  ;;  %v7972_v34 = vand.u32 4294901760, %v7971_v33 }
 0x996   : > { %19813 = vmatprep.subr.bf16.mxu1 %v26096_v6  ;;  %v7979_v17 = vand.u32 4294901760, %v7978_v4  ;;  %v7985_v31 = vsub.f32 %v23452_v20, %v7984_v29  ;;  %v7992_v58 = vsub.f32 %v23456_v63, %v7991_v18  ;;  %v8006_v57 = vsub.f32 %v23460_v51, %v8005_v44 }
 0x997   : > { %19641 = vmatpush3.bf16.msra.mxu0 %v23503_v0  ;;  %v19820_v26 = vpack.c.bf16 %v7965_v12, %v7958_v30  ;;  %v26171_v18 = vpack.c.bf16 %v23351_v5, %v23349_v8  ;;  %v19841_v44 = vpack.c.bf16 %v23405_v2, %v23403_v61  ;;  %v19850_v8 = vpack.c.bf16 %v23456_v63, %v23452_v20  ;;  %v15610_v63 = vld [vmem:[%s21793_s10 + $0x220] sm:$0xff]  ;;  %v15616_v30 = vld [vmem:[%s21793_s10 + $0x250] sm:$0xff]  ;;  %v15617_v12 = vld [vmem:[%s21793_s10 + $0x258] sm:$0xff] }
 0x998   : > { %19642 = vmatprep.subr.bf16.mxu0 %v26096_v6  ;;  %v19823_v40 = vpack.c.bf16 %v7979_v17, %v7972_v34  ;;  %v7986_v53 = vand.u32 4294901760, %v7985_v31  ;;  %v7993_v50 = vand.u32 4294901760, %v7992_v58  ;;  %v8007_v54 = vand.u32 4294901760, %v8006_v57 }
 0x999   : > { %19815 = vmatpush3.bf16.msra.mxu1 %v19814_v13  ;;  %v7999_v13 = vsub.f32 %v23458_v49, %v7998_v39  ;;  %v26170_v17 = vpack.c.bf16 %v23347_v47, %v23345_v16  ;;  %v26172_v39 = vpack.c.bf16 %v23358_v23, %v23353_v9  ;;  %v19844_v16 = vpack.c.bf16 %v23441_v37, %v23436_v35  ;;  %v15608_v35 = vld [vmem:[%s21793_s10 + $0x210] sm:$0xff]  ;;  %v15609_v37 = vld [vmem:[%s21793_s10 + $0x218] sm:$0xff] }
 0x99a   : > { %19816 = vmatprep.subr.bf16.mxu1 %v26096_v6  ;;  %v19826_v10 = vpack.c.bf16 %v7993_v50, %v7986_v53  ;;  %v19847_v47 = vpack.c.bf16 %v23450_v43, %v23448_v46  ;;  %v19853_v5 = vpack.c.bf16 %v23460_v51, %v23458_v49  ;;  %v7167_v46 = vand.u32 4294901760, %v15608_v35  ;;  %v15611_v49 = vld [vmem:[%s21793_s10 + $0x228] sm:$0xff]  ;;  %v15620_v53 = vld [vmem:[%s21793_s10 + $0x270] sm:$0xff] }
 0x99b   : > { %v8000_v11 = vand.u32 4294901760, %v7999_v13  ;;  %v7170_v43 = vand.u32 4294901760, %v15609_v37  ;;  %v7173_v51 = vand.u32 4294901760, %v15610_v63  ;;  %v7194_v4 = vand.u32 4294901760, %v15617_v12  ;;  %v15618_v13 = vld [vmem:[%s21793_s10 + $0x260] sm:$0xff] }
 0x99c   : > { %v23630_v34 = vsub.f32 %v15608_v35, %v7167_v46 }
 0x99d   : > { %19818 = vmatpush3.bf16.msra.mxu1 %v19817_v45  ;;  %v19829_v29 = vpack.c.bf16 %v8007_v54, %v8000_v11  ;;  %v23597_v20 = vpack.c.bf16 %v7170_v43, %v7167_v46  ;;  %v23634_v31 = vsub.f32 %v15610_v63, %v7173_v51  ;;  %v15621_v11 = vld [vmem:[%s21793_s10 + $0x278] sm:$0xff] }
 0x99e   : > { %19819 = vmatprep.subr.bf16.mxu1 %v26096_v6  ;;  %v7268_v63 = vand.u32 4294901760, %v23630_v34 }
 0x99f   : > { %19644 = vmatpush3.bf16.msra.mxu0 %v23597_v20 }
 0x9a0   : > { %19645 = vmatprep.subr.bf16.mxu0 %v26096_v6 }
 0x9a1   : > { %19821 = vmatpush3.bf16.msra.mxu1 %v19820_v26  ;;  %v23632_v26 = vsub.f32 %v15609_v37, %v7170_v43 }
 0x9a2   : > { %19822 = vmatprep.subr.bf16.mxu1 %v26096_v6 }
 0x9a5   : > { %19824 = vmatpush3.bf16.msra.mxu1 %v19823_v40  ;;  %v15619_v40 = vld [vmem:[%s21793_s10 + $0x268] sm:$0xff] }
 0x9a6   : > { %19825 = vmatprep.subr.bf16.mxu1 %v26096_v6 }
 0x9a9   : > { %19827 = vmatpush3.bf16.msra.mxu1 %v19826_v10 }
 0x9aa   : > { %19828 = vmatprep.subr.bf16.mxu1 %v26096_v6 }
 0x9ad   : > { %19830 = vmatpush3.bf16.msra.mxu1 %v19829_v29 }
 0x9ae   : > { %19831 = vmatprep.subr.bf16.mxu1 %v26096_v6 }
 0x9b0   : > { %18261 = vmatmul.mubr.f32.vlgmr.msra.gmra.mrb[24].mxu1 %v23409_v52 }
 0x9b1   : > { %19833 = vmatpush3.bf16.msra.mxu1 %v26170_v17  ;;  %18295 = vmatprep.mubr.msk.f32.mxu1 %vm21344_vm0, %v26106_v19  ;;  %v23656_v17 = vsub.f32 %v15617_v12, %v7194_v4 }
 0x9b2   : > { %19834 = vmatprep.subr.bf16.mxu1 %v26096_v6 }
 0x9b5   : > { %19836 = vmatpush3.bf16.msra.mxu1 %v26171_v18  ;;  %v7197_v18 = vand.u32 4294901760, %v15618_v13 }
 0x9b6   : > { %19837 = vmatprep.subr.bf16.mxu1 %v26096_v6 }
 0x9b9   : > { %19839 = vmatpush3.bf16.msra.mxu1 %v26172_v39  ;;  %v7200_v39 = vand.u32 4294901760, %v15619_v40 }
 0x9ba   : > { %19840 = vmatprep.subr.bf16.mxu1 %v26096_v6 }
 0x9bd   : > { %19842 = vmatpush3.bf16.msra.mxu1 %v19841_v44  ;;  %v7203_v44 = vand.u32 4294901760, %v15620_v53 }
 0x9be   : > { %19843 = vmatprep.subr.bf16.mxu1 %v26096_v6 }
 0x9c1   : > { %19845 = vmatpush3.bf16.msra.mxu1 %v19844_v16  ;;  %v23661_v16 = vsub.f32 %v15618_v13, %v7197_v18 }
 0x9c2   : > { %19846 = vmatprep.subr.bf16.mxu1 %v26096_v6 }
 0x9c5   : > { %19848 = vmatpush3.bf16.msra.mxu1 %v19847_v47  ;;  %v7206_v47 = vand.u32 4294901760, %v15621_v11 }
 0x9c6   : > { %19849 = vmatprep.subr.bf16.mxu1 %v26096_v6 }
 0x9c7   : > { %v23677_v35 = vpack.c.bf16 %v7206_v47, %v7203_v44 }
 0x9c9   : > { %19851 = vmatpush3.bf16.msra.mxu1 %v19850_v8  ;;  %v23664_v8 = vpack.c.bf16 %v7200_v39, %v7197_v18 }
 0x9ca   : > { %19852 = vmatprep.subr.bf16.mxu1 %v26096_v6 }
 0x9cd   : > { %19854 = vmatpush3.bf16.msra.mxu1 %v19853_v5  ;;  %v23666_v5 = vsub.f32 %v15619_v40, %v7200_v39 }
 0x9ce   : > { %19855 = vmatprep.subr.bf16.mxu1 %v26096_v6 }
 0x9d0   : > { %18296 = vmatmul.mubr.f32.vlgmr.msra.gmra.mrb[24].mxu1 %v23423_v28 }
 0x9d1   : > { %19857 = vmatpush3.bf16.msra.mxu1 %v23343_v42  ;;  %18330 = vmatprep.mubr.msk.f32.mxu1 %vm21344_vm0, %v26106_v19 }
 0x9d2   : > { %19858 = vmatprep.subr.bf16.mxu1 %v26096_v6 }
 0x9d5   : > { %19860 = vmatpush3.bf16.msra.mxu1 %v23356_v60 }
 0x9d6   : > { %19861 = vmatprep.subr.bf16.mxu1 %v26096_v6 }
 0x9d9   : > { %19863 = vmatpush3.bf16.msra.mxu1 %v23362_v14 }
 0x9da   : > { %19864 = vmatprep.subr.bf16.mxu1 %v26096_v6 }
 0x9dd   : > { %19866 = vmatpush3.bf16.msra.mxu1 %v23373_v24 }
 0x9de   : > { %19867 = vmatprep.subr.bf16.mxu1 %v26096_v6 }
 0x9e1   : > { %19869 = vmatpush3.bf16.msra.mxu1 %v23379_v27 }
 0x9e2   : > { %19870 = vmatprep.subr.bf16.mxu1 %v26096_v6 }
 0x9e5   : > { %19872 = vmatpush3.bf16.msra.mxu1 %v23401_v48 }
 0x9e6   : > { %19873 = vmatprep.subr.bf16.mxu1 %v26096_v6 }
 0x9e9   : > { %19875 = vmatpush3.bf16.msra.mxu1 %v23407_v55 }
 0x9ea   : > { %19876 = vmatprep.subr.bf16.mxu1 %v26096_v6 }
 0x9ed   : > { %19878 = vmatpush3.bf16.msra.mxu1 %v23428_v25 }
 0x9ee   : > { %19879 = vmatprep.subr.bf16.mxu1 %v26096_v6 }
 0x9f0   : > { %18331 = vmatmul.mubr.f32.vlgmr.msra.gmra.mrb[24].mxu1 %v23431_v3 }
 0x9f1   : > { %19881 = vmatpush3.bf16.msra.mxu1 %v23480_v56  ;;  %18365 = vmatprep.mubr.msk.f32.mxu1 %vm21344_vm0, %v26106_v19 }
 0x9f2   : > { %19882 = vmatprep.subr.bf16.mxu1 %v26096_v6 }
 0x9f5   : > { %19884 = vmatpush3.bf16.msra.mxu1 %v23487_v41  ;;  %v15612_v41 = vld [vmem:[%s21793_s10 + $0x230] sm:$0xff] }
 0x9f6   : > { %19885 = vmatprep.subr.bf16.mxu1 %v26096_v6 }
 0x9f9   : > { %19887 = vmatpush3.bf16.msra.mxu1 %v23489_v15  ;;  %v15613_v15 = vld [vmem:[%s21793_s10 + $0x238] sm:$0xff] }
 0x9fa   : > { %19888 = vmatprep.subr.bf16.mxu1 %v26096_v6 }
 0x9fd   : > { %19890 = vmatpush3.bf16.msra.mxu1 %v23491_v59  ;;  %v7182_v59 = vand.u32 4294901760, %v15613_v15 }
 0x9fe   : > { %19891 = vmatprep.subr.bf16.mxu1 %v26096_v6 }
 0xa01   : > { %19893 = vmatpush3.bf16.msra.mxu1 %v23493_v62 }
 0xa02   : > { %19894 = vmatprep.subr.bf16.mxu1 %v26096_v6 }
 0xa05   : > { %19896 = vmatpush3.bf16.msra.mxu1 %v23495_v7  ;;  %v15614_v7 = vld [vmem:[%s21793_s10 + $0x240] sm:$0xff] }
 0xa06   : > { %19897 = vmatprep.subr.bf16.mxu1 %v26096_v6  ;;  %v7185_v33 = vand.u32 4294901760, %v15614_v7 }
 0xa08   : > { %v23646_v57 = vsub.f32 %v15614_v7, %v7185_v33 }
 0xa09   : > { %19899 = vmatpush3.bf16.msra.mxu1 %v23497_v22  ;;  %v7176_v22 = vand.u32 4294901760, %v15611_v49 }
 0xa0a   : > { %19900 = vmatprep.subr.bf16.mxu1 %v26096_v6 }
 0xa0b   : > { %v23606_v56 = vpack.c.bf16 %v7176_v22, %v7173_v51  ;;  %v23636_v58 = vsub.f32 %v15611_v49, %v7176_v22  ;;  %v7275_v49 = vand.u32 4294901760, %v23632_v26  ;;  %v7269_v22 = vsub.f32 %v23630_v34, %v7268_v63 }
 0xa0d   : > { %19902 = vmatpush3.bf16.msra.mxu1 %v23499_v36  ;;  %19647 = vmatpush3.bf16.msra.mxu0 %v23606_v56  ;;  %v15615_v36 = vld [vmem:[%s21793_s10 + $0x248] sm:$0xff] }
 0xa0e   : > { %19903 = vmatprep.subr.bf16.mxu1 %v26096_v6  ;;  %19648 = vmatprep.subr.bf16.mxu0 %v26096_v6 }
 0xa10   : > { %18366 = vmatmul.mubr.f32.vlgmr.msra.gmra.mrb[24].mxu1 %v23409_v52 }
 0xa11   : > { %19905 = vmatpush3.bf16.msra.mxu1 %v23343_v42  ;;  %18400 = vmatprep.mubr.msk.f32.mxu1 %vm21344_vm0, %v26106_v19  ;;  %v7179_v42 = vand.u32 4294901760, %v15612_v41 }
 0xa12   : > { %19906 = vmatprep.subr.bf16.mxu1 %v26096_v6 }
 0xa13   : > { %v23616_v62 = vpack.c.bf16 %v7182_v59, %v7179_v42  ;;  %v23642_v50 = vsub.f32 %v15612_v41, %v7179_v42  ;;  %v7270_v41 = vand.u32 4294901760, %v7269_v22  ;;  %v25851_v42 = vand.u32 4294901760, %v23634_v31 }
 0xa15   : > { %19908 = vmatpush3.bf16.msra.mxu1 %v23356_v60  ;;  %19650 = vmatpush3.bf16.msra.mxu0 %v23616_v62  ;;  %v7188_v60 = vand.u32 4294901760, %v15615_v36 }
 0xa16   : > { %19909 = vmatprep.subr.bf16.mxu1 %v26096_v6  ;;  %19651 = vmatprep.subr.bf16.mxu0 %v26096_v6 }
 0xa17   : > { %v23624_v45 = vpack.c.bf16 %v7188_v60, %v7185_v33  ;;  %v23648_v10 = vsub.f32 %v15615_v36, %v7188_v60  ;;  %v7283_v36 = vsub.f32 %v23634_v31, %v25851_v42 }
 0xa19   : > { %19911 = vmatpush3.bf16.msra.mxu1 %v23362_v14  ;;  %19653 = vmatpush3.bf16.msra.mxu0 %v23624_v45  ;;  %v7191_v14 = vand.u32 4294901760, %v15616_v30  ;;  %v25846_v18 = vand.u32 4294901760, %v23648_v10 }
 0xa1a   : > { %19912 = vmatprep.subr.bf16.mxu1 %v26096_v6  ;;  %19654 = vmatprep.subr.bf16.mxu0 %v26096_v6 }
 0xa1b   : > { %v23652_v54 = vpack.c.bf16 %v7194_v4, %v7191_v14  ;;  %v23654_v29 = vsub.f32 %v15616_v30, %v7191_v14  ;;  %v25849_v30 = vand.u32 4294901760, %v23642_v50 }
 0xa1c   : > { %v7064_v9 = vpop.xlane.xlu1 %7063 }
 0xa1d   : > { %v7065_v23 = vmul.f32 0.0078125, %v7064_v9  ;;  %19914 = vmatpush3.bf16.msra.mxu1 %v23373_v24  ;;  %v23644_v24 = vsub.f32 %v15613_v15, %v7182_v59  ;;  %19656 = vmatpush3.bf16.msra.mxu0 %v23652_v54  ;;  %v23668_v9 = vsub.f32 %v15620_v53, %v7203_v44  ;;  %v25850_v59 = vand.u32 4294901760, %v23636_v58 }
 0xa1e   : > { %19915 = vmatprep.subr.bf16.mxu1 %v26096_v6  ;;  %19657 = vmatprep.subr.bf16.mxu0 %v26096_v6  ;;  %v7297_v4 = vsub.f32 %v23642_v50, %v25849_v30 }
 0xa1f   : > { %v23581_v61 = vsub.f32 %v23368_v1, %v7065_v23  ;;  %v23670_v23 = vsub.f32 %v15621_v11, %v7206_v47  ;;  %v7290_v33 = vsub.f32 %v23636_v58, %v25850_v59  ;;  %v25848_v12 = vand.u32 4294901760, %v23644_v24 }
 0xa20   : > { %v7298_v40 = vand.u32 4294901760, %v7297_v4  ;;  %v25847_v11 = vand.u32 4294901760, %v23646_v57  ;;  %v7318_v47 = vsub.f32 %v23648_v10, %v25846_v18  ;;  %v15605_v18 = vld [vmem:[%s21832_s9 + $0x4] ss:$0 sm:$0xff] }
 0xa21   : > { %v7067_v2 = vmul.f32 %v23581_v61, %v23581_v61  ;;  %19917 = vmatpush3.bf16.msra.mxu1 %v23379_v27  ;;  %v7254_v27 = vand.u32 4294901760, %v23505_v21  ;;  %19659 = vmatpush3.bf16.msra.mxu0 %v23664_v8  ;;  %v7291_v60 = vand.u32 4294901760, %v7290_v33  ;;  %v7304_v13 = vsub.f32 %v23644_v24, %v25848_v12 }
 0xa22   : > { %19918 = vmatprep.subr.bf16.mxu1 %v26096_v6  ;;  %19660 = vmatprep.subr.bf16.mxu0 %v26096_v6  ;;  %v7311_v44 = vsub.f32 %v23646_v57, %v25847_v11  ;;  %v25843_v33 = vand.u32 4294901760, %v23661_v16 }
 0xa23   : > { %7068 = vadd.xlane.f32.xlu0 %v7067_v2  ;;  %v7261_v2 = vand.u32 4294901760, %v23507_v32  ;;  %v7255_v37 = vsub.f32 %v23505_v21, %v7254_v27  ;;  %v7305_v53 = vand.u32 4294901760, %v7304_v13 }
 0xa24   : > { %v7339_v4 = vsub.f32 %v23661_v16, %v25843_v33 }
 0xa25   : > { %19920 = vmatpush3.bf16.msra.mxu1 %v23401_v48  ;;  %v7262_v48 = vsub.f32 %v23507_v32, %v7261_v2  ;;  %v7256_v46 = vand.u32 4294901760, %v7255_v37  ;;  %19662 = vmatpush3.bf16.msra.mxu0 %v23677_v35  ;;  %v19673_v39 = vpack.c.bf16 %v7305_v53, %v7298_v40  ;;  %v7312_v37 = vand.u32 4294901760, %v7311_v44 }
 0xa26   : > { %19921 = vmatprep.subr.bf16.mxu1 %v26096_v6  ;;  %19663 = vmatprep.subr.bf16.mxu0 %v26096_v6  ;;  %v7340_v40 = vand.u32 4294901760, %v7339_v4  ;;  %v25841_v44 = vand.u32 4294901760, %v23668_v9  ;;  %v19688_v4 = vpack.c.bf16 %v23507_v32, %v23505_v21  ;;  %v26173_v21 = vand.u32 4294901760, %v23634_v31 }
 0xa27   : > { %v7263_v43 = vand.u32 4294901760, %v7262_v48  ;;  %v7319_v48 = vand.u32 4294901760, %v7318_v47  ;;  %v25840_v47 = vand.u32 4294901760, %v23670_v23  ;;  %v26174_v32 = vand.u32 4294901760, %v23636_v58 }
 0xa29   : > { %19923 = vmatpush3.bf16.msra.mxu1 %v23407_v55  ;;  %v23692_v51 = vpack.c.bf16 %v7263_v43, %v7256_v46  ;;  %v7276_v55 = vsub.f32 %v23632_v26, %v7275_v49  ;;  %v25845_v46 = vand.u32 4294901760, %v23654_v29  ;;  %v25844_v43 = vand.u32 4294901760, %v23656_v17 }
 0xa2a   : > { %19924 = vmatprep.subr.bf16.mxu1 %v26096_v6  ;;  %v19676_v22 = vpack.c.bf16 %v7319_v48, %v7312_v37  ;;  %v7353_v48 = vsub.f32 %v23668_v9, %v25841_v44 }
 0xa2b   : > { %v7277_v15 = vand.u32 4294901760, %v7276_v55  ;;  %v7325_v55 = vsub.f32 %v23654_v29, %v25845_v46 }
 0xa2d   : > { %19926 = vmatpush3.bf16.msra.mxu1 %v23428_v25  ;;  %v23704_v7 = vpack.c.bf16 %v7277_v15, %v7270_v41  ;;  %v7284_v25 = vand.u32 4294901760, %v7283_v36  ;;  %v7332_v41 = vsub.f32 %v23656_v17, %v25844_v43  ;;  %v7326_v15 = vand.u32 4294901760, %v7325_v55  ;;  %v15604_v43 = vld [vmem:[%s21832_s9 + $0x1] ss:$0 sm:$0xff] }
 0xa2e   : > { %18613 = vmatprep.subr.mxu1 %v26106_v19  ;;  %v7360_v55 = vsub.f32 %v23670_v23, %v25840_v47  ;;  %v19700_v47 = vpack.c.bf16 %v23648_v10, %v23646_v57 }
 0xa2f   : > { %v19670_v14 = vpack.c.bf16 %v7291_v60, %v7284_v25  ;;  %v7333_v36 = vand.u32 4294901760, %v7332_v41  ;;  %v25842_v25 = vand.u32 4294901760, %v23666_v5  ;;  %v7354_v41 = vand.u32 4294901760, %v7353_v48 }
 0xa30   : > { %18401 = vmatmul.mubr.f32.vlgmr.msra.gmra.mrb[24].mxu1 %v23409_v52  ;;  %v19703_v48 = vpack.c.bf16 %v23656_v17, %v23654_v29 }
 0xa31   : > { %18615 = vmatprep.mubr.msk.f32.mxu1 %vm21344_vm0, %v26106_v19  ;;  %v19679_v60 = vpack.c.bf16 %v7333_v36, %v7326_v15  ;;  %v7346_v13 = vsub.f32 %v23666_v5, %v25842_v25  ;;  %v7361_v15 = vand.u32 4294901760, %v7360_v55  ;;  %v19706_v55 = vpack.c.bf16 %v23666_v5, %v23661_v16 }
 0xa33   : > { %v7347_v53 = vand.u32 4294901760, %v7346_v13  ;;  %v19685_v36 = vpack.c.bf16 %v7361_v15, %v7354_v41  ;;  %v19691_v13 = vpack.c.bf16 %v23632_v26, %v23630_v34  ;;  %v19709_v41 = vpack.c.bf16 %v23670_v23, %v23668_v9 }
 0xa34   : > { %v26176_v34 = vand.u32 4294901760, %v23644_v24 }
 0xa35   : > { %v19682_v37 = vpack.c.bf16 %v7347_v53, %v7340_v40  ;;  %v19694_v40 = vpack.c.bf16 %v23636_v58, %v23634_v31  ;;  %v19697_v53 = vpack.c.bf16 %v23644_v24, %v23642_v50  ;;  %v26179_v31 = vand.u32 4294901760, %v23654_v29  ;;  %v15641_v29 = vld [vmem:[%s21793_s10 + $0x318] sm:$0xff] }
 0xa36   : > { %v26180_v58 = vand.u32 4294901760, %v23656_v17  ;;  %v26182_v24 = vand.u32 4294901760, %v23666_v5  ;;  %v15642_v5 = vld [vmem:[%s21793_s10 + $0x320] sm:$0xff] }
 0xab0   : > { %v7069_v15 = vpop.xlane.xlu0 %7068 }
 0xab1   : > { %v7070_v44 = vmul.f32 0.0078125, %v7069_v15 }
 0xab3   : > { %v7071_v25 = vadd.f32 1e-05, %v7070_v44 }
 0xab5   : > { %20992 = vrsqrt.f32 %v7071_v25 }
 0xabf   : > { %v20993_v33 = vpop.eup %20992 }
 0xac0   : > { %v7073_v46 = vmul.f32 %v20993_v33, %v23581_v61  ;;  %v15671_v61 = vld [vmem:[%s21799_s1 + $0x5] ss:$0 sm:$0xff] }
 0xac2   : > { %v7078_v11 = vmul.f32 %v15604_v43, %v7073_v46 }
 0xac4   : > { %v7083_v12 = vadd.f32 %v15605_v18, %v7078_v11  ;;  %v19736_v18 = vpack.c.bf16 %v7261_v2, %v7254_v27  ;;  %v19742_v27 = vpack.c.bf16 %v26174_v32, %v26173_v21  ;;  %v26175_v2 = vand.u32 4294901760, %v23642_v50 }
 0xac5   : > { %v26181_v50 = vand.u32 4294901760, %v23661_v16  ;;  %v8461_v16 = vand.u32 4294901760, %v15641_v29 }
 0xac6   : > { %v23774_v30 = vand.u32 4294901760, %v7083_v12  ;;  %v19745_v26 = vpack.c.bf16 %v26176_v34, %v26175_v2 }
 0xac7   : > { %v19754_v46 = vpack.c.bf16 %v26182_v24, %v26181_v50 }
 0xac8   : > { %v23777_v59 = vsub.f32 %v7083_v12, %v23774_v30 }
 0xaca   : > { %v7243_v42 = vand.u32 4294901760, %v23777_v59 }
 0xacc   : > { %v7244_v15 = vsub.f32 %v23777_v59, %v7243_v42 }
 0xace   : > { %v7245_v44 = vand.u32 4294901760, %v7244_v15 }
 0xad0   : > { %18016 = vmatmul.mubr.f32.vlgmr.msra.gmra.mrb[10].mxu0 %v7245_v44  ;;  %v15650_v44 = vld [vmem:[%s21793_s10 + $0x360] sm:$0xff] }
 0xad1   : > { %19665 = vmatpush3.bf16.msra.mxu0 %v23692_v51  ;;  %18050 = vmatprep.mubr.msk.f32.mxu0 %vm21344_vm0, %v26106_v19 }
 0xad2   : > { %19666 = vmatprep.subr.bf16.mxu0 %v26096_v6 }
 0xad5   : > { %19668 = vmatpush3.bf16.msra.mxu0 %v23704_v7 }
 0xad6   : > { %19669 = vmatprep.subr.bf16.mxu0 %v26096_v6 }
 0xad9   : > { %19671 = vmatpush3.bf16.msra.mxu0 %v19670_v14 }
 0xada   : > { %19672 = vmatprep.subr.bf16.mxu0 %v26096_v6 }
 0xadd   : > { %19674 = vmatpush3.bf16.msra.mxu0 %v19673_v39  ;;  %v19739_v39 = vpack.c.bf16 %v7275_v49, %v7268_v63  ;;  %v26177_v63 = vand.u32 4294901760, %v23646_v57  ;;  %v26178_v49 = vand.u32 4294901760, %v23648_v10  ;;  %v26183_v57 = vand.u32 4294901760, %v23668_v9  ;;  %v15643_v9 = vld [vmem:[%s21793_s10 + $0x328] sm:$0xff] }
 0xade   : > { %19675 = vmatprep.subr.bf16.mxu0 %v26096_v6  ;;  %v26184_v10 = vand.u32 4294901760, %v23670_v23  ;;  %v8464_v23 = vand.u32 4294901760, %v15642_v5 }
 0xae0   : > { %v19757_v43 = vpack.c.bf16 %v26184_v10, %v26183_v57 }
 0xae1   : > { %19677 = vmatpush3.bf16.msra.mxu0 %v19676_v22  ;;  %v15645_v22 = vld [vmem:[%s21793_s10 + $0x338] sm:$0xff] }
 0xae2   : > { %19678 = vmatprep.subr.bf16.mxu0 %v26096_v6  ;;  %v8473_v25 = vand.u32 4294901760, %v15645_v22 }
 0xae5   : > { %19680 = vmatpush3.bf16.msra.mxu0 %v19679_v60 }
 0xae6   : > { %19681 = vmatprep.subr.bf16.mxu0 %v26096_v6 }
 0xae9   : > { %19683 = vmatpush3.bf16.msra.mxu0 %v19682_v37  ;;  %v15646_v37 = vld [vmem:[%s21793_s10 + $0x340] sm:$0xff] }
 0xaea   : > { %19684 = vmatprep.subr.bf16.mxu0 %v26096_v6 }
 0xaed   : > { %19686 = vmatpush3.bf16.msra.mxu0 %v19685_v36  ;;  %v15647_v36 = vld [vmem:[%s21793_s10 + $0x348] sm:$0xff] }
 0xaee   : > { %19687 = vmatprep.subr.bf16.mxu0 %v26096_v6 }
 0xaf0   : > { %18051 = vmatmul.mubr.f32.vlgmr.msra.gmra.mrb[10].mxu0 %v23774_v30 }
 0xaf1   : > { %19689 = vmatpush3.bf16.msra.mxu0 %v19688_v4  ;;  %18085 = vmatprep.mubr.msk.f32.mxu0 %vm21344_vm0, %v26106_v19  ;;  %v8476_v4 = vand.u32 4294901760, %v15646_v37 }
 0xaf2   : > { %19690 = vmatprep.subr.bf16.mxu0 %v26096_v6 }
 0xaf5   : > { %19692 = vmatpush3.bf16.msra.mxu0 %v19691_v13  ;;  %v8479_v13 = vand.u32 4294901760, %v15647_v36 }
 0xaf6   : > { %19693 = vmatprep.subr.bf16.mxu0 %v26096_v6 }
 0xaf9   : > { %19695 = vmatpush3.bf16.msra.mxu0 %v19694_v40  ;;  %v15648_v40 = vld [vmem:[%s21793_s10 + $0x350] sm:$0xff] }
 0xafa   : > { %19696 = vmatprep.subr.bf16.mxu0 %v26096_v6 }
 0xafd   : > { %19698 = vmatpush3.bf16.msra.mxu0 %v19697_v53  ;;  %v15649_v53 = vld [vmem:[%s21793_s10 + $0x358] sm:$0xff] }
 0xafe   : > { %19699 = vmatprep.subr.bf16.mxu0 %v26096_v6 }
 0xb01   : > { %19701 = vmatpush3.bf16.msra.mxu0 %v19700_v47 }
 0xb02   : > { %19702 = vmatprep.subr.bf16.mxu0 %v26096_v6 }
 0xb03   : > { %v8443_v51 = vpop.f32.mrb[24].mxu1 }
 0xb04   : > { %v23822_v7 = vadd.f32 %v15671_v61, %v8443_v51  ;;  %v18402_v12 = vpop.f32.mrb[25].mxu1  ;;  %v15651_v61 = vld [vmem:[%s21793_s10 + $0x368] sm:$0xff]  ;;  %v8488_v51 = vand.u32 4294901760, %v15650_v44 }
 0xb05   : > { %19704 = vmatpush3.bf16.msra.mxu0 %v19703_v48  ;;  %v8482_v48 = vand.u32 4294901760, %v15648_v40  ;;  %v8491_v12 = vand.u32 4294901760, %v15651_v61 }
 0xb06   : > { %19705 = vmatprep.subr.bf16.mxu0 %v26096_v6  ;;  %9100 = vrot.lane.b32.xlu1 %v23822_v7, %s21347_s5  ;;  %v23830_v14 = vsel %vm2749_vm1, %v23822_v7, 0 }
 0xb07   : > { %v23833_v11 = vand.u32 4294901760, %v23830_v14  ;;  %v23955_v34 = vpack.c.bf16 %v8491_v12, %v8488_v51 }
 0xb09   : > { %19707 = vmatpush3.bf16.msra.mxu0 %v19706_v55  ;;  %18614 = vmatpush3.xpose.msra.mxu1 %v23833_v11  ;;  %v8485_v55 = vand.u32 4294901760, %v15649_v53 }
 0xb0a   : > { %19708 = vmatprep.subr.bf16.mxu0 %v26096_v6  ;;  %18618 = vmatprep.subr.mxu1 %v26106_v19 }
 0xb0b   : > { %v23936_v15 = vpack.c.bf16 %v8485_v55, %v8482_v48 }
 0xb0d   : > { %19710 = vmatpush3.bf16.msra.mxu0 %v19709_v41  ;;  %v23933_v41 = vpack.c.bf16 %v8479_v13, %v8476_v4 }
 0xb0e   : > { %19711 = vmatprep.subr.bf16.mxu0 %v26096_v6 }
 0xb10   : > { %18086 = vmatmul.mubr.f32.vlgmr.msra.gmra.mrb[10].mxu0 %v23777_v59  ;;  %v19751_v59 = vpack.c.bf16 %v26180_v58, %v26179_v31 }
 0xb11   : > { %19713 = vmatpush3.bf16.msra.mxu0 %v23503_v0  ;;  %18120 = vmatprep.mubr.msk.f32.mxu0 %vm21344_vm0, %v26106_v19 }
 0xb12   : > { %19714 = vmatprep.subr.bf16.mxu0 %v26096_v6 }
 0xb15   : > { %19716 = vmatpush3.bf16.msra.mxu0 %v23597_v20 }
 0xb16   : > { %19717 = vmatprep.subr.bf16.mxu0 %v26096_v6 }
 0xb19   : > { %19719 = vmatpush3.bf16.msra.mxu0 %v23606_v56 }
 0xb1a   : > { %19720 = vmatprep.subr.bf16.mxu0 %v26096_v6 }
 0xb1d   : > { %19722 = vmatpush3.bf16.msra.mxu0 %v23616_v62 }
 0xb1e   : > { %19723 = vmatprep.subr.bf16.mxu0 %v26096_v6 }
 0xb21   : > { %19725 = vmatpush3.bf16.msra.mxu0 %v23624_v45 }
 0xb22   : > { %19726 = vmatprep.subr.bf16.mxu0 %v26096_v6 }
 0xb25   : > { %19728 = vmatpush3.bf16.msra.mxu0 %v23652_v54 }
 0xb26   : > { %19729 = vmatprep.subr.bf16.mxu0 %v26096_v6 }
 0xb29   : > { %19731 = vmatpush3.bf16.msra.mxu0 %v23664_v8 }
 0xb2a   : > { %19732 = vmatprep.subr.bf16.mxu0 %v26096_v6 }
 0xb2d   : > { %19734 = vmatpush3.bf16.msra.mxu0 %v23677_v35 }
 0xb2e   : > { %19735 = vmatprep.subr.bf16.mxu0 %v26096_v6 }
 0xb30   : > { %18121 = vmatmul.mubr.f32.vlgmr.msra.gmra.mrb[10].mxu0 %v7243_v42  ;;  %v19748_v42 = vpack.c.bf16 %v26178_v49, %v26177_v63  ;;  %v23959_v63 = vsub.f32 %v15641_v29, %v8461_v16  ;;  %v23995_v29 = vsub.f32 %v15647_v36, %v8479_v13 }
 0xb31   : > { %19737 = vmatpush3.bf16.msra.mxu0 %v19736_v18  ;;  %18155 = vmatprep.mubr.msk.f32.mxu0 %vm21344_vm0, %v26106_v19  ;;  %v23943_v18 = vld [vmem:[%s21793_s10 + $0x370] sm:$0xff] }
 0xb32   : > { %19738 = vmatprep.subr.bf16.mxu0 %v26096_v6  ;;  %v8494_v21 = vand.u32 4294901760, %v23943_v18  ;;  %v8566_v24 = vand.u32 4294901760, %v23959_v63 }
 0xb35   : > { %19740 = vmatpush3.bf16.msra.mxu0 %v19739_v39  ;;  %v23946_v39 = vld [vmem:[%s21793_s10 + $0x378] sm:$0xff] }
 0xb36   : > { %19741 = vmatprep.subr.bf16.mxu0 %v26096_v6  ;;  %v8497_v32 = vand.u32 4294901760, %v23946_v39 }
 0xb38   : > { %v23964_v49 = vpack.c.bf16 %v8497_v32, %v8494_v21 }
 0xb39   : > { %19743 = vmatpush3.bf16.msra.mxu0 %v19742_v27 }
 0xb3a   : > { %19744 = vmatprep.subr.bf16.mxu0 %v26096_v6 }
 0xb3d   : > { %19746 = vmatpush3.bf16.msra.mxu0 %v19745_v26 }
 0xb3e   : > { %19747 = vmatprep.subr.bf16.mxu0 %v26096_v6 }
 0xb41   : > { %19749 = vmatpush3.bf16.msra.mxu0 %v19748_v42 }
 0xb42   : > { %19750 = vmatprep.subr.bf16.mxu0 %v26096_v6 }
 0xb45   : > { %19752 = vmatpush3.bf16.msra.mxu0 %v19751_v59 }
 0xb46   : > { %19753 = vmatprep.subr.bf16.mxu0 %v26096_v6 }
 0xb49   : > { %19755 = vmatpush3.bf16.msra.mxu0 %v19754_v46  ;;  %v23978_v46 = vsub.f32 %v15642_v5, %v8464_v23 }
 0xb4a   : > { %19756 = vmatprep.subr.bf16.mxu0 %v26096_v6 }
 0xb4d   : > { %19758 = vmatpush3.bf16.msra.mxu0 %v19757_v43 }
 0xb4e   : > { %19759 = vmatprep.subr.bf16.mxu0 %v26096_v6 }
 0xb50   : > { %18156 = vmatmul.mubr.f32.vlgmr.msra.gmra.mrb[10].mxu0 %v23774_v30 }
 0xb51   : > { %19761 = vmatpush3.bf16.msra.mxu0 %v23503_v0  ;;  %18190 = vmatprep.mubr.msk.f32.mxu0 %vm21344_vm0, %v26106_v19  ;;  %v15638_v0 = vld [vmem:[%s21793_s10 + $0x300] sm:$0xff] }
 0xb52   : > { %19762 = vmatprep.subr.bf16.mxu0 %v26096_v6 }
 0xb55   : > { %19764 = vmatpush3.bf16.msra.mxu0 %v23597_v20  ;;  %v15639_v20 = vld [vmem:[%s21793_s10 + $0x308] sm:$0xff] }
 0xb56   : > { %19765 = vmatprep.subr.bf16.mxu0 %v26096_v6 }
 0xb59   : > { %19767 = vmatpush3.bf16.msra.mxu0 %v23606_v56  ;;  %v8452_v56 = vand.u32 4294901760, %v15638_v0 }
 0xb5a   : > { %19768 = vmatprep.subr.bf16.mxu0 %v26096_v6 }
 0xb5b   : > { %v23951_v27 = vsub.f32 %v15638_v0, %v8452_v56 }
 0xb5d   : > { %19770 = vmatpush3.bf16.msra.mxu0 %v23616_v62  ;;  %v8455_v62 = vand.u32 4294901760, %v15639_v20  ;;  %v8545_v42 = vand.u32 4294901760, %v23951_v27 }
 0xb5e   : > { %19771 = vmatprep.subr.bf16.mxu0 %v26096_v6 }
 0xb5f   : > { %v23953_v2 = vsub.f32 %v15639_v20, %v8455_v62  ;;  %v8546_v58 = vsub.f32 %v23951_v27, %v8545_v42 }
 0xb61   : > { %19773 = vmatpush3.bf16.msra.mxu0 %v23624_v45  ;;  %v23907_v45 = vpack.c.bf16 %v8455_v62, %v8452_v56  ;;  %v8552_v31 = vand.u32 4294901760, %v23953_v2  ;;  %v8547_v43 = vand.u32 4294901760, %v8546_v58  ;;  %v8567_v56 = vsub.f32 %v23959_v63, %v8566_v24 }
 0xb62   : > { %19774 = vmatprep.subr.bf16.mxu0 %v26096_v6  ;;  %v23991_v62 = vsub.f32 %v15645_v22, %v8473_v25 }
 0xb63   : > { %v8553_v59 = vsub.f32 %v23953_v2, %v8552_v31 }
 0xb65   : > { %19776 = vmatpush3.bf16.msra.mxu0 %v23652_v54  ;;  %v15640_v54 = vld [vmem:[%s21793_s10 + $0x310] sm:$0xff]  ;;  %v8554_v0 = vand.u32 4294901760, %v8553_v59  ;;  %v24031_v59 = vsub.f32 %v15650_v44, %v8488_v51  ;;  %v24048_v51 = vsub.f32 %v23946_v39, %v8497_v32 }
 0xb66   : > { %19777 = vmatprep.subr.bf16.mxu0 %v26096_v6  ;;  %v8458_v17 = vand.u32 4294901760, %v15640_v54 }
 0xb67   : > { %v19952_v5 = vpack.c.bf16 %v8554_v0, %v8547_v43  ;;  %v24033_v43 = vsub.f32 %v15651_v61, %v8491_v12 }
 0xb68   : > { %v23957_v26 = vsub.f32 %v15640_v54, %v8458_v17  ;;  %v23993_v54 = vsub.f32 %v15646_v37, %v8476_v4  ;;  %v8608_v37 = vand.u32 4294901760, %v23995_v29 }
 0xb69   : > { %19779 = vmatpush3.bf16.msra.mxu0 %v23664_v8  ;;  %v23913_v8 = vpack.c.bf16 %v8461_v16, %v8458_v17  ;;  %v23997_v17 = vsub.f32 %v15648_v40, %v8482_v48  ;;  %v24000_v16 = vsub.f32 %v15649_v53, %v8485_v55 }
 0xb6a   : > { %19780 = vmatprep.subr.bf16.mxu0 %v26096_v6  ;;  %v8559_v50 = vand.u32 4294901760, %v23957_v26  ;;  %v8609_v58 = vsub.f32 %v23995_v29, %v8608_v37 }
 0xb6b   : > { %v8615_v13 = vand.u32 4294901760, %v23997_v17  ;;  %v8622_v40 = vand.u32 4294901760, %v24000_v16 }
 0xb6c   : > { %v8560_v20 = vsub.f32 %v23957_v26, %v8559_v50 }
 0xb6d   : > { %19782 = vmatpush3.bf16.msra.mxu0 %v23677_v35  ;;  %v8467_v35 = vand.u32 4294901760, %v15643_v9  ;;  %v8616_v44 = vsub.f32 %v23997_v17, %v8615_v13  ;;  %v8623_v61 = vsub.f32 %v24000_v16, %v8622_v40 }
 0xb6e   : > { %19927 = vmatprep.subr.bf16.mxu0 %v26096_v6 }
 0xb6f   : > { %v23921_v60 = vpack.c.bf16 %v8467_v35, %v8464_v23  ;;  %v23980_v57 = vsub.f32 %v15643_v9, %v8467_v35  ;;  %v8561_v9 = vand.u32 4294901760, %v8560_v20  ;;  %v8568_v23 = vand.u32 4294901760, %v8567_v56 }
 0xb70   : > { %18191 = vmatmul.mubr.f32.vlgmr.msra.gmra.mrb[10].mxu0 %v23774_v30  ;;  %v15644_v30 = vld [vmem:[%s21793_s10 + $0x330] sm:$0xff] }
 0xb71   : > { %18435 = vmatprep.mubr.msk.f32.mxu0 %vm21344_vm0, %v26106_v19  ;;  %19929 = vmatpush3.bf16.msra.mxu0 %v23907_v45  ;;  %v8470_v33 = vand.u32 4294901760, %v15644_v30  ;;  %v19955_v35 = vpack.c.bf16 %v8568_v23, %v8561_v9  ;;  %v8580_v22 = vand.u32 4294901760, %v23980_v57  ;;  %v24037_v9 = vsub.f32 %v23943_v18, %v8494_v21 }
 0xb72   : > { %19930 = vmatprep.subr.bf16.mxu0 %v26096_v6  ;;  %v8629_v18 = vand.u32 4294901760, %v24031_v59  ;;  %v8636_v21 = vand.u32 4294901760, %v24033_v43 }
 0xb73   : > { %v23924_v47 = vpack.c.bf16 %v8473_v25, %v8470_v33  ;;  %v23982_v10 = vsub.f32 %v15644_v30, %v8470_v33  ;;  %v8573_v30 = vand.u32 4294901760, %v23978_v46  ;;  %v25852_v25 = vand.u32 4294901760, %v23993_v54 }
 0xb74   : > { %v8581_v4 = vsub.f32 %v23980_v57, %v8580_v22  ;;  %v8637_v39 = vsub.f32 %v24033_v43, %v8636_v21  ;;  %v8643_v32 = vand.u32 4294901760, %v24037_v9 }
 0xb75   : > { %19932 = vmatpush3.bf16.msra.mxu0 %v23913_v8  ;;  %v8587_v33 = vand.u32 4294901760, %v23982_v10  ;;  %v8574_v36 = vsub.f32 %v23978_v46, %v8573_v30  ;;  %v8602_v55 = vsub.f32 %v23993_v54, %v25852_v25 }
 0xb76   : > { %19933 = vmatprep.subr.bf16.mxu0 %v26096_v6  ;;  %v8582_v20 = vand.u32 4294901760, %v8581_v4  ;;  %v8624_v4 = vand.u32 4294901760, %v8623_v61  ;;  %v19979_v61 = vpack.c.bf16 %v23959_v63, %v23957_v26  ;;  %v20039_v63 = vpack.c.bf16 %v8622_v40, %v8615_v13 }
 0xb77   : > { %v8588_v53 = vsub.f32 %v23982_v10, %v8587_v33  ;;  %v8575_v0 = vand.u32 4294901760, %v8574_v36  ;;  %v8603_v25 = vand.u32 4294901760, %v8602_v55  ;;  %v8617_v36 = vand.u32 4294901760, %v8616_v44 }
 0xb78   : > { %v19976_v44 = vpack.c.bf16 %v23953_v2, %v23951_v27  ;;  %v26186_v2 = vand.u32 4294901760, %v23993_v54 }
 0xb79   : > { %19935 = vmatpush3.bf16.msra.mxu0 %v23921_v60  ;;  %v8589_v56 = vand.u32 4294901760, %v8588_v53  ;;  %v19958_v23 = vpack.c.bf16 %v8582_v20, %v8575_v0  ;;  %v8630_v53 = vsub.f32 %v24031_v59, %v8629_v18  ;;  %v19967_v55 = vpack.c.bf16 %v8624_v4, %v8617_v36 }
 0xb7a   : > { %19936 = vmatprep.subr.bf16.mxu0 %v26096_v6  ;;  %v19988_v36 = vpack.c.bf16 %v23995_v29, %v23993_v54  ;;  %v19991_v4 = vpack.c.bf16 %v24000_v16, %v23997_v17  ;;  %v20036_v26 = vpack.c.bf16 %v8608_v37, %v26186_v2 }
 0xb7d   : > { %19938 = vmatpush3.bf16.msra.mxu0 %v23924_v47 }
 0xb7e   : > { %19939 = vmatprep.subr.bf16.mxu0 %v26096_v6 }
 0xb81   : > { %19941 = vmatpush3.bf16.msra.mxu0 %v23933_v41 }
 0xb82   : > { %19942 = vmatprep.subr.bf16.mxu0 %v26096_v6 }
 0xb85   : > { %19944 = vmatpush3.bf16.msra.mxu0 %v23936_v15 }
 0xb86   : > { %19945 = vmatprep.subr.bf16.mxu0 %v26096_v6 }
 0xb89   : > { %19947 = vmatpush3.bf16.msra.mxu0 %v23955_v34 }
 0xb8a   : > { %19948 = vmatprep.subr.bf16.mxu0 %v26096_v6 }
 0xb8d   : > { %19950 = vmatpush3.bf16.msra.mxu0 %v23964_v49 }
 0xb8e   : > { %19951 = vmatprep.subr.bf16.mxu0 %v26096_v6 }
 0xb90   : > { %18436 = vmatmul.mubr.f32.vlgmr.msra.gmra.mrb[12].mxu0 %v23443_v38  ;;  %v25853_v38 = vand.u32 4294901760, %v23991_v62 }
 0xb91   : > { %18470 = vmatprep.mubr.msk.f32.mxu0 %vm21344_vm0, %v26106_v19  ;;  %19953 = vmatpush3.bf16.msra.mxu0 %v19952_v5 }
 0xb92   : > { %19954 = vmatprep.subr.bf16.mxu0 %v26096_v6  ;;  %v8595_v48 = vsub.f32 %v23991_v62, %v25853_v38  ;;  %v8610_v38 = vand.u32 4294901760, %v8609_v58  ;;  %v8644_v58 = vsub.f32 %v24037_v9, %v8643_v32 }
 0xb94   : > { %v8596_v5 = vand.u32 4294901760, %v8595_v48  ;;  %v8650_v48 = vand.u32 4294901760, %v24048_v51 }
 0xb95   : > { %19956 = vmatpush3.bf16.msra.mxu0 %v19955_v35  ;;  %v19964_v35 = vpack.c.bf16 %v8610_v38, %v8603_v25  ;;  %v8631_v38 = vand.u32 4294901760, %v8630_v53  ;;  %v8638_v25 = vand.u32 4294901760, %v8637_v39  ;;  %v19994_v53 = vpack.c.bf16 %v24033_v43, %v24031_v59 }
 0xb96   : > { %19957 = vmatprep.subr.bf16.mxu0 %v26096_v6  ;;  %v19961_v12 = vpack.c.bf16 %v8596_v5, %v8589_v56  ;;  %v8651_v0 = vsub.f32 %v24048_v51, %v8650_v48  ;;  %v8645_v56 = vand.u32 4294901760, %v8644_v58  ;;  %v19997_v39 = vpack.c.bf16 %v24048_v51, %v24037_v9 }
 0xb97   : > { %v19970_v20 = vpack.c.bf16 %v8638_v25, %v8631_v38 }
 0xb98   : > { %v8652_v5 = vand.u32 4294901760, %v8651_v0 }
 0xb99   : > { %19959 = vmatpush3.bf16.msra.mxu0 %v19958_v23 }
 0xb9a   : > { %19960 = vmatprep.subr.bf16.mxu0 %v26096_v6  ;;  %v19973_v23 = vpack.c.bf16 %v8652_v5, %v8645_v56 }
 0xb9d   : > { %19962 = vmatpush3.bf16.msra.mxu0 %v19961_v12  ;;  %v19982_v12 = vpack.c.bf16 %v23980_v57, %v23978_v46 }
 0xb9e   : > { %19963 = vmatprep.subr.bf16.mxu0 %v26096_v6 }
 0xba1   : > { %19965 = vmatpush3.bf16.msra.mxu0 %v19964_v35  ;;  %v19985_v35 = vpack.c.bf16 %v23991_v62, %v23982_v10 }
 0xba2   : > { %19966 = vmatprep.subr.bf16.mxu0 %v26096_v6 }
 0xba5   : > { %19968 = vmatpush3.bf16.msra.mxu0 %v19967_v55  ;;  %v15670_v55 = vld [vmem:[%s21799_s1 + $0x4] ss:$0 sm:$0xff] }
 0xba6   : > { %19969 = vmatprep.subr.bf16.mxu0 %v26096_v6 }
 0xba9   : > { %19971 = vmatpush3.bf16.msra.mxu0 %v19970_v20 }
 0xbaa   : > { %19972 = vmatprep.subr.bf16.mxu0 %v26096_v6 }
 0xbad   : > { %19974 = vmatpush3.bf16.msra.mxu0 %v19973_v23 }
 0xbae   : > { %19975 = vmatprep.subr.bf16.mxu0 %v26096_v6 }
 0xbb0   : > { %18471 = vmatmul.mubr.f32.vlgmr.msra.gmra.mrb[12].mxu0 %v23409_v52 }
 0xbb1   : > { %19977 = vmatpush3.bf16.msra.mxu0 %v19976_v44  ;;  %18505 = vmatprep.mubr.msk.f32.mxu0 %vm21344_vm0, %v26106_v19 }
 0xbb2   : > { %19978 = vmatprep.subr.bf16.mxu0 %v26096_v6 }
 0xbb5   : > { %19980 = vmatpush3.bf16.msra.mxu0 %v19979_v61 }
 0xbb6   : > { %19981 = vmatprep.subr.bf16.mxu0 %v26096_v6 }
 0xbb9   : > { %19983 = vmatpush3.bf16.msra.mxu0 %v19982_v12 }
 0xbba   : > { %19984 = vmatprep.subr.bf16.mxu0 %v26096_v6 }
 0xbbd   : > { %19986 = vmatpush3.bf16.msra.mxu0 %v19985_v35 }
 0xbbe   : > { %19987 = vmatprep.subr.bf16.mxu0 %v26096_v6 }
 0xbc1   : > { %19989 = vmatpush3.bf16.msra.mxu0 %v19988_v36  ;;  %v20024_v36 = vpack.c.bf16 %v8552_v31, %v8545_v42  ;;  %v20042_v42 = vpack.c.bf16 %v8636_v21, %v8629_v18  ;;  %v20045_v31 = vpack.c.bf16 %v8650_v48, %v8643_v32 }
 0xbc2   : > { %19990 = vmatprep.subr.bf16.mxu0 %v26096_v6 }
 0xbc5   : > { %19992 = vmatpush3.bf16.msra.mxu0 %v19991_v4  ;;  %v20027_v4 = vpack.c.bf16 %v8566_v24, %v8559_v50  ;;  %v9101_v50 = vpop.permute.xlu1 %9100 }
 0xbc6   : > { %19993 = vmatprep.subr.bf16.mxu0 %v26096_v6  ;;  %v9568_v24 = vsel %vm2749_vm1, %v9101_v50, 0 }
 0xbc7   : > { %v9571_v46 = vand.u32 4294901760, %v9568_v24 }
 0xbc9   : > { %19995 = vmatpush3.bf16.msra.mxu0 %v19994_v53 }
 0xbca   : > { %19996 = vmatprep.subr.bf16.mxu0 %v26096_v6 }
 0xbcd   : > { %19998 = vmatpush3.bf16.msra.mxu0 %v19997_v39 }
 0xbce   : > { %19999 = vmatprep.subr.bf16.mxu0 %v26096_v6 }
 0xbd0   : > { %18506 = vmatmul.mubr.f32.vlgmr.msra.gmra.mrb[12].mxu0 %v23423_v28  ;;  %v9198_v28 = vsub.f32 %v23830_v14, %v23833_v11 }
 0xbd1   : > { %20001 = vmatpush3.bf16.msra.mxu0 %v23907_v45  ;;  %18540 = vmatprep.mubr.msk.f32.mxu0 %vm21344_vm0, %v26106_v19 }
 0xbd2   : > { %20002 = vmatprep.subr.bf16.mxu0 %v26096_v6  ;;  %v9199_v5 = vand.u32 4294901760, %v9198_v28 }
 0xbd4   : > { %v9200_v44 = vsub.f32 %v9198_v28, %v9199_v5 }
 0xbd5   : > { %20004 = vmatpush3.bf16.msra.mxu0 %v23913_v8 }
 0xbd6   : > { %20005 = vmatprep.subr.bf16.mxu0 %v26096_v6  ;;  %v9201_v35 = vand.u32 4294901760, %v9200_v44  ;;  %v15672_v44 = vld [vmem:[%s21799_s1 + $0x6] ss:$0 sm:$0xff] }
 0xbd9   : > { %20007 = vmatpush3.bf16.msra.mxu0 %v23921_v60 }
 0xbda   : > { %20008 = vmatprep.subr.bf16.mxu0 %v26096_v6 }
 0xbdd   : > { %20010 = vmatpush3.bf16.msra.mxu0 %v23924_v47 }
 0xbde   : > { %20011 = vmatprep.subr.bf16.mxu0 %v26096_v6 }
 0xbe1   : > { %20013 = vmatpush3.bf16.msra.mxu0 %v23933_v41 }
 0xbe2   : > { %20014 = vmatprep.subr.bf16.mxu0 %v26096_v6 }
 0xbe5   : > { %20016 = vmatpush3.bf16.msra.mxu0 %v23936_v15 }
 0xbe6   : > { %20017 = vmatprep.subr.bf16.mxu0 %v26096_v6 }
 0xbe9   : > { %20019 = vmatpush3.bf16.msra.mxu0 %v23955_v34 }
 0xbea   : > { %20020 = vmatprep.subr.bf16.mxu0 %v26096_v6 }
 0xbed   : > { %20022 = vmatpush3.bf16.msra.mxu0 %v23964_v49 }
 0xbee   : > { %20023 = vmatprep.subr.bf16.mxu0 %v26096_v6 }
 0xbf0   : > { %18541 = vmatmul.mubr.f32.vlgmr.msra.gmra.mrb[12].mxu0 %v23431_v3  ;;  %v20030_v3 = vpack.c.bf16 %v8580_v22, %v8573_v30 }
 0xbf1   : > { %20025 = vmatpush3.bf16.msra.mxu0 %v20024_v36  ;;  %18575 = vmatprep.mubr.msk.f32.mxu0 %vm21344_vm0, %v26106_v19 }
 0xbf2   : > { %20026 = vmatprep.subr.bf16.mxu0 %v26096_v6 }
 0xbf5   : > { %20028 = vmatpush3.bf16.msra.mxu0 %v20027_v4 }
 0xbf6   : > { %20029 = vmatprep.subr.bf16.mxu0 %v26096_v6 }
 0xbf9   : > { %20031 = vmatpush3.bf16.msra.mxu0 %v20030_v3 }
 0xbfa   : > { %20032 = vmatprep.subr.bf16.mxu0 %v26096_v6 }
 0xc43   : > { %v7797_v38 = vpop.f32.mrb[10].mxu0 }
 0xc44   : > { %v20602_v25 = vadd.f32 %v15670_v55, %v7797_v38  ;;  %v18192_v58 = vpop.f32.mrb[11].mxu0 }
 0xc46   : > { %v7801_v0 = vmul.f32 0.17677669, %v20602_v25 }
 0xc48   : > { %v9116_v20 = vsel %vm2749_vm1, %v7801_v0, 0  ;;  %9093 = vrot.lane.b32.xlu0 %v7801_v0, %s21347_s5 }
 0xc49   : > { %v24115_v56 = vand.u32 4294901760, %v9116_v20 }
 0xc4b   : > { %v9187_v23 = vsub.f32 %v9116_v20, %v24115_v56  ;;  %v693_v20 = vld [vmem:[%s26187_s25] sm:$0xff] }
 0xc4c   : > { %9095 = vrot.lane.b32.xlu0 %v7801_v0, %s21346_s4  ;;  %vm10916_vm6 = vcmp.gt.f32.partialorder %v693_v20, 0.5 }
 0xc4d   : > { %v9188_v14 = vand.u32 4294901760, %v9187_v23 }
 0xc4f   : > { %v9189_v61 = vsub.f32 %v9187_v23, %v9188_v14 }
 0xc50   : > { %9102 = vrot.lane.b32.xlu0 %v23822_v7, %s21346_s4 }
 0xc51   : > { %v9190_v12 = vand.u32 4294901760, %v9189_v61 }
 0xc53   : > { %18616 = vmatmul.mubr.f32.vlgmr.msra.gmra.mrb[26].mxu1 %v9190_v12 }
 0xc54   : > { %18619 = vmatpush3.xpose.msra.mxu1 %v9201_v35  ;;  %9097 = vrot.lane.b32.xlu0 %v7801_v0, %s21348_s7 }
 0xc55   : > { %18620 = vmatprep.mubr.msk.f32.mxu1 %vm21344_vm0, %v26106_v19  ;;  %18623 = vmatprep.subr.mxu1 %v26106_v19 }
 0xc58   : > { %9104 = vrot.lane.b32.xlu0 %v23822_v7, %s21348_s7  ;;  %v26185_v7 = vand.u32 4294901760, %v23991_v62 }
 0xc5a   : > { %v20033_v27 = vpack.c.bf16 %v26185_v7, %v8587_v33 }
 0xc5b   : > { %18621 = vmatmul.mubr.f32.vlgmr.msra.gmra.mrb[26].mxu1 %v24115_v56 }
 0xc5c   : > { %18624 = vmatpush3.xpose.msra.mxu1 %v9198_v28  ;;  %18625 = vmatprep.mubr.msk.f32.mxu1 %vm21344_vm0, %v26106_v19 }
 0xc5d   : > { %18628 = vmatprep.subr.mxu1 %v26106_v19  ;;  %20034 = vmatpush3.bf16.msra.mxu0 %v20033_v27 }
 0xc5e   : > { %20035 = vmatprep.subr.bf16.mxu0 %v26096_v6 }
 0xc61   : > { %20037 = vmatpush3.bf16.msra.mxu0 %v20036_v26 }
 0xc62   : > { %20038 = vmatprep.subr.bf16.mxu0 %v26096_v6 }
 0xc63   : > { %18626 = vmatmul.mubr.f32.vlgmr.msra.gmra.mrb[26].mxu1 %v9187_v23 }
 0xc64   : > { %18629 = vmatpush3.xpose.msra.mxu1 %v23833_v11  ;;  %18630 = vmatprep.mubr.msk.f32.mxu1 %vm21344_vm0, %v26106_v19 }
 0xc65   : > { %18633 = vmatprep.subr.mxu1 %v26106_v19  ;;  %20040 = vmatpush3.bf16.msra.mxu0 %v20039_v63 }
 0xc66   : > { %20041 = vmatprep.subr.bf16.mxu0 %v26096_v6 }
 0xc69   : > { %20043 = vmatpush3.bf16.msra.mxu0 %v20042_v42 }
 0xc6a   : > { %20044 = vmatprep.subr.bf16.mxu0 %v26096_v6 }
 0xc6b   : > { %18631 = vmatmul.mubr.f32.vlgmr.msra.gmra.mrb[26].mxu1 %v9188_v14 }
 0xc6c   : > { %18634 = vmatpush3.xpose.msra.mxu1 %v9199_v5  ;;  %18635 = vmatprep.mubr.msk.f32.mxu1 %vm21344_vm0, %v26106_v19 }
 0xc6d   : > { %18638 = vmatprep.subr.mxu1 %v26106_v19  ;;  %20046 = vmatpush3.bf16.msra.mxu0 %v20045_v31 }
 0xc6e   : > { %20047 = vmatprep.subr.bf16.mxu0 %v26096_v6 }
 0xc70   : > { %18576 = vmatmul.mubr.f32.vlgmr.msra.gmra.mrb[12].mxu0 %v23409_v52 }
 0xc71   : > { %20049 = vmatpush3.bf16.msra.mxu0 %v23907_v45  ;;  %18610 = vmatprep.mubr.msk.f32.mxu0 %vm21344_vm0, %v26106_v19 }
 0xc72   : > { %20050 = vmatprep.subr.bf16.mxu0 %v26096_v6 }
 0xc73   : > { %18636 = vmatmul.mubr.f32.vlgmr.msra.gmra.mrb[26].mxu1 %v24115_v56 }
 0xc74   : > { %18639 = vmatpush3.xpose.msra.mxu1 %v23833_v11  ;;  %18640 = vmatprep.mubr.msk.f32.mxu1 %vm21344_vm0, %v26106_v19  ;;  %v9648_v11 = vsub.f32 %v9568_v24, %v9571_v46 }
 0xc75   : > { %18643 = vmatprep.subr.mxu1 %v26106_v19  ;;  %20052 = vmatpush3.bf16.msra.mxu0 %v23913_v8 }
 0xc76   : > { %20053 = vmatprep.subr.bf16.mxu0 %v26096_v6 }
 0xc79   : > { %20055 = vmatpush3.bf16.msra.mxu0 %v23921_v60 }
 0xc7a   : > { %20056 = vmatprep.subr.bf16.mxu0 %v26096_v6 }
 0xc7b   : > { %18641 = vmatmul.mubr.f32.vlgmr.msra.gmra.mrb[26].mxu1 %v24115_v56 }
 0xc7c   : > { %18644 = vmatpush3.xpose.msra.mxu1 %v9571_v46  ;;  %18645 = vmatprep.mubr.msk.f32.mxu1 %vm21344_vm0, %v26106_v19 }
 0xc7d   : > { %18648 = vmatprep.subr.mxu1 %v26106_v19  ;;  %20058 = vmatpush3.bf16.msra.mxu0 %v23924_v47  ;;  %v9649_v47 = vand.u32 4294901760, %v9648_v11 }
 0xc7e   : > { %20059 = vmatprep.subr.bf16.mxu0 %v26096_v6 }
 0xc81   : > { %20061 = vmatpush3.bf16.msra.mxu0 %v23933_v41 }
 0xc82   : > { %20062 = vmatprep.subr.bf16.mxu0 %v26096_v6 }
 0xc85   : > { %20064 = vmatpush3.bf16.msra.mxu0 %v23936_v15 }
 0xc86   : > { %20065 = vmatprep.subr.bf16.mxu0 %v26096_v6 }
 0xc89   : > { %20067 = vmatpush3.bf16.msra.mxu0 %v23955_v34  ;;  %v9650_v34 = vsub.f32 %v9648_v11, %v9649_v47 }
 0xc8a   : > { %20068 = vmatprep.subr.bf16.mxu0 %v26096_v6 }
 0xc8b   : > { %v9651_v62 = vand.u32 4294901760, %v9650_v34 }
 0xc8d   : > { %20070 = vmatpush3.bf16.msra.mxu0 %v23964_v49 }
 0xc8e   : > { %20071 = vmatprep.subr.bf16.mxu0 %v26096_v6 }
 0xc90   : > { %18611 = vmatmul.mubr.f32.vlgmr.msra.gmra.mrb[12].mxu0 %v23409_v52 }
 0xc91   : > { %18885 = vmatprep.mubr.msk.f32.mxu0 %vm21344_vm0, %v26106_v19 }
 0xcba   : > { %v9094_v45 = vpop.permute.xlu0 %9093 }
 0xcbb   : > { %v9566_v8 = vsel %vm2749_vm1, %v9094_v45, 0 }
 0xcbc   : > { %v9636_v60 = vand.u32 4294901760, %v9566_v8 }
 0xcbe   : > { %v9637_v41 = vsub.f32 %v9566_v8, %v9636_v60  ;;  %v9096_v52 = vpop.permute.xlu0 %9095 }
 0xcbf   : > { %v10016_v54 = vsel %vm2749_vm1, %v9096_v52, 0 }
 0xcc0   : > { %v9638_v15 = vand.u32 4294901760, %v9637_v41  ;;  %v10086_v17 = vand.u32 4294901760, %v10016_v54 }
 0xcc2   : > { %v9639_v57 = vsub.f32 %v9637_v41, %v9638_v15  ;;  %v9103_v49 = vpop.permute.xlu0 %9102  ;;  %v10087_v30 = vsub.f32 %v10016_v54, %v10086_v17 }
 0xcc3   : > { %v10018_v29 = vsel %vm2749_vm1, %v9103_v49, 0 }
 0xcc4   : > { %v9640_v10 = vand.u32 4294901760, %v9639_v57  ;;  %v10021_v16 = vand.u32 4294901760, %v10018_v29  ;;  %v10088_v33 = vand.u32 4294901760, %v10087_v30 }
 0xcc6   : > { %18646 = vmatmul.mubr.f32.vlgmr.msra.gmra.mrb[28].mxu1 %v9640_v10  ;;  %v10098_v22 = vsub.f32 %v10018_v29, %v10021_v16  ;;  %v10089_v13 = vsub.f32 %v10087_v30, %v10088_v33  ;;  %v9098_v9 = vpop.permute.xlu0 %9097 }
 0xcc7   : > { %18649 = vmatpush3.xpose.msra.mxu1 %v9651_v62  ;;  %18650 = vmatprep.mubr.msk.f32.mxu1 %vm21344_vm0, %v26106_v19  ;;  %v10466_v18 = vsel %vm2749_vm1, %v9098_v9, 0 }
 0xcc8   : > { %18653 = vmatprep.subr.mxu1 %v26106_v19  ;;  %v10099_v37 = vand.u32 4294901760, %v10098_v22  ;;  %v10090_v59 = vand.u32 4294901760, %v10089_v13  ;;  %v10536_v32 = vand.u32 4294901760, %v10466_v18 }
 0xcca   : > { %v10100_v40 = vsub.f32 %v10098_v22, %v10099_v37  ;;  %v9105_v51 = vpop.permute.xlu0 %9104  ;;  %v10537_v53 = vsub.f32 %v10466_v18, %v10536_v32 }
 0xccb   : > { %v10468_v21 = vsel %vm2749_vm1, %v9105_v51, 0 }
 0xccc   : > { %v10101_v43 = vand.u32 4294901760, %v10100_v40  ;;  %v10471_v48 = vand.u32 4294901760, %v10468_v21  ;;  %v10538_v55 = vand.u32 4294901760, %v10537_v53 }
 0xcce   : > { %18651 = vmatmul.mubr.f32.vlgmr.msra.gmra.mrb[28].mxu1 %v9636_v60  ;;  %v10548_v39 = vsub.f32 %v10468_v21, %v10471_v48  ;;  %v10539_v25 = vsub.f32 %v10537_v53, %v10538_v55 }
 0xccf   : > { %18654 = vmatpush3.xpose.msra.mxu1 %v9648_v11  ;;  %18655 = vmatprep.mubr.msk.f32.mxu1 %vm21344_vm0, %v26106_v19 }
 0xcd0   : > { %18658 = vmatprep.subr.mxu1 %v26106_v19  ;;  %v10549_v38 = vand.u32 4294901760, %v10548_v39  ;;  %v10540_v28 = vand.u32 4294901760, %v10539_v25 }
 0xcd2   : > { %v10550_v58 = vsub.f32 %v10548_v39, %v10549_v38 }
 0xcd4   : > { %v10551_v0 = vand.u32 4294901760, %v10550_v58 }
 0xcd6   : > { %18656 = vmatmul.mubr.f32.vlgmr.msra.gmra.mrb[28].mxu1 %v9637_v41 }
 0xcd7   : > { %18659 = vmatpush3.xpose.msra.mxu1 %v9571_v46  ;;  %18660 = vmatprep.mubr.msk.f32.mxu1 %vm21344_vm0, %v26106_v19 }
 0xcd8   : > { %18663 = vmatprep.subr.mxu1 %v26106_v19 }
 0xcde   : > { %18661 = vmatmul.mubr.f32.vlgmr.msra.gmra.mrb[28].mxu1 %v9638_v15 }
 0xcdf   : > { %18664 = vmatpush3.xpose.msra.mxu1 %v9649_v47  ;;  %18665 = vmatprep.mubr.msk.f32.mxu1 %vm21344_vm0, %v26106_v19 }
 0xce0   : > { %18668 = vmatprep.subr.mxu1 %v26106_v19 }
 0xce6   : > { %18666 = vmatmul.mubr.f32.vlgmr.msra.gmra.mrb[28].mxu1 %v9636_v60 }
 0xce7   : > { %18669 = vmatpush3.xpose.msra.mxu1 %v9571_v46  ;;  %18670 = vmatprep.mubr.msk.f32.mxu1 %vm21344_vm0, %v26106_v19 }
 0xce8   : > { %18673 = vmatprep.subr.mxu1 %v26106_v19 }
 0xcee   : > { %18671 = vmatmul.mubr.f32.vlgmr.msra.gmra.mrb[28].mxu1 %v9636_v60 }
 0xcef   : > { %18674 = vmatpush3.xpose.msra.mxu1 %v10021_v16  ;;  %18675 = vmatprep.mubr.msk.f32.mxu1 %vm21344_vm0, %v26106_v19 }
 0xcf0   : > { %18678 = vmatprep.subr.mxu1 %v26106_v19 }
 0xcf2   : > { %18676 = vmatmul.mubr.f32.vlgmr.msra.gmra.mrb[30].mxu1 %v10090_v59 }
 0xcf3   : > { %18679 = vmatpush3.xpose.msra.mxu1 %v10101_v43  ;;  %18680 = vmatprep.mubr.msk.f32.mxu1 %vm21344_vm0, %v26106_v19 }
 0xcf4   : > { %18683 = vmatprep.subr.mxu1 %v26106_v19 }
 0xcfa   : > { %18681 = vmatmul.mubr.f32.vlgmr.msra.gmra.mrb[30].mxu1 %v10086_v17 }
 0xcfb   : > { %18684 = vmatpush3.xpose.msra.mxu1 %v10098_v22  ;;  %18685 = vmatprep.mubr.msk.f32.mxu1 %vm21344_vm0, %v26106_v19 }
 0xcfc   : > { %18688 = vmatprep.subr.mxu1 %v26106_v19 }
 0xd02   : > { %18686 = vmatmul.mubr.f32.vlgmr.msra.gmra.mrb[30].mxu1 %v10087_v30 }
 0xd03   : > { %18689 = vmatpush3.xpose.msra.mxu1 %v10021_v16  ;;  %18690 = vmatprep.mubr.msk.f32.mxu1 %vm21344_vm0, %v26106_v19 }
 0xd04   : > { %18693 = vmatprep.subr.mxu1 %v26106_v19 }
 0xd0a   : > { %18691 = vmatmul.mubr.f32.vlgmr.msra.gmra.mrb[30].mxu1 %v10088_v33 }
 0xd0b   : > { %18694 = vmatpush3.xpose.msra.mxu1 %v10099_v37  ;;  %18695 = vmatprep.mubr.msk.f32.mxu1 %vm21344_vm0, %v26106_v19 }
 0xd0c   : > { %18698 = vmatprep.subr.mxu1 %v26106_v19 }
 0xd12   : > { %18696 = vmatmul.mubr.f32.vlgmr.msra.gmra.mrb[30].mxu1 %v10086_v17 }
 0xd13   : > { %18699 = vmatpush3.xpose.msra.mxu1 %v10021_v16  ;;  %18700 = vmatprep.mubr.msk.f32.mxu1 %vm21344_vm0, %v26106_v19 }
 0xd14   : > { %18703 = vmatprep.subr.mxu1 %v26106_v19 }
 0xd1a   : > { %18701 = vmatmul.mubr.f32.vlgmr.msra.gmra.mrb[30].mxu1 %v10086_v17 }
 0xd1b   : > { %18704 = vmatpush3.xpose.msra.mxu1 %v10471_v48  ;;  %18705 = vmatprep.mubr.msk.f32.mxu1 %vm21344_vm0, %v26106_v19 }
 0xd1c   : > { %18708 = vmatprep.subr.mxu1 %v26106_v19 }
 0xd1e   : > { %18706 = vmatmul.mubr.f32.vlgmr.msra.gmra.mrb[32].mxu1 %v10540_v28 }
 0xd1f   : > { %18709 = vmatpush3.xpose.msra.mxu1 %v10551_v0  ;;  %18710 = vmatprep.mubr.msk.f32.mxu1 %vm21344_vm0, %v26106_v19 }
 0xd20   : > { %18713 = vmatprep.subr.mxu1 %v26106_v19 }
 0xd26   : > { %18711 = vmatmul.mubr.f32.vlgmr.msra.gmra.mrb[32].mxu1 %v10536_v32 }
 0xd27   : > { %18714 = vmatpush3.xpose.msra.mxu1 %v10548_v39  ;;  %18715 = vmatprep.mubr.msk.f32.mxu1 %vm21344_vm0, %v26106_v19 }
 0xd28   : > { %18718 = vmatprep.subr.mxu1 %v26106_v19 }
 0xd2e   : > { %18716 = vmatmul.mubr.f32.vlgmr.msra.gmra.mrb[32].mxu1 %v10537_v53 }
 0xd2f   : > { %18719 = vmatpush3.xpose.msra.mxu1 %v10471_v48  ;;  %18720 = vmatprep.mubr.msk.f32.mxu1 %vm21344_vm0, %v26106_v19 }
 0xd30   : > { %18723 = vmatprep.subr.mxu1 %v26106_v19 }
 0xd36   : > { %18721 = vmatmul.mubr.f32.vlgmr.msra.gmra.mrb[32].mxu1 %v10538_v55 }
 0xd37   : > { %18724 = vmatpush3.xpose.msra.mxu1 %v10549_v38  ;;  %18725 = vmatprep.mubr.msk.f32.mxu1 %vm21344_vm0, %v26106_v19 }
 0xd38   : > { %18728 = vmatprep.subr.mxu1 %v26106_v19 }
 0xd3e   : > { %18726 = vmatmul.mubr.f32.vlgmr.msra.gmra.mrb[32].mxu1 %v10536_v32 }
 0xd3f   : > { %18729 = vmatpush3.xpose.msra.mxu1 %v10471_v48  ;;  %18730 = vmatprep.mubr.msk.f32.mxu1 %vm21344_vm0, %v26106_v19 }
 0xd40   : > { %18733 = vmatprep.subr.mxu1 %v26106_v19 }
 0xd46   : > { %18731 = vmatmul.mubr.f32.vlgmr.msra.gmra.mrb[32].mxu1 %v10536_v32 }
 0xd47   : > { %18735 = vmatprep.mubr.msk.f32.mxu1 %vm21344_vm0, %v26106_v19 }
 0xd4e   : > { %v9562_v56 = vpop.f32.mrb[26].mxu1 }
 0xd4f   : > { %v10919_v5 = vsel %vm10916_vm6, %v9562_v56, -1e+09  ;;  %v18642_v23 = vpop.f32.mrb[27].mxu1 }
 0xd50   : > { %v10923_v14 = vsel %vm4557_vm3, %v10919_v5, -inf }
 0xd51   : > { %10924 = vmax.xlane.f32.xlu1 %v10923_v14 }
 0xd63   : > { %v9088_v61 = vpop.f32.mrb[12].mxu0 }
 0xd64   : > { %v24284_v12 = vadd.f32 %v15672_v44, %v9088_v61  ;;  %v18612_v35 = vpop.f32.mrb[13].mxu0 }
 0xd66   : > { %v24287_v36 = vand.u32 4294901760, %v24284_v12 }
 0xd68   : > { %18734 = vmatpush3.msra.mxu1 %v24287_v36  ;;  %v11048_v16 = vsub.f32 %v24284_v12, %v24287_v36 }
 0xd69   : > { %18738 = vmatprep.subr.mxu1 %v26106_v19 }
 0xd6a   : > { %v11049_v37 = vand.u32 4294901760, %v11048_v16 }
 0xd6c   : > { %v11050_v43 = vsub.f32 %v11048_v16, %v11049_v37 }
 0xd6e   : > { %v11051_v18 = vand.u32 4294901760, %v11050_v43 }
 0xdc1   : > { %v10012_v4 = vpop.f32.mrb[28].mxu1 }
 0xdc2   : > { %v10920_v3 = vsel %vm10916_vm6, %v10012_v4, -1e+09  ;;  %v18672_v7 = vpop.f32.mrb[29].mxu1 }
 0xdc3   : > { %v10926_v27 = vsel %vm4557_vm3, %v10920_v3, -inf }
 0xdc4   : > { %10927 = vmax.xlane.f32.xlu0 %v10926_v27 }
 0xdde   : > { %v10925_v2 = vpop.xlane.xlu1 %10924 }
 0xddf   : > { %v10935_v26 = vsub.f32 %v10919_v5, %v10925_v2 }
 0xde1   : > { %v10939_v63 = vmul.f32 1.442695, %v10935_v26 }
 0xde3   : > { %20994 = vpow2.f32 %v10939_v63 }
 0xded   : > { %v20995_v42 = vpop.eup %20994  ;;  %v10462_v31 = vpop.f32.mrb[30].mxu1 }
 0xdee   : > { %v10921_v50 = vsel %vm10916_vm6, %v10462_v31, -1e+09  ;;  %v18702_v24 = vpop.f32.mrb[31].mxu1  ;;  %v10947_v46 = vsel %vm4557_vm3, %v20995_v42, 0.0 }
 0xdef   : > { %10948 = vadd.xlane.f32.xlu1 %v10947_v46  ;;  %v10929_v11 = vsel %vm4557_vm3, %v10921_v50, -inf }
 0xdf0   : > { %10930 = vmax.xlane.f32.xlu0 %v10929_v11 }
 0xe19   : > { %v10912_v45 = vpop.f32.mrb[32].mxu1 }
 0xe1a   : > { %v10922_v8 = vsel %vm10916_vm6, %v10912_v45, -1e+09  ;;  %v18732_v60 = vpop.f32.mrb[33].mxu1 }
 0xe1b   : > { %v10932_v47 = vsel %vm4557_vm3, %v10922_v8, -inf }
 0xe1c   : > { %10933 = vmax.xlane.f32.xlu0 %v10932_v47 }
 0xe32   : > { %9107 = vrot.lane.b32.xlu0 %v24284_v12, %s21347_s5 }
 0xe51   : > { %v10928_v41 = vpop.xlane.xlu0 %10927 }
 0xe52   : > { %v10936_v15 = vsub.f32 %v10920_v3, %v10928_v41 }
 0xe54   : > { %v10941_v34 = vmul.f32 1.442695, %v10936_v15 }
 0xe56   : > { %20996 = vpow2.f32 %v10941_v34 }
 0xe60   : > { %v24300_v57 = vpop.eup %20996 }
 0xe61   : > { %v10950_v10 = vsel %vm4557_vm3, %v24300_v57, 0.0 }
 0xe62   : > { %10951 = vadd.xlane.f32.xlu1 %v10950_v10 }
 0xe7c   : > { %v10949_v62 = vpop.xlane.xlu1 %10948 }
 0xe7d   : > { %20998 = vrcp.f32 %v10949_v62  ;;  %v10931_v52 = vpop.xlane.xlu0 %10930 }
 0xe7e   : > { %v10937_v49 = vsub.f32 %v10921_v50, %v10931_v52 }
 0xe80   : > { %v10943_v54 = vmul.f32 1.442695, %v10937_v49 }
 0xe82   : > { %21000 = vpow2.f32 %v10943_v54 }
 0xe87   : > { %v20999_v29 = vpop.eup %20998 }
 0xe88   : > { %v10963_v17 = vmul.f32 %v20999_v29, %v20995_v42 }
 0xe8a   : > { %v10968_v30 = vsel %vm4557_vm3, %v10963_v17, 0 }
 0xe8b   : > { %v11036_v22 = vand.u32 4294901760, %v10968_v30 }
 0xe8c   : > { %v24307_v33 = vpop.eup %21000 }
 0xe8d   : > { %v10953_v13 = vsel %vm4557_vm3, %v24307_v33, 0.0  ;;  %v11037_v40 = vsub.f32 %v10968_v30, %v11036_v22 }
 0xe8e   : > { %10954 = vadd.xlane.f32.xlu1 %v10953_v13  ;;  %v15654_v13 = vld [vmem:[%s21793_s10 + $0x380] sm:$0xff] }
 0xe8f   : > { %v11038_v59 = vand.u32 4294901760, %v11037_v40  ;;  %v12783_v43 = vand.u32 4294901760, %v15654_v13 }
 0xe91   : > { %v11039_v9 = vsub.f32 %v11037_v40, %v11038_v59 }
 0xe93   : > { %v11040_v51 = vand.u32 4294901760, %v11039_v9 }
 0xe95   : > { %18736 = vmatmul.mubr.f32.vlgmr.msra.gmra.mrb[34].mxu1 %v11040_v51  ;;  %v15657_v51 = vld [vmem:[%s21793_s10 + $0x398] sm:$0xff] }
 0xe96   : > { %18739 = vmatpush3.msra.mxu1 %v11051_v18  ;;  %18740 = vmatprep.mubr.msk.f32.mxu1 %vm21344_vm0, %v26106_v19 }
 0xe97   : > { %18743 = vmatprep.subr.mxu1 %v26106_v19 }
 0xe9d   : > { %18741 = vmatmul.mubr.f32.vlgmr.msra.gmra.mrb[34].mxu1 %v11036_v22 }
 0xe9e   : > { %18744 = vmatpush3.msra.mxu1 %v11048_v16  ;;  %18745 = vmatprep.mubr.msk.f32.mxu1 %vm21344_vm0, %v26106_v19 }
 0xe9f   : > { %9110 = vrot.lane.b32.xlu1 %v24284_v12, %s21346_s4  ;;  %18748 = vmatprep.subr.mxu1 %v26106_v19 }
 0xea3   : > { %9113 = vrot.lane.b32.xlu1 %v24284_v12, %s21348_s7 }
 0xea5   : > { %18746 = vmatmul.mubr.f32.vlgmr.msra.gmra.mrb[34].mxu1 %v11037_v40  ;;  %v15655_v40 = vld [vmem:[%s21793_s10 + $0x388] sm:$0xff] }
 0xea6   : > { %18749 = vmatpush3.msra.mxu1 %v24287_v36  ;;  %18750 = vmatprep.mubr.msk.f32.mxu1 %vm21344_vm0, %v26106_v19  ;;  %v12786_v9 = vand.u32 4294901760, %v15655_v40 }
 0xea7   : > { %18753 = vmatprep.subr.mxu1 %v26106_v19 }
 0xea9   : > { %v10934_v21 = vpop.xlane.xlu0 %10933 }
 0xeaa   : > { %v10938_v32 = vsub.f32 %v10922_v8, %v10934_v21  ;;  %v15658_v21 = vld [vmem:[%s21793_s10 + $0x3a0] sm:$0xff] }
 0xeac   : > { %v10945_v48 = vmul.f32 1.442695, %v10938_v32  ;;  %v15659_v32 = vld [vmem:[%s21793_s10 + $0x3a8] sm:$0xff] }
 0xead   : > { %18751 = vmatmul.mubr.f32.vlgmr.msra.gmra.mrb[34].mxu1 %v11038_v59  ;;  %v9108_v39 = vpop.permute.xlu0 %9107  ;;  %v15656_v59 = vld [vmem:[%s21793_s10 + $0x390] sm:$0xff] }
 0xeae   : > { %21002 = vpow2.f32 %v10945_v48  ;;  %18754 = vmatpush3.msra.mxu1 %v11049_v37  ;;  %18755 = vmatprep.mubr.msk.f32.mxu1 %vm21344_vm0, %v26106_v19  ;;  %v11420_v38 = vand.u32 4294901760, %v9108_v39  ;;  %v12789_v18 = vand.u32 4294901760, %v15656_v59  ;;  %v12792_v48 = vand.u32 4294901760, %v15657_v51 }
 0xeaf   : > { %18758 = vmatprep.subr.mxu1 %v26106_v19 }
 0xeb0   : > { %v11497_v28 = vsub.f32 %v9108_v39, %v11420_v38  ;;  %v12798_v39 = vand.u32 4294901760, %v15659_v32 }
 0xeb2   : > { %v11498_v5 = vand.u32 4294901760, %v11497_v28 }
 0xeb4   : > { %v11499_v44 = vsub.f32 %v11497_v28, %v11498_v5 }
 0xeb5   : > { %18756 = vmatmul.mubr.f32.vlgmr.msra.gmra.mrb[34].mxu1 %v11036_v22 }
 0xeb6   : > { %18759 = vmatpush3.msra.mxu1 %v24287_v36  ;;  %18760 = vmatprep.mubr.msk.f32.mxu1 %vm21344_vm0, %v26106_v19  ;;  %v11500_v35 = vand.u32 4294901760, %v11499_v44 }
 0xeb7   : > { %18763 = vmatprep.subr.mxu1 %v26106_v19 }
 0xeb8   : > { %v24332_v53 = vpop.eup %21002 }
 0xeb9   : > { %v10956_v55 = vsel %vm4557_vm3, %v24332_v53, 0.0 }
 0xeba   : > { %10957 = vadd.xlane.f32.xlu0 %v10956_v55  ;;  %v24408_v55 = vld [vmem:[%s21793_s10 + $0x3b0] sm:$0xff] }
 0xebd   : > { %18761 = vmatmul.mubr.f32.vlgmr.msra.gmra.mrb[34].mxu1 %v11036_v22 }
 0xebe   : > { %18764 = vmatpush3.msra.mxu1 %v11420_v38  ;;  %18765 = vmatprep.mubr.msk.f32.mxu1 %vm21344_vm0, %v26106_v19 }
 0xebf   : > { %18768 = vmatprep.subr.mxu1 %v26106_v19 }
 0xeef   : > { %v10952_v25 = vpop.xlane.xlu1 %10951 }
 0xef0   : > { %21004 = vrcp.f32 %v10952_v25  ;;  %v24412_v25 = vsub.f32 %v15655_v40, %v12786_v9 }
 0xef2   : > { %v12883_v44 = vand.u32 4294901760, %v24412_v25 }
 0xefa   : > { %v21005_v58 = vpop.eup %21004 }
 0xefb   : > { %v10964_v0 = vmul.f32 %v21005_v58, %v24300_v57  ;;  %v24414_v58 = vsub.f32 %v15656_v59, %v12789_v18 }
 0xefd   : > { %v11417_v20 = vsel %vm4557_vm3, %v10964_v0, 0  ;;  %v15661_v0 = vld [vmem:[%s21793_s10 + $0x3b8] sm:$0xff] }
 0xefe   : > { %v11485_v56 = vand.u32 4294901760, %v11417_v20 }
 0xf00   : > { %v11486_v23 = vsub.f32 %v11417_v20, %v11485_v56  ;;  %v24419_v20 = vsub.f32 %v15657_v51, %v12792_v48 }
 0xf02   : > { %v11487_v14 = vand.u32 4294901760, %v11486_v23 }
 0xf04   : > { %v11488_v61 = vsub.f32 %v11486_v23, %v11487_v14 }
 0xf06   : > { %v11489_v12 = vand.u32 4294901760, %v11488_v61  ;;  %v12890_v61 = vand.u32 4294901760, %v24414_v58 }
 0xf08   : > { %18766 = vmatmul.mubr.f32.vlgmr.msra.gmra.mrb[36].mxu1 %v11489_v12  ;;  %v12801_v12 = vand.u32 4294901760, %v24408_v55 }
 0xf09   : > { %18769 = vmatpush3.msra.mxu1 %v11500_v35  ;;  %18770 = vmatprep.mubr.msk.f32.mxu1 %vm21344_vm0, %v26106_v19  ;;  %v12897_v35 = vand.u32 4294901760, %v24419_v20 }
 0xf0a   : > { %18773 = vmatprep.subr.mxu1 %v26106_v19 }
 0xf10   : > { %18771 = vmatmul.mubr.f32.vlgmr.msra.gmra.mrb[36].mxu1 %v11485_v56 }
 0xf11   : > { %18774 = vmatpush3.msra.mxu1 %v11497_v28  ;;  %18775 = vmatprep.mubr.msk.f32.mxu1 %vm21344_vm0, %v26106_v19  ;;  %v24416_v28 = vpack.c.bf16 %v12786_v9, %v12783_v43 }
 0xf12   : > { %18778 = vmatprep.subr.mxu1 %v26106_v19 }
 0xf13   : > { %20073 = vmatpush3.bf16.msra.mxu0 %v24416_v28 }
 0xf14   : > { %20074 = vmatprep.subr.bf16.mxu0 %v26096_v6 }
 0xf18   : > { %18776 = vmatmul.mubr.f32.vlgmr.msra.gmra.mrb[36].mxu1 %v11486_v23  ;;  %v24425_v23 = vpack.c.bf16 %v12792_v48, %v12789_v18 }
 0xf19   : > { %18779 = vmatpush3.msra.mxu1 %v11420_v38  ;;  %18780 = vmatprep.mubr.msk.f32.mxu1 %vm21344_vm0, %v26106_v19 }
 0xf1a   : > { %18783 = vmatprep.subr.mxu1 %v26106_v19  ;;  %20076 = vmatpush3.bf16.msra.mxu0 %v24425_v23 }
 0xf1b   : > { %v10955_v36 = vpop.xlane.xlu1 %10954  ;;  %20077 = vmatprep.subr.bf16.mxu0 %v26096_v6 }
 0xf1c   : > { %21006 = vrcp.f32 %v10955_v36 }
 0xf1f   : > { %v9111_v4 = vpop.permute.xlu1 %9110 }
 0xf20   : > { %18781 = vmatmul.mubr.f32.vlgmr.msra.gmra.mrb[36].mxu1 %v11487_v14  ;;  %v11869_v3 = vand.u32 4294901760, %v9111_v4 }
 0xf21   : > { %18784 = vmatpush3.msra.mxu1 %v11498_v5  ;;  %18785 = vmatprep.mubr.msk.f32.mxu1 %vm21344_vm0, %v26106_v19  ;;  %v24423_v5 = vsub.f32 %v15659_v32, %v12798_v39 }
 0xf22   : > { %18788 = vmatprep.subr.mxu1 %v26106_v19  ;;  %v11946_v2 = vsub.f32 %v9111_v4, %v11869_v3 }
 0xf23   : > { %v9114_v60 = vpop.permute.xlu1 %9113  ;;  %v12911_v4 = vand.u32 4294901760, %v24423_v5 }
 0xf24   : > { %v11947_v42 = vand.u32 4294901760, %v11946_v2  ;;  %v12318_v47 = vand.u32 4294901760, %v9114_v60 }
 0xf26   : > { %v21007_v7 = vpop.eup %21006  ;;  %v11948_v24 = vsub.f32 %v11946_v2, %v11947_v42  ;;  %v12395_v15 = vsub.f32 %v9114_v60, %v12318_v47  ;;  %v15663_v60 = vld [vmem:[%s21793_s10 + $0x3c8] sm:$0xff] }
 0xf27   : > { %v10965_v27 = vmul.f32 %v21007_v7, %v24307_v33 }
 0xf28   : > { %18786 = vmatmul.mubr.f32.vlgmr.msra.gmra.mrb[36].mxu1 %v11485_v56  ;;  %v11949_v45 = vand.u32 4294901760, %v11948_v24  ;;  %v12396_v62 = vand.u32 4294901760, %v12395_v15  ;;  %v15662_v24 = vld [vmem:[%s21793_s10 + $0x3c0] sm:$0xff] }
 0xf29   : > { %18789 = vmatpush3.msra.mxu1 %v11420_v38  ;;  %18790 = vmatprep.mubr.msk.f32.mxu1 %vm21344_vm0, %v26106_v19  ;;  %v11866_v26 = vsel %vm4557_vm3, %v10965_v27, 0  ;;  %v24410_v38 = vsub.f32 %v15654_v13, %v12783_v43  ;;  %v12884_v27 = vsub.f32 %v24412_v25, %v12883_v44 }
 0xf2a   : > { %18793 = vmatprep.subr.mxu1 %v26106_v19  ;;  %v11934_v63 = vand.u32 4294901760, %v11866_v26  ;;  %v12397_v54 = vsub.f32 %v12395_v15, %v12396_v62 }
 0xf2b   : > { %v12876_v14 = vand.u32 4294901760, %v24410_v38 }
 0xf2c   : > { %v11935_v31 = vsub.f32 %v11866_v26, %v11934_v63  ;;  %v12398_v16 = vand.u32 4294901760, %v12397_v54  ;;  %v24446_v26 = vsub.f32 %v24408_v55, %v12801_v12  ;;  %v24497_v55 = vld [vmem:[%s21793_s10 + $0x3f0] sm:$0xff] }
 0xf2d   : > { %v12877_v7 = vsub.f32 %v24410_v38, %v12876_v14 }
 0xf2e   : > { %v11936_v50 = vand.u32 4294901760, %v11935_v31 }
 0xf30   : > { %18791 = vmatmul.mubr.f32.vlgmr.msra.gmra.mrb[36].mxu1 %v11485_v56  ;;  %v11937_v46 = vsub.f32 %v11935_v31, %v11936_v50 }
 0xf31   : > { %18794 = vmatpush3.msra.mxu1 %v11869_v3  ;;  %18795 = vmatprep.mubr.msk.f32.mxu1 %vm21344_vm0, %v26106_v19 }
 0xf32   : > { %18798 = vmatprep.subr.mxu1 %v26106_v19  ;;  %v11938_v11 = vand.u32 4294901760, %v11937_v46  ;;  %v12878_v46 = vand.u32 4294901760, %v12877_v7 }
 0xf34   : > { %18796 = vmatmul.mubr.f32.vlgmr.msra.gmra.mrb[38].mxu1 %v11938_v11  ;;  %v12885_v11 = vand.u32 4294901760, %v12884_v27 }
 0xf35   : > { %18799 = vmatpush3.msra.mxu1 %v11949_v45  ;;  %18800 = vmatprep.mubr.msk.f32.mxu1 %vm21344_vm0, %v26106_v19 }
 0xf36   : > { %18803 = vmatprep.subr.mxu1 %v26106_v19 }
 0xf3c   : > { %18801 = vmatmul.mubr.f32.vlgmr.msra.gmra.mrb[38].mxu1 %v11934_v63 }
 0xf3d   : > { %18804 = vmatpush3.msra.mxu1 %v11946_v2  ;;  %18805 = vmatprep.mubr.msk.f32.mxu1 %vm21344_vm0, %v26106_v19  ;;  %v12891_v2 = vsub.f32 %v24414_v58, %v12890_v61 }
 0xf3e   : > { %18808 = vmatprep.subr.mxu1 %v26106_v19 }
 0xf3f   : > { %v12892_v45 = vand.u32 4294901760, %v12891_v2 }
 0xf44   : > { %18806 = vmatmul.mubr.f32.vlgmr.msra.gmra.mrb[38].mxu1 %v11935_v31  ;;  %v12912_v31 = vsub.f32 %v24423_v5, %v12911_v4 }
 0xf45   : > { %18809 = vmatpush3.msra.mxu1 %v11869_v3  ;;  %18810 = vmatprep.mubr.msk.f32.mxu1 %vm21344_vm0, %v26106_v19 }
 0xf46   : > { %18813 = vmatprep.subr.mxu1 %v26106_v19 }
 0xf47   : > { %v10958_v8 = vpop.xlane.xlu0 %10957 }
 0xf48   : > { %21008 = vrcp.f32 %v10958_v8  ;;  %v12918_v8 = vand.u32 4294901760, %v24446_v26 }
 0xf4c   : > { %18811 = vmatmul.mubr.f32.vlgmr.msra.gmra.mrb[38].mxu1 %v11936_v50 }
 0xf4d   : > { %18814 = vmatpush3.msra.mxu1 %v11947_v42  ;;  %18815 = vmatprep.mubr.msk.f32.mxu1 %vm21344_vm0, %v26106_v19 }
 0xf4e   : > { %18818 = vmatprep.subr.mxu1 %v26106_v19 }
 0xf52   : > { %v21009_v41 = vpop.eup %21008 }
 0xf53   : > { %v10966_v34 = vmul.f32 %v21009_v41, %v24332_v53  ;;  %v12795_v53 = vand.u32 4294901760, %v15658_v21 }
 0xf54   : > { %18816 = vmatmul.mubr.f32.vlgmr.msra.gmra.mrb[38].mxu1 %v11934_v63 }
 0xf55   : > { %18819 = vmatpush3.msra.mxu1 %v11869_v3  ;;  %18820 = vmatprep.mubr.msk.f32.mxu1 %vm21344_vm0, %v26106_v19  ;;  %v12315_v57 = vsel %vm4557_vm3, %v10966_v34, 0  ;;  %v24421_v56 = vsub.f32 %v15658_v21, %v12795_v53  ;;  %v12804_v3 = vand.u32 4294901760, %v15661_v0  ;;  %v20096_v34 = vpack.c.bf16 %v12885_v11, %v12878_v46 }
 0xf56   : > { %18823 = vmatprep.subr.mxu1 %v26106_v19  ;;  %v12383_v10 = vand.u32 4294901760, %v12315_v57  ;;  %v12825_v11 = vand.u32 4294901760, %v24497_v55 }
 0xf57   : > { %v12904_v36 = vand.u32 4294901760, %v24421_v56  ;;  %v24457_v50 = vsub.f32 %v15661_v0, %v12804_v3  ;;  %v24488_v18 = vpack.c.bf16 %v12804_v3, %v12801_v12  ;;  %v24500_v0 = vld [vmem:[%s21793_s10 + $0x3f8] sm:$0xff] }
 0xf58   : > { %v12384_v52 = vsub.f32 %v12315_v57, %v12383_v10  ;;  %v12919_v57 = vsub.f32 %v24446_v26, %v12918_v8 }
 0xf59   : > { %v12905_v42 = vsub.f32 %v24421_v56, %v12904_v36  ;;  %v12925_v41 = vand.u32 4294901760, %v24457_v50 }
 0xf5a   : > { %v12385_v49 = vand.u32 4294901760, %v12384_v52  ;;  %v12920_v40 = vand.u32 4294901760, %v12919_v57 }
 0xf5b   : > { %v12906_v54 = vand.u32 4294901760, %v12905_v42 }
 0xf5c   : > { %18821 = vmatmul.mubr.f32.vlgmr.msra.gmra.mrb[38].mxu1 %v11934_v63  ;;  %v12386_v29 = vsub.f32 %v12384_v52, %v12385_v49  ;;  %v12898_v63 = vsub.f32 %v24419_v20, %v12897_v35 }
 0xf5d   : > { %18824 = vmatpush3.msra.mxu1 %v12318_v47  ;;  %18825 = vmatprep.mubr.msk.f32.mxu1 %vm21344_vm0, %v26106_v19 }
 0xf5e   : > { %18828 = vmatprep.subr.mxu1 %v26106_v19  ;;  %v12387_v17 = vand.u32 4294901760, %v12386_v29  ;;  %v12913_v29 = vand.u32 4294901760, %v12912_v31 }
 0xf60   : > { %18826 = vmatmul.mubr.f32.vlgmr.msra.gmra.mrb[40].mxu1 %v12387_v17  ;;  %v12926_v17 = vsub.f32 %v24457_v50, %v12925_v41  ;;  %v20102_v7 = vpack.c.bf16 %v12913_v29, %v12906_v54 }
 0xf61   : > { %18829 = vmatpush3.msra.mxu1 %v12398_v16  ;;  %18830 = vmatprep.mubr.msk.f32.mxu1 %vm21344_vm0, %v26106_v19  ;;  %v12810_v16 = vand.u32 4294901760, %v15663_v60 }
 0xf62   : > { %18833 = vmatprep.subr.mxu1 %v26106_v19  ;;  %v12927_v9 = vand.u32 4294901760, %v12926_v17 }
 0xf63   : > { %v24486_v51 = vsub.f32 %v15663_v60, %v12810_v16 }
 0xf64   : > { %v20105_v60 = vpack.c.bf16 %v12927_v9, %v12920_v40 }
 0xf65   : > { %v12939_v27 = vand.u32 4294901760, %v24486_v51 }
 0xf68   : > { %18831 = vmatmul.mubr.f32.vlgmr.msra.gmra.mrb[40].mxu1 %v12383_v10 }
 0xf69   : > { %18834 = vmatpush3.msra.mxu1 %v12395_v15  ;;  %18835 = vmatprep.mubr.msk.f32.mxu1 %vm21344_vm0, %v26106_v19  ;;  %v15664_v15 = vld [vmem:[%s21793_s10 + $0x3d0] sm:$0xff] }
 0xf6a   : > { %18838 = vmatprep.subr.mxu1 %v26106_v19  ;;  %v12813_v43 = vand.u32 4294901760, %v15664_v15 }
 0xf6c   : > { %v24492_v48 = vsub.f32 %v15664_v15, %v12813_v43 }
 0xf70   : > { %18836 = vmatmul.mubr.f32.vlgmr.msra.gmra.mrb[40].mxu1 %v12384_v52  ;;  %v15665_v52 = vld [vmem:[%s21793_s10 + $0x3d8] sm:$0xff] }
 0xf71   : > { %18839 = vmatpush3.msra.mxu1 %v12318_v47  ;;  %18840 = vmatprep.mubr.msk.f32.mxu1 %vm21344_vm0, %v26106_v19  ;;  %v12816_v21 = vand.u32 4294901760, %v15665_v52 }
 0xf72   : > { %18843 = vmatprep.subr.mxu1 %v26106_v19 }
 0xf73   : > { %v24503_v12 = vsub.f32 %v15665_v52, %v12816_v21  ;;  %v24542_v29 = vpack.c.bf16 %v12816_v21, %v12813_v43 }
 0xf75   : > { %v12953_v46 = vand.u32 4294901760, %v24503_v12 }
 0xf77   : > { %v12954_v52 = vsub.f32 %v24503_v12, %v12953_v46 }
 0xf78   : > { %18841 = vmatmul.mubr.f32.vlgmr.msra.gmra.mrb[40].mxu1 %v12385_v49 }
 0xf79   : > { %18844 = vmatpush3.msra.mxu1 %v12396_v62  ;;  %18845 = vmatprep.mubr.msk.f32.mxu1 %vm21344_vm0, %v26106_v19  ;;  %v12807_v62 = vand.u32 4294901760, %v15662_v24 }
 0xf7a   : > { %18848 = vmatprep.subr.mxu1 %v26106_v19 }
 0xf7b   : > { %v24482_v59 = vsub.f32 %v15662_v24, %v12807_v62  ;;  %v24505_v3 = vpack.c.bf16 %v12810_v16, %v12807_v62  ;;  %v12940_v24 = vsub.f32 %v24486_v51, %v12939_v27 }
 0xf7d   : > { %v12932_v32 = vand.u32 4294901760, %v24482_v59  ;;  %v12941_v62 = vand.u32 4294901760, %v12940_v24 }
 0xf7f   : > { %v12933_v2 = vsub.f32 %v24482_v59, %v12932_v32 }
 0xf80   : > { %18846 = vmatmul.mubr.f32.vlgmr.msra.gmra.mrb[40].mxu1 %v12383_v10 }
 0xf81   : > { %18849 = vmatpush3.msra.mxu1 %v12318_v47  ;;  %18850 = vmatprep.mubr.msk.f32.mxu1 %vm21344_vm0, %v26106_v19  ;;  %v12899_v47 = vand.u32 4294901760, %v12898_v63  ;;  %v12946_v63 = vand.u32 4294901760, %v24492_v48 }
 0xf82   : > { %20095 = vmatprep.subr.bf16.mxu1 %v26096_v6 }
 0xf83   : > { %v20099_v13 = vpack.c.bf16 %v12899_v47, %v12892_v45  ;;  %v12828_v45 = vand.u32 4294901760, %v24500_v0  ;;  %v12934_v47 = vand.u32 4294901760, %v12933_v2  ;;  %v12947_v15 = vsub.f32 %v24492_v48, %v12946_v63 }
 0xf85   : > { %v24538_v54 = vsub.f32 %v24500_v0, %v12828_v45  ;;  %v12948_v17 = vand.u32 4294901760, %v12947_v15  ;;  %v24570_v15 = vpack.c.bf16 %v12828_v45, %v12825_v11  ;;  %v20132_v45 = vpack.c.bf16 %v24486_v51, %v24482_v59 }
 0xf87   : > { %v12981_v40 = vand.u32 4294901760, %v24538_v54 }
 0xf88   : > { %18851 = vmatmul.mubr.f32.vlgmr.msra.gmra.mrb[40].mxu1 %v12383_v10  ;;  %v24469_v10 = vpack.c.bf16 %v12798_v39, %v12795_v53 }
 0xf89   : > { %18920 = vmatprep.mubr.msk.f32.mxu1 %vm21344_vm0, %v26106_v19  ;;  %20097 = vmatpush3.bf16.msra.mxu1 %v20096_v34  ;;  %v12982_v0 = vsub.f32 %v24538_v54, %v12981_v40 }
 0xf8a   : > { %20098 = vmatprep.subr.bf16.mxu1 %v26096_v6  ;;  %20079 = vmatpush3.bf16.msra.mxu0 %v24469_v10 }
 0xf8b   : > { %20080 = vmatprep.subr.bf16.mxu0 %v26096_v6  ;;  %v12983_v24 = vand.u32 4294901760, %v12982_v0 }
 0xf8d   : > { %20100 = vmatpush3.bf16.msra.mxu1 %v20099_v13 }
 0xf8e   : > { %20101 = vmatprep.subr.bf16.mxu1 %v26096_v6  ;;  %20082 = vmatpush3.bf16.msra.mxu0 %v24488_v18 }
 0xf8f   : > { %20083 = vmatprep.subr.bf16.mxu0 %v26096_v6 }
 0xf90   : > { %v24398_v30 = vpop.f32.mrb[34].mxu1 }
 0xf91   : > { %v18762_v22 = vpop.f32.mrb[35].mxu1  ;;  %20103 = vmatpush3.bf16.msra.mxu1 %v20102_v7 }
 0xf92   : > { %v24476_v22 = vld [vmem:[%s21793_s10 + $0x3e0] sm:$0xff]  ;;  %20104 = vmatprep.subr.bf16.mxu1 %v26096_v6  ;;  %20085 = vmatpush3.bf16.msra.mxu0 %v24505_v3 }
 0xf93   : > { %v12819_v53 = vand.u32 4294901760, %v24476_v22  ;;  %20086 = vmatprep.subr.bf16.mxu0 %v26096_v6 }
 0xf95   : > { %v24512_v42 = vsub.f32 %v24476_v22, %v12819_v53  ;;  %20106 = vmatpush3.bf16.msra.mxu1 %v20105_v60 }
 0xf96   : > { %20107 = vmatprep.subr.bf16.mxu1 %v26096_v6  ;;  %20088 = vmatpush3.bf16.msra.mxu0 %v24542_v29 }
 0xf97   : > { %v12960_v34 = vand.u32 4294901760, %v24512_v42  ;;  %20089 = vmatprep.subr.bf16.mxu0 %v26096_v6 }
 0xf99   : > { %v12961_v16 = vsub.f32 %v24512_v42, %v12960_v34 }
 0xf9b   : > { %v12962_v43 = vand.u32 4294901760, %v12961_v16  ;;  %v20135_v16 = vpack.c.bf16 %v24503_v12, %v24492_v48 }
0x1003   : > { %v11861_v33 = vpop.f32.mrb[36].mxu1 }
0x1004   : > { %12764 = vrot.lane.b32.xlu1 %v11861_v33, %s21348_s7  ;;  %v18792_v37 = vpop.f32.mrb[37].mxu1  ;;  %v24479_v33 = vld [vmem:[%s21793_s10 + $0x3e8] sm:$0xff] }
0x1005   : > { %v12822_v39 = vand.u32 4294901760, %v24479_v33 }
0x1007   : > { %v24515_v31 = vsub.f32 %v24479_v33, %v12822_v39  ;;  %v20108_v33 = vpack.c.bf16 %v12941_v62, %v12934_v47  ;;  %v24566_v47 = vpack.c.bf16 %v12822_v39, %v12819_v53  ;;  %v20120_v62 = vpack.c.bf16 %v24412_v25, %v24410_v38 }
0x1008   : > { %v20123_v53 = vpack.c.bf16 %v24419_v20, %v24414_v58  ;;  %v20126_v39 = vpack.c.bf16 %v24423_v5, %v24421_v56  ;;  %v20174_v38 = vpack.c.bf16 %v12911_v4, %v12904_v36  ;;  %v20177_v25 = vpack.c.bf16 %v12925_v41, %v12918_v8 }
0x1009   : > { %v12967_v57 = vand.u32 4294901760, %v24515_v31  ;;  %20109 = vmatpush3.bf16.msra.mxu1 %v20108_v33  ;;  %20091 = vmatpush3.bf16.msra.mxu0 %v24566_v47  ;;  %v20180_v58 = vpack.c.bf16 %v12939_v27, %v12932_v32  ;;  %v20183_v20 = vpack.c.bf16 %v12953_v46, %v12946_v63  ;;  %v13450_v63 = vld [vmem:[%s21805_s8 + $0x18] sm:$0xff] }
0x100a   : > { %20110 = vmatprep.subr.bf16.mxu1 %v26096_v6  ;;  %20092 = vmatprep.subr.bf16.mxu0 %v26096_v6  ;;  %v13495_v46 = vand.u32 4294901760, %v13450_v63 }
0x100b   : > { %v12968_v22 = vsub.f32 %v24515_v31, %v12967_v57  ;;  %v20186_v56 = vpack.c.bf16 %v12967_v57, %v12960_v34  ;;  %v13449_v34 = vld [vmem:[%s21805_s8 + $0x10] sm:$0xff] }
0x100d   : > { %v12969_v21 = vand.u32 4294901760, %v12968_v22  ;;  %20094 = vmatpush3.bf16.msra.mxu0 %v24570_v15  ;;  %v20138_v22 = vpack.c.bf16 %v24515_v31, %v24512_v42  ;;  %v13447_v42 = vld [vmem:[%s21805_s8] sm:$0xff] }
0x100e   : > { %20119 = vmatprep.subr.bf16.mxu0 %v26096_v6  ;;  %v13493_v57 = vand.u32 4294901760, %v13447_v42 }
0x100f   : > { %v20114_v7 = vpack.c.bf16 %v12969_v21, %v12962_v43 }
0x102f   : > { %v12310_v49 = vpop.f32.mrb[38].mxu1 }
0x1030   : > { %12768 = vrot.lane.b32.xlu1 %v12310_v49, %s21346_s4  ;;  %v18822_v37 = vpop.f32.mrb[39].mxu1  ;;  %v24535_v49 = vsub.f32 %v24497_v55, %v12825_v11  ;;  %v20129_v11 = vpack.c.bf16 %v24457_v50, %v24446_v26 }
0x1031   : > { %v12955_v37 = vand.u32 4294901760, %v12954_v52 }
0x1032   : > { %v12974_v13 = vand.u32 4294901760, %v24535_v49  ;;  %v20141_v33 = vpack.c.bf16 %v24538_v54, %v24535_v49 }
0x1033   : > { %v20111_v9 = vpack.c.bf16 %v12955_v37, %v12948_v17 }
0x1034   : > { %v12975_v55 = vsub.f32 %v24535_v49, %v12974_v13  ;;  %v20189_v5 = vpack.c.bf16 %v12981_v40, %v12974_v13  ;;  %v13497_v49 = vand.u32 4294901760, %v13449_v34  ;;  %v24701_v13 = vsub.f32 %v13450_v63, %v13495_v46  ;;  %v13469_v63 = vld [vmem:[%s21805_s8 + $0xb0] sm:$0xff] }
0x1035   : > { %20112 = vmatpush3.bf16.msra.mxu1 %v20111_v9 }
0x1036   : > { %v12976_v2 = vand.u32 4294901760, %v12975_v55  ;;  %20113 = vmatprep.subr.bf16.mxu1 %v26096_v6  ;;  %v24705_v40 = vpack.c.bf16 %v13497_v49, %v13493_v57 }
0x1038   : > { %v20117_v60 = vpack.c.bf16 %v12983_v24, %v12976_v2  ;;  %26190 = vst [vmem:[#allocation39_spill] sm:$0xff] %v24705_v40 }
0x1039   : > { %20115 = vmatpush3.bf16.msra.mxu1 %v20114_v7 }
0x103a   : > { %20116 = vmatprep.subr.bf16.mxu1 %v26096_v6 }
0x103d   : > { %20118 = vmatpush3.bf16.msra.mxu1 %v20117_v60 }
0x103e   : > { %20143 = vmatprep.subr.bf16.mxu1 %v26096_v6 }
0x105b   : > { %v12759_v52 = vpop.f32.mrb[40].mxu1 }
0x105c   : > { %12772 = vrot.lane.b32.xlu1 %v12759_v52, %s21347_s5  ;;  %v18852_v17 = vpop.f32.mrb[41].mxu1 }
0x1076   : > { %v12765_v37 = vpop.permute.xlu1 %12764 }
0x1077   : > { %v12775_v9 = vsel %vm2749_vm1, %v24398_v30, %v12765_v37 }
0x10a2   : > { %v12769_v43 = vpop.permute.xlu1 %12768 }
0x10a3   : > { %v12776_v21 = vsel %vm6411_vm4, %v12775_v9, %v12769_v43 }
0x10ce   : > { %v12773_v55 = vpop.permute.xlu1 %12772 }
0x10cf   : > { %v12777_v0 = vsel %vm6413_vm5, %v12776_v21, %v12773_v55  ;;  %v13456_v55 = vld [vmem:[%s21805_s8 + $0x48] sm:$0xff] }
0x10d0   : > { %v24595_v7 = vand.u32 4294901760, %v12777_v0 }
0x10d2   : > { %v12864_v2 = vsub.f32 %v12777_v0, %v24595_v7  ;;  %18921 = vmatmul.mubr.f32.vlgmr.msra.gmra.mrb[42].mxu1 %v24595_v7  ;;  %v13458_v0 = vld [vmem:[%s21805_s8 + $0x58] sm:$0xff] }
0x10d3   : > { %20145 = vmatpush3.bf16.msra.mxu1 %v24416_v28  ;;  %18990 = vmatprep.mubr.msk.f32.mxu1 %vm21344_vm0, %v26106_v19 }
0x10d4   : > { %v12865_v24 = vand.u32 4294901760, %v12864_v2  ;;  %20146 = vmatprep.subr.bf16.mxu1 %v26096_v6 }
0x10d6   : > { %v12866_v30 = vsub.f32 %v12864_v2, %v12865_v24 }
0x10d7   : > { %20148 = vmatpush3.bf16.msra.mxu1 %v24425_v23 }
0x10d8   : > { %20149 = vmatprep.subr.bf16.mxu1 %v26096_v6  ;;  %v12867_v60 = vand.u32 4294901760, %v12866_v30  ;;  %v13457_v30 = vld [vmem:[%s21805_s8 + $0x50] sm:$0xff] }
0x10da   : > { %18886 = vmatmul.mubr.f32.vlgmr.msra.gmra.mrb[14].mxu0 %v12867_v60 }
0x10db   : > { %20121 = vmatpush3.bf16.msra.mxu0 %v20120_v62  ;;  %20151 = vmatpush3.bf16.msra.mxu1 %v24469_v10  ;;  %v20168_v62 = vpack.c.bf16 %v12883_v44, %v12876_v14  ;;  %v15673_v44 = vld [vmem:[%s21799_s1 + $0x7] ss:$0 sm:$0xff] }
0x10dc   : > { %20122 = vmatprep.subr.bf16.mxu0 %v26096_v6  ;;  %20152 = vmatprep.subr.bf16.mxu1 %v26096_v6 }
0x10dd   : > { %18955 = vmatprep.mubr.msk.f32.mxu0 %vm21344_vm0, %v26106_v19 }
0x10df   : > { %20124 = vmatpush3.bf16.msra.mxu0 %v20123_v53  ;;  %20154 = vmatpush3.bf16.msra.mxu1 %v24488_v18 }
0x10e0   : > { %20125 = vmatprep.subr.bf16.mxu0 %v26096_v6  ;;  %20155 = vmatprep.subr.bf16.mxu1 %v26096_v6 }
0x10e3   : > { %20127 = vmatpush3.bf16.msra.mxu0 %v20126_v39  ;;  %20157 = vmatpush3.bf16.msra.mxu1 %v24505_v3  ;;  %v13452_v39 = vld [vmem:[%s21805_s8 + $0x28] sm:$0xff] }
0x10e4   : > { %20128 = vmatprep.subr.bf16.mxu0 %v26096_v6  ;;  %20158 = vmatprep.subr.bf16.mxu1 %v26096_v6 }
0x10e7   : > { %20130 = vmatpush3.bf16.msra.mxu0 %v20129_v11  ;;  %20160 = vmatpush3.bf16.msra.mxu1 %v24542_v29  ;;  %v13454_v11 = vld [vmem:[%s21805_s8 + $0x38] sm:$0xff] }
0x10e8   : > { %20131 = vmatprep.subr.bf16.mxu0 %v26096_v6  ;;  %20161 = vmatprep.subr.bf16.mxu1 %v26096_v6 }
0x10eb   : > { %20133 = vmatpush3.bf16.msra.mxu0 %v20132_v45  ;;  %20163 = vmatpush3.bf16.msra.mxu1 %v24566_v47  ;;  %v13499_v45 = vand.u32 4294901760, %v13452_v39 }
0x10ec   : > { %20134 = vmatprep.subr.bf16.mxu0 %v26096_v6  ;;  %20164 = vmatprep.subr.bf16.mxu1 %v26096_v6 }
0x10ef   : > { %20136 = vmatpush3.bf16.msra.mxu0 %v20135_v16  ;;  %20166 = vmatpush3.bf16.msra.mxu1 %v24570_v15  ;;  %v13503_v16 = vand.u32 4294901760, %v13454_v11 }
0x10f0   : > { %20137 = vmatprep.subr.bf16.mxu0 %v26096_v6  ;;  %20191 = vmatprep.subr.bf16.mxu1 %v26096_v6 }
0x10f1   : > { %v24720_v9 = vpack.c.bf16 %v13503_v16, %v13499_v45 }
0x10f2   : > { %18991 = vmatmul.mubr.f32.vlgmr.msra.gmra.mrb[44].mxu1 %v12865_v24  ;;  %v13455_v24 = vld [vmem:[%s21805_s8 + $0x40] sm:$0xff] }
0x10f3   : > { %20139 = vmatpush3.bf16.msra.mxu0 %v20138_v22  ;;  %20193 = vmatpush3.bf16.msra.mxu1 %v24416_v28  ;;  %v20171_v28 = vpack.c.bf16 %v12897_v35, %v12890_v61  ;;  %v13451_v22 = vld [vmem:[%s21805_s8 + $0x20] sm:$0xff]  ;;  %26191 = vst [vmem:[#allocation40_spill] sm:$0xff] %v24720_v9  ;;  %v13509_v60 = vand.u32 4294901760, %v13455_v24 }
0x10f4   : > { %20140 = vmatprep.subr.bf16.mxu0 %v26096_v6  ;;  %20194 = vmatprep.subr.bf16.mxu1 %v26096_v6  ;;  %v13501_v37 = vand.u32 4294901760, %v13451_v22 }
0x10f5   : > { %19060 = vmatprep.mubr.msk.f32.mxu1 %vm21344_vm0, %v26106_v19 }
0x10f7   : > { %20142 = vmatpush3.bf16.msra.mxu0 %v20141_v33  ;;  %20196 = vmatpush3.bf16.msra.mxu1 %v24425_v23  ;;  %v13453_v33 = vld [vmem:[%s21805_s8 + $0x30] sm:$0xff] }
0x10f8   : > { %20167 = vmatprep.subr.bf16.mxu0 %v26096_v6  ;;  %20197 = vmatprep.subr.bf16.mxu1 %v26096_v6  ;;  %v13505_v43 = vand.u32 4294901760, %v13453_v33 }
0x10fa   : > { %18956 = vmatmul.mubr.f32.vlgmr.msra.gmra.mrb[16].mxu0 %v12864_v2  ;;  %v24722_v21 = vpack.c.bf16 %v13505_v43, %v13501_v37  ;;  %v13511_v2 = vand.u32 4294901760, %v13458_v0 }
0x10fb   : > { %20169 = vmatpush3.bf16.msra.mxu0 %v20168_v62  ;;  %20199 = vmatpush3.bf16.msra.mxu1 %v24469_v10  ;;  %v13513_v62 = vand.u32 4294901760, %v13457_v30 }
0x10fc   : > { %20170 = vmatprep.subr.bf16.mxu0 %v26096_v6  ;;  %20200 = vmatprep.subr.bf16.mxu1 %v26096_v6  ;;  %26192 = vst [vmem:[#allocation41_spill] sm:$0xff] %v24722_v21 }
0x10fd   : > { %19025 = vmatprep.mubr.msk.f32.mxu0 %vm21344_vm0, %v26106_v19 }
0x10ff   : > { %20172 = vmatpush3.bf16.msra.mxu0 %v20171_v28  ;;  %20202 = vmatpush3.bf16.msra.mxu1 %v24488_v18 }
0x1100   : > { %20173 = vmatprep.subr.bf16.mxu0 %v26096_v6  ;;  %20203 = vmatprep.subr.bf16.mxu1 %v26096_v6 }
0x1103   : > { %20175 = vmatpush3.bf16.msra.mxu0 %v20174_v38  ;;  %20205 = vmatpush3.bf16.msra.mxu1 %v24505_v3  ;;  %v13448_v3 = vld [vmem:[%s21805_s8 + $0x8] sm:$0xff]  ;;  %v24732_v38 = vpack.c.bf16 %v13513_v62, %v13509_v60 }
0x1104   : > { %20176 = vmatprep.subr.bf16.mxu0 %v26096_v6  ;;  %20206 = vmatprep.subr.bf16.mxu1 %v26096_v6  ;;  %v13491_v31 = vand.u32 4294901760, %v13448_v3 }
0x1105   : > { %26194 = vst [vmem:[#allocation43_spill] sm:$0xff] %v24732_v38 }
0x1106   : > { %v24697_v54 = vpack.c.bf16 %v13495_v46, %v13491_v31  ;;  %v13537_v46 = vand.u32 4294901760, %v13469_v63 }
0x1107   : > { %20178 = vmatpush3.bf16.msra.mxu0 %v20177_v25  ;;  %20208 = vmatpush3.bf16.msra.mxu1 %v24542_v29  ;;  %v24699_v29 = vsub.f32 %v13448_v3, %v13491_v31  ;;  %v13460_v25 = vld [vmem:[%s21805_s8 + $0x68] sm:$0xff]  ;;  %v13467_v3 = vld [vmem:[%s21805_s8 + $0xa0] sm:$0xff] }
0x1108   : > { %20179 = vmatprep.subr.bf16.mxu0 %v26096_v6  ;;  %20209 = vmatprep.subr.bf16.mxu1 %v26096_v6  ;;  %26189 = vst [vmem:[#allocation38_spill] sm:$0xff] %v24697_v54  ;;  %v13533_v31 = vand.u32 4294901760, %v13467_v3 }
0x110b   : > { %20181 = vmatpush3.bf16.msra.mxu0 %v20180_v58  ;;  %20211 = vmatpush3.bf16.msra.mxu1 %v24566_v47  ;;  %v24707_v47 = vsub.f32 %v13449_v34, %v13497_v49  ;;  %v13462_v58 = vld [vmem:[%s21805_s8 + $0x78] sm:$0xff]  ;;  %v24762_v34 = vsub.f32 %v13452_v39, %v13499_v45  ;;  %v24766_v49 = vsub.f32 %v13451_v22, %v13501_v37  ;;  %v13472_v39 = vld [vmem:[%s21805_s8 + $0xc8] sm:$0xff]  ;;  %v13471_v37 = vld [vmem:[%s21805_s8 + $0xc0] sm:$0xff] }
0x110c   : > { %20182 = vmatprep.subr.bf16.mxu0 %v26096_v6  ;;  %20212 = vmatprep.subr.bf16.mxu1 %v26096_v6 }
0x110f   : > { %20184 = vmatpush3.bf16.msra.mxu0 %v20183_v20  ;;  %20214 = vmatpush3.bf16.msra.mxu1 %v24570_v15  ;;  %v13515_v20 = vand.u32 4294901760, %v13460_v25 }
0x1110   : > { %20185 = vmatprep.subr.bf16.mxu0 %v26096_v6 }
0x1112   : > { %19061 = vmatmul.mubr.f32.vlgmr.msra.gmra.mrb[46].mxu1 %v24595_v7 }
0x1113   : > { %20187 = vmatpush3.bf16.msra.mxu0 %v20186_v56  ;;  %v13519_v56 = vand.u32 4294901760, %v13462_v58 }
0x1114   : > { %20188 = vmatprep.subr.bf16.mxu0 %v26096_v6 }
0x1115   : > { %v24782_v45 = vsub.f32 %v13462_v58, %v13519_v56  ;;  %v24806_v58 = vpack.c.bf16 %v13537_v46, %v13533_v31 }
0x1117   : > { %20190 = vmatpush3.bf16.msra.mxu0 %v20189_v5  ;;  %v13459_v5 = vld [vmem:[%s21805_s8 + $0x60] sm:$0xff]  ;;  %26201 = vst [vmem:[#allocation50_spill] sm:$0xff] %v24806_v58 }
0x1118   : > { %20216 = vmatprep.subr.bf16.mxu0 %v24697_v54 }
0x111a   : > { %19026 = vmatmul.mubr.f32.vlgmr.msra.gmra.mrb[18].mxu0 %v24595_v7  ;;  %v13507_v7 = vand.u32 4294901760, %v13456_v55 }
0x111b   : > { %13587 = vmatprep.mubr.f32.mxu0 %v26106_v19  ;;  %20218 = vmatpush1.bf16.msra.mxu0 %v24705_v40 }
0x111c   : > { %20220 = vmatprep.subr.bf16.mxu0 %v24720_v9  ;;  %v24730_v28 = vpack.c.bf16 %v13511_v2, %v13507_v7 }
0x111e   : > { %26193 = vst [vmem:[#allocation42_spill] sm:$0xff] %v24730_v28 }
0x111f   : > { %20222 = vmatpush1.bf16.msra.mxu0 %v24722_v21 }
0x1120   : > { %20224 = vmatprep.subr.bf16.mxu0 %v24730_v28 }
0x1123   : > { %20226 = vmatpush1.bf16.msra.mxu0 %v24732_v38 }
0x11a5   : > { %v13020_v23 = vpop.f32.mrb[42].mxu1 }
0x11a6   : > { %v18922_v14 = vpop.f32.mrb[43].mxu1 }
0x11a7   : > { %v13517_v14 = vand.u32 4294901760, %v13459_v5 }
0x11ad   : > { %v12869_v61 = vpop.f32.mrb[14].mxu0 }
0x11ae   : > { %v12870_v35 = vadd.f32 %v15673_v44, %v12869_v61  ;;  %v18887_v36 = vpop.f32.mrb[15].mxu0  ;;  %v24740_v61 = vpack.c.bf16 %v13519_v56, %v13515_v20  ;;  %v24810_v56 = vsub.f32 %v13469_v63, %v13537_v46  ;;  %v25859_v46 = vand.u32 4294901760, %v24699_v29 }
0x11af   : > { %v13464_v36 = vld [vmem:[%s21805_s8 + $0x88] sm:$0xff] }
0x11b0   : > { %v13021_v4 = vadd.f32 %v13020_v23, %v12870_v35  ;;  %v13461_v23 = vld [vmem:[%s21805_s8 + $0x70] sm:$0xff]  ;;  %26195 = vst [vmem:[#allocation44_spill] sm:$0xff] %v24740_v61  ;;  %20228 = vmatprep.subr.bf16.mxu0 %v24740_v61 }
0x11b1   : > { %v13521_v44 = vand.u32 4294901760, %v13461_v23 }
0x11b3   : > { %v24742_v35 = vpack.c.bf16 %v13521_v44, %v13517_v14  ;;  %v24786_v22 = vsub.f32 %v13461_v23, %v13521_v44 }
0x11b5   : > { %26196 = vst [vmem:[#allocation45_spill] sm:$0xff] %v24742_v35  ;;  %20230 = vmatpush1.bf16.msra.mxu0 %v24742_v35 }
0x11c5   : > { %v13213_v26 = vpop.f32.mrb[44].mxu1 }
0x11c6   : > { %v18992_v50 = vpop.f32.mrb[45].mxu1 }
0x11cd   : > { %v13124_v8 = vpop.f32.mrb[16].mxu0 }
0x11ce   : > { %v13125_v41 = vadd.f32 %v13124_v8, %v13021_v4  ;;  %v18957_v6 = vpop.f32.mrb[17].mxu0  ;;  %v13466_v4 = vld [vmem:[%s21805_s8 + $0x98] sm:$0xff]  ;;  %v13463_v8 = vld [vmem:[%s21805_s8 + $0x80] sm:$0xff] }
0x11cf   : > { %v13527_v50 = vand.u32 4294901760, %v13466_v4  ;;  %v13525_v6 = vand.u32 4294901760, %v13463_v8 }
0x11d0   : > { %v13214_v10 = vadd.f32 %v13213_v26, %v13125_v41  ;;  %v13523_v26 = vand.u32 4294901760, %v13464_v36  ;;  %v13465_v41 = vld [vmem:[%s21805_s8 + $0x90] sm:$0xff] }
0x11e5   : > { %v13419_v59 = vpop.f32.mrb[46].mxu1 }
0x11e6   : > { %v19062_v51 = vpop.f32.mrb[47].mxu1 }
0x11ed   : > { %v13332_v18 = vpop.f32.mrb[18].mxu0 }
0x11ee   : > { %v13333_v32 = vadd.f32 %v13332_v18, %v13214_v10  ;;  %v19027_v48 = vpop.f32.mrb[19].mxu0  ;;  %v13529_v10 = vand.u32 4294901760, %v13465_v41  ;;  %v13468_v18 = vld [vmem:[%s21805_s8 + $0xa8] sm:$0xff] }
0x11ef   : > { %v13531_v48 = vand.u32 4294901760, %v13468_v18 }
0x11f0   : > { %v13420_v27 = vadd.f32 %v13419_v59, %v13333_v32  ;;  %v24750_v59 = vpack.c.bf16 %v13527_v50, %v13523_v26  ;;  %v24752_v51 = vpack.c.bf16 %v13529_v10, %v13525_v6  ;;  %v13470_v32 = vld [vmem:[%s21805_s8 + $0xb8] sm:$0xff] }
0x11f2   : > { %v24690_v12 = vadd.f32 %v13420_v27, %v23368_v1  ;;  %v24703_v1 = vsub.f32 %v13447_v42, %v13493_v57  ;;  %26197 = vst [vmem:[#allocation46_spill] sm:$0xff] %v24750_v59  ;;  %26198 = vst [vmem:[#allocation47_spill] sm:$0xff] %v24752_v51  ;;  %20232 = vmatprep.subr.bf16.mxu0 %v24750_v59  ;;  %v13535_v27 = vand.u32 4294901760, %v13470_v32 }
0x11f3   : > { %20234 = vmatpush1.bf16.msra.mxu0 %v24752_v51  ;;  %v24764_v57 = vsub.f32 %v13454_v11, %v13503_v16  ;;  %v24776_v51 = vsub.f32 %v13457_v30, %v13513_v62  ;;  %v24780_v11 = vsub.f32 %v13460_v25, %v13515_v20  ;;  %v24784_v16 = vsub.f32 %v13459_v5, %v13517_v14  ;;  %v13478_v30 = vld [vmem:[%s21805_s8 + $0xf8] sm:$0xff] }
0x11f4   : > { %26188 = vst [vmem:[#allocation54_spill] sm:$0xff] %v24690_v12  ;;  %13426 = vadd.xlane.f32.xlu1 %v24690_v12  ;;  %v24760_v42 = vpack.c.bf16 %v13535_v27, %v13531_v48  ;;  %v24802_v62 = vsub.f32 %v13468_v18, %v13531_v48  ;;  %v24804_v25 = vsub.f32 %v13470_v32, %v13535_v27  ;;  %v13539_v5 = vand.u32 4294901760, %v13472_v39 }
0x11f5   : > { %26200 = vst [vmem:[#allocation49_spill] sm:$0xff] %v24764_v57  ;;  %v24808_v20 = vsub.f32 %v13467_v3, %v13533_v31  ;;  %v13541_v14 = vand.u32 4294901760, %v13471_v37 }
0x11f6   : > { %26199 = vst [vmem:[#allocation48_spill] sm:$0xff] %v24760_v42  ;;  %20236 = vmatprep.subr.bf16.mxu0 %v24760_v42 }
0x11f7   : > { %20238 = vmatpush1.bf16.msra.mxu0 %v24806_v58 }
0x1281   : > { %v13427_v15 = vpop.xlane.xlu1 %13426 }
0x1282   : > { %v13428_v52 = vmul.f32 0.0078125, %v13427_v15  ;;  %v24768_v15 = vsub.f32 %v13453_v33, %v13505_v43  ;;  %v13474_v33 = vld [vmem:[%s21805_s8 + $0xd8] sm:$0xff]  ;;  %v13473_v43 = vld [vmem:[%s21805_s8 + $0xd0] sm:$0xff] }
0x1283   : > { %v13543_v23 = vand.u32 4294901760, %v13474_v33  ;;  %v13545_v44 = vand.u32 4294901760, %v13473_v43 }
0x1284   : > { %v24712_v17 = vsub.f32 %v24690_v12, %v13428_v52  ;;  %v24770_v52 = vsub.f32 %v13456_v55, %v13507_v7  ;;  %v24774_v12 = vsub.f32 %v13455_v24, %v13509_v60  ;;  %v24791_v55 = vsub.f32 %v13464_v36, %v13523_v26  ;;  %v13476_v24 = vld [vmem:[%s21805_s8 + $0xe8] sm:$0xff]  ;;  %v13475_v60 = vld [vmem:[%s21805_s8 + $0xe0] sm:$0xff]  ;;  %v13477_v26 = vld [vmem:[%s21805_s8 + $0xf0] sm:$0xff] }
0x1285   : > { %v24795_v7 = vsub.f32 %v13463_v8, %v13525_v6  ;;  %v13547_v36 = vand.u32 4294901760, %v13476_v24  ;;  %v24814_v8 = vpack.c.bf16 %v13543_v23, %v13539_v5  ;;  %v24818_v6 = vsub.f32 %v13474_v33, %v13543_v23 }
0x1286   : > { %v13430_v53 = vmul.f32 %v24712_v17, %v24712_v17  ;;  %v24822_v18 = vpack.c.bf16 %v13545_v44, %v13541_v14  ;;  %v24824_v32 = vsub.f32 %v13473_v43, %v13545_v44  ;;  %v13553_v63 = vand.u32 4294901760, %v13477_v26 }
0x1287   : > { %26202 = vst [vmem:[#allocation51_spill] sm:$0xff] %v24814_v8  ;;  %v24828_v27 = vsub.f32 %v13476_v24, %v13547_v36  ;;  %20240 = vmatprep.subr.bf16.mxu0 %v24814_v8  ;;  %v25857_v33 = vand.u32 4294901760, %v24703_v1  ;;  %v25863_v43 = vand.u32 4294901760, %v24762_v34 }
0x1288   : > { %13431 = vadd.xlane.f32.xlu0 %v13430_v53  ;;  %v24772_v53 = vsub.f32 %v13458_v0, %v13511_v2  ;;  %v24793_v0 = vsub.f32 %v13466_v4, %v13527_v50  ;;  %v24797_v2 = vsub.f32 %v13465_v41, %v13529_v10  ;;  %v13551_v4 = vand.u32 4294901760, %v13478_v30  ;;  %26203 = vst [vmem:[#allocation52_spill] sm:$0xff] %v24822_v18 }
0x1289   : > { %v13549_v50 = vand.u32 4294901760, %v13475_v60  ;;  %v24816_v41 = vsub.f32 %v13472_v39, %v13539_v5  ;;  %v24820_v10 = vsub.f32 %v13471_v37, %v13541_v14  ;;  %20242 = vmatpush1.bf16.msra.mxu0 %v24822_v18  ;;  %v25858_v39 = vand.u32 4294901760, %v24701_v13 }
0x128a   : > { %v24826_v48 = vpack.c.bf16 %v13551_v4, %v13547_v36  ;;  %v24831_v3 = vsub.f32 %v13478_v30, %v13551_v4  ;;  %v25862_v37 = vand.u32 4294901760, %v24707_v47  ;;  %v24844_v30 = vsub.f32 %v13477_v26, %v13553_v63 }
0x128b   : > { %v24833_v31 = vsub.f32 %v13475_v60, %v13549_v50  ;;  %v24842_v24 = vpack.c.bf16 %v13553_v63, %v13549_v50  ;;  %v13602_v60 = vsub.f32 %v24699_v29, %v25859_v46  ;;  %v25864_v5 = vand.u32 4294901760, %v24764_v57 }
0x128c   : > { %26204 = vst [vmem:[#allocation53_spill] sm:$0xff] %v24826_v48  ;;  %20244 = vmatprep.subr.bf16.mxu0 %v24826_v48  ;;  %v13614_v23 = vsub.f32 %v24701_v13, %v25858_v39  ;;  %v13608_v14 = vsub.f32 %v24703_v1, %v25857_v33  ;;  %v13620_v44 = vsub.f32 %v24707_v47, %v25862_v37  ;;  %v25876_v50 = vand.u32 4294901760, %v24766_v49 }
0x128d   : > { %26205 = vst [vmem:[#allocation55_spill] sm:$0xff] %v24842_v24  ;;  %v13626_v36 = vsub.f32 %v24762_v34, %v25863_v43  ;;  %v13603_v4 = vand.u32 4294901760, %v13602_v60  ;;  %v13638_v26 = vsub.f32 %v24764_v57, %v25864_v5  ;;  %v25871_v63 = vand.u32 4294901760, %v24768_v15  ;;  %20246 = vmatpush1.bf16.msra.mxu0 %v24842_v24 }
0x128e   : > { %v13615_v33 = vand.u32 4294901760, %v13614_v23  ;;  %v13609_v39 = vand.u32 4294901760, %v13608_v14  ;;  %v13621_v46 = vand.u32 4294901760, %v13620_v44  ;;  %v13632_v43 = vsub.f32 %v24766_v49, %v25876_v50 }
0x128f   : > { %v13627_v48 = vand.u32 4294901760, %v13626_v36  ;;  %v13639_v37 = vand.u32 4294901760, %v13638_v26  ;;  %v13644_v60 = vsub.f32 %v24768_v15, %v25871_v63  ;;  %v25874_v5 = vand.u32 4294901760, %v24770_v52 }
0x1290   : > { %v20247_v18 = vpack.c.bf16 %v13615_v33, %v13603_v4  ;;  %v24875_v8 = vpack.c.bf16 %v13621_v46, %v13609_v39  ;;  %v25872_v24 = vand.u32 4294901760, %v24772_v53  ;;  %v25873_v23 = vand.u32 4294901760, %v24774_v12 }
0x1291   : > { %v24879_v14 = vpack.c.bf16 %v13639_v37, %v13627_v48  ;;  %v13633_v44 = vand.u32 4294901760, %v13632_v43  ;;  %v13645_v36 = vand.u32 4294901760, %v13644_v60  ;;  %v13650_v26 = vsub.f32 %v24770_v52, %v25874_v5 }
0x1292   : > { %20248 = vmatprep.subr.bf16.mxu0 %v20247_v18  ;;  %v13662_v63 = vsub.f32 %v24772_v53, %v25872_v24  ;;  %v13656_v46 = vsub.f32 %v24774_v12, %v25873_v23  ;;  %v25875_v39 = vand.u32 4294901760, %v24776_v51  ;;  %v25879_v48 = vand.u32 4294901760, %v24780_v11 }
0x1293   : > { %v24892_v33 = vpack.c.bf16 %v13645_v36, %v13633_v44  ;;  %v13651_v37 = vand.u32 4294901760, %v13650_v26  ;;  %v25880_v43 = vand.u32 4294901760, %v24782_v45  ;;  %v25883_v4 = vand.u32 4294901760, %v24784_v16 }
0x1294   : > { %v13663_v18 = vand.u32 4294901760, %v13662_v63  ;;  %v13657_v60 = vand.u32 4294901760, %v13656_v46  ;;  %v13668_v24 = vsub.f32 %v24776_v51, %v25875_v39  ;;  %v13674_v23 = vsub.f32 %v24780_v11, %v25879_v48 }
0x1295   : > { %v13686_v44 = vsub.f32 %v24782_v45, %v25880_v43  ;;  %v13680_v36 = vsub.f32 %v24784_v16, %v25883_v4  ;;  %v25885_v26 = vand.u32 4294901760, %v24786_v22  ;;  %v25884_v39 = vand.u32 4294901760, %v24791_v55 }
0x1296   : > { %v24909_v63 = vpack.c.bf16 %v13663_v18, %v13651_v37  ;;  %v13669_v46 = vand.u32 4294901760, %v13668_v24  ;;  %v13675_v5 = vand.u32 4294901760, %v13674_v23  ;;  %v25888_v43 = vand.u32 4294901760, %v24793_v0 }
0x1297   : > { %v13687_v50 = vand.u32 4294901760, %v13686_v44  ;;  %v13681_v58 = vand.u32 4294901760, %v13680_v36  ;;  %v13692_v48 = vsub.f32 %v24786_v22, %v25885_v26  ;;  %v13698_v4 = vsub.f32 %v24791_v55, %v25884_v39 }
0x1298   : > { %v24916_v42 = vpack.c.bf16 %v13669_v46, %v13657_v60  ;;  %v25889_v37 = vand.u32 4294901760, %v24795_v7  ;;  %v25893_v24 = vand.u32 4294901760, %v24797_v2  ;;  %v13710_v44 = vsub.f32 %v24793_v0, %v25888_v43 }
0x1299   : > { %v24923_v23 = vpack.c.bf16 %v13687_v50, %v13675_v5  ;;  %v13693_v18 = vand.u32 4294901760, %v13692_v48  ;;  %v13699_v36 = vand.u32 4294901760, %v13698_v4  ;;  %v25892_v39 = vand.u32 4294901760, %v24802_v62 }
0x129a   : > { %v13704_v60 = vsub.f32 %v24795_v7, %v25889_v37  ;;  %v13716_v46 = vsub.f32 %v24797_v2, %v25893_v24  ;;  %v13711_v5 = vand.u32 4294901760, %v13710_v44  ;;  %v25896_v50 = vand.u32 4294901760, %v24804_v25 }
0x129b   : > { %v24935_v26 = vpack.c.bf16 %v13693_v18, %v13681_v58  ;;  %v25897_v48 = vand.u32 4294901760, %v24808_v20  ;;  %v13722_v4 = vsub.f32 %v24802_v62, %v25892_v39  ;;  %v25898_v37 = vand.u32 4294901760, %v24810_v56 }
0x129c   : > { %v13705_v59 = vand.u32 4294901760, %v13704_v60  ;;  %v13717_v43 = vand.u32 4294901760, %v13716_v46  ;;  %v24943_v35 = vpack.c.bf16 %v13711_v5, %v13699_v36  ;;  %v13734_v58 = vsub.f32 %v24804_v25, %v25896_v50 }
0x129d   : > { %v13728_v18 = vsub.f32 %v24808_v20, %v25897_v48  ;;  %v13723_v60 = vand.u32 4294901760, %v13722_v4  ;;  %v13740_v46 = vsub.f32 %v24810_v56, %v25898_v37  ;;  %v25899_v39 = vand.u32 4294901760, %v24816_v41 }
0x129e   : > { %v24951_v44 = vpack.c.bf16 %v13717_v43, %v13705_v59  ;;  %v13735_v24 = vand.u32 4294901760, %v13734_v58  ;;  %v25904_v5 = vand.u32 4294901760, %v24818_v6  ;;  %v25905_v61 = vand.u32 4294901760, %v24820_v10 }
0x129f   : > { %v13729_v36 = vand.u32 4294901760, %v13728_v18  ;;  %v13741_v50 = vand.u32 4294901760, %v13740_v46  ;;  %v13746_v48 = vsub.f32 %v24816_v41, %v25899_v39  ;;  %v25906_v59 = vand.u32 4294901760, %v24824_v32 }
0x12a0   : > { %v24963_v43 = vpack.c.bf16 %v13735_v24, %v13723_v60  ;;  %v13758_v4 = vsub.f32 %v24818_v6, %v25904_v5  ;;  %v13752_v58 = vsub.f32 %v24820_v10, %v25905_v61  ;;  %v25911_v39 = vand.u32 4294901760, %v24828_v27 }
0x12a1   : > { %v24971_v18 = vpack.c.bf16 %v13741_v50, %v13729_v36  ;;  %v13747_v37 = vand.u32 4294901760, %v13746_v48  ;;  %v13764_v46 = vsub.f32 %v24824_v32, %v25906_v59  ;;  %v25918_v60 = vand.u32 4294901760, %v24831_v3 }
0x12a2   : > { %v13759_v38 = vand.u32 4294901760, %v13758_v4  ;;  %v13753_v24 = vand.u32 4294901760, %v13752_v58  ;;  %v25916_v28 = vand.u32 4294901760, %v24833_v31  ;;  %v13770_v61 = vsub.f32 %v24828_v27, %v25911_v39 }
0x12a3   : > { %v13765_v5 = vand.u32 4294901760, %v13764_v46  ;;  %v25917_v50 = vand.u32 4294901760, %v24844_v30  ;;  %v13782_v36 = vsub.f32 %v24831_v3, %v25918_v60 }
0x12a4   : > { %v20271_v48 = vpack.c.bf16 %v13759_v38, %v13747_v37  ;;  %v13776_v4 = vsub.f32 %v24833_v31, %v25916_v28  ;;  %v13771_v59 = vand.u32 4294901760, %v13770_v61  ;;  %v20279_v38 = vpack.c.bf16 %v24701_v13, %v24699_v29 }
0x12a5   : > { %v20273_v58 = vpack.c.bf16 %v13765_v5, %v13753_v24  ;;  %v13788_v46 = vsub.f32 %v24844_v30, %v25917_v50  ;;  %v13783_v21 = vand.u32 4294901760, %v13782_v36  ;;  %v20281_v37 = vpack.c.bf16 %v24707_v47, %v24703_v1  ;;  %v15674_v24 = vld [vmem:[%s21832_s9 + $0x2] ss:$0 sm:$0xff]  ;;  %v15675_v5 = vld [vmem:[%s21832_s9 + $0x5] ss:$0 sm:$0xff] }
0x12a6   : > { %v13777_v9 = vand.u32 4294901760, %v13776_v4  ;;  %v20283_v28 = vpack.c.bf16 %v24764_v57, %v24762_v34 }
0x12a7   : > { %v13789_v39 = vand.u32 4294901760, %v13788_v46  ;;  %v20275_v40 = vpack.c.bf16 %v13783_v21, %v13771_v59 }
0x12a9   : > { %v20277_v54 = vpack.c.bf16 %v13789_v39, %v13777_v9 }
0x1315   : > { %v13432_v21 = vpop.xlane.xlu0 %13431 }
0x1316   : > { %v13433_v59 = vmul.f32 0.0078125, %v13432_v21 }
0x1318   : > { %v13434_v9 = vadd.f32 1e-05, %v13433_v59 }
0x131a   : > { %21010 = vrsqrt.f32 %v13434_v9  ;;  %v14353_v9 = vld [vmem:[%s21807_s23 + $0x28] sm:$0xff] }
0x1324   : > { %v21011_v36 = vpop.eup %21010 }
0x1325   : > { %v13436_v4 = vmul.f32 %v21011_v36, %v24712_v17  ;;  %v14364_v17 = vld [vmem:[%s21807_s23 + $0x80] sm:$0xff] }
0x1327   : > { %v13441_v61 = vmul.f32 %v15674_v24, %v13436_v4  ;;  %v14352_v24 = vld [vmem:[%s21807_s23 + $0x20] sm:$0xff] }
0x1329   : > { %v13446_v46 = vadd.f32 %v15675_v5, %v13441_v61  ;;  %v14369_v5 = vld [vmem:[%s21807_s23 + $0xa8] sm:$0xff] }
0x132b   : > { %v25027_v57 = vand.u32 4294901760, %v13446_v46 }
0x132d   : > { %v25030_v50 = vsub.f32 %v13446_v46, %v25027_v57 }
0x132f   : > { %v25920_v60 = vand.u32 4294901760, %v25030_v50 }
0x1331   : > { %v13591_v21 = vsub.f32 %v25030_v50, %v25920_v60 }
0x1333   : > { %v13592_v59 = vand.u32 4294901760, %v13591_v21  ;;  %v14370_v21 = vld [vmem:[%s21807_s23 + $0xb0] sm:$0xff] }
0x1335   : > { %13593 = vmatmul.mubr.f32.vlgmr.msra.gmra.mrb[20].mxu0 %v13592_v59  ;;  %v26211_v59 = vpack.c.bf16 %v24768_v15, %v24766_v49 }
0x1336   : > { %20250 = vmatpush1.bf16.msra.mxu0 %v24875_v8  ;;  %13823 = vmatprep.mubr.f32.mxu0 %v26106_v19  ;;  %v14429_v8 = vand.u32 4294901760, %v14364_v17 }
0x1337   : > { %20252 = vmatprep.subr.bf16.mxu0 %v24879_v14 }
0x133a   : > { %20254 = vmatpush1.bf16.msra.mxu0 %v24892_v33  ;;  %v14349_v33 = vld [vmem:[%s21807_s23 + $0x8] sm:$0xff] }
0x133b   : > { %20256 = vmatprep.subr.bf16.mxu0 %v24909_v63  ;;  %v14384_v63 = vand.u32 4294901760, %v14349_v33 }
0x133e   : > { %20258 = vmatpush1.bf16.msra.mxu0 %v24916_v42  ;;  %v14348_v42 = vld [vmem:[%s21807_s23] sm:$0xff] }
0x133f   : > { %20260 = vmatprep.subr.bf16.mxu0 %v24923_v23 }
0x1342   : > { %20262 = vmatpush1.bf16.msra.mxu0 %v24935_v26  ;;  %v14381_v26 = vand.u32 4294901760, %v14348_v42 }
0x1343   : > { %20264 = vmatprep.subr.bf16.mxu0 %v24943_v35  ;;  %v14365_v35 = vld [vmem:[%s21807_s23 + $0x88] sm:$0xff] }
0x1344   : > { %v14432_v14 = vand.u32 4294901760, %v14365_v35  ;;  %v25065_v61 = vsub.f32 %v14348_v42, %v14381_v26  ;;  %v25070_v36 = vpack.c.bf16 %v14384_v63, %v14381_v26  ;;  %v14393_v26 = vand.u32 4294901760, %v14352_v24 }
0x1346   : > { %20266 = vmatpush1.bf16.msra.mxu0 %v24951_v44  ;;  %26207 = vst [vmem:[#allocation57_spill] sm:$0xff] %v25070_v36 }
0x1347   : > { %20268 = vmatprep.subr.bf16.mxu0 %v24963_v43  ;;  %v14350_v43 = vld [vmem:[%s21807_s23 + $0x10] sm:$0xff] }
0x134a   : > { %20270 = vmatpush1.bf16.msra.mxu0 %v24971_v18  ;;  %v14351_v18 = vld [vmem:[%s21807_s23 + $0x18] sm:$0xff] }
0x134b   : > { %20272 = vmatprep.subr.bf16.mxu0 %v20271_v48  ;;  %v14368_v48 = vld [vmem:[%s21807_s23 + $0xa0] sm:$0xff]  ;;  %v14390_v42 = vand.u32 4294901760, %v14351_v18 }
0x134d   : > { %v25096_v60 = vsub.f32 %v14351_v18, %v14390_v42 }
0x134e   : > { %20274 = vmatpush1.bf16.msra.mxu0 %v20273_v58  ;;  %v25059_v58 = vpack.c.bf16 %v14432_v14, %v14429_v8 }
0x134f   : > { %20276 = vmatprep.subr.bf16.mxu0 %v20275_v40  ;;  %v14367_v40 = vld [vmem:[%s21807_s23 + $0x98] sm:$0xff]  ;;  %26216 = vst [vmem:[#allocation64_spill] sm:$0xff] %v25096_v60 }
0x1350   : > { %v14438_v44 = vand.u32 4294901760, %v14367_v40  ;;  %26206 = vst [vmem:[#allocation56_spill] sm:$0xff] %v25059_v58  ;;  %20408 = vmatprep.subr.bf16.mxu1 %v25059_v58  ;;  %v14355_v58 = vld [vmem:[%s21807_s23 + $0x38] sm:$0xff] }
0x1351   : > { %20410 = vmatpush3.bf16.msra.mxu1 %v25070_v36 }
0x1352   : > { %20278 = vmatpush1.bf16.msra.mxu0 %v20277_v54  ;;  %v14366_v54 = vld [vmem:[%s21807_s23 + $0x90] sm:$0xff] }
0x1353   : > { %20280 = vmatprep.subr.bf16.mxu0 %v20279_v38  ;;  %v14435_v23 = vand.u32 4294901760, %v14366_v54  ;;  %v25061_v38 = vsub.f32 %v14364_v17, %v14429_v8  ;;  %v25083_v17 = vsub.f32 %v14367_v40, %v14438_v44  ;;  %v14441_v8 = vand.u32 4294901760, %v14368_v48 }
0x1355   : > { %13825 = vmatmul.mubr.f32.vlgmr.msra.gmra.mrb[20].mxu0 %v25027_v57  ;;  %v25074_v4 = vpack.c.bf16 %v14438_v44, %v14435_v23  ;;  %v25076_v46 = vsub.f32 %v14366_v54, %v14435_v23  ;;  %26212 = vst [vmem:[#allocation61_spill] sm:$0xff] %v25083_v17  ;;  %v14396_v54 = vand.u32 4294901760, %v14353_v9  ;;  %v14447_v23 = vand.u32 4294901760, %v14370_v21 }
0x1356   : > { %20282 = vmatpush1.bf16.msra.mxu0 %v20281_v37  ;;  %13959 = vmatprep.mubr.f32.mxu0 %v26106_v19  ;;  %v25063_v37 = vsub.f32 %v14365_v35, %v14432_v14  ;;  %v14387_v35 = vand.u32 4294901760, %v14350_v43  ;;  %v26213_v14 = vpack.c.bf16 %v24772_v53, %v24770_v52  ;;  %v25098_v39 = vsub.f32 %v14368_v48, %v14441_v8 }
0x1357   : > { %20284 = vmatprep.subr.bf16.mxu0 %v20283_v28  ;;  %v25072_v28 = vsub.f32 %v14349_v33, %v14384_v63  ;;  %26209 = vst [vmem:[#allocation59_spill] sm:$0xff] %v25074_v4  ;;  %26210 = vst [vmem:[#allocation60_spill] sm:$0xff] %v25076_v46  ;;  %v14444_v33 = vand.u32 4294901760, %v14369_v5  ;;  %v14371_v63 = vld [vmem:[%s21807_s23 + $0xb8] sm:$0xff]  ;;  %20412 = vmatprep.subr.bf16.mxu1 %v25074_v4  ;;  %v25105_v17 = vsub.f32 %v14352_v24, %v14393_v26 }
0x1358   : > { %v25092_v40 = vpack.c.bf16 %v14390_v42, %v14387_v35  ;;  %v25094_v44 = vsub.f32 %v14350_v43, %v14387_v35  ;;  %26217 = vst [vmem:[#allocation65_spill] sm:$0xff] %v25098_v39  ;;  %v26221_v46 = vpack.c.bf16 %v24776_v51, %v24774_v12  ;;  %v25110_v4 = vsub.f32 %v14353_v9, %v14396_v54 }
0x1359   : > { %26208 = vst [vmem:[#allocation58_spill] sm:$0xff] %v25072_v28  ;;  %v25103_v36 = vsub.f32 %v14369_v5, %v14444_v33  ;;  %26220 = vst [vmem:[#allocation68_spill] sm:$0xff] %v25105_v17  ;;  %v14450_v28 = vand.u32 4294901760, %v14371_v63  ;;  %v25112_v43 = vsub.f32 %v14370_v21, %v14447_v23  ;;  %v26224_v48 = vpack.c.bf16 %v24782_v45, %v24780_v11 }
0x135a   : > { %20286 = vmatpush1.bf16.msra.mxu0 %v26211_v59  ;;  %v14354_v59 = vld [vmem:[%s21807_s23 + $0x30] sm:$0xff]  ;;  %26214 = vst [vmem:[#allocation62_spill] sm:$0xff] %v25092_v40  ;;  %26215 = vst [vmem:[#allocation63_spill] sm:$0xff] %v25094_v44  ;;  %20414 = vmatpush3.bf16.msra.mxu1 %v25092_v40  ;;  %v25118_v5 = vpack.c.bf16 %v14396_v54, %v14393_v26  ;;  %v14402_v24 = vand.u32 4294901760, %v14355_v58  ;;  %v26230_v42 = vpack.c.bf16 %v24786_v22, %v24784_v16 }
0x135b   : > { %20288 = vmatprep.subr.bf16.mxu0 %v26213_v14  ;;  %v25101_v14 = vpack.c.bf16 %v14444_v33, %v14441_v8  ;;  %26219 = vst [vmem:[#allocation67_spill] sm:$0xff] %v25103_v36  ;;  %26222 = vst [vmem:[#allocation69_spill] sm:$0xff] %v25110_v4  ;;  %v14399_v18 = vand.u32 4294901760, %v14354_v59  ;;  %v25121_v35 = vpack.c.bf16 %v14450_v28, %v14447_v23  ;;  %v26256_v40 = vand.u32 4294901760, %v24701_v13  ;;  %v26261_v36 = vld [vmem:[#allocation49_spill] sm:$0xff] }
0x135c   : > { %26223 = vst [vmem:[#allocation70_spill] sm:$0xff] %v25112_v43  ;;  %26225 = vst [vmem:[#allocation71_spill] sm:$0xff] %v25118_v5  ;;  %v25127_v21 = vsub.f32 %v14355_v58, %v14402_v24  ;;  %v26231_v8 = vpack.c.bf16 %v24793_v0, %v24791_v55  ;;  %v26234_v58 = vpack.c.bf16 %v24804_v25, %v24802_v62  ;;  %v26259_v43 = vand.u32 4294901760, %v24707_v47 }
0x135d   : > { %26218 = vst [vmem:[#allocation66_spill] sm:$0xff] %v25101_v14  ;;  %20416 = vmatprep.subr.bf16.mxu1 %v25101_v14  ;;  %26226 = vst [vmem:[#allocation72_spill] sm:$0xff] %v25121_v35  ;;  %v25125_v9 = vsub.f32 %v14354_v59, %v14399_v18  ;;  %v25136_v33 = vpack.c.bf16 %v14402_v24, %v14399_v18  ;;  %v26235_v26 = vpack.c.bf16 %v24810_v56, %v24808_v20  ;;  %v26240_v18 = vld [vmem:[#allocation38_spill] sm:$0xff]  ;;  %v26242_v24 = vld [vmem:[#allocation40_spill] sm:$0xff] }
0x135e   : > { %20290 = vmatpush1.bf16.msra.mxu0 %v26221_v46  ;;  %v25123_v46 = vsub.f32 %v14371_v63, %v14450_v28  ;;  %26229 = vst [vmem:[#allocation75_spill] sm:$0xff] %v25127_v21  ;;  %20418 = vmatpush3.bf16.msra.mxu1 %v25118_v5  ;;  %v26233_v28 = vpack.c.bf16 %v24797_v2, %v24795_v7  ;;  %v26254_v5 = vld [vmem:[#allocation53_spill] sm:$0xff]  ;;  %v26255_v14 = vand.u32 4294901760, %v24699_v29  ;;  %v26260_v17 = vand.u32 4294901760, %v24762_v34 }
0x135f   : > { %20292 = vmatprep.subr.bf16.mxu0 %v26224_v48  ;;  %26228 = vst [vmem:[#allocation74_spill] sm:$0xff] %v25125_v9  ;;  %26232 = vst [vmem:[#allocation76_spill] sm:$0xff] %v25136_v33  ;;  %20420 = vmatprep.subr.bf16.mxu1 %v25121_v35  ;;  %v26236_v54 = vpack.c.bf16 %v24818_v6, %v24816_v41  ;;  %v26237_v63 = vpack.c.bf16 %v24824_v32, %v24820_v10  ;;  %v26241_v48 = vld [vmem:[#allocation39_spill] sm:$0xff]  ;;  %v26253_v35 = vld [vmem:[#allocation52_spill] sm:$0xff]  ;;  %v26262_v39 = vand.u32 4294901760, %v26261_v36 }
0x1360   : > { %26227 = vst [vmem:[#allocation73_spill] sm:$0xff] %v25123_v46  ;;  %v26238_v23 = vpack.c.bf16 %v24831_v3, %v24828_v27  ;;  %v26239_v59 = vpack.c.bf16 %v24844_v30, %v24833_v31  ;;  %v20343_v21 = vpack.c.bf16 %v26256_v40, %v26255_v14  ;;  %v26257_v9 = vld [vmem:[#allocation55_spill] sm:$0xff]  ;;  %v26258_v46 = vand.u32 4294901760, %v24703_v1 }
0x1361   : > { %v20347_v60 = vpack.c.bf16 %v26262_v39, %v26260_v17  ;;  %v26263_v44 = vand.u32 4294901760, %v25030_v50  ;;  %v26264_v29 = vand.u32 4294901760, %v24766_v49  ;;  %v26265_v13 = vand.u32 4294901760, %v24768_v15 }
0x1362   : > { %20294 = vmatpush1.bf16.msra.mxu0 %v26230_v42  ;;  %20422 = vmatpush3.bf16.msra.mxu1 %v25136_v33  ;;  %v26243_v42 = vld [vmem:[#allocation41_spill] sm:$0xff]  ;;  %v26252_v33 = vld [vmem:[#allocation51_spill] sm:$0xff]  ;;  %v20345_v4 = vpack.c.bf16 %v26259_v43, %v26258_v46  ;;  %v26266_v1 = vand.u32 4294901760, %v24770_v52  ;;  %v26267_v47 = vand.u32 4294901760, %v24772_v53  ;;  %v26268_v39 = vand.u32 4294901760, %v24774_v12 }
0x1363   : > { %20296 = vmatprep.subr.bf16.mxu0 %v26231_v8  ;;  %v26244_v8 = vld [vmem:[#allocation42_spill] sm:$0xff]  ;;  %v20349_v40 = vpack.c.bf16 %v26265_v13, %v26264_v29  ;;  %v26270_v49 = vand.u32 4294901760, %v24780_v11  ;;  %v26271_v15 = vand.u32 4294901760, %v24782_v45  ;;  %v26273_v52 = vand.u32 4294901760, %v24786_v22 }
0x1364   : > { %v20351_v34 = vpack.c.bf16 %v26267_v47, %v26266_v1  ;;  %v26274_v53 = vand.u32 4294901760, %v24791_v55  ;;  %v26275_v12 = vand.u32 4294901760, %v24793_v0  ;;  %v26277_v11 = vand.u32 4294901760, %v24797_v2  ;;  %v14361_v1 = vld [vmem:[%s21807_s23 + $0x68] sm:$0xff] }
0x1365   : > { %v26278_v45 = vand.u32 4294901760, %v24802_v62  ;;  %v26280_v22 = vand.u32 4294901760, %v24808_v20  ;;  %v26281_v55 = vand.u32 4294901760, %v24810_v56  ;;  %v26282_v0 = vand.u32 4294901760, %v24816_v41 }
0x1366   : > { %20298 = vmatpush1.bf16.msra.mxu0 %v26233_v28  ;;  %v26245_v28 = vld [vmem:[#allocation43_spill] sm:$0xff]  ;;  %v26284_v2 = vand.u32 4294901760, %v24820_v10  ;;  %v26285_v62 = vand.u32 4294901760, %v24824_v32  ;;  %v26287_v20 = vand.u32 4294901760, %v24831_v3  ;;  %v26288_v56 = vand.u32 4294901760, %v24833_v31  ;;  %v14357_v3 = vld [vmem:[%s21807_s23 + $0x48] sm:$0xff] }
0x1367   : > { %20300 = vmatprep.subr.bf16.mxu0 %v26234_v58  ;;  %v26246_v58 = vld [vmem:[#allocation44_spill] sm:$0xff]  ;;  %v20365_v46 = vpack.c.bf16 %v26281_v55, %v26280_v22  ;;  %v26289_v41 = vand.u32 4294901760, %v24844_v30  ;;  %v14408_v30 = vand.u32 4294901760, %v14357_v3 }
0x1368   : > { %v20369_v29 = vpack.c.bf16 %v26285_v62, %v26284_v2 }
0x136a   : > { %20302 = vmatpush1.bf16.msra.mxu0 %v26235_v26  ;;  %v26247_v26 = vld [vmem:[#allocation45_spill] sm:$0xff] }
0x136b   : > { %20304 = vmatprep.subr.bf16.mxu0 %v26236_v54  ;;  %v26248_v54 = vld [vmem:[#allocation46_spill] sm:$0xff] }
0x136e   : > { %20306 = vmatpush1.bf16.msra.mxu0 %v26237_v63  ;;  %v26249_v63 = vld [vmem:[#allocation47_spill] sm:$0xff] }
0x136f   : > { %20308 = vmatprep.subr.bf16.mxu0 %v26238_v23  ;;  %v26250_v23 = vld [vmem:[#allocation48_spill] sm:$0xff] }
0x1372   : > { %20310 = vmatpush1.bf16.msra.mxu0 %v26239_v59  ;;  %v26251_v59 = vld [vmem:[#allocation50_spill] sm:$0xff] }
0x1373   : > { %20312 = vmatprep.subr.bf16.mxu0 %v26240_v18 }
0x1375   : > { %13962 = vmatmul.mubr.f32.vlgmr.msra.gmra.mrb[20].mxu0 %v25030_v50  ;;  %v26269_v50 = vand.u32 4294901760, %v24776_v51  ;;  %v26276_v51 = vand.u32 4294901760, %v24795_v7  ;;  %v26283_v7 = vand.u32 4294901760, %v24818_v6  ;;  %v14373_v6 = vld [vmem:[%s21807_s23 + $0xc8] sm:$0xff] }
0x1376   : > { %20314 = vmatpush1.bf16.msra.mxu0 %v26241_v48  ;;  %14064 = vmatprep.mubr.f32.mxu0 %v26106_v19  ;;  %v14456_v32 = vand.u32 4294901760, %v14373_v6 }
0x1377   : > { %20316 = vmatprep.subr.bf16.mxu0 %v26242_v24  ;;  %v20353_v36 = vpack.c.bf16 %v26269_v50, %v26268_v39  ;;  %v20361_v14 = vpack.c.bf16 %v26277_v11, %v26276_v51  ;;  %v25962_v51 = vand.u32 4294901760, %v25065_v61 }
0x1378   : > { %v25313_v55 = vsub.f32 %v14373_v6, %v14456_v32 }
0x137a   : > { %20318 = vmatpush1.bf16.msra.mxu0 %v26243_v42  ;;  %26296 = vst [vmem:[#allocation43_spill] sm:$0xff] %v25313_v55 }
0x137b   : > { %20320 = vmatprep.subr.bf16.mxu0 %v26244_v8 }
0x137e   : > { %20322 = vmatpush1.bf16.msra.mxu0 %v26245_v28 }
0x137f   : > { %20324 = vmatprep.subr.bf16.mxu0 %v26246_v58 }
0x1382   : > { %20326 = vmatpush1.bf16.msra.mxu0 %v26247_v26 }
0x1383   : > { %20328 = vmatprep.subr.bf16.mxu0 %v26248_v54 }
0x1386   : > { %20330 = vmatpush1.bf16.msra.mxu0 %v26249_v63 }
0x1387   : > { %20332 = vmatprep.subr.bf16.mxu0 %v26250_v23 }
0x138a   : > { %20334 = vmatpush1.bf16.msra.mxu0 %v26251_v59 }
0x138b   : > { %20336 = vmatprep.subr.bf16.mxu0 %v26252_v33 }
0x138e   : > { %20338 = vmatpush1.bf16.msra.mxu0 %v26253_v35 }
0x138f   : > { %20340 = vmatprep.subr.bf16.mxu0 %v26254_v5 }
0x1392   : > { %20342 = vmatpush1.bf16.msra.mxu0 %v26257_v9 }
0x1393   : > { %20344 = vmatprep.subr.bf16.mxu0 %v20343_v21  ;;  %v20367_v21 = vpack.c.bf16 %v26283_v7, %v26282_v0  ;;  %v25317_v0 = vsub.f32 %v14357_v3, %v14408_v30 }
0x1395   : > { %14068 = vmatmul.mubr.f32.vlgmr.msra.gmra.mrb[20].mxu0 %v26263_v44  ;;  %v20359_v44 = vpack.c.bf16 %v26275_v12, %v26274_v53  ;;  %v25965_v53 = vand.u32 4294901760, %v25063_v37  ;;  %26298 = vst [vmem:[#allocation45_spill] sm:$0xff] %v25317_v0 }
0x1396   : > { %20346 = vmatpush1.bf16.msra.mxu0 %v20345_v4  ;;  %14234 = vmatprep.mubr.f32.mxu0 %v26106_v19  ;;  %v20355_v4 = vpack.c.bf16 %v26271_v15, %v26270_v49  ;;  %v14379_v49 = vld [vmem:[%s21807_s23 + $0xf8] sm:$0xff] }
0x1397   : > { %20348 = vmatprep.subr.bf16.mxu0 %v20347_v60  ;;  %v26272_v60 = vand.u32 4294901760, %v24784_v16  ;;  %v26279_v16 = vand.u32 4294901760, %v24804_v25  ;;  %v26286_v25 = vand.u32 4294901760, %v24828_v27  ;;  %v14356_v27 = vld [vmem:[%s21807_s23 + $0x40] sm:$0xff] }
0x1398   : > { %v14405_v31 = vand.u32 4294901760, %v14356_v27 }
0x1399   : > { %v20357_v17 = vpack.c.bf16 %v26273_v52, %v26272_v60  ;;  %v20363_v43 = vpack.c.bf16 %v26279_v16, %v26278_v45  ;;  %v20371_v13 = vpack.c.bf16 %v26287_v20, %v26286_v25  ;;  %v14362_v60 = vld [vmem:[%s21807_s23 + $0x70] sm:$0xff]  ;;  %v14363_v52 = vld [vmem:[%s21807_s23 + $0x78] sm:$0xff]  ;;  %v14615_v45 = vsub.f32 %v25063_v37, %v25965_v53 }
0x139a   : > { %20350 = vmatpush1.bf16.msra.mxu0 %v20349_v40  ;;  %v20373_v40 = vpack.c.bf16 %v26289_v41, %v26288_v56  ;;  %v14423_v12 = vand.u32 4294901760, %v14362_v60  ;;  %v26294_v16 = vld [vmem:[#allocation58_spill] sm:$0xff] }
0x139b   : > { %20352 = vmatprep.subr.bf16.mxu0 %v20351_v34  ;;  %v14420_v34 = vand.u32 4294901760, %v14361_v1 }
0x139e   : > { %20354 = vmatpush1.bf16.msra.mxu0 %v20353_v36  ;;  %v14378_v36 = vld [vmem:[%s21807_s23 + $0xf0] sm:$0xff] }
0x139f   : > { %20356 = vmatprep.subr.bf16.mxu0 %v20355_v4  ;;  %v14471_v15 = vand.u32 4294901760, %v14378_v36  ;;  %v14474_v4 = vand.u32 4294901760, %v14379_v49 }
0x13a1   : > { %v25302_v11 = vpack.c.bf16 %v14474_v4, %v14471_v15  ;;  %v25336_v56 = vsub.f32 %v14378_v36, %v14471_v15  ;;  %v25338_v41 = vsub.f32 %v14379_v49, %v14474_v4  ;;  %v26315_v36 = vld [vmem:[#allocation67_spill] sm:$0xff]  ;;  %v26316_v15 = vld [vmem:[#allocation68_spill] sm:$0xff] }
0x13a2   : > { %20358 = vmatpush1.bf16.msra.mxu0 %v20357_v17  ;;  %v25970_v17 = vand.u32 4294901760, %v25061_v38  ;;  %v25952_v49 = vand.u32 4294901760, %v26315_v36  ;;  %v25953_v4 = vand.u32 4294901760, %v26316_v15 }
0x13a3   : > { %20360 = vmatprep.subr.bf16.mxu0 %v20359_v44  ;;  %v14426_v44 = vand.u32 4294901760, %v14363_v52  ;;  %26293 = vst [vmem:[#allocation41_spill] sm:$0xff] %v25302_v11  ;;  %26307 = vst [vmem:[#allocation49_spill] sm:$0xff] %v25338_v41 }
0x13a5   : > { %v25344_v6 = vsub.f32 %v14363_v52, %v14426_v44 }
0x13a6   : > { %20362 = vmatpush1.bf16.msra.mxu0 %v20361_v14  ;;  %v14608_v14 = vsub.f32 %v25061_v38, %v25970_v17 }
0x13a7   : > { %20364 = vmatprep.subr.bf16.mxu0 %v20363_v43  ;;  %v25961_v43 = vand.u32 4294901760, %v26294_v16  ;;  %26309 = vst [vmem:[#allocation77_spill] sm:$0xff] %v25344_v6 }
0x13a9   : > { %v14503_v3 = vsub.f32 %v26294_v16, %v25961_v43 }
0x13aa   : > { %20366 = vmatpush1.bf16.msra.mxu0 %v20365_v46  ;;  %v25315_v46 = vsub.f32 %v14356_v27, %v14405_v31  ;;  %v14496_v27 = vsub.f32 %v25065_v61, %v25962_v51 }
0x13ab   : > { %20368 = vmatprep.subr.bf16.mxu0 %v20367_v21 }
0x13ac   : > { %26297 = vst [vmem:[#allocation44_spill] sm:$0xff] %v25315_v46 }
0x13ae   : > { %20370 = vmatpush1.bf16.msra.mxu0 %v20369_v29 }
0x13af   : > { %20372 = vmatprep.subr.bf16.mxu0 %v20371_v13  ;;  %v25334_v13 = vsub.f32 %v14361_v1, %v14420_v34 }
0x13b1   : > { %26306 = vst [vmem:[#allocation55_spill] sm:$0xff] %v25334_v13 }
0x13b2   : > { %20374 = vmatpush1.bf16.msra.mxu0 %v20373_v40  ;;  %v25340_v40 = vpack.c.bf16 %v14426_v44, %v14423_v12 }
0x13b3   : > { %20376 = vmatprep.subr.bf16.mxu0 %v26240_v18 }
0x13b4   : > { %26308 = vst [vmem:[#allocation58_spill] sm:$0xff] %v25340_v40 }
0x13b5   : > { %14236 = vmatmul.mubr.f32.vlgmr.msra.gmra.mrb[20].mxu0 %v25027_v57 }
0x13b6   : > { %20378 = vmatpush1.bf16.msra.mxu0 %v26241_v48  ;;  %14338 = vmatprep.mubr.f32.mxu0 %v26106_v19  ;;  %v14372_v19 = vld [vmem:[%s21807_s23 + $0xc0] sm:$0xff]  ;;  %v14358_v48 = vld [vmem:[%s21807_s23 + $0x50] sm:$0xff] }
0x13b7   : > { %20380 = vmatprep.subr.bf16.mxu0 %v26242_v24  ;;  %v14453_v10 = vand.u32 4294901760, %v14372_v19  ;;  %v14359_v24 = vld [vmem:[%s21807_s23 + $0x58] sm:$0xff] }
0x13b9   : > { %v25311_v22 = vsub.f32 %v14372_v19, %v14453_v10  ;;  %v25342_v19 = vsub.f32 %v14362_v60, %v14423_v12 }
0x13ba   : > { %20382 = vmatpush1.bf16.msra.mxu0 %v26243_v42  ;;  %v14411_v42 = vand.u32 4294901760, %v14358_v48 }
0x13bb   : > { %20384 = vmatprep.subr.bf16.mxu0 %v26244_v8  ;;  %v14414_v8 = vand.u32 4294901760, %v14359_v24  ;;  %26295 = vst [vmem:[#allocation42_spill] sm:$0xff] %v25311_v22 }
0x13bc   : > { %v25323_v2 = vsub.f32 %v14358_v48, %v14411_v42 }
0x13bd   : > { %v25325_v62 = vsub.f32 %v14359_v24, %v14414_v8  ;;  %v14497_v24 = vand.u32 4294901760, %v14496_v27 }
0x13be   : > { %20386 = vmatpush1.bf16.msra.mxu0 %v26245_v28  ;;  %26301 = vst [vmem:[#allocation48_spill] sm:$0xff] %v25323_v2 }
0x13bf   : > { %20388 = vmatprep.subr.bf16.mxu0 %v26246_v58  ;;  %v25281_v58 = vpack.c.bf16 %v14414_v8, %v14411_v42  ;;  %26302 = vst [vmem:[#allocation50_spill] sm:$0xff] %v25325_v62  ;;  %v26313_v42 = vld [vmem:[#allocation64_spill] sm:$0xff] }
0x13c0   : > { %v25951_v8 = vand.u32 4294901760, %v26313_v42 }
0x13c1   : > { %26290 = vst [vmem:[#allocation38_spill] sm:$0xff] %v25281_v58 }
0x13c2   : > { %20390 = vmatpush1.bf16.msra.mxu0 %v26247_v26  ;;  %v14376_v26 = vld [vmem:[%s21807_s23 + $0xe0] sm:$0xff] }
0x13c3   : > { %20392 = vmatprep.subr.bf16.mxu0 %v26248_v54  ;;  %v14377_v54 = vld [vmem:[%s21807_s23 + $0xe8] sm:$0xff] }
0x13c6   : > { %20394 = vmatpush1.bf16.msra.mxu0 %v26249_v63  ;;  %v14465_v63 = vand.u32 4294901760, %v14376_v26 }
0x13c7   : > { %20396 = vmatprep.subr.bf16.mxu0 %v26250_v23  ;;  %v14468_v23 = vand.u32 4294901760, %v14377_v54 }
0x13c8   : > { %v25328_v29 = vsub.f32 %v14376_v26, %v14465_v63  ;;  %v26314_v26 = vld [vmem:[#allocation65_spill] sm:$0xff] }
0x13c9   : > { %v25289_v39 = vpack.c.bf16 %v14468_v23, %v14465_v63  ;;  %v25330_v25 = vsub.f32 %v14377_v54, %v14468_v23  ;;  %v25950_v54 = vand.u32 4294901760, %v26314_v26  ;;  %v14504_v63 = vand.u32 4294901760, %v14503_v3  ;;  %v26317_v3 = vld [vmem:[#allocation69_spill] sm:$0xff] }
0x13ca   : > { %20398 = vmatpush1.bf16.msra.mxu0 %v26251_v59  ;;  %v14360_v59 = vld [vmem:[%s21807_s23 + $0x60] sm:$0xff]  ;;  %26303 = vst [vmem:[#allocation51_spill] sm:$0xff] %v25328_v29 }
0x13cb   : > { %20400 = vmatprep.subr.bf16.mxu0 %v26252_v33  ;;  %v25269_v33 = vpack.c.bf16 %v14456_v32, %v14453_v10  ;;  %v14417_v47 = vand.u32 4294901760, %v14360_v59  ;;  %26291 = vst [vmem:[#allocation39_spill] sm:$0xff] %v25289_v39  ;;  %26304 = vst [vmem:[#allocation52_spill] sm:$0xff] %v25330_v25  ;;  %v14609_v10 = vand.u32 4294901760, %v14608_v14  ;;  %v14616_v32 = vand.u32 4294901760, %v14615_v45 }
0x13cc   : > { %v25375_v60 = vpack.c.bf16 %v14504_v63, %v14497_v24  ;;  %v26319_v63 = vld [vmem:[#allocation73_spill] sm:$0xff] }
0x13cd   : > { %20424 = vmatprep.subr.bf16.mxu1 %v25269_v33  ;;  %v25291_v50 = vpack.c.bf16 %v14420_v34, %v14417_v47  ;;  %v25332_v20 = vsub.f32 %v14360_v59, %v14417_v47  ;;  %v20439_v48 = vpack.c.bf16 %v14616_v32, %v14609_v10  ;;  %v14517_v47 = vsub.f32 %v26313_v42, %v25951_v8 }
0x13ce   : > { %20402 = vmatpush1.bf16.msra.mxu0 %v26253_v35  ;;  %v25271_v35 = vpack.c.bf16 %v14408_v30, %v14405_v31  ;;  %v26310_v31 = vld [vmem:[#allocation60_spill] sm:$0xff]  ;;  %v14636_v34 = vsub.f32 %v26314_v26, %v25950_v54  ;;  %v14643_v10 = vsub.f32 %v26315_v36, %v25952_v49  ;;  %v14524_v32 = vsub.f32 %v26316_v15, %v25953_v4  ;;  %v26318_v54 = vld [vmem:[#allocation70_spill] sm:$0xff]  ;;  %v26321_v4 = vld [vmem:[#allocation75_spill] sm:$0xff] }
0x13cf   : > { %20404 = vmatprep.subr.bf16.mxu0 %v26254_v5  ;;  %v14374_v5 = vld [vmem:[%s21807_s23 + $0xd0] sm:$0xff]  ;;  %26292 = vst [vmem:[#allocation40_spill] sm:$0xff] %v25291_v50  ;;  %26305 = vst [vmem:[#allocation53_spill] sm:$0xff] %v25332_v20  ;;  %v25957_v30 = vand.u32 4294901760, %v26310_v31  ;;  %v14518_v14 = vand.u32 4294901760, %v14517_v47  ;;  %v25958_v24 = vand.u32 4294901760, %v26318_v54 }
0x13d0   : > { %20426 = vmatpush3.bf16.msra.mxu1 %v25271_v35  ;;  %v14637_v45 = vand.u32 4294901760, %v14636_v34  ;;  %v14525_v47 = vand.u32 4294901760, %v14524_v32  ;;  %v26320_v34 = vld [vmem:[#allocation74_spill] sm:$0xff]  ;;  %v25969_v32 = vand.u32 4294901760, %v25313_v55  ;;  %v25982_v17 = vand.u32 4294901760, %v25332_v20 }
0x13d1   : > { %v14622_v23 = vsub.f32 %v26310_v31, %v25957_v30  ;;  %v25960_v8 = vand.u32 4294901760, %v26320_v34 }
0x13d2   : > { %20406 = vmatpush1.bf16.msra.mxu0 %v26257_v9  ;;  %v14375_v9 = vld [vmem:[%s21807_s23 + $0xd8] sm:$0xff] }
0x13d3   : > { %v14462_v18 = vand.u32 4294901760, %v14375_v9  ;;  %v14623_v52 = vand.u32 4294901760, %v14622_v23  ;;  %v25959_v23 = vand.u32 4294901760, %v26319_v63 }
0x13d5   : > { %14340 = vmatmul.mubr.f32.vlgmr.msra.gmra.mrb[20].mxu0 %v25027_v57  ;;  %v14459_v57 = vand.u32 4294901760, %v14374_v5  ;;  %v25321_v21 = vsub.f32 %v14375_v9, %v14462_v18 }
0x13d7   : > { %v25279_v28 = vpack.c.bf16 %v14462_v18, %v14459_v57  ;;  %v25319_v7 = vsub.f32 %v14374_v5, %v14459_v57  ;;  %26300 = vst [vmem:[#allocation47_spill] sm:$0xff] %v25321_v21  ;;  %v26311_v5 = vld [vmem:[#allocation61_spill] sm:$0xff]  ;;  %v26312_v57 = vld [vmem:[#allocation63_spill] sm:$0xff] }
0x13d8   : > { %v25956_v9 = vand.u32 4294901760, %v26311_v5  ;;  %v25954_v18 = vand.u32 4294901760, %v26312_v57 }
0x13d9   : > { %20428 = vmatprep.subr.bf16.mxu1 %v25279_v28  ;;  %26299 = vst [vmem:[#allocation46_spill] sm:$0xff] %v25319_v7 }
0x13da   : > { %20430 = vmatpush3.bf16.msra.mxu1 %v25281_v58  ;;  %v14629_v59 = vsub.f32 %v26311_v5, %v25956_v9  ;;  %v14510_v1 = vsub.f32 %v26312_v57, %v25954_v18  ;;  %v25963_v18 = vand.u32 4294901760, %v26321_v4 }
0x13db   : > { %20432 = vmatprep.subr.bf16.mxu1 %v25289_v39 }
0x13dc   : > { %v14630_v12 = vand.u32 4294901760, %v14629_v59  ;;  %v14511_v44 = vand.u32 4294901760, %v14510_v1  ;;  %v14644_v1 = vand.u32 4294901760, %v14643_v10  ;;  %v25964_v10 = vand.u32 4294901760, %v25311_v22 }
0x13de   : > { %20434 = vmatpush3.bf16.msra.mxu1 %v25291_v50  ;;  %v25383_v27 = vpack.c.bf16 %v14630_v12, %v14623_v52  ;;  %v25388_v59 = vpack.c.bf16 %v14518_v14, %v14511_v44  ;;  %v14650_v52 = vsub.f32 %v26318_v54, %v25958_v24  ;;  %v14657_v12 = vsub.f32 %v26319_v63, %v25959_v23 }
0x13df   : > { %20436 = vmatprep.subr.bf16.mxu1 %v25302_v11  ;;  %v25401_v44 = vpack.c.bf16 %v14644_v1, %v14637_v45  ;;  %v14538_v14 = vsub.f32 %v26320_v34, %v25960_v8  ;;  %v14545_v24 = vsub.f32 %v26321_v4, %v25963_v18  ;;  %v14664_v45 = vsub.f32 %v25311_v22, %v25964_v10 }
0x13e0   : > { %v14651_v9 = vand.u32 4294901760, %v14650_v52  ;;  %v14658_v30 = vand.u32 4294901760, %v14657_v12  ;;  %v14671_v1 = vsub.f32 %v25313_v55, %v25969_v32  ;;  %v25966_v8 = vand.u32 4294901760, %v25315_v46 }
0x13e1   : > { %v14539_v23 = vand.u32 4294901760, %v14538_v14  ;;  %v14546_v52 = vand.u32 4294901760, %v14545_v24  ;;  %v25967_v12 = vand.u32 4294901760, %v25317_v0  ;;  %v14665_v51 = vand.u32 4294901760, %v14664_v45 }
0x13e2   : > { %20438 = vmatpush3.bf16.msra.mxu1 %v25340_v40  ;;  %v14672_v18 = vand.u32 4294901760, %v14671_v1  ;;  %v14552_v14 = vsub.f32 %v25315_v46, %v25966_v8  ;;  %v25968_v10 = vand.u32 4294901760, %v25319_v7  ;;  %v25973_v1 = vand.u32 4294901760, %v25325_v62 }
0x13e3   : > { %20440 = vmatprep.subr.bf16.mxu1 %v20439_v48  ;;  %v25955_v48 = vand.u32 4294901760, %v26317_v3  ;;  %v25427_v53 = vpack.c.bf16 %v14546_v52, %v14539_v23  ;;  %v25988_v11 = vand.u32 4294901760, %v25336_v56 }
0x13e4   : > { %v25434_v24 = vpack.c.bf16 %v14672_v18, %v14665_v51  ;;  %v14678_v45 = vsub.f32 %v25319_v7, %v25968_v10  ;;  %v14573_v51 = vsub.f32 %v25325_v62, %v25973_v1  ;;  %v25976_v18 = vand.u32 4294901760, %v25328_v29 }
0x13e5   : > { %v14531_v49 = vsub.f32 %v26317_v3, %v25955_v48  ;;  %v25983_v1 = vand.u32 4294901760, %v25334_v13 }
0x13e7   : > { %v14532_v48 = vand.u32 4294901760, %v14531_v49  ;;  %v25420_v49 = vpack.c.bf16 %v14658_v30, %v14651_v9  ;;  %v25971_v30 = vand.u32 4294901760, %v25321_v21  ;;  %v25972_v9 = vand.u32 4294901760, %v25323_v2 }
0x13e9   : > { %v25418_v43 = vpack.c.bf16 %v14532_v48, %v14525_v47  ;;  %v14559_v48 = vsub.f32 %v25317_v0, %v25967_v12  ;;  %v14553_v47 = vand.u32 4294901760, %v14552_v14  ;;  %v14685_v23 = vsub.f32 %v25321_v21, %v25971_v30 }
0x13ea   : > { %v14566_v52 = vsub.f32 %v25323_v2, %v25972_v9  ;;  %v14679_v12 = vand.u32 4294901760, %v14678_v45  ;;  %v25979_v14 = vand.u32 4294901760, %v25330_v25  ;;  %v14574_v30 = vand.u32 4294901760, %v14573_v51 }
0x13eb   : > { %v14560_v8 = vand.u32 4294901760, %v14559_v48  ;;  %v14686_v48 = vand.u32 4294901760, %v14685_v23  ;;  %v14692_v9 = vsub.f32 %v25328_v29, %v25976_v18  ;;  %v14587_v51 = vsub.f32 %v25334_v13, %v25983_v1 }
0x13ec   : > { %v14567_v32 = vand.u32 4294901760, %v14566_v52  ;;  %v14699_v45 = vsub.f32 %v25330_v25, %v25979_v14  ;;  %v25989_v14 = vand.u32 4294901760, %v25338_v41 }
0x13ed   : > { %v25451_v10 = vpack.c.bf16 %v14560_v8, %v14553_v47  ;;  %v25461_v40 = vpack.c.bf16 %v14686_v48, %v14679_v12  ;;  %v14580_v8 = vsub.f32 %v25332_v20, %v25982_v17  ;;  %v14693_v23 = vand.u32 4294901760, %v14692_v9 }
0x13ee   : > { %v25466_v47 = vpack.c.bf16 %v14574_v30, %v14567_v32  ;;  %v14700_v52 = vand.u32 4294901760, %v14699_v45  ;;  %v25990_v12 = vand.u32 4294901760, %v25342_v19  ;;  %v14588_v50 = vand.u32 4294901760, %v14587_v51 }
0x13ef   : > { %v14581_v18 = vand.u32 4294901760, %v14580_v8  ;;  %v25991_v17 = vand.u32 4294901760, %v25344_v6  ;;  %v14706_v32 = vsub.f32 %v25336_v56, %v25988_v11  ;;  %v14713_v30 = vsub.f32 %v25338_v41, %v25989_v14 }
0x13f0   : > { %v25474_v48 = vpack.c.bf16 %v14700_v52, %v14693_v23  ;;  %v14594_v9 = vsub.f32 %v25342_v19, %v25990_v12  ;;  %v20471_v11 = vpack.c.bf16 %v25063_v37, %v25061_v38  ;;  %v20473_v14 = vpack.c.bf16 %v26294_v16, %v25065_v61 }
0x13f1   : > { %v20465_v45 = vpack.c.bf16 %v14588_v50, %v14581_v18  ;;  %v14601_v8 = vsub.f32 %v25344_v6, %v25991_v17  ;;  %v14707_v23 = vand.u32 4294901760, %v14706_v32  ;;  %v14714_v52 = vand.u32 4294901760, %v14713_v30 }
0x13f2   : > { %v14595_v51 = vand.u32 4294901760, %v14594_v9  ;;  %v20475_v12 = vpack.c.bf16 %v26311_v5, %v26310_v31  ;;  %v20477_v50 = vpack.c.bf16 %v26313_v42, %v26312_v57  ;;  %v20479_v18 = vpack.c.bf16 %v26315_v36, %v26314_v26 }
0x13f3   : > { %v14602_v1 = vand.u32 4294901760, %v14601_v8  ;;  %v20467_v39 = vpack.c.bf16 %v14714_v52, %v14707_v23  ;;  %v20481_v32 = vpack.c.bf16 %v26317_v3, %v26316_v15  ;;  %v20485_v30 = vpack.c.bf16 %v26321_v4, %v26320_v34  ;;  %v13479_v34 = vld [vmem:[%s21837_s6] sm:$0x3] }
0x13f4   : > { %v20487_v9 = vpack.c.bf16 %v25313_v55, %v25311_v22  ;;  %v20489_v8 = vpack.c.bf16 %v25317_v0, %v25315_v46  ;;  %v20491_v23 = vpack.c.bf16 %v25321_v21, %v25319_v7  ;;  %v20493_v52 = vpack.c.bf16 %v25325_v62, %v25323_v2 }
0x13f5   : > { %v20469_v58 = vpack.c.bf16 %v14602_v1, %v14595_v51  ;;  %v20483_v1 = vpack.c.bf16 %v26319_v63, %v26318_v54  ;;  %v20495_v51 = vpack.c.bf16 %v25330_v25, %v25328_v29  ;;  %v20497_v17 = vpack.c.bf16 %v25334_v13, %v25332_v20 }
0x13f6   : > { %v20499_v4 = vpack.c.bf16 %v25338_v41, %v25336_v56  ;;  %v20501_v55 = vpack.c.bf16 %v25344_v6, %v25342_v19  ;;  %v13481_v22 = vlaneseq }
0x13f8   : > { %v13482_v0 = vshrl.u32 %v13481_v22, 7 }
0x13fa   : > { %v13483_v46 = vsub.s32 0, %v13482_v0  ;;  %v13487_v21 = vsub.s32 1, %v13482_v0 }
0x13fc   : > { %v13484_v7 = vrot.slane %v13479_v34, %v13483_v46  ;;  %v13488_v63 = vrot.slane %v13479_v34, %v13487_v21 }
0x14a8   : > { %v14341_v62 = vpop.f32.mrb[20].mxu0 }
0x14a9   : > { %v20605_v2 = vadd.f32 %v14341_v62, %v13484_v7  ;;  %v14343_v54 = vpop.f32.mrb[21].mxu0  ;;  %v26327_v62 = vld [vmem:[#allocation71_spill] sm:$0xff] }
0x14aa   : > { %v20606_v25 = vadd.f32 %v14343_v54, %v13488_v63  ;;  %v26333_v54 = vld [vmem:[#allocation41_spill] sm:$0xff]  ;;  %v26337_v63 = vand.u32 4294901760, %v25065_v61 }
0x14ab   : > { %v14346_v29 = vmax.f32 %v20605_v2, 0.0 }
0x14ac   : > { %v14347_v3 = vmax.f32 %v20606_v25, 0.0  ;;  %v26331_v25 = vld [vmem:[#allocation39_spill] sm:$0xff] }
0x14ad   : > { %v25522_v13 = vand.u32 4294901760, %v14346_v29 }
0x14ae   : > { %v25524_v20 = vand.u32 4294901760, %v14347_v3 }
0x14af   : > { %v25527_v41 = vsub.f32 %v14346_v29, %v25522_v13  ;;  %v26328_v29 = vld [vmem:[#allocation72_spill] sm:$0xff] }
0x14b0   : > { %v14477_v22 = vsub.f32 %v14347_v3, %v25524_v20  ;;  %v26336_v3 = vld [vmem:[#allocation58_spill] sm:$0xff] }
0x14b1   : > { %v14484_v6 = vand.u32 4294901760, %v25527_v41 }
0x14b2   : > { %v14478_v0 = vand.u32 4294901760, %v14477_v22 }
0x14b3   : > { %v14485_v46 = vsub.f32 %v25527_v41, %v14484_v6 }
0x14b4   : > { %v14479_v7 = vsub.f32 %v14477_v22, %v14478_v0 }
0x14b5   : > { %v14486_v2 = vand.u32 4294901760, %v14485_v46 }
0x14b6   : > { %v14480_v21 = vand.u32 4294901760, %v14479_v7  ;;  %v26366_v7 = vld [vmem:[#allocation47_spill] sm:$0xff] }
0x14b8   : > { %14481 = vmatprep.mubr.f32.mxu1 %v14480_v21  ;;  %v26367_v21 = vand.u32 4294901760, %v26366_v7 }
0x14b9   : > { %14487 = vmatmul.mubr.f32.vlgmr.msra.gmra.mrb[48].mxu1 %v14486_v2 }
0x14ba   : > { %20442 = vmatpush3.bf16.msra.mxu1 %v25375_v60  ;;  %14717 = vmatprep.mubr.f32.mxu1 %v25524_v20  ;;  %v26335_v60 = vand.u32 4294901760, %v25063_v37  ;;  %v26342_v37 = vand.u32 4294901760, %v26313_v42  ;;  %v26352_v42 = vld [vmem:[#allocation74_spill] sm:$0xff] }
0x14bb   : > { %20444 = vmatprep.subr.bf16.mxu1 %v25383_v27 }
0x14be   : > { %20446 = vmatpush3.bf16.msra.mxu1 %v25388_v59  ;;  %v26338_v59 = vand.u32 4294901760, %v26294_v16  ;;  %v26343_v16 = vand.u32 4294901760, %v26314_v26 }
0x14bf   : > { %20448 = vmatprep.subr.bf16.mxu1 %v25401_v44  ;;  %v26339_v44 = vand.u32 4294901760, %v26310_v31 }
0x14c0   : > { %v20537_v34 = vpack.c.bf16 %v26338_v59, %v26337_v63 }
0x14c2   : > { %20450 = vmatpush3.bf16.msra.mxu1 %v25418_v43  ;;  %v26326_v43 = vld [vmem:[#allocation66_spill] sm:$0xff] }
0x14c3   : > { %20452 = vmatprep.subr.bf16.mxu1 %v25420_v49 }
0x14c6   : > { %20454 = vmatpush3.bf16.msra.mxu1 %v25427_v53  ;;  %v26324_v53 = vld [vmem:[#allocation59_spill] sm:$0xff] }
0x14c7   : > { %20456 = vmatprep.subr.bf16.mxu1 %v25434_v24  ;;  %v26344_v24 = vand.u32 4294901760, %v26315_v36  ;;  %v26356_v36 = vld [vmem:[#allocation42_spill] sm:$0xff] }
0x14c9   : > { %v20543_v31 = vpack.c.bf16 %v26344_v24, %v26343_v16  ;;  %v26378_v16 = vld [vmem:[#allocation55_spill] sm:$0xff] }
0x14ca   : > { %20458 = vmatpush3.bf16.msra.mxu1 %v25451_v10  ;;  %v26340_v10 = vand.u32 4294901760, %v26311_v5  ;;  %v26345_v5 = vand.u32 4294901760, %v26316_v15  ;;  %v26379_v24 = vand.u32 4294901760, %v26378_v16 }
0x14cb   : > { %20460 = vmatprep.subr.bf16.mxu1 %v25461_v40  ;;  %v26332_v40 = vld [vmem:[#allocation40_spill] sm:$0xff] }
0x14cc   : > { %v20539_v49 = vpack.c.bf16 %v26340_v10, %v26339_v44  ;;  %v26374_v10 = vld [vmem:[#allocation52_spill] sm:$0xff] }
0x14ce   : > { %20462 = vmatpush3.bf16.msra.mxu1 %v25466_v47  ;;  %v26348_v47 = vld [vmem:[#allocation70_spill] sm:$0xff] }
0x14cf   : > { %20464 = vmatprep.subr.bf16.mxu1 %v25474_v48  ;;  %v26350_v48 = vld [vmem:[#allocation73_spill] sm:$0xff] }
0x14d2   : > { %20466 = vmatpush3.bf16.msra.mxu1 %v20465_v45 }
0x14d3   : > { %20468 = vmatprep.subr.bf16.mxu1 %v20467_v39  ;;  %v26323_v39 = vld [vmem:[#allocation57_spill] sm:$0xff] }
0x14d6   : > { %20470 = vmatpush3.bf16.msra.mxu1 %v20469_v58  ;;  %v26322_v58 = vld [vmem:[#allocation56_spill] sm:$0xff] }
0x14d7   : > { %20472 = vmatprep.subr.bf16.mxu1 %v20471_v11  ;;  %v26325_v11 = vld [vmem:[#allocation62_spill] sm:$0xff] }
0x14d9   : > { %14719 = vmatmul.mubr.f32.vlgmr.msra.gmra.mrb[50].mxu1 %v25522_v13 }
0x14da   : > { %20474 = vmatpush3.bf16.msra.mxu1 %v20473_v14  ;;  %14854 = vmatprep.mubr.f32.mxu1 %v14477_v22  ;;  %v26346_v14 = vld [vmem:[#allocation69_spill] sm:$0xff] }
0x14db   : > { %20476 = vmatprep.subr.bf16.mxu1 %v20475_v12  ;;  %v26349_v12 = vand.u32 4294901760, %v26348_v47  ;;  %v26383_v47 = vand.u32 4294901760, %v25342_v19 }
0x14de   : > { %20478 = vmatpush3.bf16.msra.mxu1 %v20477_v50  ;;  %v26353_v50 = vand.u32 4294901760, %v26352_v42 }
0x14df   : > { %20480 = vmatprep.subr.bf16.mxu1 %v20479_v18  ;;  %v26354_v18 = vld [vmem:[#allocation75_spill] sm:$0xff] }
0x14e0   : > { %v26355_v26 = vand.u32 4294901760, %v26354_v18  ;;  %v15676_v18 = vld [vmem:[%s683_s17] ss:$0 sm:$0xff] }
0x14e2   : > { %20482 = vmatpush3.bf16.msra.mxu1 %v20481_v32  ;;  %v20549_v32 = vpack.c.bf16 %v26355_v26, %v26353_v50  ;;  %v26387_v26 = vld [vmem:[#allocation54_spill] sm:$0xff] }
0x14e3   : > { %20484 = vmatprep.subr.bf16.mxu1 %v20483_v1  ;;  %v26357_v1 = vand.u32 4294901760, %v26356_v36 }
0x14e6   : > { %20486 = vmatpush3.bf16.msra.mxu1 %v20485_v30  ;;  %v26358_v30 = vld [vmem:[#allocation43_spill] sm:$0xff] }
0x14e7   : > { %20488 = vmatprep.subr.bf16.mxu1 %v20487_v9  ;;  %v26359_v15 = vand.u32 4294901760, %v26358_v30 }
0x14e9   : > { %v20551_v9 = vpack.c.bf16 %v26359_v15, %v26357_v1 }
0x14ea   : > { %20490 = vmatpush3.bf16.msra.mxu1 %v20489_v8  ;;  %v26360_v8 = vld [vmem:[#allocation44_spill] sm:$0xff] }
0x14eb   : > { %20492 = vmatprep.subr.bf16.mxu1 %v20491_v23  ;;  %v26361_v23 = vand.u32 4294901760, %v26360_v8 }
0x14ee   : > { %20494 = vmatpush3.bf16.msra.mxu1 %v20493_v52  ;;  %v26362_v52 = vld [vmem:[#allocation45_spill] sm:$0xff] }
0x14ef   : > { %20496 = vmatprep.subr.bf16.mxu1 %v20495_v51  ;;  %v26363_v51 = vand.u32 4294901760, %v26362_v52 }
0x14f1   : > { %v20553_v22 = vpack.c.bf16 %v26363_v51, %v26361_v23 }
0x14f2   : > { %20498 = vmatpush3.bf16.msra.mxu1 %v20497_v17  ;;  %v26329_v17 = vld [vmem:[#allocation76_spill] sm:$0xff] }
0x14f3   : > { %20500 = vmatprep.subr.bf16.mxu1 %v20499_v4  ;;  %v26334_v4 = vand.u32 4294901760, %v25061_v38  ;;  %v26341_v38 = vand.u32 4294901760, %v26312_v57  ;;  %v26351_v57 = vand.u32 4294901760, %v26350_v48 }
0x14f5   : > { %v20535_v27 = vpack.c.bf16 %v26335_v60, %v26334_v4  ;;  %v20541_v61 = vpack.c.bf16 %v26342_v37, %v26341_v38  ;;  %v20547_v45 = vpack.c.bf16 %v26351_v57, %v26349_v12  ;;  %v26368_v4 = vld [vmem:[#allocation48_spill] sm:$0xff]  ;;  %v26376_v37 = vld [vmem:[#allocation53_spill] sm:$0xff] }
0x14f6   : > { %20502 = vmatpush3.bf16.msra.mxu1 %v20501_v55  ;;  %v26330_v55 = vld [vmem:[#allocation38_spill] sm:$0xff]  ;;  %v26369_v60 = vand.u32 4294901760, %v26368_v4  ;;  %v26384_v12 = vld [vmem:[#allocation77_spill] sm:$0xff] }
0x14f7   : > { %20504 = vmatprep.subr.bf16.mxu1 %v26322_v58  ;;  %v26385_v48 = vand.u32 4294901760, %v26384_v12 }
0x14f9   : > { %14857 = vmatmul.mubr.f32.vlgmr.msra.gmra.mrb[52].mxu1 %v25527_v41  ;;  %v26347_v41 = vand.u32 4294901760, %v26346_v14  ;;  %v26381_v14 = vld [vmem:[#allocation49_spill] sm:$0xff]  ;;  %v20565_v57 = vpack.c.bf16 %v26385_v48, %v26383_v47 }
0x14fa   : > { %20506 = vmatpush3.bf16.msra.mxu1 %v26323_v39  ;;  %14961 = vmatprep.mubr.f32.mxu1 %v14478_v0  ;;  %v26364_v0 = vld [vmem:[#allocation46_spill] sm:$0xff] }
0x14fb   : > { %20508 = vmatprep.subr.bf16.mxu1 %v26324_v53  ;;  %v26365_v46 = vand.u32 4294901760, %v26364_v0 }
0x14fd   : > { %v20555_v2 = vpack.c.bf16 %v26367_v21, %v26365_v46 }
0x14fe   : > { %20510 = vmatpush3.bf16.msra.mxu1 %v26325_v11 }
0x14ff   : > { %20512 = vmatprep.subr.bf16.mxu1 %v26326_v43 }
0x1502   : > { %20514 = vmatpush3.bf16.msra.mxu1 %v26327_v62 }
0x1503   : > { %20516 = vmatprep.subr.bf16.mxu1 %v26328_v29 }
0x1506   : > { %20518 = vmatpush3.bf16.msra.mxu1 %v26329_v17 }
0x1507   : > { %20520 = vmatprep.subr.bf16.mxu1 %v25269_v33 }
0x150a   : > { %20522 = vmatpush3.bf16.msra.mxu1 %v25271_v35 }
0x150b   : > { %20524 = vmatprep.subr.bf16.mxu1 %v25279_v28 }
0x150e   : > { %20526 = vmatpush3.bf16.msra.mxu1 %v26330_v55 }
0x150f   : > { %20528 = vmatprep.subr.bf16.mxu1 %v26331_v25 }
0x1512   : > { %20530 = vmatpush3.bf16.msra.mxu1 %v26332_v40 }
0x1513   : > { %20532 = vmatprep.subr.bf16.mxu1 %v26333_v54 }
0x1516   : > { %20534 = vmatpush3.bf16.msra.mxu1 %v26336_v3 }
0x1517   : > { %20536 = vmatprep.subr.bf16.mxu1 %v20535_v27  ;;  %v26370_v27 = vld [vmem:[#allocation50_spill] sm:$0xff] }
0x1518   : > { %v26371_v63 = vand.u32 4294901760, %v26370_v27 }
0x1519   : > { %14965 = vmatmul.mubr.f32.vlgmr.msra.gmra.mrb[54].mxu1 %v14484_v6  ;;  %v20545_v6 = vpack.c.bf16 %v26347_v41, %v26345_v5  ;;  %v26380_v5 = vand.u32 4294901760, %v25336_v56  ;;  %v26382_v41 = vand.u32 4294901760, %v26381_v14 }
0x151a   : > { %20538 = vmatpush3.bf16.msra.mxu1 %v20537_v34  ;;  %15131 = vmatprep.mubr.f32.mxu1 %v25524_v20  ;;  %v20557_v59 = vpack.c.bf16 %v26371_v63, %v26369_v60  ;;  %v26372_v34 = vld [vmem:[#allocation51_spill] sm:$0xff] }
0x151b   : > { %20540 = vmatprep.subr.bf16.mxu1 %v20539_v49  ;;  %v26373_v44 = vand.u32 4294901760, %v26372_v34  ;;  %v26375_v49 = vand.u32 4294901760, %v26374_v10 }
0x151d   : > { %v20559_v38 = vpack.c.bf16 %v26375_v49, %v26373_v44 }
0x151e   : > { %20542 = vmatpush3.bf16.msra.mxu1 %v20541_v61  ;;  %v26377_v61 = vand.u32 4294901760, %v26376_v37 }
0x151f   : > { %20544 = vmatprep.subr.bf16.mxu1 %v20543_v31 }
0x1520   : > { %v20561_v31 = vpack.c.bf16 %v26379_v24, %v26377_v61 }
0x1522   : > { %20546 = vmatpush3.bf16.msra.mxu1 %v20545_v6  ;;  %v20563_v6 = vpack.c.bf16 %v26382_v41, %v26380_v5 }
0x1523   : > { %20548 = vmatprep.subr.bf16.mxu1 %v20547_v45 }
0x1526   : > { %20550 = vmatpush3.bf16.msra.mxu1 %v20549_v32 }
0x1527   : > { %20552 = vmatprep.subr.bf16.mxu1 %v20551_v9 }
0x152a   : > { %20554 = vmatpush3.bf16.msra.mxu1 %v20553_v22 }
0x152b   : > { %20556 = vmatprep.subr.bf16.mxu1 %v20555_v2 }
0x152e   : > { %20558 = vmatpush3.bf16.msra.mxu1 %v20557_v59 }
0x152f   : > { %20560 = vmatprep.subr.bf16.mxu1 %v20559_v38 }
0x1532   : > { %20562 = vmatpush3.bf16.msra.mxu1 %v20561_v31 }
0x1533   : > { %20564 = vmatprep.subr.bf16.mxu1 %v20563_v6 }
0x1536   : > { %20566 = vmatpush3.bf16.msra.mxu1 %v20565_v57 }
0x1537   : > { %20568 = vmatprep.subr.bf16.mxu1 %v26322_v58 }
0x1539   : > { %15133 = vmatmul.mubr.f32.vlgmr.msra.gmra.mrb[56].mxu1 %v25522_v13 }
0x153a   : > { %20570 = vmatpush3.bf16.msra.mxu1 %v26323_v39  ;;  %15235 = vmatprep.mubr.f32.mxu1 %v25524_v20 }
0x153b   : > { %20572 = vmatprep.subr.bf16.mxu1 %v26324_v53 }
0x153e   : > { %20574 = vmatpush3.bf16.msra.mxu1 %v26325_v11 }
0x153f   : > { %20576 = vmatprep.subr.bf16.mxu1 %v26326_v43 }
0x1542   : > { %20578 = vmatpush3.bf16.msra.mxu1 %v26327_v62 }
0x1543   : > { %20580 = vmatprep.subr.bf16.mxu1 %v26328_v29 }
0x1546   : > { %20582 = vmatpush3.bf16.msra.mxu1 %v26329_v17 }
0x1547   : > { %20584 = vmatprep.subr.bf16.mxu1 %v25269_v33 }
0x154a   : > { %20586 = vmatpush3.bf16.msra.mxu1 %v25271_v35 }
0x154b   : > { %20588 = vmatprep.subr.bf16.mxu1 %v25279_v28 }
0x154e   : > { %20590 = vmatpush3.bf16.msra.mxu1 %v26330_v55 }
0x154f   : > { %20592 = vmatprep.subr.bf16.mxu1 %v26331_v25 }
0x1552   : > { %20594 = vmatpush3.bf16.msra.mxu1 %v26332_v40 }
0x1553   : > { %20596 = vmatprep.subr.bf16.mxu1 %v26333_v54 }
0x1556   : > { %20598 = vmatpush3.bf16.msra.mxu1 %v26336_v3 }
0x1559   : > { %15237 = vmatmul.mubr.f32.vlgmr.msra.gmra.mrb[58].mxu1 %v25522_v13 }
0x158c   : > { %v16725_v20 = vpop.f32.mrb[48].mxu1 }
0x158d   : > { %v16726_v56 = vpop.f32.mrb[49].mxu1 }
0x158e   : > { %v16727_v19 = vadd.f32 %v16726_v56, %v16725_v20 }
0x15ac   : > { %v16760_v33 = vpop.f32.mrb[50].mxu1 }
0x15ad   : > { %v16761_v58 = vpop.f32.mrb[51].mxu1 }
0x15ae   : > { %v16762_v35 = vadd.f32 %v16761_v58, %v16760_v33 }
0x15b0   : > { %v14721_v39 = vadd.f32 %v16762_v35, %v16727_v19 }
0x15cc   : > { %v16795_v28 = vpop.f32.mrb[52].mxu1 }
0x15cd   : > { %v16796_v53 = vpop.f32.mrb[53].mxu1 }
0x15ce   : > { %v16797_v11 = vadd.f32 %v16796_v53, %v16795_v28 }
0x15d0   : > { %v14859_v43 = vadd.f32 %v16797_v11, %v14721_v39 }
0x15ec   : > { %v16830_v62 = vpop.f32.mrb[54].mxu1 }
0x15ed   : > { %v16831_v29 = vpop.f32.mrb[55].mxu1 }
0x15ee   : > { %v16832_v17 = vadd.f32 %v16831_v29, %v16830_v62 }
0x15f0   : > { %v14967_v55 = vadd.f32 %v16832_v17, %v14859_v43 }
0x160c   : > { %v16865_v25 = vpop.f32.mrb[56].mxu1 }
0x160d   : > { %v16866_v40 = vpop.f32.mrb[57].mxu1 }
0x160e   : > { %v16867_v54 = vadd.f32 %v16866_v40, %v16865_v25 }
0x1610   : > { %v15135_v13 = vadd.f32 %v16867_v54, %v14967_v55 }
0x162c   : > { %v16900_v3 = vpop.f32.mrb[58].mxu1 }
0x162d   : > { %v16901_v45 = vpop.f32.mrb[59].mxu1 }
0x162e   : > { %v16902_v42 = vadd.f32 %v16901_v45, %v16900_v3 }
0x1630   : > { %v15239_v50 = vadd.f32 %v16902_v42, %v15135_v13  ;;  %15255 = sbr.rel (%p15677_p5) target bundleno = 5687 (0x1637), region = 96 }
0x1632   : > { %v15242_v32 = vadd.f32 %v15239_v50, %v26387_v26 }
0x1634   : > { %v15250_v36 = vadd.f32 %v15676_v18, %v15242_v32 }
0x1636   : > { %15251 = vst [vmem:[#allocation2] sm:$0xff] %v15250_v36  ;;  %15256 = vst [vmem:[%s664_s21] sm:$0xff] (!%p15677_p5), %v15250_v36 }
0x1637 PF: > { %s26389_s20 = sld [smem:[#allocation26_spill]]  ;;  %s26390_s10 = sld [smem:[#allocation32_spill]] }
0x1638   : > { %s26391_s15 = sld [smem:[#allocation89_spill]]  ;;  %s15271_s28 = sshll.u32 %s664_s21, 4  ;;  %s15272_s28 = int_to_ptr.vmem [resolvable:$true] %s15271_s28 }
0x1639   : > { %s15258_s18 = scalar_lea.sflag [#allocation5], %s21775_s12  ;;  %s21193_s0 = scalar_lea.vmem %s15272_s28, 128 }
0x163a   : > { %p21194_p9 = scmp.ne.s32.totalorder %s15272_s28, %s21193_s0  ;;  %s21349_s13 = smov [#allocation14]  }
0x163b   : > { %s21197_s2 = sshll.u32 %s21349_s13, 4  ;;  %s21198_s2 = int_to_ptr.vmem [resolvable:$false] %s21197_s2 }
0x163c   : > { %s21199_s3 = scalar_lea.vmem %s21198_s2, 256  ;;  %p21200_p10 = scmp.lt.s32.totalorder %s15272_s28, %s21198_s2 }
0x163d   : > { %s15679_s1 = sshll.u32 %s26389_s20, 7  ;;  %p26392_p6 = scmp.ne.s32.totalorder %s26390_s10, 0 }
0x163e   : > { %s25664_s29 = scalar_lea.hbm %s26391_s15, %s15679_s1  ;;  %p21201_p1 = scmp.lt.s32.totalorder %s21199_s3, %s21193_s0 }
0x163f   : > { %p21195_p3 = pnand %p21194_p9, %p26392_p6 }
0x1640   : > { %p21202_p7 = por %p21201_p1, %p21200_p10 }
0x1641   : > { %p21196_p12 = pneg %p21195_p3 }
0x1643   : > { %p21203_p8 = pnand %p21202_p7, %p21196_p12 }
0x1645   : > { %21206 = shalt.err (!%p21203_p8)
}
0x1646   : > { %s21207_s21 = scalar_lea.hbm %s25664_s29, 128  ;;  %s21211_s6 = scalar_lea.hbm %s26391_s15, 256 }
0x1647   : > { %p21208_p11 = scmp.ne.s32.totalorder %s25664_s29, %s21207_s21  ;;  %p21212_p13 = scmp.lt.u32.totalorder %s25664_s29, %s26391_s15 }
0x1648   : > { %p21213_p2 = scmp.lt.u32.totalorder %s21211_s6, %s21207_s21  ;;  %p21215_p9 = scmp.lt.u32.totalorder %s21207_s21, %s25664_s29 }
0x1649   : > { %p21209_p4 = pnand %p21208_p11, %p26392_p6 }
0x164a   : > { %p21214_p5 = por %p21213_p2, %p21212_p13 }
0x164b   : > { %p21210_p0 = pneg %p21209_p4 }
0x164c   : > { %p21216_p3 = por %p21215_p9, %p21214_p5 }
0x164e   : > { %p21217_p12 = pnand %p21216_p3, %p21210_p0 }
0x1650   : > { %21220 = shalt.err (!%p21217_p12)
}
0x1651   : > { %20849 = dma.vmem_to_hbm [thread:$0]  (%p26392_p6), %s15272_s28, 128, %s25664_s29, %s15258_s18  }
0x1652 PF: > { %s26393_s17 = sld [smem:[#allocation22_spill]]  ;;  %s26394_s4 = sld [smem:[#allocation33_spill]] }
0x1653   : > { %p20875_p10 = scmp.ge.s32.totalorder %s21331_s27, 2 }
0x1658   : > { %s15283_s5 = sand.u32 1, %s26393_s17   ;;  %p26395_p1 = scmp.ne.s32.totalorder %s26394_s4, 0 }
0x1659   : > { %s15284_s7 = scalar_lea.sflag [#allocation5], %s15283_s5 }
0x165a   : > { %p20871_p7 = pnand %p20875_p10, %p26395_p1 }
0x165c   : > { %21286 = dma.done.wait (!%p20871_p7), %s15284_s7, 128  }
0x165d   : > { %21288 = vsyncadd (!%p20871_p7), %s15284_s7, 4294967168  ;;  %s36_s27 = sadd.s32 1, %s21331_s27   ;;  %s26396_s17 = sld [smem:[#allocation21_spill]] }
0x165e   : > { %p33_p8 = scmp.ge.s32.totalorder %s36_s27, 6   ;;  %s26397_s22 = sld [smem:[#allocation36_spill]] }
0x165f   : > { %s26398_s20 = sld [smem:[#allocation23_spill]]  ;;  %s26399_s21 = sld [smem:[#allocation24_spill]] }
0x1660   : > { %s26400_s25 = sld [smem:[#allocation37_spill]]  ;;  %s26401_s23 = sld [smem:[#allocation27_spill]] }
0x1661   : > { %s26402_s24 = sld [smem:[#allocation28_spill]]  ;;  %s26403_s9 = sld [smem:[#allocation34_spill]] }
0x1662   : > { %s26404_s26 = sld [smem:[#allocation35_spill]]  ;;  %s26405_s18 = smov %s21299_s19 }
0x1663   :  { %35 = sbr.rel (!%p33_p8) target bundleno = 28 (0x1c), region = 200 }
0x1664   : > { %s26406_s19 = smov %s26397_s22 }
0x1666   : > { %s26407_s22 = smov %s26400_s25 }
0x1667   : > { %s26408_s25 = smov %s26403_s9 }
0x166a   :  { %15289 = vsyncpa [#allocation4], 1 }
0x166b   :  { %15291 = vsyncpa [#allocation4 + $0x1], 1 }
0x166c   :  { %15292 = vsyncpa [#allocation7], 1 }
0x166d   :  { %15294 = vsyncpa [#allocation7 + $0x1], 1 }
0x166e   :  { %15295 = vsyncpa [#allocation10], 1 }
0x166f   :  { %15297 = vsyncpa [#allocation10 + $0x1], 1 }
0x1670   :  { %15298 = vsyncpa [#allocation13], 1 }
0x1671   :  { %15300 = vsyncpa [#allocation13 + $0x1], 1 }
0x1672   :  { %15301 = vsyncpa [#allocation5], 1 }
0x1673   :  { %15303 = vsyncpa [#allocation5 + $0x1], 1 }

</bundles_post_ra>
